<compile_context>
chip_gen: v5e
topology: v5e:2x2
jax: 0.10.0
libtpu: 0.0.40
codegen_flags: <defaults>
</compile_context>

<pallas_src>
import jax
import jax.numpy as jnp
from jax.experimental import pallas as pl
from jax.experimental.pallas import tpu as pltpu

GN_EPS = 1e-5        # torch.nn.GroupNorm default (timm GroupNormAct)
WS_EPS = 1e-6        # timm StdConv2d eps
MATMUL_DTYPE = jnp.bfloat16   # MXU operand dtype; accumulation stays f32


# ----------------------------------------------------------------------------- helpers
def _largest_tile(n, target=512):
    """Largest divisor of n that is <= target and a multiple of 8 (else n itself)."""
    if n <= target:
        return n
    for d in range(target - target % 8, 7, -8):
        if n % d == 0:
            return d
    return n


def _vmem_limit(*byte_counts):
    """Scoped-VMEM request: 2x (double buffering) the listed blocks, clamped."""
    est = 2 * sum(int(b) for b in byte_counts)
    return int(min(max(32 * 1024 * 1024, est), 48 * 1024 * 1024))


def _std_conv_weight(w):
    """StdConv2d weight standardization. w: (kh, kw, cin, cout) HWIO."""
    mu = jnp.mean(w, axis=(0, 1, 2), keepdims=True)
    var = jnp.var(w, axis=(0, 1, 2), keepdims=True)
    return (w - mu) * jax.lax.rsqrt(var + WS_EPS)


def _prep_1x1(w):
    """(1,1,cin,cout) -> standardized (cin, cout) in MATMUL_DTYPE."""
    return _std_conv_weight(w).reshape(w.shape[2], w.shape[3]).astype(MATMUL_DTYPE)


def _prep_3x3(w):
    """(3,3,cin,cout) -> standardized (9*cin, cout), tap-major, in MATMUL_DTYPE."""
    return _std_conv_weight(w).reshape(9 * w.shape[2], w.shape[3]).astype(MATMUL_DTYPE)


def _group_matrix(c, groups):
    """Block-diagonal (C, C) 0/1 matrix: same-group channel membership."""
    cg = c // groups
    gid = jnp.arange(c) // cg
    return (gid[:, None] == gid[None, :]).astype(jnp.float32)


# ----------------------------------------------------------------------- GroupNorm stats
def _make_gn_stats_kernel(hw_total, eps):
    def kernel(x_ref, gamma_ref, beta_ref, m_ref, scale_ref, shift_ref, s_sc, ss_sc):
        r = pl.program_id(1)

        @pl.when(r == 0)
        def _():
            s_sc[...] = jnp.zeros_like(s_sc)
            ss_sc[...] = jnp.zeros_like(ss_sc)

        x = x_ref[0].astype(jnp.float32)                      # (TR, C)
        s_sc[...] += jnp.sum(x, axis=0, keepdims=True)        # per-channel sums (f32)
        ss_sc[...] += jnp.sum(x * x, axis=0, keepdims=True)

        @pl.when(r == pl.num_programs(1) - 1)
        def _():
            m = m_ref[...]                                    # (C, C) group membership
            gs = jnp.dot(s_sc[...], m, preferred_element_type=jnp.float32)
            gss = jnp.dot(ss_sc[...], m, preferred_element_type=jnp.float32)
            cnt = jnp.sum(m, axis=0, keepdims=True) * float(hw_total)
            mean = gs / cnt
            var = gss / cnt - mean * mean
            rstd = jax.lax.rsqrt(var + eps)
            scale = gamma_ref[...].astype(jnp.float32) * rstd
            shift = beta_ref[...].astype(jnp.float32) - mean * scale
            scale_ref[0] = scale.astype(scale_ref.dtype)
            shift_ref[0] = shift.astype(shift_ref.dtype)

    return kernel


def gn_scale_shift(x_tok, gamma, beta, groups, eps=GN_EPS):
    """GroupNorm affine folded to per-(batch, channel) scale/shift: y = x*scale+shift."""
    B, T, C = x_tok.shape
    TR = _largest_tile(T)
    m = _group_matrix(C, groups)
    scale, shift = pl.pallas_call(
        _make_gn_stats_kernel(T, eps),
        out_shape=(jax.ShapeDtypeStruct((B, 1, C), jnp.float32),
                   jax.ShapeDtypeStruct((B, 1, C), jnp.float32)),
        grid_spec=pltpu.PrefetchScalarGridSpec(
            num_scalar_prefetch=0,
            grid=(B, T // TR),
            in_specs=[
                pl.BlockSpec((1, TR, C), lambda b, r: (b, r, 0)),
                pl.BlockSpec((1, C), lambda b, r: (0, 0)),
                pl.BlockSpec((1, C), lambda b, r: (0, 0)),
                pl.BlockSpec((C, C), lambda b, r: (0, 0)),
            ],
            out_specs=(pl.BlockSpec((1, 1, C), lambda b, r: (b, 0, 0)),
                       pl.BlockSpec((1, 1, C), lambda b, r: (b, 0, 0))),
            scratch_shapes=[pltpu.VMEM((1, C), jnp.float32),
                            pltpu.VMEM((1, C), jnp.float32)],
        ),
        compiler_params=pltpu.CompilerParams(
            dimension_semantics=("parallel", "arbitrary"),
            vmem_limit_bytes=_vmem_limit(TR * C * 4, C * C * 4),
        ),
    )(x_tok, gamma.reshape(1, C), beta.reshape(1, C), m)
    return scale, shift


# ------------------------------------------------------ fused GN-act + 1x1 conv (matmul)
def _make_normact_matmul_kernel(has_residual):
    def kernel(x_ref, scale_ref, shift_ref, w_ref, *rest):
        if has_residual:
            res_ref, o_ref = rest
        else:
            (o_ref,) = rest
        x = x_ref[0].astype(jnp.float32)                      # (TM, Cin)
        sc = scale_ref[0].astype(jnp.float32)                 # (1, Cin)
        sh = shift_ref[0].astype(jnp.float32)
        xn = jnp.maximum(x * sc + sh, 0.0)                    # GN + ReLU (f32)
        y = jnp.dot(xn.astype(MATMUL_DTYPE), w_ref[...],      # bf16 operands, f32 acc
                    preferred_element_type=jnp.float32)
        if has_residual:
            y = y + res_ref[0].astype(jnp.float32)
        o_ref[0] = y.astype(o_ref.dtype)

    return kernel


def normact_matmul(x_tok, scale, shift, w, residual=None):
    """relu(x*scale+shift) @ w (+ residual). x_tok: (B, T, Cin), w: (Cin, Cout)."""
    B, T, Cin = x_tok.shape
    Cout = w.shape[1]
    TM = _largest_tile(T)
    in_specs = [
        pl.BlockSpec((1, TM, Cin), lambda b, t: (b, t, 0)),
        pl.BlockSpec((1, 1, Cin), lambda b, t: (b, 0, 0)),
        pl.BlockSpec((1, 1, Cin), lambda b, t: (b, 0, 0)),
        pl.BlockSpec((Cin, Cout), lambda b, t: (0, 0)),       # weight stays resident
    ]
    args = [x_tok, scale, shift, w]
    if residual is not None:
        in_specs.append(pl.BlockSpec((1, TM, Cout), lambda b, t: (b, t, 0)))
        args.append(residual)
    itemsize = x_tok.dtype.itemsize
    out = pl.pallas_call(
        _make_normact_matmul_kernel(residual is not None),
        out_shape=jax.ShapeDtypeStruct((B, T, Cout), x_tok.dtype),
        grid_spec=pltpu.PrefetchScalarGridSpec(
            num_scalar_prefetch=0,
            grid=(B, T // TM),
            in_specs=in_specs,
            out_specs=pl.BlockSpec((1, TM, Cout), lambda b, t: (b, t, 0)),
        ),
        compiler_params=pltpu.CompilerParams(
            dimension_semantics=("parallel", "parallel"),
            vmem_limit_bytes=_vmem_limit(
                TM * Cin * itemsize,
                TM * Cout * itemsize * (2 if residual is not None else 1),
                Cin * Cout * 2),
        ),
    )(*args)
    return out


# ----------------------------------------------------------- fused GN-act + 3x3 conv
def _make_conv3x3_kernel(H, W, cin, cout):
    def kernel(x_ref, scale_ref, shift_ref, w_ref, o_ref, pad_ref, acc_ref):
        x = x_ref[0].astype(jnp.float32)                      # (H, W, Cin)
        sc = scale_ref[0].astype(jnp.float32).reshape(1, 1, cin)
        sh = shift_ref[0].astype(jnp.float32).reshape(1, 1, cin)
        xn = jnp.maximum(x * sc + sh, 0.0)                    # GN + ReLU (f32)

        # Zero-padded (post-activation) buffer, 'same' padding of 1.
        pad_ref[...] = jnp.zeros_like(pad_ref)
        pad_ref[1:H + 1, 1:W + 1, :] = xn.astype(pad_ref.dtype)

        acc_ref[...] = jnp.zeros_like(acc_ref)
        for t in range(9):                                    # unrolled 9 taps
            dy, dx = t // 3, t % 3
            win = pad_ref[dy:dy + H, dx:dx + W, :]            # (H, W, Cin)
            lhs = win.reshape(H * W, cin).astype(MATMUL_DTYPE)
            acc_ref[...] += jnp.dot(lhs, w_ref[t * cin:(t + 1) * cin, :],
                                    preferred_element_type=jnp.float32)
        o_ref[0] = acc_ref[...].reshape(H, W, cout).astype(o_ref.dtype)

    return kernel


def conv3x3_same(x, scale, shift, w9):
    """Fused GN+ReLU then 3x3 'same' conv (stride 1). x: (B,H,W,Cin), w9: (9*Cin,Cout)."""
    B, H, W, Cin = x.shape
    Cout = w9.shape[1]
    return pl.pallas_call(
        _make_conv3x3_kernel(H, W, Cin, Cout),
        out_shape=jax.ShapeDtypeStruct((B, H, W, Cout), x.dtype),
        grid_spec=pltpu.PrefetchScalarGridSpec(
            num_scalar_prefetch=0,
            grid=(B,),
            in_specs=[
                pl.BlockSpec((1, H, W, Cin), lambda b: (b, 0, 0, 0)),
                pl.BlockSpec((1, 1, Cin), lambda b: (b, 0, 0)),
                pl.BlockSpec((1, 1, Cin), lambda b: (b, 0, 0)),
                pl.BlockSpec((9 * Cin, Cout), lambda b: (0, 0)),   # weight resident
            ],
            out_specs=pl.BlockSpec((1, H, W, Cout), lambda b: (b, 0, 0, 0)),
            scratch_shapes=[pltpu.VMEM((H + 2, W + 2, Cin), jnp.float32),
                            pltpu.VMEM((H * W, Cout), jnp.float32)],
        ),
        compiler_params=pltpu.CompilerParams(
            dimension_semantics=("parallel",),
            vmem_limit_bytes=_vmem_limit(
                H * W * Cin * 4, H * W * Cout * 4,
                (H + 2) * (W + 2) * Cin * 4, H * W * Cout * 4, 9 * Cin * Cout * 2),
        ),
    )(x, scale, shift, w9)


# --------------------------------------------------------------------- block / stage
def preact_bottleneck(x, p, stride, gn_groups):
    B, H, W, Cin = x.shape
    mid = p["w1"].shape[3]
    Cout = p["w3"].shape[3]
    x_tok = x.reshape(B, H * W, Cin)

    sc1, sh1 = gn_scale_shift(x_tok, p["g1"], p["b1"], gn_groups)

    # Shortcut branch.
    if "wd" in p:
        # DownsampleConv (1x1, stride s) applied to the norm1-activated input.
        # The pointwise norm+act commutes with spatial subsampling.
        x_ds = x[:, ::stride, ::stride, :] if stride > 1 else x
        Ho, Wo = x_ds.shape[1], x_ds.shape[2]
        shortcut = normact_matmul(x_ds.reshape(B, Ho * Wo, Cin), sc1, sh1,
                                  _prep_1x1(p["wd"])).reshape(B, Ho, Wo, Cout)
    else:
        assert stride == 1
        shortcut = x

    # Residual branch.
    y1 = normact_matmul(x_tok, sc1, sh1, _prep_1x1(p["w1"])).reshape(B, H, W, mid)

    sc2, sh2 = gn_scale_shift(y1.reshape(B, H * W, mid), p["g2"], p["b2"], gn_groups)
    y2 = conv3x3_same(y1, sc2, sh2, _prep_3x3(p["w2"]))
    if stride > 1:
        # TODO(synk): native strided taps in conv3x3 would avoid stride**2 extra FLOPs.
        y2 = y2[:, ::stride, ::stride, :]
    Ho, Wo = y2.shape[1], y2.shape[2]

    sc3, sh3 = gn_scale_shift(y2.reshape(B, Ho * Wo, mid), p["g3"], p["b3"], gn_groups)
    out = normact_matmul(y2.reshape(B, Ho * Wo, mid), sc3, sh3, _prep_1x1(p["w3"]),
                         residual=shortcut.reshape(B, Ho * Wo, Cout))
    return out.reshape(B, Ho, Wo, Cout)


def resnet_stage(x, block_params, stride, gn_groups=32):
    """ResNetStage.forward: sequential PreActBottleneck blocks (NHWC)."""
    for idx, p in enumerate(block_params):
        x = preact_bottleneck(x, p, stride if idx == 0 else 1, gn_groups)
    return x


# ------------------------------------------------------------------ pure-JAX reference
def _gn_act_ref(x, gamma, beta, groups, eps=GN_EPS):
    B, H, W, C = x.shape
    xg = x.reshape(B, H * W, groups, C // groups).astype(jnp.float32)
    mean = jnp.mean(xg, axis=(1, 3), keepdims=True)
    var = jnp.mean(jnp.square(xg - mean), axis=(1, 3), keepdims=True)
    xn = ((xg - mean) * jax.lax.rsqrt(var + eps)).reshape(B, H, W, C)
    xn = xn * gamma.reshape(1, 1, 1, C) + beta.reshape(1, 1, 1, C)
    return jnp.maximum(xn, 0.0)


def _conv_ref(x, w_hwio, stride, padding, mm_dtype):
    w = _std_conv_weight(w_hwio.astype(jnp.float32))
    return jax.lax.conv_general_dilated(
        x.astype(mm_dtype), w.astype(mm_dtype),
        window_strides=(stride, stride), padding=padding,
        dimension_numbers=("NHWC", "HWIO", "NHWC"),
        preferred_element_type=jnp.float32,
        precision=jax.lax.Precision.HIGHEST)


def _block_ref(x, p, stride, gn_groups, mm_dtype):
    xp = _gn_act_ref(x, p["g1"], p["b1"], gn_groups)
    shortcut = _conv_ref(xp, p["wd"], stride, "VALID", mm_dtype) if "wd" in p else x
    y = _conv_ref(xp, p["w1"], 1, "VALID", mm_dtype)
    y = _conv_ref(_gn_act_ref(y, p["g2"], p["b2"], gn_groups), p["w2"], stride,
                  [(1, 1), (1, 1)], mm_dtype)
    y = _conv_ref(_gn_act_ref(y, p["g3"], p["b3"], gn_groups), p["w3"], 1,
                  "VALID", mm_dtype)
    return y + shortcut


def resnet_stage_ref(x, block_params, stride, gn_groups, mm_dtype):
    for idx, p in enumerate(block_params):
        x = _block_ref(x, p, stride if idx == 0 else 1, gn_groups, mm_dtype)
    return x


# ---------------------------------------------------------------------------- demo/test
if __name__ == "__main__":
    key = jax.random.PRNGKey(0)

    # Small but GroupNorm(32)-compatible, lane-friendly config (R50-like stage).
    B, H, W = 2, 16, 16
    IN_CHS, OUT_CHS, STRIDE, DEPTH = 64, 256, 2, 2
    GN_GROUPS = 32
    MID = int(OUT_CHS * 0.25)          # bottle_ratio=0.25 -> 64 (make_div(., 8))

    def conv_init(k, kh, kw, cin, cout):
        return (jax.random.normal(k, (kh, kw, cin, cout), jnp.float32)
                / jnp.sqrt(float(kh * kw * cin)))

    params = []
    prev = IN_CHS
    for blk in range(DEPTH):
        key, *ks = jax.random.split(key, 12)
        p = {
            "g1": 1.0 + 0.05 * jax.random.normal(ks[0], (prev,), jnp.float32),
            "b1": 0.05 * jax.random.normal(ks[1], (prev,), jnp.float32),
            "w1": conv_init(ks[2], 1, 1, prev, MID),
            "g2": 1.0 + 0.05 * jax.random.normal(ks[3], (MID,), jnp.float32),
            "b2": 0.05 * jax.random.normal(ks[4], (MID,), jnp.float32),
            "w2": conv_init(ks[5], 3, 3, MID, MID),
            "g3": 1.0 + 0.05 * jax.random.normal(ks[6], (MID,), jnp.float32),
            "b3": 0.05 * jax.random.normal(ks[7], (MID,), jnp.float32),
            "w3": conv_init(ks[8], 1, 1, MID, OUT_CHS),
        }
        if blk == 0:
            p["wd"] = conv_init(ks[9], 1, 1, prev, OUT_CHS)
        params.append(p)
        prev = OUT_CHS

    key, kx = jax.random.split(key)
    x = jax.random.normal(kx, (B, H, W, IN_CHS), jnp.float32)

    fwd = jax.jit(lambda xx, pp: resnet_stage(xx, pp, STRIDE, GN_GROUPS))
    out = jax.block_until_ready(fwd(x, params))

    Ho, Wo = H // STRIDE, W // STRIDE
    assert out.shape == (B, Ho, Wo, OUT_CHS)

    # Reference matching the kernel's mixed-precision policy (bf16 operands, f32 acc).
    ref_mixed = resnet_stage_ref(x, params, STRIDE, GN_GROUPS, MATMUL_DTYPE)
    assert jnp.allclose(out, ref_mixed, atol=3e-2, rtol=3e-2), \
        "mismatch vs mixed-precision reference"

    # Sanity check against the full-f32 reference (loose: bf16 operand rounding).
    ref_f32 = resnet_stage_ref(x, params, STRIDE, GN_GROUPS, jnp.float32)
    rel = jnp.max(jnp.abs(out - ref_f32)) / (jnp.max(jnp.abs(ref_f32)) + 1e-6)
    assert float(rel) < 0.1, f"relative error vs f32 reference too large: {float(rel)}"

    print("KERNEL_OK")
</pallas_src>

<mosaic_0001>
module attributes {stable_mosaic.version = 11 : i64} {
  func.func @kernel(%arg0: i32, %arg1: i32, %arg2: memref<1x256x64xf32, #tpu.memory_space<vmem>>, %arg3: memref<1x64xf32, #tpu.memory_space<vmem>>, %arg4: memref<1x64xf32, #tpu.memory_space<vmem>>, %arg5: memref<64x64xf32, #tpu.memory_space<vmem>>, %arg6: memref<1x1x64xf32, #tpu.memory_space<vmem>>, %arg7: memref<1x1x64xf32, #tpu.memory_space<vmem>>, %arg8: memref<1x64xf32, #tpu.memory_space<vmem>>, %arg9: memref<1x64xf32, #tpu.memory_space<vmem>>) attributes {dimension_semantics = [#tpu.dimension_semantics<parallel>, #tpu.dimension_semantics<arbitrary>], iteration_bounds = array<i64: 2, 1>, scalar_prefetch = 0 : i64, scratch_operands = 2 : i64, tpu.core_type = #tpu.core_type<tc>, window_params = [{transform_indices = @transform_0, window_bounds = array<i64: 1, 256, 64>}, {pipeline_mode = #tpu.pipeline_mode<synchronous>, transform_indices = @transform_1, window_bounds = array<i64: 1, 64>}, {pipeline_mode = #tpu.pipeline_mode<synchronous>, transform_indices = @transform_2, window_bounds = array<i64: 1, 64>}, {pipeline_mode = #tpu.pipeline_mode<synchronous>, transform_indices = @transform_3, window_bounds = array<i64: 64, 64>}, {transform_indices = @transform_4, window_bounds = array<i64: 1, 1, 64>}, {transform_indices = @transform_5, window_bounds = array<i64: 1, 1, 64>}]} {
    %c0_i32 = arith.constant 0 : i32
    %0 = arith.cmpi eq, %arg1, %c0_i32 : i32
    %1 = arith.extui %0 : i1 to i32
    %c0_i32_0 = arith.constant 0 : i32
    %2 = arith.cmpi ne, %1, %c0_i32_0 : i32
    scf.if %2 {
      %cst_14 = arith.constant 0.000000e+00 : f32
      %19 = vector.broadcast %cst_14 : f32 to vector<1x64xf32>
      %c0_15 = arith.constant 0 : index
      %c0_16 = arith.constant 0 : index
      %20 = vector.load %arg8[%c0_15, %c0_16] : memref<1x64xf32, #tpu.memory_space<vmem>>, vector<1x64xf32>
      tpu.vector_store %arg8[%c0_15, %c0_16], %19 {strides = array<i32>} : memref<1x64xf32, #tpu.memory_space<vmem>>, vector<1x64xf32>,
      %cst_17 = arith.constant 0.000000e+00 : f32
      %21 = vector.broadcast %cst_17 : f32 to vector<1x64xf32>
      %c0_18 = arith.constant 0 : index
      %c0_19 = arith.constant 0 : index
      %22 = vector.load %arg9[%c0_18, %c0_19] : memref<1x64xf32, #tpu.memory_space<vmem>>, vector<1x64xf32>
      tpu.vector_store %arg9[%c0_18, %c0_19], %21 {strides = array<i32>} : memref<1x64xf32, #tpu.memory_space<vmem>>, vector<1x64xf32>,
    } else {
    }
    %c0 = arith.constant 0 : index
    %c0_1 = arith.constant 0 : index
    %c0_2 = arith.constant 0 : index
    %3 = vector.load %arg2[%c0, %c0_1, %c0_2] : memref<1x256x64xf32, #tpu.memory_space<vmem>>, vector<1x256x64xf32>
    %4 = vector.shape_cast %3 : vector<1x256x64xf32> to vector<256x64xf32>
    %c0_3 = arith.constant 0 : index
    %c0_4 = arith.constant 0 : index
    %5 = vector.load %arg8[%c0_3, %c0_4] : memref<1x64xf32, #tpu.memory_space<vmem>>, vector<1x64xf32>
    %cst = arith.constant dense<0.000000e+00> : vector<64xf32>
    %6 = vector.multi_reduction <add>, %4, %cst [0] : vector<256x64xf32> to vector<64xf32>
    %7 = vector.shape_cast %6 : vector<64xf32> to vector<1x64xf32>
    %8 = arith.addf %5, %7 : vector<1x64xf32>
    %c0_5 = arith.constant 0 : index
    %c0_6 = arith.constant 0 : index
    %9 = vector.load %arg8[%c0_5, %c0_6] : memref<1x64xf32, #tpu.memory_space<vmem>>, vector<1x64xf32>
    tpu.vector_store %arg8[%c0_5, %c0_6], %8 {strides = array<i32>} : memref<1x64xf32, #tpu.memory_space<vmem>>, vector<1x64xf32>,
    %c0_7 = arith.constant 0 : index
    %c0_8 = arith.constant 0 : index
    %10 = vector.load %arg9[%c0_7, %c0_8] : memref<1x64xf32, #tpu.memory_space<vmem>>, vector<1x64xf32>
    %11 = arith.mulf %4, %4 : vector<256x64xf32>
    %cst_9 = arith.constant dense<0.000000e+00> : vector<64xf32>
    %12 = vector.multi_reduction <add>, %11, %cst_9 [0] : vector<256x64xf32> to vector<64xf32>
    %13 = vector.shape_cast %12 : vector<64xf32> to vector<1x64xf32>
    %14 = arith.addf %10, %13 : vector<1x64xf32>
    %c0_10 = arith.constant 0 : index
    %c0_11 = arith.constant 0 : index
    %15 = vector.load %arg9[%c0_10, %c0_11] : memref<1x64xf32, #tpu.memory_space<vmem>>, vector<1x64xf32>
    tpu.vector_store %arg9[%c0_10, %c0_11], %14 {strides = array<i32>} : memref<1x64xf32, #tpu.memory_space<vmem>>, vector<1x64xf32>,
    %c0_i32_12 = arith.constant 0 : i32
    %16 = arith.cmpi eq, %arg1, %c0_i32_12 : i32
    %17 = arith.extui %16 : i1 to i32
    %c0_i32_13 = arith.constant 0 : i32
    %18 = arith.cmpi ne, %17, %c0_i32_13 : i32
    scf.if %18 {
      %c0_14 = arith.constant 0 : index
      %c0_15 = arith.constant 0 : index
      %19 = vector.load %arg5[%c0_14, %c0_15] : memref<64x64xf32, #tpu.memory_space<vmem>>, vector<64x64xf32>
      %c0_16 = arith.constant 0 : index
      %c0_17 = arith.constant 0 : index
      %20 = vector.load %arg8[%c0_16, %c0_17] : memref<1x64xf32, #tpu.memory_space<vmem>>, vector<1x64xf32>
      %cst_18 = arith.constant dense<0.000000e+00> : vector<1x64xf32>
      %21 = tpu.matmul %20, %19, %cst_18 {dimension_numbers = #tpu.dot_dimension_numbers<[1], [0], [0], [1], [0, 0, 1, 1], [], []>} : vector<1x64xf32>, vector<64x64xf32>, vector<1x64xf32> -> vector<1x64xf32>
      %c0_19 = arith.constant 0 : index
      %c0_20 = arith.constant 0 : index
      %22 = vector.load %arg9[%c0_19, %c0_20] : memref<1x64xf32, #tpu.memory_space<vmem>>, vector<1x64xf32>
      %cst_21 = arith.constant dense<0.000000e+00> : vector<1x64xf32>
      %23 = tpu.matmul %22, %19, %cst_21 {dimension_numbers = #tpu.dot_dimension_numbers<[1], [0], [0], [1], [0, 0, 1, 1], [], []>} : vector<1x64xf32>, vector<64x64xf32>, vector<1x64xf32> -> vector<1x64xf32>
      %cst_22 = arith.constant dense<0.000000e+00> : vector<64xf32>
      %24 = vector.multi_reduction <add>, %19, %cst_22 [0] : vector<64x64xf32> to vector<64xf32>
      %25 = vector.shape_cast %24 : vector<64xf32> to vector<1x64xf32>
      %cst_23 = arith.constant 2.560000e+02 : f32
      %26 = vector.broadcast %cst_23 : f32 to vector<1x64xf32>
      %27 = arith.mulf %25, %26 : vector<1x64xf32>
      %28 = arith.divf %21, %27 : vector<1x64xf32>
      %29 = arith.divf %23, %27 : vector<1x64xf32>
      %30 = arith.mulf %28, %28 : vector<1x64xf32>
      %31 = arith.subf %29, %30 : vector<1x64xf32>
      %cst_24 = arith.constant 9.99999974E-6 : f32
      %32 = vector.broadcast %cst_24 : f32 to vector<1x64xf32>
      %33 = arith.addf %31, %32 : vector<1x64xf32>
      %34 = math.rsqrt %33 : vector<1x64xf32>
      %c0_25 = arith.constant 0 : index
      %c0_26 = arith.constant 0 : index
      %35 = vector.load %arg3[%c0_25, %c0_26] : memref<1x64xf32, #tpu.memory_space<vmem>>, vector<1x64xf32>
      %36 = arith.mulf %35, %34 : vector<1x64xf32>
      %c0_27 = arith.constant 0 : index
      %c0_28 = arith.constant 0 : index
      %37 = vector.load %arg4[%c0_27, %c0_28] : memref<1x64xf32, #tpu.memory_space<vmem>>, vector<1x64xf32>
      %38 = arith.mulf %28, %36 : vector<1x64xf32>
      %39 = arith.subf %37, %38 : vector<1x64xf32>
      %c0_29 = arith.constant 0 : index
      %c0_30 = arith.constant 0 : index
      %c0_31 = arith.constant 0 : index
      %40 = vector.load %arg6[%c0_29, %c0_30, %c0_31] : memref<1x1x64xf32, #tpu.memory_space<vmem>>, vector<1x1x64xf32>
      %41 = vector.shape_cast %40 : vector<1x1x64xf32> to vector<1x64xf32>
      %42 = vector.shape_cast %36 : vector<1x64xf32> to vector<1x1x64xf32>
      tpu.vector_store %arg6[%c0_29, %c0_30, %c0_31], %42 {strides = array<i32>} : memref<1x1x64xf32, #tpu.memory_space<vmem>>, vector<1x1x64xf32>,
      %c0_32 = arith.constant 0 : index
      %c0_33 = arith.constant 0 : index
      %c0_34 = arith.constant 0 : index
      %43 = vector.load %arg7[%c0_32, %c0_33, %c0_34] : memref<1x1x64xf32, #tpu.memory_space<vmem>>, vector<1x1x64xf32>
      %44 = vector.shape_cast %43 : vector<1x1x64xf32> to vector<1x64xf32>
      %45 = vector.shape_cast %39 : vector<1x64xf32> to vector<1x1x64xf32>
      tpu.vector_store %arg7[%c0_32, %c0_33, %c0_34], %45 {strides = array<i32>} : memref<1x1x64xf32, #tpu.memory_space<vmem>>, vector<1x1x64xf32>,
    } else {
    }
    return
  }
  func.func @transform_0(%arg0: i32, %arg1: i32) -> (i32, i32, i32) {
    %c0_i32 = arith.constant 0 : i32
    %c0_i32_0 = arith.constant 0 : i32
    return %arg0, %arg1, %c0_i32 : i32, i32, i32
  }
  func.func @transform_1(%arg0: i32, %arg1: i32) -> (i32, i32) {
    %c0_i32 = arith.constant 0 : i32
    %c0_i32_0 = arith.constant 0 : i32
    %c0_i32_1 = arith.constant 0 : i32
    return %c0_i32, %c0_i32_0 : i32, i32
  }
  func.func @transform_2(%arg0: i32, %arg1: i32) -> (i32, i32) {
    %c0_i32 = arith.constant 0 : i32
    %c0_i32_0 = arith.constant 0 : i32
    %c0_i32_1 = arith.constant 0 : i32
    return %c0_i32, %c0_i32_0 : i32, i32
  }
  func.func @transform_3(%arg0: i32, %arg1: i32) -> (i32, i32) {
    %c0_i32 = arith.constant 0 : i32
    %c0_i32_0 = arith.constant 0 : i32
    %c0_i32_1 = arith.constant 0 : i32
    return %c0_i32, %c0_i32_0 : i32, i32
  }
  func.func @transform_4(%arg0: i32, %arg1: i32) -> (i32, i32, i32) {
    %c0_i32 = arith.constant 0 : i32
    %c0_i32_0 = arith.constant 0 : i32
    %c0_i32_1 = arith.constant 0 : i32
    return %arg0, %c0_i32, %c0_i32_0 : i32, i32, i32
  }
  func.func @transform_5(%arg0: i32, %arg1: i32) -> (i32, i32, i32) {
    %c0_i32 = arith.constant 0 : i32
    %c0_i32_0 = arith.constant 0 : i32
    %c0_i32_1 = arith.constant 0 : i32
    return %arg0, %c0_i32, %c0_i32_0 : i32, i32, i32
  }
}

module attributes {stable_mosaic.version = 11 : i64} {
  func.func @kernel(%arg0: i32, %arg1: i32, %arg2: memref<1x256x64xf32, #tpu.memory_space<vmem>>, %arg3: memref<1x1x64xf32, #tpu.memory_space<vmem>>, %arg4: memref<1x1x64xf32, #tpu.memory_space<vmem>>, %arg5: memref<64x64xbf16, #tpu.memory_space<vmem>>, %arg6: memref<1x256x64xf32, #tpu.memory_space<vmem>>) attributes {dimension_semantics = [#tpu.dimension_semantics<parallel>, #tpu.dimension_semantics<parallel>], iteration_bounds = array<i64: 2, 1>, scalar_prefetch = 0 : i64, scratch_operands = 0 : i64, tpu.core_type = #tpu.core_type<tc>, window_params = [{transform_indices = @transform_0, window_bounds = array<i64: 1, 256, 64>}, {transform_indices = @transform_1, window_bounds = array<i64: 1, 1, 64>}, {transform_indices = @transform_2, window_bounds = array<i64: 1, 1, 64>}, {pipeline_mode = #tpu.pipeline_mode<synchronous>, transform_indices = @transform_3, window_bounds = array<i64: 64, 64>}, {transform_indices = @transform_4, window_bounds = array<i64: 1, 256, 64>}]} {
    %c0 = arith.constant 0 : index
    %c0_0 = arith.constant 0 : index
    %c0_1 = arith.constant 0 : index
    %0 = vector.load %arg2[%c0, %c0_0, %c0_1] : memref<1x256x64xf32, #tpu.memory_space<vmem>>, vector<1x256x64xf32>
    %1 = vector.shape_cast %0 : vector<1x256x64xf32> to vector<256x64xf32>
    %c0_2 = arith.constant 0 : index
    %c0_3 = arith.constant 0 : index
    %c0_4 = arith.constant 0 : index
    %2 = vector.load %arg3[%c0_2, %c0_3, %c0_4] : memref<1x1x64xf32, #tpu.memory_space<vmem>>, vector<1x1x64xf32>
    %3 = vector.shape_cast %2 : vector<1x1x64xf32> to vector<1x64xf32>
    %c0_5 = arith.constant 0 : index
    %c0_6 = arith.constant 0 : index
    %c0_7 = arith.constant 0 : index
    %4 = vector.load %arg4[%c0_5, %c0_6, %c0_7] : memref<1x1x64xf32, #tpu.memory_space<vmem>>, vector<1x1x64xf32>
    %5 = vector.shape_cast %4 : vector<1x1x64xf32> to vector<1x64xf32>
    %6 = vector.broadcast %3 : vector<1x64xf32> to vector<256x64xf32>
    %7 = arith.mulf %1, %6 : vector<256x64xf32>
    %8 = vector.broadcast %5 : vector<1x64xf32> to vector<256x64xf32>
    %9 = arith.addf %7, %8 : vector<256x64xf32>
    %cst = arith.constant 0.000000e+00 : f32
    %10 = vector.broadcast %cst : f32 to vector<256x64xf32>
    %11 = arith.maximumf %9, %10 : vector<256x64xf32>
    %12 = arith.truncf %11 : vector<256x64xf32> to vector<256x64xbf16>
    %c0_8 = arith.constant 0 : index
    %c0_9 = arith.constant 0 : index
    %13 = vector.load %arg5[%c0_8, %c0_9] : memref<64x64xbf16, #tpu.memory_space<vmem>>, vector<64x64xbf16>
    %cst_10 = arith.constant dense<0.000000e+00> : vector<256x64xf32>
    %14 = tpu.matmul %12, %13, %cst_10 {dimension_numbers = #tpu.dot_dimension_numbers<[1], [0], [0], [1], [0, 0, 1, 1], [], []>} : vector<256x64xbf16>, vector<64x64xbf16>, vector<256x64xf32> -> vector<256x64xf32>
    %c0_11 = arith.constant 0 : index
    %c0_12 = arith.constant 0 : index
    %c0_13 = arith.constant 0 : index
    %15 = vector.load %arg6[%c0_11, %c0_12, %c0_13] : memref<1x256x64xf32, #tpu.memory_space<vmem>>, vector<1x256x64xf32>
    %16 = vector.shape_cast %15 : vector<1x256x64xf32> to vector<256x64xf32>
    %17 = vector.shape_cast %14 : vector<256x64xf32> to vector<1x256x64xf32>
    tpu.vector_store %arg6[%c0_11, %c0_12, %c0_13], %17 {strides = array<i32>} : memref<1x256x64xf32, #tpu.memory_space<vmem>>, vector<1x256x64xf32>,
    return
  }
  func.func @transform_0(%arg0: i32, %arg1: i32) -> (i32, i32, i32) {
    %c0_i32 = arith.constant 0 : i32
    %c0_i32_0 = arith.constant 0 : i32
    return %arg0, %arg1, %c0_i32 : i32, i32, i32
  }
  func.func @transform_1(%arg0: i32, %arg1: i32) -> (i32, i32, i32) {
    %c0_i32 = arith.constant 0 : i32
    %c0_i32_0 = arith.constant 0 : i32
    %c0_i32_1 = arith.constant 0 : i32
    return %arg0, %c0_i32, %c0_i32_0 : i32, i32, i32
  }
  func.func @transform_2(%arg0: i32, %arg1: i32) -> (i32, i32, i32) {
    %c0_i32 = arith.constant 0 : i32
    %c0_i32_0 = arith.constant 0 : i32
    %c0_i32_1 = arith.constant 0 : i32
    return %arg0, %c0_i32, %c0_i32_0 : i32, i32, i32
  }
  func.func @transform_3(%arg0: i32, %arg1: i32) -> (i32, i32) {
    %c0_i32 = arith.constant 0 : i32
    %c0_i32_0 = arith.constant 0 : i32
    %c0_i32_1 = arith.constant 0 : i32
    return %c0_i32, %c0_i32_0 : i32, i32
  }
  func.func @transform_4(%arg0: i32, %arg1: i32) -> (i32, i32, i32) {
    %c0_i32 = arith.constant 0 : i32
    %c0_i32_0 = arith.constant 0 : i32
    return %arg0, %arg1, %c0_i32 : i32, i32, i32
  }
}

module attributes {stable_mosaic.version = 11 : i64} {
  func.func @kernel(%arg0: i32, %arg1: i32, %arg2: memref<1x256x64xf32, #tpu.memory_space<vmem>>, %arg3: memref<1x64xf32, #tpu.memory_space<vmem>>, %arg4: memref<1x64xf32, #tpu.memory_space<vmem>>, %arg5: memref<64x64xf32, #tpu.memory_space<vmem>>, %arg6: memref<1x1x64xf32, #tpu.memory_space<vmem>>, %arg7: memref<1x1x64xf32, #tpu.memory_space<vmem>>, %arg8: memref<1x64xf32, #tpu.memory_space<vmem>>, %arg9: memref<1x64xf32, #tpu.memory_space<vmem>>) attributes {dimension_semantics = [#tpu.dimension_semantics<parallel>, #tpu.dimension_semantics<arbitrary>], iteration_bounds = array<i64: 2, 1>, scalar_prefetch = 0 : i64, scratch_operands = 2 : i64, tpu.core_type = #tpu.core_type<tc>, window_params = [{transform_indices = @transform_0, window_bounds = array<i64: 1, 256, 64>}, {pipeline_mode = #tpu.pipeline_mode<synchronous>, transform_indices = @transform_1, window_bounds = array<i64: 1, 64>}, {pipeline_mode = #tpu.pipeline_mode<synchronous>, transform_indices = @transform_2, window_bounds = array<i64: 1, 64>}, {pipeline_mode = #tpu.pipeline_mode<synchronous>, transform_indices = @transform_3, window_bounds = array<i64: 64, 64>}, {transform_indices = @transform_4, window_bounds = array<i64: 1, 1, 64>}, {transform_indices = @transform_5, window_bounds = array<i64: 1, 1, 64>}]} {
    %c0_i32 = arith.constant 0 : i32
    %0 = arith.cmpi eq, %arg1, %c0_i32 : i32
    %1 = arith.extui %0 : i1 to i32
    %c0_i32_0 = arith.constant 0 : i32
    %2 = arith.cmpi ne, %1, %c0_i32_0 : i32
    scf.if %2 {
      %cst_14 = arith.constant 0.000000e+00 : f32
      %19 = vector.broadcast %cst_14 : f32 to vector<1x64xf32>
      %c0_15 = arith.constant 0 : index
      %c0_16 = arith.constant 0 : index
      %20 = vector.load %arg8[%c0_15, %c0_16] : memref<1x64xf32, #tpu.memory_space<vmem>>, vector<1x64xf32>
      tpu.vector_store %arg8[%c0_15, %c0_16], %19 {strides = array<i32>} : memref<1x64xf32, #tpu.memory_space<vmem>>, vector<1x64xf32>,
      %cst_17 = arith.constant 0.000000e+00 : f32
      %21 = vector.broadcast %cst_17 : f32 to vector<1x64xf32>
      %c0_18 = arith.constant 0 : index
      %c0_19 = arith.constant 0 : index
      %22 = vector.load %arg9[%c0_18, %c0_19] : memref<1x64xf32, #tpu.memory_space<vmem>>, vector<1x64xf32>
      tpu.vector_store %arg9[%c0_18, %c0_19], %21 {strides = array<i32>} : memref<1x64xf32, #tpu.memory_space<vmem>>, vector<1x64xf32>,
    } else {
    }
    %c0 = arith.constant 0 : index
    %c0_1 = arith.constant 0 : index
    %c0_2 = arith.constant 0 : index
    %3 = vector.load %arg2[%c0, %c0_1, %c0_2] : memref<1x256x64xf32, #tpu.memory_space<vmem>>, vector<1x256x64xf32>
    %4 = vector.shape_cast %3 : vector<1x256x64xf32> to vector<256x64xf32>
    %c0_3 = arith.constant 0 : index
    %c0_4 = arith.constant 0 : index
    %5 = vector.load %arg8[%c0_3, %c0_4] : memref<1x64xf32, #tpu.memory_space<vmem>>, vector<1x64xf32>
    %cst = arith.constant dense<0.000000e+00> : vector<64xf32>
    %6 = vector.multi_reduction <add>, %4, %cst [0] : vector<256x64xf32> to vector<64xf32>
    %7 = vector.shape_cast %6 : vector<64xf32> to vector<1x64xf32>
    %8 = arith.addf %5, %7 : vector<1x64xf32>
    %c0_5 = arith.constant 0 : index
    %c0_6 = arith.constant 0 : index
    %9 = vector.load %arg8[%c0_5, %c0_6] : memref<1x64xf32, #tpu.memory_space<vmem>>, vector<1x64xf32>
    tpu.vector_store %arg8[%c0_5, %c0_6], %8 {strides = array<i32>} : memref<1x64xf32, #tpu.memory_space<vmem>>, vector<1x64xf32>,
    %c0_7 = arith.constant 0 : index
    %c0_8 = arith.constant 0 : index
    %10 = vector.load %arg9[%c0_7, %c0_8] : memref<1x64xf32, #tpu.memory_space<vmem>>, vector<1x64xf32>
    %11 = arith.mulf %4, %4 : vector<256x64xf32>
    %cst_9 = arith.constant dense<0.000000e+00> : vector<64xf32>
    %12 = vector.multi_reduction <add>, %11, %cst_9 [0] : vector<256x64xf32> to vector<64xf32>
    %13 = vector.shape_cast %12 : vector<64xf32> to vector<1x64xf32>
    %14 = arith.addf %10, %13 : vector<1x64xf32>
    %c0_10 = arith.constant 0 : index
    %c0_11 = arith.constant 0 : index
    %15 = vector.load %arg9[%c0_10, %c0_11] : memref<1x64xf32, #tpu.memory_space<vmem>>, vector<1x64xf32>
    tpu.vector_store %arg9[%c0_10, %c0_11], %14 {strides = array<i32>} : memref<1x64xf32, #tpu.memory_space<vmem>>, vector<1x64xf32>,
    %c0_i32_12 = arith.constant 0 : i32
    %16 = arith.cmpi eq, %arg1, %c0_i32_12 : i32
    %17 = arith.extui %16 : i1 to i32
    %c0_i32_13 = arith.constant 0 : i32
    %18 = arith.cmpi ne, %17, %c0_i32_13 : i32
    scf.if %18 {
      %c0_14 = arith.constant 0 : index
      %c0_15 = arith.constant 0 : index
      %19 = vector.load %arg5[%c0_14, %c0_15] : memref<64x64xf32, #tpu.memory_space<vmem>>, vector<64x64xf32>
      %c0_16 = arith.constant 0 : index
      %c0_17 = arith.constant 0 : index
      %20 = vector.load %arg8[%c0_16, %c0_17] : memref<1x64xf32, #tpu.memory_space<vmem>>, vector<1x64xf32>
      %cst_18 = arith.constant dense<0.000000e+00> : vector<1x64xf32>
      %21 = tpu.matmul %20, %19, %cst_18 {dimension_numbers = #tpu.dot_dimension_numbers<[1], [0], [0], [1], [0, 0, 1, 1], [], []>} : vector<1x64xf32>, vector<64x64xf32>, vector<1x64xf32> -> vector<1x64xf32>
      %c0_19 = arith.constant 0 : index
      %c0_20 = arith.constant 0 : index
      %22 = vector.load %arg9[%c0_19, %c0_20] : memref<1x64xf32, #tpu.memory_space<vmem>>, vector<1x64xf32>
      %cst_21 = arith.constant dense<0.000000e+00> : vector<1x64xf32>
      %23 = tpu.matmul %22, %19, %cst_21 {dimension_numbers = #tpu.dot_dimension_numbers<[1], [0], [0], [1], [0, 0, 1, 1], [], []>} : vector<1x64xf32>, vector<64x64xf32>, vector<1x64xf32> -> vector<1x64xf32>
      %cst_22 = arith.constant dense<0.000000e+00> : vector<64xf32>
      %24 = vector.multi_reduction <add>, %19, %cst_22 [0] : vector<64x64xf32> to vector<64xf32>
      %25 = vector.shape_cast %24 : vector<64xf32> to vector<1x64xf32>
      %cst_23 = arith.constant 2.560000e+02 : f32
      %26 = vector.broadcast %cst_23 : f32 to vector<1x64xf32>
      %27 = arith.mulf %25, %26 : vector<1x64xf32>
      %28 = arith.divf %21, %27 : vector<1x64xf32>
      %29 = arith.divf %23, %27 : vector<1x64xf32>
      %30 = arith.mulf %28, %28 : vector<1x64xf32>
      %31 = arith.subf %29, %30 : vector<1x64xf32>
      %cst_24 = arith.constant 9.99999974E-6 : f32
      %32 = vector.broadcast %cst_24 : f32 to vector<1x64xf32>
      %33 = arith.addf %31, %32 : vector<1x64xf32>
      %34 = math.rsqrt %33 : vector<1x64xf32>
      %c0_25 = arith.constant 0 : index
      %c0_26 = arith.constant 0 : index
      %35 = vector.load %arg3[%c0_25, %c0_26] : memref<1x64xf32, #tpu.memory_space<vmem>>, vector<1x64xf32>
      %36 = arith.mulf %35, %34 : vector<1x64xf32>
      %c0_27 = arith.constant 0 : index
      %c0_28 = arith.constant 0 : index
      %37 = vector.load %arg4[%c0_27, %c0_28] : memref<1x64xf32, #tpu.memory_space<vmem>>, vector<1x64xf32>
      %38 = arith.mulf %28, %36 : vector<1x64xf32>
      %39 = arith.subf %37, %38 : vector<1x64xf32>
      %c0_29 = arith.constant 0 : index
      %c0_30 = arith.constant 0 : index
      %c0_31 = arith.constant 0 : index
      %40 = vector.load %arg6[%c0_29, %c0_30, %c0_31] : memref<1x1x64xf32, #tpu.memory_space<vmem>>, vector<1x1x64xf32>
      %41 = vector.shape_cast %40 : vector<1x1x64xf32> to vector<1x64xf32>
      %42 = vector.shape_cast %36 : vector<1x64xf32> to vector<1x1x64xf32>
      tpu.vector_store %arg6[%c0_29, %c0_30, %c0_31], %42 {strides = array<i32>} : memref<1x1x64xf32, #tpu.memory_space<vmem>>, vector<1x1x64xf32>,
      %c0_32 = arith.constant 0 : index
      %c0_33 = arith.constant 0 : index
      %c0_34 = arith.constant 0 : index
      %43 = vector.load %arg7[%c0_32, %c0_33, %c0_34] : memref<1x1x64xf32, #tpu.memory_space<vmem>>, vector<1x1x64xf32>
      %44 = vector.shape_cast %43 : vector<1x1x64xf32> to vector<1x64xf32>
      %45 = vector.shape_cast %39 : vector<1x64xf32> to vector<1x1x64xf32>
      tpu.vector_store %arg7[%c0_32, %c0_33, %c0_34], %45 {strides = array<i32>} : memref<1x1x64xf32, #tpu.memory_space<vmem>>, vector<1x1x64xf32>,
    } else {
    }
    return
  }
  func.func @transform_0(%arg0: i32, %arg1: i32) -> (i32, i32, i32) {
    %c0_i32 = arith.constant 0 : i32
    %c0_i32_0 = arith.constant 0 : i32
    return %arg0, %arg1, %c0_i32 : i32, i32, i32
  }
  func.func @transform_1(%arg0: i32, %arg1: i32) -> (i32, i32) {
    %c0_i32 = arith.constant 0 : i32
    %c0_i32_0 = arith.constant 0 : i32
    %c0_i32_1 = arith.constant 0 : i32
    return %c0_i32, %c0_i32_0 : i32, i32
  }
  func.func @transform_2(%arg0: i32, %arg1: i32) -> (i32, i32) {
    %c0_i32 = arith.constant 0 : i32
    %c0_i32_0 = arith.constant 0 : i32
    %c0_i32_1 = arith.constant 0 : i32
    return %c0_i32, %c0_i32_0 : i32, i32
  }
  func.func @transform_3(%arg0: i32, %arg1: i32) -> (i32, i32) {
    %c0_i32 = arith.constant 0 : i32
    %c0_i32_0 = arith.constant 0 : i32
    %c0_i32_1 = arith.constant 0 : i32
    return %c0_i32, %c0_i32_0 : i32, i32
  }
  func.func @transform_4(%arg0: i32, %arg1: i32) -> (i32, i32, i32) {
    %c0_i32 = arith.constant 0 : i32
    %c0_i32_0 = arith.constant 0 : i32
    %c0_i32_1 = arith.constant 0 : i32
    return %arg0, %c0_i32, %c0_i32_0 : i32, i32, i32
  }
  func.func @transform_5(%arg0: i32, %arg1: i32) -> (i32, i32, i32) {
    %c0_i32 = arith.constant 0 : i32
    %c0_i32_0 = arith.constant 0 : i32
    %c0_i32_1 = arith.constant 0 : i32
    return %arg0, %c0_i32, %c0_i32_0 : i32, i32, i32
  }
}

module attributes {stable_mosaic.version = 11 : i64} {
  func.func @kernel(%arg0: i32, %arg1: i32, %arg2: memref<1x64x64xf32, #tpu.memory_space<vmem>>, %arg3: memref<1x64xf32, #tpu.memory_space<vmem>>, %arg4: memref<1x64xf32, #tpu.memory_space<vmem>>, %arg5: memref<64x64xf32, #tpu.memory_space<vmem>>, %arg6: memref<1x1x64xf32, #tpu.memory_space<vmem>>, %arg7: memref<1x1x64xf32, #tpu.memory_space<vmem>>, %arg8: memref<1x64xf32, #tpu.memory_space<vmem>>, %arg9: memref<1x64xf32, #tpu.memory_space<vmem>>) attributes {dimension_semantics = [#tpu.dimension_semantics<parallel>, #tpu.dimension_semantics<arbitrary>], iteration_bounds = array<i64: 2, 1>, scalar_prefetch = 0 : i64, scratch_operands = 2 : i64, tpu.core_type = #tpu.core_type<tc>, window_params = [{transform_indices = @transform_0, window_bounds = array<i64: 1, 64, 64>}, {pipeline_mode = #tpu.pipeline_mode<synchronous>, transform_indices = @transform_1, window_bounds = array<i64: 1, 64>}, {pipeline_mode = #tpu.pipeline_mode<synchronous>, transform_indices = @transform_2, window_bounds = array<i64: 1, 64>}, {pipeline_mode = #tpu.pipeline_mode<synchronous>, transform_indices = @transform_3, window_bounds = array<i64: 64, 64>}, {transform_indices = @transform_4, window_bounds = array<i64: 1, 1, 64>}, {transform_indices = @transform_5, window_bounds = array<i64: 1, 1, 64>}]} {
    %c0_i32 = arith.constant 0 : i32
    %0 = arith.cmpi eq, %arg1, %c0_i32 : i32
    %1 = arith.extui %0 : i1 to i32
    %c0_i32_0 = arith.constant 0 : i32
    %2 = arith.cmpi ne, %1, %c0_i32_0 : i32
    scf.if %2 {
      %cst_14 = arith.constant 0.000000e+00 : f32
      %19 = vector.broadcast %cst_14 : f32 to vector<1x64xf32>
      %c0_15 = arith.constant 0 : index
      %c0_16 = arith.constant 0 : index
      %20 = vector.load %arg8[%c0_15, %c0_16] : memref<1x64xf32, #tpu.memory_space<vmem>>, vector<1x64xf32>
      tpu.vector_store %arg8[%c0_15, %c0_16], %19 {strides = array<i32>} : memref<1x64xf32, #tpu.memory_space<vmem>>, vector<1x64xf32>,
      %cst_17 = arith.constant 0.000000e+00 : f32
      %21 = vector.broadcast %cst_17 : f32 to vector<1x64xf32>
      %c0_18 = arith.constant 0 : index
      %c0_19 = arith.constant 0 : index
      %22 = vector.load %arg9[%c0_18, %c0_19] : memref<1x64xf32, #tpu.memory_space<vmem>>, vector<1x64xf32>
      tpu.vector_store %arg9[%c0_18, %c0_19], %21 {strides = array<i32>} : memref<1x64xf32, #tpu.memory_space<vmem>>, vector<1x64xf32>,
    } else {
    }
    %c0 = arith.constant 0 : index
    %c0_1 = arith.constant 0 : index
    %c0_2 = arith.constant 0 : index
    %3 = vector.load %arg2[%c0, %c0_1, %c0_2] : memref<1x64x64xf32, #tpu.memory_space<vmem>>, vector<1x64x64xf32>
    %4 = vector.shape_cast %3 : vector<1x64x64xf32> to vector<64x64xf32>
    %c0_3 = arith.constant 0 : index
    %c0_4 = arith.constant 0 : index
    %5 = vector.load %arg8[%c0_3, %c0_4] : memref<1x64xf32, #tpu.memory_space<vmem>>, vector<1x64xf32>
    %cst = arith.constant dense<0.000000e+00> : vector<64xf32>
    %6 = vector.multi_reduction <add>, %4, %cst [0] : vector<64x64xf32> to vector<64xf32>
    %7 = vector.shape_cast %6 : vector<64xf32> to vector<1x64xf32>
    %8 = arith.addf %5, %7 : vector<1x64xf32>
    %c0_5 = arith.constant 0 : index
    %c0_6 = arith.constant 0 : index
    %9 = vector.load %arg8[%c0_5, %c0_6] : memref<1x64xf32, #tpu.memory_space<vmem>>, vector<1x64xf32>
    tpu.vector_store %arg8[%c0_5, %c0_6], %8 {strides = array<i32>} : memref<1x64xf32, #tpu.memory_space<vmem>>, vector<1x64xf32>,
    %c0_7 = arith.constant 0 : index
    %c0_8 = arith.constant 0 : index
    %10 = vector.load %arg9[%c0_7, %c0_8] : memref<1x64xf32, #tpu.memory_space<vmem>>, vector<1x64xf32>
    %11 = arith.mulf %4, %4 : vector<64x64xf32>
    %cst_9 = arith.constant dense<0.000000e+00> : vector<64xf32>
    %12 = vector.multi_reduction <add>, %11, %cst_9 [0] : vector<64x64xf32> to vector<64xf32>
    %13 = vector.shape_cast %12 : vector<64xf32> to vector<1x64xf32>
    %14 = arith.addf %10, %13 : vector<1x64xf32>
    %c0_10 = arith.constant 0 : index
    %c0_11 = arith.constant 0 : index
    %15 = vector.load %arg9[%c0_10, %c0_11] : memref<1x64xf32, #tpu.memory_space<vmem>>, vector<1x64xf32>
    tpu.vector_store %arg9[%c0_10, %c0_11], %14 {strides = array<i32>} : memref<1x64xf32, #tpu.memory_space<vmem>>, vector<1x64xf32>,
    %c0_i32_12 = arith.constant 0 : i32
    %16 = arith.cmpi eq, %arg1, %c0_i32_12 : i32
    %17 = arith.extui %16 : i1 to i32
    %c0_i32_13 = arith.constant 0 : i32
    %18 = arith.cmpi ne, %17, %c0_i32_13 : i32
    scf.if %18 {
      %c0_14 = arith.constant 0 : index
      %c0_15 = arith.constant 0 : index
      %19 = vector.load %arg5[%c0_14, %c0_15] : memref<64x64xf32, #tpu.memory_space<vmem>>, vector<64x64xf32>
      %c0_16 = arith.constant 0 : index
      %c0_17 = arith.constant 0 : index
      %20 = vector.load %arg8[%c0_16, %c0_17] : memref<1x64xf32, #tpu.memory_space<vmem>>, vector<1x64xf32>
      %cst_18 = arith.constant dense<0.000000e+00> : vector<1x64xf32>
      %21 = tpu.matmul %20, %19, %cst_18 {dimension_numbers = #tpu.dot_dimension_numbers<[1], [0], [0], [1], [0, 0, 1, 1], [], []>} : vector<1x64xf32>, vector<64x64xf32>, vector<1x64xf32> -> vector<1x64xf32>
      %c0_19 = arith.constant 0 : index
      %c0_20 = arith.constant 0 : index
      %22 = vector.load %arg9[%c0_19, %c0_20] : memref<1x64xf32, #tpu.memory_space<vmem>>, vector<1x64xf32>
      %cst_21 = arith.constant dense<0.000000e+00> : vector<1x64xf32>
      %23 = tpu.matmul %22, %19, %cst_21 {dimension_numbers = #tpu.dot_dimension_numbers<[1], [0], [0], [1], [0, 0, 1, 1], [], []>} : vector<1x64xf32>, vector<64x64xf32>, vector<1x64xf32> -> vector<1x64xf32>
      %cst_22 = arith.constant dense<0.000000e+00> : vector<64xf32>
      %24 = vector.multi_reduction <add>, %19, %cst_22 [0] : vector<64x64xf32> to vector<64xf32>
      %25 = vector.shape_cast %24 : vector<64xf32> to vector<1x64xf32>
      %cst_23 = arith.constant 6.400000e+01 : f32
      %26 = vector.broadcast %cst_23 : f32 to vector<1x64xf32>
      %27 = arith.mulf %25, %26 : vector<1x64xf32>
      %28 = arith.divf %21, %27 : vector<1x64xf32>
      %29 = arith.divf %23, %27 : vector<1x64xf32>
      %30 = arith.mulf %28, %28 : vector<1x64xf32>
      %31 = arith.subf %29, %30 : vector<1x64xf32>
      %cst_24 = arith.constant 9.99999974E-6 : f32
      %32 = vector.broadcast %cst_24 : f32 to vector<1x64xf32>
      %33 = arith.addf %31, %32 : vector<1x64xf32>
      %34 = math.rsqrt %33 : vector<1x64xf32>
      %c0_25 = arith.constant 0 : index
      %c0_26 = arith.constant 0 : index
      %35 = vector.load %arg3[%c0_25, %c0_26] : memref<1x64xf32, #tpu.memory_space<vmem>>, vector<1x64xf32>
      %36 = arith.mulf %35, %34 : vector<1x64xf32>
      %c0_27 = arith.constant 0 : index
      %c0_28 = arith.constant 0 : index
      %37 = vector.load %arg4[%c0_27, %c0_28] : memref<1x64xf32, #tpu.memory_space<vmem>>, vector<1x64xf32>
      %38 = arith.mulf %28, %36 : vector<1x64xf32>
      %39 = arith.subf %37, %38 : vector<1x64xf32>
      %c0_29 = arith.constant 0 : index
      %c0_30 = arith.constant 0 : index
      %c0_31 = arith.constant 0 : index
      %40 = vector.load %arg6[%c0_29, %c0_30, %c0_31] : memref<1x1x64xf32, #tpu.memory_space<vmem>>, vector<1x1x64xf32>
      %41 = vector.shape_cast %40 : vector<1x1x64xf32> to vector<1x64xf32>
      %42 = vector.shape_cast %36 : vector<1x64xf32> to vector<1x1x64xf32>
      tpu.vector_store %arg6[%c0_29, %c0_30, %c0_31], %42 {strides = array<i32>} : memref<1x1x64xf32, #tpu.memory_space<vmem>>, vector<1x1x64xf32>,
      %c0_32 = arith.constant 0 : index
      %c0_33 = arith.constant 0 : index
      %c0_34 = arith.constant 0 : index
      %43 = vector.load %arg7[%c0_32, %c0_33, %c0_34] : memref<1x1x64xf32, #tpu.memory_space<vmem>>, vector<1x1x64xf32>
      %44 = vector.shape_cast %43 : vector<1x1x64xf32> to vector<1x64xf32>
      %45 = vector.shape_cast %39 : vector<1x64xf32> to vector<1x1x64xf32>
      tpu.vector_store %arg7[%c0_32, %c0_33, %c0_34], %45 {strides = array<i32>} : memref<1x1x64xf32, #tpu.memory_space<vmem>>, vector<1x1x64xf32>,
    } else {
    }
    return
  }
  func.func @transform_0(%arg0: i32, %arg1: i32) -> (i32, i32, i32) {
    %c0_i32 = arith.constant 0 : i32
    %c0_i32_0 = arith.constant 0 : i32
    return %arg0, %arg1, %c0_i32 : i32, i32, i32
  }
  func.func @transform_1(%arg0: i32, %arg1: i32) -> (i32, i32) {
    %c0_i32 = arith.constant 0 : i32
    %c0_i32_0 = arith.constant 0 : i32
    %c0_i32_1 = arith.constant 0 : i32
    return %c0_i32, %c0_i32_0 : i32, i32
  }
  func.func @transform_2(%arg0: i32, %arg1: i32) -> (i32, i32) {
    %c0_i32 = arith.constant 0 : i32
    %c0_i32_0 = arith.constant 0 : i32
    %c0_i32_1 = arith.constant 0 : i32
    return %c0_i32, %c0_i32_0 : i32, i32
  }
  func.func @transform_3(%arg0: i32, %arg1: i32) -> (i32, i32) {
    %c0_i32 = arith.constant 0 : i32
    %c0_i32_0 = arith.constant 0 : i32
    %c0_i32_1 = arith.constant 0 : i32
    return %c0_i32, %c0_i32_0 : i32, i32
  }
  func.func @transform_4(%arg0: i32, %arg1: i32) -> (i32, i32, i32) {
    %c0_i32 = arith.constant 0 : i32
    %c0_i32_0 = arith.constant 0 : i32
    %c0_i32_1 = arith.constant 0 : i32
    return %arg0, %c0_i32, %c0_i32_0 : i32, i32, i32
  }
  func.func @transform_5(%arg0: i32, %arg1: i32) -> (i32, i32, i32) {
    %c0_i32 = arith.constant 0 : i32
    %c0_i32_0 = arith.constant 0 : i32
    %c0_i32_1 = arith.constant 0 : i32
    return %arg0, %c0_i32, %c0_i32_0 : i32, i32, i32
  }
}

module attributes {stable_mosaic.version = 11 : i64} {
  func.func @kernel(%arg0: i32, %arg1: memref<1x16x16x64xf32, #tpu.memory_space<vmem>>, %arg2: memref<1x1x64xf32, #tpu.memory_space<vmem>>, %arg3: memref<1x1x64xf32, #tpu.memory_space<vmem>>, %arg4: memref<576x64xbf16, #tpu.memory_space<vmem>>, %arg5: memref<1x16x16x64xf32, #tpu.memory_space<vmem>>, %arg6: memref<18x18x64xf32, #tpu.memory_space<vmem>>, %arg7: memref<256x64xf32, #tpu.memory_space<vmem>>) attributes {dimension_semantics = [#tpu.dimension_semantics<parallel>], iteration_bounds = array<i64: 2>, scalar_prefetch = 0 : i64, scratch_operands = 2 : i64, tpu.core_type = #tpu.core_type<tc>, window_params = [{transform_indices = @transform_0, window_bounds = array<i64: 1, 16, 16, 64>}, {transform_indices = @transform_1, window_bounds = array<i64: 1, 1, 64>}, {transform_indices = @transform_2, window_bounds = array<i64: 1, 1, 64>}, {pipeline_mode = #tpu.pipeline_mode<synchronous>, transform_indices = @transform_3, window_bounds = array<i64: 576, 64>}, {transform_indices = @transform_4, window_bounds = array<i64: 1, 16, 16, 64>}]} {
    %c0 = arith.constant 0 : index
    %c0_0 = arith.constant 0 : index
    %c0_1 = arith.constant 0 : index
    %c0_2 = arith.constant 0 : index
    %0 = vector.load %arg1[%c0, %c0_0, %c0_1, %c0_2] : memref<1x16x16x64xf32, #tpu.memory_space<vmem>>, vector<1x16x16x64xf32>
    %1 = vector.shape_cast %0 : vector<1x16x16x64xf32> to vector<16x16x64xf32>
    %c0_3 = arith.constant 0 : index
    %c0_4 = arith.constant 0 : index
    %c0_5 = arith.constant 0 : index
    %2 = vector.load %arg2[%c0_3, %c0_4, %c0_5] : memref<1x1x64xf32, #tpu.memory_space<vmem>>, vector<1x1x64xf32>
    %3 = vector.shape_cast %2 : vector<1x1x64xf32> to vector<1x64xf32>
    %4 = vector.shape_cast %3 : vector<1x64xf32> to vector<1x1x64xf32>
    %c0_6 = arith.constant 0 : index
    %c0_7 = arith.constant 0 : index
    %c0_8 = arith.constant 0 : index
    %5 = vector.load %arg3[%c0_6, %c0_7, %c0_8] : memref<1x1x64xf32, #tpu.memory_space<vmem>>, vector<1x1x64xf32>
    %6 = vector.shape_cast %5 : vector<1x1x64xf32> to vector<1x64xf32>
    %7 = vector.shape_cast %6 : vector<1x64xf32> to vector<1x1x64xf32>
    %8 = vector.broadcast %4 : vector<1x1x64xf32> to vector<16x16x64xf32>
    %9 = arith.mulf %1, %8 : vector<16x16x64xf32>
    %10 = vector.broadcast %7 : vector<1x1x64xf32> to vector<16x16x64xf32>
    %11 = arith.addf %9, %10 : vector<16x16x64xf32>
    %cst = arith.constant 0.000000e+00 : f32
    %12 = vector.broadcast %cst : f32 to vector<16x16x64xf32>
    %13 = arith.maximumf %11, %12 : vector<16x16x64xf32>
    %cst_9 = arith.constant 0.000000e+00 : f32
    %14 = vector.broadcast %cst_9 : f32 to vector<18x18x64xf32>
    %c0_10 = arith.constant 0 : index
    %c0_11 = arith.constant 0 : index
    %c0_12 = arith.constant 0 : index
    %15 = vector.load %arg6[%c0_10, %c0_11, %c0_12] : memref<18x18x64xf32, #tpu.memory_space<vmem>>, vector<18x18x64xf32>
    tpu.vector_store %arg6[%c0_10, %c0_11, %c0_12], %14 {strides = array<i32>} : memref<18x18x64xf32, #tpu.memory_space<vmem>>, vector<18x18x64xf32>,
    %c1 = arith.constant 1 : index
    %c1_13 = arith.constant 1 : index
    %c0_14 = arith.constant 0 : index
    %16 = vector.load %arg6[%c1, %c1_13, %c0_14] : memref<18x18x64xf32, #tpu.memory_space<vmem>>, vector<16x16x64xf32>
    tpu.vector_store %arg6[%c1, %c1_13, %c0_14], %13 {strides = array<i32>} : memref<18x18x64xf32, #tpu.memory_space<vmem>>, vector<16x16x64xf32>,
    %cst_15 = arith.constant 0.000000e+00 : f32
    %17 = vector.broadcast %cst_15 : f32 to vector<256x64xf32>
    %c0_16 = arith.constant 0 : index
    %c0_17 = arith.constant 0 : index
    %18 = vector.load %arg7[%c0_16, %c0_17] : memref<256x64xf32, #tpu.memory_space<vmem>>, vector<256x64xf32>
    tpu.vector_store %arg7[%c0_16, %c0_17], %17 {strides = array<i32>} : memref<256x64xf32, #tpu.memory_space<vmem>>, vector<256x64xf32>,
    %c0_18 = arith.constant 0 : index
    %c0_19 = arith.constant 0 : index
    %c0_20 = arith.constant 0 : index
    %19 = vector.load %arg6[%c0_18, %c0_19, %c0_20] : memref<18x18x64xf32, #tpu.memory_space<vmem>>, vector<16x16x64xf32>
    %20 = vector.shape_cast %19 : vector<16x16x64xf32> to vector<256x64xf32>
    %21 = arith.truncf %20 : vector<256x64xf32> to vector<256x64xbf16>
    %c0_21 = arith.constant 0 : index
    %c0_22 = arith.constant 0 : index
    %22 = vector.load %arg7[%c0_21, %c0_22] : memref<256x64xf32, #tpu.memory_space<vmem>>, vector<256x64xf32>
    %c0_23 = arith.constant 0 : index
    %c0_24 = arith.constant 0 : index
    %23 = vector.load %arg4[%c0_23, %c0_24] : memref<576x64xbf16, #tpu.memory_space<vmem>>, vector<64x64xbf16>
    %cst_25 = arith.constant dense<0.000000e+00> : vector<256x64xf32>
    %24 = tpu.matmul %21, %23, %cst_25 {dimension_numbers = #tpu.dot_dimension_numbers<[1], [0], [0], [1], [0, 0, 1, 1], [], []>} : vector<256x64xbf16>, vector<64x64xbf16>, vector<256x64xf32> -> vector<256x64xf32>
    %25 = arith.addf %22, %24 : vector<256x64xf32>
    %c0_26 = arith.constant 0 : index
    %c0_27 = arith.constant 0 : index
    %26 = vector.load %arg7[%c0_26, %c0_27] : memref<256x64xf32, #tpu.memory_space<vmem>>, vector<256x64xf32>
    tpu.vector_store %arg7[%c0_26, %c0_27], %25 {strides = array<i32>} : memref<256x64xf32, #tpu.memory_space<vmem>>, vector<256x64xf32>,
    %c0_28 = arith.constant 0 : index
    %c1_29 = arith.constant 1 : index
    %c0_30 = arith.constant 0 : index
    %27 = vector.load %arg6[%c0_28, %c1_29, %c0_30] : memref<18x18x64xf32, #tpu.memory_space<vmem>>, vector<16x16x64xf32>
    %28 = vector.shape_cast %27 : vector<16x16x64xf32> to vector<256x64xf32>
    %29 = arith.truncf %28 : vector<256x64xf32> to vector<256x64xbf16>
    %c0_31 = arith.constant 0 : index
    %c0_32 = arith.constant 0 : index
    %30 = vector.load %arg7[%c0_31, %c0_32] : memref<256x64xf32, #tpu.memory_space<vmem>>, vector<256x64xf32>
    %c64 = arith.constant 64 : index
    %c0_33 = arith.constant 0 : index
    %31 = vector.load %arg4[%c64, %c0_33] : memref<576x64xbf16, #tpu.memory_space<vmem>>, vector<64x64xbf16>
    %cst_34 = arith.constant dense<0.000000e+00> : vector<256x64xf32>
    %32 = tpu.matmul %29, %31, %cst_34 {dimension_numbers = #tpu.dot_dimension_numbers<[1], [0], [0], [1], [0, 0, 1, 1], [], []>} : vector<256x64xbf16>, vector<64x64xbf16>, vector<256x64xf32> -> vector<256x64xf32>
    %33 = arith.addf %30, %32 : vector<256x64xf32>
    %c0_35 = arith.constant 0 : index
    %c0_36 = arith.constant 0 : index
    %34 = vector.load %arg7[%c0_35, %c0_36] : memref<256x64xf32, #tpu.memory_space<vmem>>, vector<256x64xf32>
    tpu.vector_store %arg7[%c0_35, %c0_36], %33 {strides = array<i32>} : memref<256x64xf32, #tpu.memory_space<vmem>>, vector<256x64xf32>,
    %c0_37 = arith.constant 0 : index
    %c2 = arith.constant 2 : index
    %c0_38 = arith.constant 0 : index
    %35 = vector.load %arg6[%c0_37, %c2, %c0_38] : memref<18x18x64xf32, #tpu.memory_space<vmem>>, vector<16x16x64xf32>
    %36 = vector.shape_cast %35 : vector<16x16x64xf32> to vector<256x64xf32>
    %37 = arith.truncf %36 : vector<256x64xf32> to vector<256x64xbf16>
    %c0_39 = arith.constant 0 : index
    %c0_40 = arith.constant 0 : index
    %38 = vector.load %arg7[%c0_39, %c0_40] : memref<256x64xf32, #tpu.memory_space<vmem>>, vector<256x64xf32>
    %c128 = arith.constant 128 : index
    %c0_41 = arith.constant 0 : index
    %39 = vector.load %arg4[%c128, %c0_41] : memref<576x64xbf16, #tpu.memory_space<vmem>>, vector<64x64xbf16>
    %cst_42 = arith.constant dense<0.000000e+00> : vector<256x64xf32>
    %40 = tpu.matmul %37, %39, %cst_42 {dimension_numbers = #tpu.dot_dimension_numbers<[1], [0], [0], [1], [0, 0, 1, 1], [], []>} : vector<256x64xbf16>, vector<64x64xbf16>, vector<256x64xf32> -> vector<256x64xf32>
    %41 = arith.addf %38, %40 : vector<256x64xf32>
    %c0_43 = arith.constant 0 : index
    %c0_44 = arith.constant 0 : index
    %42 = vector.load %arg7[%c0_43, %c0_44] : memref<256x64xf32, #tpu.memory_space<vmem>>, vector<256x64xf32>
    tpu.vector_store %arg7[%c0_43, %c0_44], %41 {strides = array<i32>} : memref<256x64xf32, #tpu.memory_space<vmem>>, vector<256x64xf32>,
    %c1_45 = arith.constant 1 : index
    %c0_46 = arith.constant 0 : index
    %c0_47 = arith.constant 0 : index
    %43 = vector.load %arg6[%c1_45, %c0_46, %c0_47] : memref<18x18x64xf32, #tpu.memory_space<vmem>>, vector<16x16x64xf32>
    %44 = vector.shape_cast %43 : vector<16x16x64xf32> to vector<256x64xf32>
    %45 = arith.truncf %44 : vector<256x64xf32> to vector<256x64xbf16>
    %c0_48 = arith.constant 0 : index
    %c0_49 = arith.constant 0 : index
    %46 = vector.load %arg7[%c0_48, %c0_49] : memref<256x64xf32, #tpu.memory_space<vmem>>, vector<256x64xf32>
    %c192 = arith.constant 192 : index
    %c0_50 = arith.constant 0 : index
    %47 = vector.load %arg4[%c192, %c0_50] : memref<576x64xbf16, #tpu.memory_space<vmem>>, vector<64x64xbf16>
    %cst_51 = arith.constant dense<0.000000e+00> : vector<256x64xf32>
    %48 = tpu.matmul %45, %47, %cst_51 {dimension_numbers = #tpu.dot_dimension_numbers<[1], [0], [0], [1], [0, 0, 1, 1], [], []>} : vector<256x64xbf16>, vector<64x64xbf16>, vector<256x64xf32> -> vector<256x64xf32>
    %49 = arith.addf %46, %48 : vector<256x64xf32>
    %c0_52 = arith.constant 0 : index
    %c0_53 = arith.constant 0 : index
    %50 = vector.load %arg7[%c0_52, %c0_53] : memref<256x64xf32, #tpu.memory_space<vmem>>, vector<256x64xf32>
    tpu.vector_store %arg7[%c0_52, %c0_53], %49 {strides = array<i32>} : memref<256x64xf32, #tpu.memory_space<vmem>>, vector<256x64xf32>,
    %c1_54 = arith.constant 1 : index
    %c1_55 = arith.constant 1 : index
    %c0_56 = arith.constant 0 : index
    %51 = vector.load %arg6[%c1_54, %c1_55, %c0_56] : memref<18x18x64xf32, #tpu.memory_space<vmem>>, vector<16x16x64xf32>
    %52 = vector.shape_cast %51 : vector<16x16x64xf32> to vector<256x64xf32>
    %53 = arith.truncf %52 : vector<256x64xf32> to vector<256x64xbf16>
    %c0_57 = arith.constant 0 : index
    %c0_58 = arith.constant 0 : index
    %54 = vector.load %arg7[%c0_57, %c0_58] : memref<256x64xf32, #tpu.memory_space<vmem>>, vector<256x64xf32>
    %c256 = arith.constant 256 : index
    %c0_59 = arith.constant 0 : index
    %55 = vector.load %arg4[%c256, %c0_59] : memref<576x64xbf16, #tpu.memory_space<vmem>>, vector<64x64xbf16>
    %cst_60 = arith.constant dense<0.000000e+00> : vector<256x64xf32>
    %56 = tpu.matmul %53, %55, %cst_60 {dimension_numbers = #tpu.dot_dimension_numbers<[1], [0], [0], [1], [0, 0, 1, 1], [], []>} : vector<256x64xbf16>, vector<64x64xbf16>, vector<256x64xf32> -> vector<256x64xf32>
    %57 = arith.addf %54, %56 : vector<256x64xf32>
    %c0_61 = arith.constant 0 : index
    %c0_62 = arith.constant 0 : index
    %58 = vector.load %arg7[%c0_61, %c0_62] : memref<256x64xf32, #tpu.memory_space<vmem>>, vector<256x64xf32>
    tpu.vector_store %arg7[%c0_61, %c0_62], %57 {strides = array<i32>} : memref<256x64xf32, #tpu.memory_space<vmem>>, vector<256x64xf32>,
    %c1_63 = arith.constant 1 : index
    %c2_64 = arith.constant 2 : index
    %c0_65 = arith.constant 0 : index
    %59 = vector.load %arg6[%c1_63, %c2_64, %c0_65] : memref<18x18x64xf32, #tpu.memory_space<vmem>>, vector<16x16x64xf32>
    %60 = vector.shape_cast %59 : vector<16x16x64xf32> to vector<256x64xf32>
    %61 = arith.truncf %60 : vector<256x64xf32> to vector<256x64xbf16>
    %c0_66 = arith.constant 0 : index
    %c0_67 = arith.constant 0 : index
    %62 = vector.load %arg7[%c0_66, %c0_67] : memref<256x64xf32, #tpu.memory_space<vmem>>, vector<256x64xf32>
    %c320 = arith.constant 320 : index
    %c0_68 = arith.constant 0 : index
    %63 = vector.load %arg4[%c320, %c0_68] : memref<576x64xbf16, #tpu.memory_space<vmem>>, vector<64x64xbf16>
    %cst_69 = arith.constant dense<0.000000e+00> : vector<256x64xf32>
    %64 = tpu.matmul %61, %63, %cst_69 {dimension_numbers = #tpu.dot_dimension_numbers<[1], [0], [0], [1], [0, 0, 1, 1], [], []>} : vector<256x64xbf16>, vector<64x64xbf16>, vector<256x64xf32> -> vector<256x64xf32>
    %65 = arith.addf %62, %64 : vector<256x64xf32>
    %c0_70 = arith.constant 0 : index
    %c0_71 = arith.constant 0 : index
    %66 = vector.load %arg7[%c0_70, %c0_71] : memref<256x64xf32, #tpu.memory_space<vmem>>, vector<256x64xf32>
    tpu.vector_store %arg7[%c0_70, %c0_71], %65 {strides = array<i32>} : memref<256x64xf32, #tpu.memory_space<vmem>>, vector<256x64xf32>,
    %c2_72 = arith.constant 2 : index
    %c0_73 = arith.constant 0 : index
    %c0_74 = arith.constant 0 : index
    %67 = vector.load %arg6[%c2_72, %c0_73, %c0_74] : memref<18x18x64xf32, #tpu.memory_space<vmem>>, vector<16x16x64xf32>
    %68 = vector.shape_cast %67 : vector<16x16x64xf32> to vector<256x64xf32>
    %69 = arith.truncf %68 : vector<256x64xf32> to vector<256x64xbf16>
    %c0_75 = arith.constant 0 : index
    %c0_76 = arith.constant 0 : index
    %70 = vector.load %arg7[%c0_75, %c0_76] : memref<256x64xf32, #tpu.memory_space<vmem>>, vector<256x64xf32>
    %c384 = arith.constant 384 : index
    %c0_77 = arith.constant 0 : index
    %71 = vector.load %arg4[%c384, %c0_77] : memref<576x64xbf16, #tpu.memory_space<vmem>>, vector<64x64xbf16>
    %cst_78 = arith.constant dense<0.000000e+00> : vector<256x64xf32>
    %72 = tpu.matmul %69, %71, %cst_78 {dimension_numbers = #tpu.dot_dimension_numbers<[1], [0], [0], [1], [0, 0, 1, 1], [], []>} : vector<256x64xbf16>, vector<64x64xbf16>, vector<256x64xf32> -> vector<256x64xf32>
    %73 = arith.addf %70, %72 : vector<256x64xf32>
    %c0_79 = arith.constant 0 : index
    %c0_80 = arith.constant 0 : index
    %74 = vector.load %arg7[%c0_79, %c0_80] : memref<256x64xf32, #tpu.memory_space<vmem>>, vector<256x64xf32>
    tpu.vector_store %arg7[%c0_79, %c0_80], %73 {strides = array<i32>} : memref<256x64xf32, #tpu.memory_space<vmem>>, vector<256x64xf32>,
    %c2_81 = arith.constant 2 : index
    %c1_82 = arith.constant 1 : index
    %c0_83 = arith.constant 0 : index
    %75 = vector.load %arg6[%c2_81, %c1_82, %c0_83] : memref<18x18x64xf32, #tpu.memory_space<vmem>>, vector<16x16x64xf32>
    %76 = vector.shape_cast %75 : vector<16x16x64xf32> to vector<256x64xf32>
    %77 = arith.truncf %76 : vector<256x64xf32> to vector<256x64xbf16>
    %c0_84 = arith.constant 0 : index
    %c0_85 = arith.constant 0 : index
    %78 = vector.load %arg7[%c0_84, %c0_85] : memref<256x64xf32, #tpu.memory_space<vmem>>, vector<256x64xf32>
    %c448 = arith.constant 448 : index
    %c0_86 = arith.constant 0 : index
    %79 = vector.load %arg4[%c448, %c0_86] : memref<576x64xbf16, #tpu.memory_space<vmem>>, vector<64x64xbf16>
    %cst_87 = arith.constant dense<0.000000e+00> : vector<256x64xf32>
    %80 = tpu.matmul %77, %79, %cst_87 {dimension_numbers = #tpu.dot_dimension_numbers<[1], [0], [0], [1], [0, 0, 1, 1], [], []>} : vector<256x64xbf16>, vector<64x64xbf16>, vector<256x64xf32> -> vector<256x64xf32>
    %81 = arith.addf %78, %80 : vector<256x64xf32>
    %c0_88 = arith.constant 0 : index
    %c0_89 = arith.constant 0 : index
    %82 = vector.load %arg7[%c0_88, %c0_89] : memref<256x64xf32, #tpu.memory_space<vmem>>, vector<256x64xf32>
    tpu.vector_store %arg7[%c0_88, %c0_89], %81 {strides = array<i32>} : memref<256x64xf32, #tpu.memory_space<vmem>>, vector<256x64xf32>,
    %c2_90 = arith.constant 2 : index
    %c2_91 = arith.constant 2 : index
    %c0_92 = arith.constant 0 : index
    %83 = vector.load %arg6[%c2_90, %c2_91, %c0_92] : memref<18x18x64xf32, #tpu.memory_space<vmem>>, vector<16x16x64xf32>
    %84 = vector.shape_cast %83 : vector<16x16x64xf32> to vector<256x64xf32>
    %85 = arith.truncf %84 : vector<256x64xf32> to vector<256x64xbf16>
    %c0_93 = arith.constant 0 : index
    %c0_94 = arith.constant 0 : index
    %86 = vector.load %arg7[%c0_93, %c0_94] : memref<256x64xf32, #tpu.memory_space<vmem>>, vector<256x64xf32>
    %c512 = arith.constant 512 : index
    %c0_95 = arith.constant 0 : index
    %87 = vector.load %arg4[%c512, %c0_95] : memref<576x64xbf16, #tpu.memory_space<vmem>>, vector<64x64xbf16>
    %cst_96 = arith.constant dense<0.000000e+00> : vector<256x64xf32>
    %88 = tpu.matmul %85, %87, %cst_96 {dimension_numbers = #tpu.dot_dimension_numbers<[1], [0], [0], [1], [0, 0, 1, 1], [], []>} : vector<256x64xbf16>, vector<64x64xbf16>, vector<256x64xf32> -> vector<256x64xf32>
    %89 = arith.addf %86, %88 : vector<256x64xf32>
    %c0_97 = arith.constant 0 : index
    %c0_98 = arith.constant 0 : index
    %90 = vector.load %arg7[%c0_97, %c0_98] : memref<256x64xf32, #tpu.memory_space<vmem>>, vector<256x64xf32>
    tpu.vector_store %arg7[%c0_97, %c0_98], %89 {strides = array<i32>} : memref<256x64xf32, #tpu.memory_space<vmem>>, vector<256x64xf32>,
    %c0_99 = arith.constant 0 : index
    %c0_100 = arith.constant 0 : index
    %91 = vector.load %arg7[%c0_99, %c0_100] : memref<256x64xf32, #tpu.memory_space<vmem>>, vector<256x64xf32>
    %92 = vector.shape_cast %91 : vector<256x64xf32> to vector<16x16x64xf32>
    %c0_101 = arith.constant 0 : index
    %c0_102 = arith.constant 0 : index
    %c0_103 = arith.constant 0 : index
    %c0_104 = arith.constant 0 : index
    %93 = vector.load %arg5[%c0_101, %c0_102, %c0_103, %c0_104] : memref<1x16x16x64xf32, #tpu.memory_space<vmem>>, vector<1x16x16x64xf32>
    %94 = vector.shape_cast %93 : vector<1x16x16x64xf32> to vector<16x16x64xf32>
    %95 = vector.shape_cast %92 : vector<16x16x64xf32> to vector<1x16x16x64xf32>
    tpu.vector_store %arg5[%c0_101, %c0_102, %c0_103, %c0_104], %95 {strides = array<i32>} : memref<1x16x16x64xf32, #tpu.memory_space<vmem>>, vector<1x16x16x64xf32>,
    return
  }
  func.func @transform_0(%arg0: i32) -> (i32, i32, i32, i32) {
    %c0_i32 = arith.constant 0 : i32
    %c0_i32_0 = arith.constant 0 : i32
    %c0_i32_1 = arith.constant 0 : i32
    %c0_i32_2 = arith.constant 0 : i32
    return %arg0, %c0_i32, %c0_i32_0, %c0_i32_1 : i32, i32, i32, i32
  }
  func.func @transform_1(%arg0: i32) -> (i32, i32, i32) {
    %c0_i32 = arith.constant 0 : i32
    %c0_i32_0 = arith.constant 0 : i32
    %c0_i32_1 = arith.constant 0 : i32
    return %arg0, %c0_i32, %c0_i32_0 : i32, i32, i32
  }
  func.func @transform_2(%arg0: i32) -> (i32, i32, i32) {
    %c0_i32 = arith.constant 0 : i32
    %c0_i32_0 = arith.constant 0 : i32
    %c0_i32_1 = arith.constant 0 : i32
    return %arg0, %c0_i32, %c0_i32_0 : i32, i32, i32
  }
  func.func @transform_3(%arg0: i32) -> (i32, i32) {
    %c0_i32 = arith.constant 0 : i32
    %c0_i32_0 = arith.constant 0 : i32
    %c0_i32_1 = arith.constant 0 : i32
    return %c0_i32, %c0_i32_0 : i32, i32
  }
  func.func @transform_4(%arg0: i32) -> (i32, i32, i32, i32) {
    %c0_i32 = arith.constant 0 : i32
    %c0_i32_0 = arith.constant 0 : i32
    %c0_i32_1 = arith.constant 0 : i32
    %c0_i32_2 = arith.constant 0 : i32
    return %arg0, %c0_i32, %c0_i32_0, %c0_i32_1 : i32, i32, i32, i32
  }
}

module attributes {stable_mosaic.version = 11 : i64} {
  func.func @kernel(%arg0: i32, %arg1: i32, %arg2: memref<1x64x64xf32, #tpu.memory_space<vmem>>, %arg3: memref<1x1x64xf32, #tpu.memory_space<vmem>>, %arg4: memref<1x1x64xf32, #tpu.memory_space<vmem>>, %arg5: memref<64x256xbf16, #tpu.memory_space<vmem>>, %arg6: memref<1x64x256xf32, #tpu.memory_space<vmem>>) attributes {dimension_semantics = [#tpu.dimension_semantics<parallel>, #tpu.dimension_semantics<parallel>], iteration_bounds = array<i64: 2, 1>, scalar_prefetch = 0 : i64, scratch_operands = 0 : i64, tpu.core_type = #tpu.core_type<tc>, window_params = [{transform_indices = @transform_0, window_bounds = array<i64: 1, 64, 64>}, {transform_indices = @transform_1, window_bounds = array<i64: 1, 1, 64>}, {transform_indices = @transform_2, window_bounds = array<i64: 1, 1, 64>}, {pipeline_mode = #tpu.pipeline_mode<synchronous>, transform_indices = @transform_3, window_bounds = array<i64: 64, 256>}, {transform_indices = @transform_4, window_bounds = array<i64: 1, 64, 256>}]} {
    %c0 = arith.constant 0 : index
    %c0_0 = arith.constant 0 : index
    %c0_1 = arith.constant 0 : index
    %0 = vector.load %arg2[%c0, %c0_0, %c0_1] : memref<1x64x64xf32, #tpu.memory_space<vmem>>, vector<1x64x64xf32>
    %1 = vector.shape_cast %0 : vector<1x64x64xf32> to vector<64x64xf32>
    %c0_2 = arith.constant 0 : index
    %c0_3 = arith.constant 0 : index
    %c0_4 = arith.constant 0 : index
    %2 = vector.load %arg3[%c0_2, %c0_3, %c0_4] : memref<1x1x64xf32, #tpu.memory_space<vmem>>, vector<1x1x64xf32>
    %3 = vector.shape_cast %2 : vector<1x1x64xf32> to vector<1x64xf32>
    %c0_5 = arith.constant 0 : index
    %c0_6 = arith.constant 0 : index
    %c0_7 = arith.constant 0 : index
    %4 = vector.load %arg4[%c0_5, %c0_6, %c0_7] : memref<1x1x64xf32, #tpu.memory_space<vmem>>, vector<1x1x64xf32>
    %5 = vector.shape_cast %4 : vector<1x1x64xf32> to vector<1x64xf32>
    %6 = vector.broadcast %3 : vector<1x64xf32> to vector<64x64xf32>
    %7 = arith.mulf %1, %6 : vector<64x64xf32>
    %8 = vector.broadcast %5 : vector<1x64xf32> to vector<64x64xf32>
    %9 = arith.addf %7, %8 : vector<64x64xf32>
    %cst = arith.constant 0.000000e+00 : f32
    %10 = vector.broadcast %cst : f32 to vector<64x64xf32>
    %11 = arith.maximumf %9, %10 : vector<64x64xf32>
    %12 = arith.truncf %11 : vector<64x64xf32> to vector<64x64xbf16>
    %c0_8 = arith.constant 0 : index
    %c0_9 = arith.constant 0 : index
    %13 = vector.load %arg5[%c0_8, %c0_9] : memref<64x256xbf16, #tpu.memory_space<vmem>>, vector<64x256xbf16>
    %cst_10 = arith.constant dense<0.000000e+00> : vector<64x256xf32>
    %14 = tpu.matmul %12, %13, %cst_10 {dimension_numbers = #tpu.dot_dimension_numbers<[1], [0], [0], [1], [0, 0, 1, 1], [], []>} : vector<64x64xbf16>, vector<64x256xbf16>, vector<64x256xf32> -> vector<64x256xf32>
    %c0_11 = arith.constant 0 : index
    %c0_12 = arith.constant 0 : index
    %c0_13 = arith.constant 0 : index
    %15 = vector.load %arg6[%c0_11, %c0_12, %c0_13] : memref<1x64x256xf32, #tpu.memory_space<vmem>>, vector<1x64x256xf32>
    %16 = vector.shape_cast %15 : vector<1x64x256xf32> to vector<64x256xf32>
    %17 = vector.shape_cast %14 : vector<64x256xf32> to vector<1x64x256xf32>
    tpu.vector_store %arg6[%c0_11, %c0_12, %c0_13], %17 {strides = array<i32>} : memref<1x64x256xf32, #tpu.memory_space<vmem>>, vector<1x64x256xf32>,
    return
  }
  func.func @transform_0(%arg0: i32, %arg1: i32) -> (i32, i32, i32) {
    %c0_i32 = arith.constant 0 : i32
    %c0_i32_0 = arith.constant 0 : i32
    return %arg0, %arg1, %c0_i32 : i32, i32, i32
  }
  func.func @transform_1(%arg0: i32, %arg1: i32) -> (i32, i32, i32) {
    %c0_i32 = arith.constant 0 : i32
    %c0_i32_0 = arith.constant 0 : i32
    %c0_i32_1 = arith.constant 0 : i32
    return %arg0, %c0_i32, %c0_i32_0 : i32, i32, i32
  }
  func.func @transform_2(%arg0: i32, %arg1: i32) -> (i32, i32, i32) {
    %c0_i32 = arith.constant 0 : i32
    %c0_i32_0 = arith.constant 0 : i32
    %c0_i32_1 = arith.constant 0 : i32
    return %arg0, %c0_i32, %c0_i32_0 : i32, i32, i32
  }
  func.func @transform_3(%arg0: i32, %arg1: i32) -> (i32, i32) {
    %c0_i32 = arith.constant 0 : i32
    %c0_i32_0 = arith.constant 0 : i32
    %c0_i32_1 = arith.constant 0 : i32
    return %c0_i32, %c0_i32_0 : i32, i32
  }
  func.func @transform_4(%arg0: i32, %arg1: i32) -> (i32, i32, i32) {
    %c0_i32 = arith.constant 0 : i32
    %c0_i32_0 = arith.constant 0 : i32
    return %arg0, %arg1, %c0_i32 : i32, i32, i32
  }
}

module attributes {stable_mosaic.version = 11 : i64} {
  func.func @kernel(%arg0: i32, %arg1: i32, %arg2: memref<1x64x64xf32, #tpu.memory_space<vmem>>, %arg3: memref<1x1x64xf32, #tpu.memory_space<vmem>>, %arg4: memref<1x1x64xf32, #tpu.memory_space<vmem>>, %arg5: memref<64x256xbf16, #tpu.memory_space<vmem>>, %arg6: memref<1x64x256xf32, #tpu.memory_space<vmem>>, %arg7: memref<1x64x256xf32, #tpu.memory_space<vmem>>) attributes {dimension_semantics = [#tpu.dimension_semantics<parallel>, #tpu.dimension_semantics<parallel>], iteration_bounds = array<i64: 2, 1>, scalar_prefetch = 0 : i64, scratch_operands = 0 : i64, tpu.core_type = #tpu.core_type<tc>, window_params = [{transform_indices = @transform_0, window_bounds = array<i64: 1, 64, 64>}, {transform_indices = @transform_1, window_bounds = array<i64: 1, 1, 64>}, {transform_indices = @transform_2, window_bounds = array<i64: 1, 1, 64>}, {pipeline_mode = #tpu.pipeline_mode<synchronous>, transform_indices = @transform_3, window_bounds = array<i64: 64, 256>}, {transform_indices = @transform_4, window_bounds = array<i64: 1, 64, 256>}, {transform_indices = @transform_5, window_bounds = array<i64: 1, 64, 256>}]} {
    %c0 = arith.constant 0 : index
    %c0_0 = arith.constant 0 : index
    %c0_1 = arith.constant 0 : index
    %0 = vector.load %arg2[%c0, %c0_0, %c0_1] : memref<1x64x64xf32, #tpu.memory_space<vmem>>, vector<1x64x64xf32>
    %1 = vector.shape_cast %0 : vector<1x64x64xf32> to vector<64x64xf32>
    %c0_2 = arith.constant 0 : index
    %c0_3 = arith.constant 0 : index
    %c0_4 = arith.constant 0 : index
    %2 = vector.load %arg3[%c0_2, %c0_3, %c0_4] : memref<1x1x64xf32, #tpu.memory_space<vmem>>, vector<1x1x64xf32>
    %3 = vector.shape_cast %2 : vector<1x1x64xf32> to vector<1x64xf32>
    %c0_5 = arith.constant 0 : index
    %c0_6 = arith.constant 0 : index
    %c0_7 = arith.constant 0 : index
    %4 = vector.load %arg4[%c0_5, %c0_6, %c0_7] : memref<1x1x64xf32, #tpu.memory_space<vmem>>, vector<1x1x64xf32>
    %5 = vector.shape_cast %4 : vector<1x1x64xf32> to vector<1x64xf32>
    %6 = vector.broadcast %3 : vector<1x64xf32> to vector<64x64xf32>
    %7 = arith.mulf %1, %6 : vector<64x64xf32>
    %8 = vector.broadcast %5 : vector<1x64xf32> to vector<64x64xf32>
    %9 = arith.addf %7, %8 : vector<64x64xf32>
    %cst = arith.constant 0.000000e+00 : f32
    %10 = vector.broadcast %cst : f32 to vector<64x64xf32>
    %11 = arith.maximumf %9, %10 : vector<64x64xf32>
    %12 = arith.truncf %11 : vector<64x64xf32> to vector<64x64xbf16>
    %c0_8 = arith.constant 0 : index
    %c0_9 = arith.constant 0 : index
    %13 = vector.load %arg5[%c0_8, %c0_9] : memref<64x256xbf16, #tpu.memory_space<vmem>>, vector<64x256xbf16>
    %cst_10 = arith.constant dense<0.000000e+00> : vector<64x256xf32>
    %14 = tpu.matmul %12, %13, %cst_10 {dimension_numbers = #tpu.dot_dimension_numbers<[1], [0], [0], [1], [0, 0, 1, 1], [], []>} : vector<64x64xbf16>, vector<64x256xbf16>, vector<64x256xf32> -> vector<64x256xf32>
    %c0_11 = arith.constant 0 : index
    %c0_12 = arith.constant 0 : index
    %c0_13 = arith.constant 0 : index
    %15 = vector.load %arg6[%c0_11, %c0_12, %c0_13] : memref<1x64x256xf32, #tpu.memory_space<vmem>>, vector<1x64x256xf32>
    %16 = vector.shape_cast %15 : vector<1x64x256xf32> to vector<64x256xf32>
    %17 = arith.addf %14, %16 : vector<64x256xf32>
    %c0_14 = arith.constant 0 : index
    %c0_15 = arith.constant 0 : index
    %c0_16 = arith.constant 0 : index
    %18 = vector.load %arg7[%c0_14, %c0_15, %c0_16] : memref<1x64x256xf32, #tpu.memory_space<vmem>>, vector<1x64x256xf32>
    %19 = vector.shape_cast %18 : vector<1x64x256xf32> to vector<64x256xf32>
    %20 = vector.shape_cast %17 : vector<64x256xf32> to vector<1x64x256xf32>
    tpu.vector_store %arg7[%c0_14, %c0_15, %c0_16], %20 {strides = array<i32>} : memref<1x64x256xf32, #tpu.memory_space<vmem>>, vector<1x64x256xf32>,
    return
  }
  func.func @transform_0(%arg0: i32, %arg1: i32) -> (i32, i32, i32) {
    %c0_i32 = arith.constant 0 : i32
    %c0_i32_0 = arith.constant 0 : i32
    return %arg0, %arg1, %c0_i32 : i32, i32, i32
  }
  func.func @transform_1(%arg0: i32, %arg1: i32) -> (i32, i32, i32) {
    %c0_i32 = arith.constant 0 : i32
    %c0_i32_0 = arith.constant 0 : i32
    %c0_i32_1 = arith.constant 0 : i32
    return %arg0, %c0_i32, %c0_i32_0 : i32, i32, i32
  }
  func.func @transform_2(%arg0: i32, %arg1: i32) -> (i32, i32, i32) {
    %c0_i32 = arith.constant 0 : i32
    %c0_i32_0 = arith.constant 0 : i32
    %c0_i32_1 = arith.constant 0 : i32
    return %arg0, %c0_i32, %c0_i32_0 : i32, i32, i32
  }
  func.func @transform_3(%arg0: i32, %arg1: i32) -> (i32, i32) {
    %c0_i32 = arith.constant 0 : i32
    %c0_i32_0 = arith.constant 0 : i32
    %c0_i32_1 = arith.constant 0 : i32
    return %c0_i32, %c0_i32_0 : i32, i32
  }
  func.func @transform_4(%arg0: i32, %arg1: i32) -> (i32, i32, i32) {
    %c0_i32 = arith.constant 0 : i32
    %c0_i32_0 = arith.constant 0 : i32
    return %arg0, %arg1, %c0_i32 : i32, i32, i32
  }
  func.func @transform_5(%arg0: i32, %arg1: i32) -> (i32, i32, i32) {
    %c0_i32 = arith.constant 0 : i32
    %c0_i32_0 = arith.constant 0 : i32
    return %arg0, %arg1, %c0_i32 : i32, i32, i32
  }
}

module attributes {stable_mosaic.version = 11 : i64} {
  func.func @kernel(%arg0: i32, %arg1: i32, %arg2: memref<1x64x256xf32, #tpu.memory_space<vmem>>, %arg3: memref<1x256xf32, #tpu.memory_space<vmem>>, %arg4: memref<1x256xf32, #tpu.memory_space<vmem>>, %arg5: memref<256x256xf32, #tpu.memory_space<vmem>>, %arg6: memref<1x1x256xf32, #tpu.memory_space<vmem>>, %arg7: memref<1x1x256xf32, #tpu.memory_space<vmem>>, %arg8: memref<1x256xf32, #tpu.memory_space<vmem>>, %arg9: memref<1x256xf32, #tpu.memory_space<vmem>>) attributes {dimension_semantics = [#tpu.dimension_semantics<parallel>, #tpu.dimension_semantics<arbitrary>], iteration_bounds = array<i64: 2, 1>, scalar_prefetch = 0 : i64, scratch_operands = 2 : i64, tpu.core_type = #tpu.core_type<tc>, window_params = [{transform_indices = @transform_0, window_bounds = array<i64: 1, 64, 256>}, {pipeline_mode = #tpu.pipeline_mode<synchronous>, transform_indices = @transform_1, window_bounds = array<i64: 1, 256>}, {pipeline_mode = #tpu.pipeline_mode<synchronous>, transform_indices = @transform_2, window_bounds = array<i64: 1, 256>}, {pipeline_mode = #tpu.pipeline_mode<synchronous>, transform_indices = @transform_3, window_bounds = array<i64: 256, 256>}, {transform_indices = @transform_4, window_bounds = array<i64: 1, 1, 256>}, {transform_indices = @transform_5, window_bounds = array<i64: 1, 1, 256>}]} {
    %c0_i32 = arith.constant 0 : i32
    %0 = arith.cmpi eq, %arg1, %c0_i32 : i32
    %1 = arith.extui %0 : i1 to i32
    %c0_i32_0 = arith.constant 0 : i32
    %2 = arith.cmpi ne, %1, %c0_i32_0 : i32
    scf.if %2 {
      %cst_14 = arith.constant 0.000000e+00 : f32
      %19 = vector.broadcast %cst_14 : f32 to vector<1x256xf32>
      %c0_15 = arith.constant 0 : index
      %c0_16 = arith.constant 0 : index
      %20 = vector.load %arg8[%c0_15, %c0_16] : memref<1x256xf32, #tpu.memory_space<vmem>>, vector<1x256xf32>
      tpu.vector_store %arg8[%c0_15, %c0_16], %19 {strides = array<i32>} : memref<1x256xf32, #tpu.memory_space<vmem>>, vector<1x256xf32>,
      %cst_17 = arith.constant 0.000000e+00 : f32
      %21 = vector.broadcast %cst_17 : f32 to vector<1x256xf32>
      %c0_18 = arith.constant 0 : index
      %c0_19 = arith.constant 0 : index
      %22 = vector.load %arg9[%c0_18, %c0_19] : memref<1x256xf32, #tpu.memory_space<vmem>>, vector<1x256xf32>
      tpu.vector_store %arg9[%c0_18, %c0_19], %21 {strides = array<i32>} : memref<1x256xf32, #tpu.memory_space<vmem>>, vector<1x256xf32>,
    } else {
    }
    %c0 = arith.constant 0 : index
    %c0_1 = arith.constant 0 : index
    %c0_2 = arith.constant 0 : index
    %3 = vector.load %arg2[%c0, %c0_1, %c0_2] : memref<1x64x256xf32, #tpu.memory_space<vmem>>, vector<1x64x256xf32>
    %4 = vector.shape_cast %3 : vector<1x64x256xf32> to vector<64x256xf32>
    %c0_3 = arith.constant 0 : index
    %c0_4 = arith.constant 0 : index
    %5 = vector.load %arg8[%c0_3, %c0_4] : memref<1x256xf32, #tpu.memory_space<vmem>>, vector<1x256xf32>
    %cst = arith.constant dense<0.000000e+00> : vector<256xf32>
    %6 = vector.multi_reduction <add>, %4, %cst [0] : vector<64x256xf32> to vector<256xf32>
    %7 = vector.shape_cast %6 : vector<256xf32> to vector<1x256xf32>
    %8 = arith.addf %5, %7 : vector<1x256xf32>
    %c0_5 = arith.constant 0 : index
    %c0_6 = arith.constant 0 : index
    %9 = vector.load %arg8[%c0_5, %c0_6] : memref<1x256xf32, #tpu.memory_space<vmem>>, vector<1x256xf32>
    tpu.vector_store %arg8[%c0_5, %c0_6], %8 {strides = array<i32>} : memref<1x256xf32, #tpu.memory_space<vmem>>, vector<1x256xf32>,
    %c0_7 = arith.constant 0 : index
    %c0_8 = arith.constant 0 : index
    %10 = vector.load %arg9[%c0_7, %c0_8] : memref<1x256xf32, #tpu.memory_space<vmem>>, vector<1x256xf32>
    %11 = arith.mulf %4, %4 : vector<64x256xf32>
    %cst_9 = arith.constant dense<0.000000e+00> : vector<256xf32>
    %12 = vector.multi_reduction <add>, %11, %cst_9 [0] : vector<64x256xf32> to vector<256xf32>
    %13 = vector.shape_cast %12 : vector<256xf32> to vector<1x256xf32>
    %14 = arith.addf %10, %13 : vector<1x256xf32>
    %c0_10 = arith.constant 0 : index
    %c0_11 = arith.constant 0 : index
    %15 = vector.load %arg9[%c0_10, %c0_11] : memref<1x256xf32, #tpu.memory_space<vmem>>, vector<1x256xf32>
    tpu.vector_store %arg9[%c0_10, %c0_11], %14 {strides = array<i32>} : memref<1x256xf32, #tpu.memory_space<vmem>>, vector<1x256xf32>,
    %c0_i32_12 = arith.constant 0 : i32
    %16 = arith.cmpi eq, %arg1, %c0_i32_12 : i32
    %17 = arith.extui %16 : i1 to i32
    %c0_i32_13 = arith.constant 0 : i32
    %18 = arith.cmpi ne, %17, %c0_i32_13 : i32
    scf.if %18 {
      %c0_14 = arith.constant 0 : index
      %c0_15 = arith.constant 0 : index
      %19 = vector.load %arg5[%c0_14, %c0_15] : memref<256x256xf32, #tpu.memory_space<vmem>>, vector<256x256xf32>
      %c0_16 = arith.constant 0 : index
      %c0_17 = arith.constant 0 : index
      %20 = vector.load %arg8[%c0_16, %c0_17] : memref<1x256xf32, #tpu.memory_space<vmem>>, vector<1x256xf32>
      %cst_18 = arith.constant dense<0.000000e+00> : vector<1x256xf32>
      %21 = tpu.matmul %20, %19, %cst_18 {dimension_numbers = #tpu.dot_dimension_numbers<[1], [0], [0], [1], [0, 0, 1, 1], [], []>} : vector<1x256xf32>, vector<256x256xf32>, vector<1x256xf32> -> vector<1x256xf32>
      %c0_19 = arith.constant 0 : index
      %c0_20 = arith.constant 0 : index
      %22 = vector.load %arg9[%c0_19, %c0_20] : memref<1x256xf32, #tpu.memory_space<vmem>>, vector<1x256xf32>
      %cst_21 = arith.constant dense<0.000000e+00> : vector<1x256xf32>
      %23 = tpu.matmul %22, %19, %cst_21 {dimension_numbers = #tpu.dot_dimension_numbers<[1], [0], [0], [1], [0, 0, 1, 1], [], []>} : vector<1x256xf32>, vector<256x256xf32>, vector<1x256xf32> -> vector<1x256xf32>
      %cst_22 = arith.constant dense<0.000000e+00> : vector<256xf32>
      %24 = vector.multi_reduction <add>, %19, %cst_22 [0] : vector<256x256xf32> to vector<256xf32>
      %25 = vector.shape_cast %24 : vector<256xf32> to vector<1x256xf32>
      %cst_23 = arith.constant 6.400000e+01 : f32
      %26 = vector.broadcast %cst_23 : f32 to vector<1x256xf32>
      %27 = arith.mulf %25, %26 : vector<1x256xf32>
      %28 = arith.divf %21, %27 : vector<1x256xf32>
      %29 = arith.divf %23, %27 : vector<1x256xf32>
      %30 = arith.mulf %28, %28 : vector<1x256xf32>
      %31 = arith.subf %29, %30 : vector<1x256xf32>
      %cst_24 = arith.constant 9.99999974E-6 : f32
      %32 = vector.broadcast %cst_24 : f32 to vector<1x256xf32>
      %33 = arith.addf %31, %32 : vector<1x256xf32>
      %34 = math.rsqrt %33 : vector<1x256xf32>
      %c0_25 = arith.constant 0 : index
      %c0_26 = arith.constant 0 : index
      %35 = vector.load %arg3[%c0_25, %c0_26] : memref<1x256xf32, #tpu.memory_space<vmem>>, vector<1x256xf32>
      %36 = arith.mulf %35, %34 : vector<1x256xf32>
      %c0_27 = arith.constant 0 : index
      %c0_28 = arith.constant 0 : index
      %37 = vector.load %arg4[%c0_27, %c0_28] : memref<1x256xf32, #tpu.memory_space<vmem>>, vector<1x256xf32>
      %38 = arith.mulf %28, %36 : vector<1x256xf32>
      %39 = arith.subf %37, %38 : vector<1x256xf32>
      %c0_29 = arith.constant 0 : index
      %c0_30 = arith.constant 0 : index
      %c0_31 = arith.constant 0 : index
      %40 = vector.load %arg6[%c0_29, %c0_30, %c0_31] : memref<1x1x256xf32, #tpu.memory_space<vmem>>, vector<1x1x256xf32>
      %41 = vector.shape_cast %40 : vector<1x1x256xf32> to vector<1x256xf32>
      %42 = vector.shape_cast %36 : vector<1x256xf32> to vector<1x1x256xf32>
      tpu.vector_store %arg6[%c0_29, %c0_30, %c0_31], %42 {strides = array<i32>} : memref<1x1x256xf32, #tpu.memory_space<vmem>>, vector<1x1x256xf32>,
      %c0_32 = arith.constant 0 : index
      %c0_33 = arith.constant 0 : index
      %c0_34 = arith.constant 0 : index
      %43 = vector.load %arg7[%c0_32, %c0_33, %c0_34] : memref<1x1x256xf32, #tpu.memory_space<vmem>>, vector<1x1x256xf32>
      %44 = vector.shape_cast %43 : vector<1x1x256xf32> to vector<1x256xf32>
      %45 = vector.shape_cast %39 : vector<1x256xf32> to vector<1x1x256xf32>
      tpu.vector_store %arg7[%c0_32, %c0_33, %c0_34], %45 {strides = array<i32>} : memref<1x1x256xf32, #tpu.memory_space<vmem>>, vector<1x1x256xf32>,
    } else {
    }
    return
  }
  func.func @transform_0(%arg0: i32, %arg1: i32) -> (i32, i32, i32) {
    %c0_i32 = arith.constant 0 : i32
    %c0_i32_0 = arith.constant 0 : i32
    return %arg0, %arg1, %c0_i32 : i32, i32, i32
  }
  func.func @transform_1(%arg0: i32, %arg1: i32) -> (i32, i32) {
    %c0_i32 = arith.constant 0 : i32
    %c0_i32_0 = arith.constant 0 : i32
    %c0_i32_1 = arith.constant 0 : i32
    return %c0_i32, %c0_i32_0 : i32, i32
  }
  func.func @transform_2(%arg0: i32, %arg1: i32) -> (i32, i32) {
    %c0_i32 = arith.constant 0 : i32
    %c0_i32_0 = arith.constant 0 : i32
    %c0_i32_1 = arith.constant 0 : i32
    return %c0_i32, %c0_i32_0 : i32, i32
  }
  func.func @transform_3(%arg0: i32, %arg1: i32) -> (i32, i32) {
    %c0_i32 = arith.constant 0 : i32
    %c0_i32_0 = arith.constant 0 : i32
    %c0_i32_1 = arith.constant 0 : i32
    return %c0_i32, %c0_i32_0 : i32, i32
  }
  func.func @transform_4(%arg0: i32, %arg1: i32) -> (i32, i32, i32) {
    %c0_i32 = arith.constant 0 : i32
    %c0_i32_0 = arith.constant 0 : i32
    %c0_i32_1 = arith.constant 0 : i32
    return %arg0, %c0_i32, %c0_i32_0 : i32, i32, i32
  }
  func.func @transform_5(%arg0: i32, %arg1: i32) -> (i32, i32, i32) {
    %c0_i32 = arith.constant 0 : i32
    %c0_i32_0 = arith.constant 0 : i32
    %c0_i32_1 = arith.constant 0 : i32
    return %arg0, %c0_i32, %c0_i32_0 : i32, i32, i32
  }
}

module attributes {stable_mosaic.version = 11 : i64} {
  func.func @kernel(%arg0: i32, %arg1: i32, %arg2: memref<1x64x256xf32, #tpu.memory_space<vmem>>, %arg3: memref<1x1x256xf32, #tpu.memory_space<vmem>>, %arg4: memref<1x1x256xf32, #tpu.memory_space<vmem>>, %arg5: memref<256x64xbf16, #tpu.memory_space<vmem>>, %arg6: memref<1x64x64xf32, #tpu.memory_space<vmem>>) attributes {dimension_semantics = [#tpu.dimension_semantics<parallel>, #tpu.dimension_semantics<parallel>], iteration_bounds = array<i64: 2, 1>, scalar_prefetch = 0 : i64, scratch_operands = 0 : i64, tpu.core_type = #tpu.core_type<tc>, window_params = [{transform_indices = @transform_0, window_bounds = array<i64: 1, 64, 256>}, {transform_indices = @transform_1, window_bounds = array<i64: 1, 1, 256>}, {transform_indices = @transform_2, window_bounds = array<i64: 1, 1, 256>}, {pipeline_mode = #tpu.pipeline_mode<synchronous>, transform_indices = @transform_3, window_bounds = array<i64: 256, 64>}, {transform_indices = @transform_4, window_bounds = array<i64: 1, 64, 64>}]} {
    %c0 = arith.constant 0 : index
    %c0_0 = arith.constant 0 : index
    %c0_1 = arith.constant 0 : index
    %0 = vector.load %arg2[%c0, %c0_0, %c0_1] : memref<1x64x256xf32, #tpu.memory_space<vmem>>, vector<1x64x256xf32>
    %1 = vector.shape_cast %0 : vector<1x64x256xf32> to vector<64x256xf32>
    %c0_2 = arith.constant 0 : index
    %c0_3 = arith.constant 0 : index
    %c0_4 = arith.constant 0 : index
    %2 = vector.load %arg3[%c0_2, %c0_3, %c0_4] : memref<1x1x256xf32, #tpu.memory_space<vmem>>, vector<1x1x256xf32>
    %3 = vector.shape_cast %2 : vector<1x1x256xf32> to vector<1x256xf32>
    %c0_5 = arith.constant 0 : index
    %c0_6 = arith.constant 0 : index
    %c0_7 = arith.constant 0 : index
    %4 = vector.load %arg4[%c0_5, %c0_6, %c0_7] : memref<1x1x256xf32, #tpu.memory_space<vmem>>, vector<1x1x256xf32>
    %5 = vector.shape_cast %4 : vector<1x1x256xf32> to vector<1x256xf32>
    %6 = vector.broadcast %3 : vector<1x256xf32> to vector<64x256xf32>
    %7 = arith.mulf %1, %6 : vector<64x256xf32>
    %8 = vector.broadcast %5 : vector<1x256xf32> to vector<64x256xf32>
    %9 = arith.addf %7, %8 : vector<64x256xf32>
    %cst = arith.constant 0.000000e+00 : f32
    %10 = vector.broadcast %cst : f32 to vector<64x256xf32>
    %11 = arith.maximumf %9, %10 : vector<64x256xf32>
    %12 = arith.truncf %11 : vector<64x256xf32> to vector<64x256xbf16>
    %c0_8 = arith.constant 0 : index
    %c0_9 = arith.constant 0 : index
    %13 = vector.load %arg5[%c0_8, %c0_9] : memref<256x64xbf16, #tpu.memory_space<vmem>>, vector<256x64xbf16>
    %cst_10 = arith.constant dense<0.000000e+00> : vector<64x64xf32>
    %14 = tpu.matmul %12, %13, %cst_10 {dimension_numbers = #tpu.dot_dimension_numbers<[1], [0], [0], [1], [0, 0, 1, 1], [], []>} : vector<64x256xbf16>, vector<256x64xbf16>, vector<64x64xf32> -> vector<64x64xf32>
    %c0_11 = arith.constant 0 : index
    %c0_12 = arith.constant 0 : index
    %c0_13 = arith.constant 0 : index
    %15 = vector.load %arg6[%c0_11, %c0_12, %c0_13] : memref<1x64x64xf32, #tpu.memory_space<vmem>>, vector<1x64x64xf32>
    %16 = vector.shape_cast %15 : vector<1x64x64xf32> to vector<64x64xf32>
    %17 = vector.shape_cast %14 : vector<64x64xf32> to vector<1x64x64xf32>
    tpu.vector_store %arg6[%c0_11, %c0_12, %c0_13], %17 {strides = array<i32>} : memref<1x64x64xf32, #tpu.memory_space<vmem>>, vector<1x64x64xf32>,
    return
  }
  func.func @transform_0(%arg0: i32, %arg1: i32) -> (i32, i32, i32) {
    %c0_i32 = arith.constant 0 : i32
    %c0_i32_0 = arith.constant 0 : i32
    return %arg0, %arg1, %c0_i32 : i32, i32, i32
  }
  func.func @transform_1(%arg0: i32, %arg1: i32) -> (i32, i32, i32) {
    %c0_i32 = arith.constant 0 : i32
    %c0_i32_0 = arith.constant 0 : i32
    %c0_i32_1 = arith.constant 0 : i32
    return %arg0, %c0_i32, %c0_i32_0 : i32, i32, i32
  }
  func.func @transform_2(%arg0: i32, %arg1: i32) -> (i32, i32, i32) {
    %c0_i32 = arith.constant 0 : i32
    %c0_i32_0 = arith.constant 0 : i32
    %c0_i32_1 = arith.constant 0 : i32
    return %arg0, %c0_i32, %c0_i32_0 : i32, i32, i32
  }
  func.func @transform_3(%arg0: i32, %arg1: i32) -> (i32, i32) {
    %c0_i32 = arith.constant 0 : i32
    %c0_i32_0 = arith.constant 0 : i32
    %c0_i32_1 = arith.constant 0 : i32
    return %c0_i32, %c0_i32_0 : i32, i32
  }
  func.func @transform_4(%arg0: i32, %arg1: i32) -> (i32, i32, i32) {
    %c0_i32 = arith.constant 0 : i32
    %c0_i32_0 = arith.constant 0 : i32
    return %arg0, %arg1, %c0_i32 : i32, i32, i32
  }
}

module attributes {stable_mosaic.version = 11 : i64} {
  func.func @kernel(%arg0: i32, %arg1: memref<1x8x8x64xf32, #tpu.memory_space<vmem>>, %arg2: memref<1x1x64xf32, #tpu.memory_space<vmem>>, %arg3: memref<1x1x64xf32, #tpu.memory_space<vmem>>, %arg4: memref<576x64xbf16, #tpu.memory_space<vmem>>, %arg5: memref<1x8x8x64xf32, #tpu.memory_space<vmem>>, %arg6: memref<10x10x64xf32, #tpu.memory_space<vmem>>, %arg7: memref<64x64xf32, #tpu.memory_space<vmem>>) attributes {dimension_semantics = [#tpu.dimension_semantics<parallel>], iteration_bounds = array<i64: 2>, scalar_prefetch = 0 : i64, scratch_operands = 2 : i64, tpu.core_type = #tpu.core_type<tc>, window_params = [{transform_indices = @transform_0, window_bounds = array<i64: 1, 8, 8, 64>}, {transform_indices = @transform_1, window_bounds = array<i64: 1, 1, 64>}, {transform_indices = @transform_2, window_bounds = array<i64: 1, 1, 64>}, {pipeline_mode = #tpu.pipeline_mode<synchronous>, transform_indices = @transform_3, window_bounds = array<i64: 576, 64>}, {transform_indices = @transform_4, window_bounds = array<i64: 1, 8, 8, 64>}]} {
    %c0 = arith.constant 0 : index
    %c0_0 = arith.constant 0 : index
    %c0_1 = arith.constant 0 : index
    %c0_2 = arith.constant 0 : index
    %0 = vector.load %arg1[%c0, %c0_0, %c0_1, %c0_2] : memref<1x8x8x64xf32, #tpu.memory_space<vmem>>, vector<1x8x8x64xf32>
    %1 = vector.shape_cast %0 : vector<1x8x8x64xf32> to vector<8x8x64xf32>
    %c0_3 = arith.constant 0 : index
    %c0_4 = arith.constant 0 : index
    %c0_5 = arith.constant 0 : index
    %2 = vector.load %arg2[%c0_3, %c0_4, %c0_5] : memref<1x1x64xf32, #tpu.memory_space<vmem>>, vector<1x1x64xf32>
    %3 = vector.shape_cast %2 : vector<1x1x64xf32> to vector<1x64xf32>
    %4 = vector.shape_cast %3 : vector<1x64xf32> to vector<1x1x64xf32>
    %c0_6 = arith.constant 0 : index
    %c0_7 = arith.constant 0 : index
    %c0_8 = arith.constant 0 : index
    %5 = vector.load %arg3[%c0_6, %c0_7, %c0_8] : memref<1x1x64xf32, #tpu.memory_space<vmem>>, vector<1x1x64xf32>
    %6 = vector.shape_cast %5 : vector<1x1x64xf32> to vector<1x64xf32>
    %7 = vector.shape_cast %6 : vector<1x64xf32> to vector<1x1x64xf32>
    %8 = vector.broadcast %4 : vector<1x1x64xf32> to vector<8x8x64xf32>
    %9 = arith.mulf %1, %8 : vector<8x8x64xf32>
    %10 = vector.broadcast %7 : vector<1x1x64xf32> to vector<8x8x64xf32>
    %11 = arith.addf %9, %10 : vector<8x8x64xf32>
    %cst = arith.constant 0.000000e+00 : f32
    %12 = vector.broadcast %cst : f32 to vector<8x8x64xf32>
    %13 = arith.maximumf %11, %12 : vector<8x8x64xf32>
    %cst_9 = arith.constant 0.000000e+00 : f32
    %14 = vector.broadcast %cst_9 : f32 to vector<10x10x64xf32>
    %c0_10 = arith.constant 0 : index
    %c0_11 = arith.constant 0 : index
    %c0_12 = arith.constant 0 : index
    %15 = vector.load %arg6[%c0_10, %c0_11, %c0_12] : memref<10x10x64xf32, #tpu.memory_space<vmem>>, vector<10x10x64xf32>
    tpu.vector_store %arg6[%c0_10, %c0_11, %c0_12], %14 {strides = array<i32>} : memref<10x10x64xf32, #tpu.memory_space<vmem>>, vector<10x10x64xf32>,
    %c1 = arith.constant 1 : index
    %c1_13 = arith.constant 1 : index
    %c0_14 = arith.constant 0 : index
    %16 = vector.load %arg6[%c1, %c1_13, %c0_14] : memref<10x10x64xf32, #tpu.memory_space<vmem>>, vector<8x8x64xf32>
    tpu.vector_store %arg6[%c1, %c1_13, %c0_14], %13 {strides = array<i32>} : memref<10x10x64xf32, #tpu.memory_space<vmem>>, vector<8x8x64xf32>,
    %cst_15 = arith.constant 0.000000e+00 : f32
    %17 = vector.broadcast %cst_15 : f32 to vector<64x64xf32>
    %c0_16 = arith.constant 0 : index
    %c0_17 = arith.constant 0 : index
    %18 = vector.load %arg7[%c0_16, %c0_17] : memref<64x64xf32, #tpu.memory_space<vmem>>, vector<64x64xf32>
    tpu.vector_store %arg7[%c0_16, %c0_17], %17 {strides = array<i32>} : memref<64x64xf32, #tpu.memory_space<vmem>>, vector<64x64xf32>,
    %c0_18 = arith.constant 0 : index
    %c0_19 = arith.constant 0 : index
    %c0_20 = arith.constant 0 : index
    %19 = vector.load %arg6[%c0_18, %c0_19, %c0_20] : memref<10x10x64xf32, #tpu.memory_space<vmem>>, vector<8x8x64xf32>
    %20 = vector.shape_cast %19 : vector<8x8x64xf32> to vector<64x64xf32>
    %21 = arith.truncf %20 : vector<64x64xf32> to vector<64x64xbf16>
    %c0_21 = arith.constant 0 : index
    %c0_22 = arith.constant 0 : index
    %22 = vector.load %arg7[%c0_21, %c0_22] : memref<64x64xf32, #tpu.memory_space<vmem>>, vector<64x64xf32>
    %c0_23 = arith.constant 0 : index
    %c0_24 = arith.constant 0 : index
    %23 = vector.load %arg4[%c0_23, %c0_24] : memref<576x64xbf16, #tpu.memory_space<vmem>>, vector<64x64xbf16>
    %cst_25 = arith.constant dense<0.000000e+00> : vector<64x64xf32>
    %24 = tpu.matmul %21, %23, %cst_25 {dimension_numbers = #tpu.dot_dimension_numbers<[1], [0], [0], [1], [0, 0, 1, 1], [], []>} : vector<64x64xbf16>, vector<64x64xbf16>, vector<64x64xf32> -> vector<64x64xf32>
    %25 = arith.addf %22, %24 : vector<64x64xf32>
    %c0_26 = arith.constant 0 : index
    %c0_27 = arith.constant 0 : index
    %26 = vector.load %arg7[%c0_26, %c0_27] : memref<64x64xf32, #tpu.memory_space<vmem>>, vector<64x64xf32>
    tpu.vector_store %arg7[%c0_26, %c0_27], %25 {strides = array<i32>} : memref<64x64xf32, #tpu.memory_space<vmem>>, vector<64x64xf32>,
    %c0_28 = arith.constant 0 : index
    %c1_29 = arith.constant 1 : index
    %c0_30 = arith.constant 0 : index
    %27 = vector.load %arg6[%c0_28, %c1_29, %c0_30] : memref<10x10x64xf32, #tpu.memory_space<vmem>>, vector<8x8x64xf32>
    %28 = vector.shape_cast %27 : vector<8x8x64xf32> to vector<64x64xf32>
    %29 = arith.truncf %28 : vector<64x64xf32> to vector<64x64xbf16>
    %c0_31 = arith.constant 0 : index
    %c0_32 = arith.constant 0 : index
    %30 = vector.load %arg7[%c0_31, %c0_32] : memref<64x64xf32, #tpu.memory_space<vmem>>, vector<64x64xf32>
    %c64 = arith.constant 64 : index
    %c0_33 = arith.constant 0 : index
    %31 = vector.load %arg4[%c64, %c0_33] : memref<576x64xbf16, #tpu.memory_space<vmem>>, vector<64x64xbf16>
    %cst_34 = arith.constant dense<0.000000e+00> : vector<64x64xf32>
    %32 = tpu.matmul %29, %31, %cst_34 {dimension_numbers = #tpu.dot_dimension_numbers<[1], [0], [0], [1], [0, 0, 1, 1], [], []>} : vector<64x64xbf16>, vector<64x64xbf16>, vector<64x64xf32> -> vector<64x64xf32>
    %33 = arith.addf %30, %32 : vector<64x64xf32>
    %c0_35 = arith.constant 0 : index
    %c0_36 = arith.constant 0 : index
    %34 = vector.load %arg7[%c0_35, %c0_36] : memref<64x64xf32, #tpu.memory_space<vmem>>, vector<64x64xf32>
    tpu.vector_store %arg7[%c0_35, %c0_36], %33 {strides = array<i32>} : memref<64x64xf32, #tpu.memory_space<vmem>>, vector<64x64xf32>,
    %c0_37 = arith.constant 0 : index
    %c2 = arith.constant 2 : index
    %c0_38 = arith.constant 0 : index
    %35 = vector.load %arg6[%c0_37, %c2, %c0_38] : memref<10x10x64xf32, #tpu.memory_space<vmem>>, vector<8x8x64xf32>
    %36 = vector.shape_cast %35 : vector<8x8x64xf32> to vector<64x64xf32>
    %37 = arith.truncf %36 : vector<64x64xf32> to vector<64x64xbf16>
    %c0_39 = arith.constant 0 : index
    %c0_40 = arith.constant 0 : index
    %38 = vector.load %arg7[%c0_39, %c0_40] : memref<64x64xf32, #tpu.memory_space<vmem>>, vector<64x64xf32>
    %c128 = arith.constant 128 : index
    %c0_41 = arith.constant 0 : index
    %39 = vector.load %arg4[%c128, %c0_41] : memref<576x64xbf16, #tpu.memory_space<vmem>>, vector<64x64xbf16>
    %cst_42 = arith.constant dense<0.000000e+00> : vector<64x64xf32>
    %40 = tpu.matmul %37, %39, %cst_42 {dimension_numbers = #tpu.dot_dimension_numbers<[1], [0], [0], [1], [0, 0, 1, 1], [], []>} : vector<64x64xbf16>, vector<64x64xbf16>, vector<64x64xf32> -> vector<64x64xf32>
    %41 = arith.addf %38, %40 : vector<64x64xf32>
    %c0_43 = arith.constant 0 : index
    %c0_44 = arith.constant 0 : index
    %42 = vector.load %arg7[%c0_43, %c0_44] : memref<64x64xf32, #tpu.memory_space<vmem>>, vector<64x64xf32>
    tpu.vector_store %arg7[%c0_43, %c0_44], %41 {strides = array<i32>} : memref<64x64xf32, #tpu.memory_space<vmem>>, vector<64x64xf32>,
    %c1_45 = arith.constant 1 : index
    %c0_46 = arith.constant 0 : index
    %c0_47 = arith.constant 0 : index
    %43 = vector.load %arg6[%c1_45, %c0_46, %c0_47] : memref<10x10x64xf32, #tpu.memory_space<vmem>>, vector<8x8x64xf32>
    %44 = vector.shape_cast %43 : vector<8x8x64xf32> to vector<64x64xf32>
    %45 = arith.truncf %44 : vector<64x64xf32> to vector<64x64xbf16>
    %c0_48 = arith.constant 0 : index
    %c0_49 = arith.constant 0 : index
    %46 = vector.load %arg7[%c0_48, %c0_49] : memref<64x64xf32, #tpu.memory_space<vmem>>, vector<64x64xf32>
    %c192 = arith.constant 192 : index
    %c0_50 = arith.constant 0 : index
    %47 = vector.load %arg4[%c192, %c0_50] : memref<576x64xbf16, #tpu.memory_space<vmem>>, vector<64x64xbf16>
    %cst_51 = arith.constant dense<0.000000e+00> : vector<64x64xf32>
    %48 = tpu.matmul %45, %47, %cst_51 {dimension_numbers = #tpu.dot_dimension_numbers<[1], [0], [0], [1], [0, 0, 1, 1], [], []>} : vector<64x64xbf16>, vector<64x64xbf16>, vector<64x64xf32> -> vector<64x64xf32>
    %49 = arith.addf %46, %48 : vector<64x64xf32>
    %c0_52 = arith.constant 0 : index
    %c0_53 = arith.constant 0 : index
    %50 = vector.load %arg7[%c0_52, %c0_53] : memref<64x64xf32, #tpu.memory_space<vmem>>, vector<64x64xf32>
    tpu.vector_store %arg7[%c0_52, %c0_53], %49 {strides = array<i32>} : memref<64x64xf32, #tpu.memory_space<vmem>>, vector<64x64xf32>,
    %c1_54 = arith.constant 1 : index
    %c1_55 = arith.constant 1 : index
    %c0_56 = arith.constant 0 : index
    %51 = vector.load %arg6[%c1_54, %c1_55, %c0_56] : memref<10x10x64xf32, #tpu.memory_space<vmem>>, vector<8x8x64xf32>
    %52 = vector.shape_cast %51 : vector<8x8x64xf32> to vector<64x64xf32>
    %53 = arith.truncf %52 : vector<64x64xf32> to vector<64x64xbf16>
    %c0_57 = arith.constant 0 : index
    %c0_58 = arith.constant 0 : index
    %54 = vector.load %arg7[%c0_57, %c0_58] : memref<64x64xf32, #tpu.memory_space<vmem>>, vector<64x64xf32>
    %c256 = arith.constant 256 : index
    %c0_59 = arith.constant 0 : index
    %55 = vector.load %arg4[%c256, %c0_59] : memref<576x64xbf16, #tpu.memory_space<vmem>>, vector<64x64xbf16>
    %cst_60 = arith.constant dense<0.000000e+00> : vector<64x64xf32>
    %56 = tpu.matmul %53, %55, %cst_60 {dimension_numbers = #tpu.dot_dimension_numbers<[1], [0], [0], [1], [0, 0, 1, 1], [], []>} : vector<64x64xbf16>, vector<64x64xbf16>, vector<64x64xf32> -> vector<64x64xf32>
    %57 = arith.addf %54, %56 : vector<64x64xf32>
    %c0_61 = arith.constant 0 : index
    %c0_62 = arith.constant 0 : index
    %58 = vector.load %arg7[%c0_61, %c0_62] : memref<64x64xf32, #tpu.memory_space<vmem>>, vector<64x64xf32>
    tpu.vector_store %arg7[%c0_61, %c0_62], %57 {strides = array<i32>} : memref<64x64xf32, #tpu.memory_space<vmem>>, vector<64x64xf32>,
    %c1_63 = arith.constant 1 : index
    %c2_64 = arith.constant 2 : index
    %c0_65 = arith.constant 0 : index
    %59 = vector.load %arg6[%c1_63, %c2_64, %c0_65] : memref<10x10x64xf32, #tpu.memory_space<vmem>>, vector<8x8x64xf32>
    %60 = vector.shape_cast %59 : vector<8x8x64xf32> to vector<64x64xf32>
    %61 = arith.truncf %60 : vector<64x64xf32> to vector<64x64xbf16>
    %c0_66 = arith.constant 0 : index
    %c0_67 = arith.constant 0 : index
    %62 = vector.load %arg7[%c0_66, %c0_67] : memref<64x64xf32, #tpu.memory_space<vmem>>, vector<64x64xf32>
    %c320 = arith.constant 320 : index
    %c0_68 = arith.constant 0 : index
    %63 = vector.load %arg4[%c320, %c0_68] : memref<576x64xbf16, #tpu.memory_space<vmem>>, vector<64x64xbf16>
    %cst_69 = arith.constant dense<0.000000e+00> : vector<64x64xf32>
    %64 = tpu.matmul %61, %63, %cst_69 {dimension_numbers = #tpu.dot_dimension_numbers<[1], [0], [0], [1], [0, 0, 1, 1], [], []>} : vector<64x64xbf16>, vector<64x64xbf16>, vector<64x64xf32> -> vector<64x64xf32>
    %65 = arith.addf %62, %64 : vector<64x64xf32>
    %c0_70 = arith.constant 0 : index
    %c0_71 = arith.constant 0 : index
    %66 = vector.load %arg7[%c0_70, %c0_71] : memref<64x64xf32, #tpu.memory_space<vmem>>, vector<64x64xf32>
    tpu.vector_store %arg7[%c0_70, %c0_71], %65 {strides = array<i32>} : memref<64x64xf32, #tpu.memory_space<vmem>>, vector<64x64xf32>,
    %c2_72 = arith.constant 2 : index
    %c0_73 = arith.constant 0 : index
    %c0_74 = arith.constant 0 : index
    %67 = vector.load %arg6[%c2_72, %c0_73, %c0_74] : memref<10x10x64xf32, #tpu.memory_space<vmem>>, vector<8x8x64xf32>
    %68 = vector.shape_cast %67 : vector<8x8x64xf32> to vector<64x64xf32>
    %69 = arith.truncf %68 : vector<64x64xf32> to vector<64x64xbf16>
    %c0_75 = arith.constant 0 : index
    %c0_76 = arith.constant 0 : index
    %70 = vector.load %arg7[%c0_75, %c0_76] : memref<64x64xf32, #tpu.memory_space<vmem>>, vector<64x64xf32>
    %c384 = arith.constant 384 : index
    %c0_77 = arith.constant 0 : index
    %71 = vector.load %arg4[%c384, %c0_77] : memref<576x64xbf16, #tpu.memory_space<vmem>>, vector<64x64xbf16>
    %cst_78 = arith.constant dense<0.000000e+00> : vector<64x64xf32>
    %72 = tpu.matmul %69, %71, %cst_78 {dimension_numbers = #tpu.dot_dimension_numbers<[1], [0], [0], [1], [0, 0, 1, 1], [], []>} : vector<64x64xbf16>, vector<64x64xbf16>, vector<64x64xf32> -> vector<64x64xf32>
    %73 = arith.addf %70, %72 : vector<64x64xf32>
    %c0_79 = arith.constant 0 : index
    %c0_80 = arith.constant 0 : index
    %74 = vector.load %arg7[%c0_79, %c0_80] : memref<64x64xf32, #tpu.memory_space<vmem>>, vector<64x64xf32>
    tpu.vector_store %arg7[%c0_79, %c0_80], %73 {strides = array<i32>} : memref<64x64xf32, #tpu.memory_space<vmem>>, vector<64x64xf32>,
    %c2_81 = arith.constant 2 : index
    %c1_82 = arith.constant 1 : index
    %c0_83 = arith.constant 0 : index
    %75 = vector.load %arg6[%c2_81, %c1_82, %c0_83] : memref<10x10x64xf32, #tpu.memory_space<vmem>>, vector<8x8x64xf32>
    %76 = vector.shape_cast %75 : vector<8x8x64xf32> to vector<64x64xf32>
    %77 = arith.truncf %76 : vector<64x64xf32> to vector<64x64xbf16>
    %c0_84 = arith.constant 0 : index
    %c0_85 = arith.constant 0 : index
    %78 = vector.load %arg7[%c0_84, %c0_85] : memref<64x64xf32, #tpu.memory_space<vmem>>, vector<64x64xf32>
    %c448 = arith.constant 448 : index
    %c0_86 = arith.constant 0 : index
    %79 = vector.load %arg4[%c448, %c0_86] : memref<576x64xbf16, #tpu.memory_space<vmem>>, vector<64x64xbf16>
    %cst_87 = arith.constant dense<0.000000e+00> : vector<64x64xf32>
    %80 = tpu.matmul %77, %79, %cst_87 {dimension_numbers = #tpu.dot_dimension_numbers<[1], [0], [0], [1], [0, 0, 1, 1], [], []>} : vector<64x64xbf16>, vector<64x64xbf16>, vector<64x64xf32> -> vector<64x64xf32>
    %81 = arith.addf %78, %80 : vector<64x64xf32>
    %c0_88 = arith.constant 0 : index
    %c0_89 = arith.constant 0 : index
    %82 = vector.load %arg7[%c0_88, %c0_89] : memref<64x64xf32, #tpu.memory_space<vmem>>, vector<64x64xf32>
    tpu.vector_store %arg7[%c0_88, %c0_89], %81 {strides = array<i32>} : memref<64x64xf32, #tpu.memory_space<vmem>>, vector<64x64xf32>,
    %c2_90 = arith.constant 2 : index
    %c2_91 = arith.constant 2 : index
    %c0_92 = arith.constant 0 : index
    %83 = vector.load %arg6[%c2_90, %c2_91, %c0_92] : memref<10x10x64xf32, #tpu.memory_space<vmem>>, vector<8x8x64xf32>
    %84 = vector.shape_cast %83 : vector<8x8x64xf32> to vector<64x64xf32>
    %85 = arith.truncf %84 : vector<64x64xf32> to vector<64x64xbf16>
    %c0_93 = arith.constant 0 : index
    %c0_94 = arith.constant 0 : index
    %86 = vector.load %arg7[%c0_93, %c0_94] : memref<64x64xf32, #tpu.memory_space<vmem>>, vector<64x64xf32>
    %c512 = arith.constant 512 : index
    %c0_95 = arith.constant 0 : index
    %87 = vector.load %arg4[%c512, %c0_95] : memref<576x64xbf16, #tpu.memory_space<vmem>>, vector<64x64xbf16>
    %cst_96 = arith.constant dense<0.000000e+00> : vector<64x64xf32>
    %88 = tpu.matmul %85, %87, %cst_96 {dimension_numbers = #tpu.dot_dimension_numbers<[1], [0], [0], [1], [0, 0, 1, 1], [], []>} : vector<64x64xbf16>, vector<64x64xbf16>, vector<64x64xf32> -> vector<64x64xf32>
    %89 = arith.addf %86, %88 : vector<64x64xf32>
    %c0_97 = arith.constant 0 : index
    %c0_98 = arith.constant 0 : index
    %90 = vector.load %arg7[%c0_97, %c0_98] : memref<64x64xf32, #tpu.memory_space<vmem>>, vector<64x64xf32>
    tpu.vector_store %arg7[%c0_97, %c0_98], %89 {strides = array<i32>} : memref<64x64xf32, #tpu.memory_space<vmem>>, vector<64x64xf32>,
    %c0_99 = arith.constant 0 : index
    %c0_100 = arith.constant 0 : index
    %91 = vector.load %arg7[%c0_99, %c0_100] : memref<64x64xf32, #tpu.memory_space<vmem>>, vector<64x64xf32>
    %92 = vector.shape_cast %91 : vector<64x64xf32> to vector<8x8x64xf32>
    %c0_101 = arith.constant 0 : index
    %c0_102 = arith.constant 0 : index
    %c0_103 = arith.constant 0 : index
    %c0_104 = arith.constant 0 : index
    %93 = vector.load %arg5[%c0_101, %c0_102, %c0_103, %c0_104] : memref<1x8x8x64xf32, #tpu.memory_space<vmem>>, vector<1x8x8x64xf32>
    %94 = vector.shape_cast %93 : vector<1x8x8x64xf32> to vector<8x8x64xf32>
    %95 = vector.shape_cast %92 : vector<8x8x64xf32> to vector<1x8x8x64xf32>
    tpu.vector_store %arg5[%c0_101, %c0_102, %c0_103, %c0_104], %95 {strides = array<i32>} : memref<1x8x8x64xf32, #tpu.memory_space<vmem>>, vector<1x8x8x64xf32>,
    return
  }
  func.func @transform_0(%arg0: i32) -> (i32, i32, i32, i32) {
    %c0_i32 = arith.constant 0 : i32
    %c0_i32_0 = arith.constant 0 : i32
    %c0_i32_1 = arith.constant 0 : i32
    %c0_i32_2 = arith.constant 0 : i32
    return %arg0, %c0_i32, %c0_i32_0, %c0_i32_1 : i32, i32, i32, i32
  }
  func.func @transform_1(%arg0: i32) -> (i32, i32, i32) {
    %c0_i32 = arith.constant 0 : i32
    %c0_i32_0 = arith.constant 0 : i32
    %c0_i32_1 = arith.constant 0 : i32
    return %arg0, %c0_i32, %c0_i32_0 : i32, i32, i32
  }
  func.func @transform_2(%arg0: i32) -> (i32, i32, i32) {
    %c0_i32 = arith.constant 0 : i32
    %c0_i32_0 = arith.constant 0 : i32
    %c0_i32_1 = arith.constant 0 : i32
    return %arg0, %c0_i32, %c0_i32_0 : i32, i32, i32
  }
  func.func @transform_3(%arg0: i32) -> (i32, i32) {
    %c0_i32 = arith.constant 0 : i32
    %c0_i32_0 = arith.constant 0 : i32
    %c0_i32_1 = arith.constant 0 : i32
    return %c0_i32, %c0_i32_0 : i32, i32
  }
  func.func @transform_4(%arg0: i32) -> (i32, i32, i32, i32) {
    %c0_i32 = arith.constant 0 : i32
    %c0_i32_0 = arith.constant 0 : i32
    %c0_i32_1 = arith.constant 0 : i32
    %c0_i32_2 = arith.constant 0 : i32
    return %arg0, %c0_i32, %c0_i32_0, %c0_i32_1 : i32, i32, i32, i32
  }
}

module attributes {stable_mosaic.version = 11 : i64} {
  func.func @kernel(%arg0: i32, %arg1: i32, %arg2: memref<1x64x64xf32, #tpu.memory_space<vmem>>, %arg3: memref<1x1x64xf32, #tpu.memory_space<vmem>>, %arg4: memref<1x1x64xf32, #tpu.memory_space<vmem>>, %arg5: memref<64x256xbf16, #tpu.memory_space<vmem>>, %arg6: memref<1x64x256xf32, #tpu.memory_space<vmem>>, %arg7: memref<1x64x256xf32, #tpu.memory_space<vmem>>) attributes {dimension_semantics = [#tpu.dimension_semantics<parallel>, #tpu.dimension_semantics<parallel>], iteration_bounds = array<i64: 2, 1>, scalar_prefetch = 0 : i64, scratch_operands = 0 : i64, tpu.core_type = #tpu.core_type<tc>, window_params = [{transform_indices = @transform_0, window_bounds = array<i64: 1, 64, 64>}, {transform_indices = @transform_1, window_bounds = array<i64: 1, 1, 64>}, {transform_indices = @transform_2, window_bounds = array<i64: 1, 1, 64>}, {pipeline_mode = #tpu.pipeline_mode<synchronous>, transform_indices = @transform_3, window_bounds = array<i64: 64, 256>}, {transform_indices = @transform_4, window_bounds = array<i64: 1, 64, 256>}, {transform_indices = @transform_5, window_bounds = array<i64: 1, 64, 256>}]} {
    %c0 = arith.constant 0 : index
    %c0_0 = arith.constant 0 : index
    %c0_1 = arith.constant 0 : index
    %0 = vector.load %arg2[%c0, %c0_0, %c0_1] : memref<1x64x64xf32, #tpu.memory_space<vmem>>, vector<1x64x64xf32>
    %1 = vector.shape_cast %0 : vector<1x64x64xf32> to vector<64x64xf32>
    %c0_2 = arith.constant 0 : index
    %c0_3 = arith.constant 0 : index
    %c0_4 = arith.constant 0 : index
    %2 = vector.load %arg3[%c0_2, %c0_3, %c0_4] : memref<1x1x64xf32, #tpu.memory_space<vmem>>, vector<1x1x64xf32>
    %3 = vector.shape_cast %2 : vector<1x1x64xf32> to vector<1x64xf32>
    %c0_5 = arith.constant 0 : index
    %c0_6 = arith.constant 0 : index
    %c0_7 = arith.constant 0 : index
    %4 = vector.load %arg4[%c0_5, %c0_6, %c0_7] : memref<1x1x64xf32, #tpu.memory_space<vmem>>, vector<1x1x64xf32>
    %5 = vector.shape_cast %4 : vector<1x1x64xf32> to vector<1x64xf32>
    %6 = vector.broadcast %3 : vector<1x64xf32> to vector<64x64xf32>
    %7 = arith.mulf %1, %6 : vector<64x64xf32>
    %8 = vector.broadcast %5 : vector<1x64xf32> to vector<64x64xf32>
    %9 = arith.addf %7, %8 : vector<64x64xf32>
    %cst = arith.constant 0.000000e+00 : f32
    %10 = vector.broadcast %cst : f32 to vector<64x64xf32>
    %11 = arith.maximumf %9, %10 : vector<64x64xf32>
    %12 = arith.truncf %11 : vector<64x64xf32> to vector<64x64xbf16>
    %c0_8 = arith.constant 0 : index
    %c0_9 = arith.constant 0 : index
    %13 = vector.load %arg5[%c0_8, %c0_9] : memref<64x256xbf16, #tpu.memory_space<vmem>>, vector<64x256xbf16>
    %cst_10 = arith.constant dense<0.000000e+00> : vector<64x256xf32>
    %14 = tpu.matmul %12, %13, %cst_10 {dimension_numbers = #tpu.dot_dimension_numbers<[1], [0], [0], [1], [0, 0, 1, 1], [], []>} : vector<64x64xbf16>, vector<64x256xbf16>, vector<64x256xf32> -> vector<64x256xf32>
    %c0_11 = arith.constant 0 : index
    %c0_12 = arith.constant 0 : index
    %c0_13 = arith.constant 0 : index
    %15 = vector.load %arg6[%c0_11, %c0_12, %c0_13] : memref<1x64x256xf32, #tpu.memory_space<vmem>>, vector<1x64x256xf32>
    %16 = vector.shape_cast %15 : vector<1x64x256xf32> to vector<64x256xf32>
    %17 = arith.addf %14, %16 : vector<64x256xf32>
    %c0_14 = arith.constant 0 : index
    %c0_15 = arith.constant 0 : index
    %c0_16 = arith.constant 0 : index
    %18 = vector.load %arg7[%c0_14, %c0_15, %c0_16] : memref<1x64x256xf32, #tpu.memory_space<vmem>>, vector<1x64x256xf32>
    %19 = vector.shape_cast %18 : vector<1x64x256xf32> to vector<64x256xf32>
    %20 = vector.shape_cast %17 : vector<64x256xf32> to vector<1x64x256xf32>
    tpu.vector_store %arg7[%c0_14, %c0_15, %c0_16], %20 {strides = array<i32>} : memref<1x64x256xf32, #tpu.memory_space<vmem>>, vector<1x64x256xf32>,
    return
  }
  func.func @transform_0(%arg0: i32, %arg1: i32) -> (i32, i32, i32) {
    %c0_i32 = arith.constant 0 : i32
    %c0_i32_0 = arith.constant 0 : i32
    return %arg0, %arg1, %c0_i32 : i32, i32, i32
  }
  func.func @transform_1(%arg0: i32, %arg1: i32) -> (i32, i32, i32) {
    %c0_i32 = arith.constant 0 : i32
    %c0_i32_0 = arith.constant 0 : i32
    %c0_i32_1 = arith.constant 0 : i32
    return %arg0, %c0_i32, %c0_i32_0 : i32, i32, i32
  }
  func.func @transform_2(%arg0: i32, %arg1: i32) -> (i32, i32, i32) {
    %c0_i32 = arith.constant 0 : i32
    %c0_i32_0 = arith.constant 0 : i32
    %c0_i32_1 = arith.constant 0 : i32
    return %arg0, %c0_i32, %c0_i32_0 : i32, i32, i32
  }
  func.func @transform_3(%arg0: i32, %arg1: i32) -> (i32, i32) {
    %c0_i32 = arith.constant 0 : i32
    %c0_i32_0 = arith.constant 0 : i32
    %c0_i32_1 = arith.constant 0 : i32
    return %c0_i32, %c0_i32_0 : i32, i32
  }
  func.func @transform_4(%arg0: i32, %arg1: i32) -> (i32, i32, i32) {
    %c0_i32 = arith.constant 0 : i32
    %c0_i32_0 = arith.constant 0 : i32
    return %arg0, %arg1, %c0_i32 : i32, i32, i32
  }
  func.func @transform_5(%arg0: i32, %arg1: i32) -> (i32, i32, i32) {
    %c0_i32 = arith.constant 0 : i32
    %c0_i32_0 = arith.constant 0 : i32
    return %arg0, %arg1, %c0_i32 : i32, i32, i32
  }
}

</mosaic_0001>

<bundles_post_ra>
// kernel: _lambda_.15
= control target key start
LH: loop header
LB: loop body
LE: loop exit
PB: predicated region body
PF: predicated region fallthrough
CT: control target
= control target key end

     0   :  { %9 = vsyncpa [#allocation3], 0  ;;  %s1270_s0 = inlined_call_operand.hbm [shape: f32[2,256,64], index: 0, kind: input, shape index: {}]   ;;  %s1271_s1 = inlined_call_operand.vmem [shape: f32[2,1,64], index: 1, kind: input, shape index: {}]   ;;  %s1272_s2 = inlined_call_operand.vmem [shape: f32[2,1,64], index: 2, kind: input, shape index: {}]   ;;  %s1273_s3 = inlined_call_operand.vmem [shape: bf16[64,64], index: 3, kind: input, shape index: {}]   ;;  %s1274_s4 = inlined_call_operand.vmem [shape: f32[2,256,64], index: 4, kind: output, shape index: {}]  }
   0x1   :  { %11 = vsyncpa [#allocation3 + $0x1], 0  ;;  %s975_s15 = smov 0   ;;  %s977_s16 = smov 0  }
   0x2   :  { %s979_s17 = smov 0   ;;  %s981_s18 = smov 0  }
   0x3   :  { %s983_s19 = smov 0   ;;  %s985_s20 = smov 0  }
   0x4 LB: > { %s744_s21 = sadd.s32 4294967295, %s946_s20   ;;  %s29_s22 = sadd.s32 1, %s942_s19  ;;  %s946_s20 = sphi %s985_s20, %s17_s20   ;;  %s942_s19 = sphi %s983_s19, %s1281_s19   ;;  %s938_s18 = sphi %s981_s18, %s1280_s18   ;;  %s934_s17 = sphi %s979_s17, %s1279_s17   ;;  %s930_s16 = sphi %s977_s16, %s1278_s16   ;;  %s926_s15 = sphi %s975_s15, %s1277_s15  }
   0x5   : > { %p31_p0 = scmp.ge.s32.totalorder %s29_s22, 2  ;;  %s38_s23 = sadd.s32 1, %s934_s17 }
   0x6   : > { %p45_p1 = scmp.ne.s32.totalorder %s934_s17, %s930_s16  ;;  %p46_p2 = scmp.eq.s32.totalorder %s946_s20, 0 }
   0x7   : > { %s1283_s22 = smov (%p31_p0, %s29_s22), 0  ;;  %p51_p4 = scmp.ne.s32.totalorder %s930_s16, %s926_s15 }
   0x8   : > { %p1011_p3 = por %p46_p2, %p45_p1  ;;  %s33_s25 = ssub.s32 %s942_s19, %s1283_s22 }
   0x9   : > { %p52_p5 = scmp.eq.s32.totalorder %s744_s21, 0  ;;  %p36_p6 = scmp.eq.s32.totalorder %s33_s25, 0 }
   0xa   : > { %p813_p8 = scmp.lt.s32.totalorder %s946_s20, 2  ;;  %s179_s28 = sand.u32 1, %s934_s17  }
   0xb   : > { %p1018_p7 = por %p52_p5, %p51_p4  ;;  %s789_s29 = sshll.u32 %s942_s19, 8 }
   0xc   : > { %s1024_s27 = scalar_select %p36_p6, %s934_s17, %s38_s23  }
   0xd   : > { %s748_s30 = sshll.u32 %s179_s28, 8  ;;  %s190_s7 = scalar_lea.hbm %s1270_s0, %s789_s29 }
   0xe   : > { %s191_s8 = sshll.u32 %s190_s7, 4  ;;  %s183_s9 = scalar_lea.vmem [#allocation2], %s748_s30  ;;  %s192_s8 = int_to_ptr.hbm [resolvable:$true] %s191_s8 }
   0xf   : > { %s193_s10 = sshll.u32 %s183_s9, 4  ;;  %p810_p9 = pnand %p813_p8, %p1011_p3  ;;  %s194_s10 = int_to_ptr.vmem [resolvable:$true] %s193_s10 }
  0x10   : > { %p751_p10 = scmp.ge.s32.totalorder %s946_s20, 1  ;;  %p213_p11 = scmp.lt.s32.totalorder %s946_s20, 3 }
  0x11   : > { %s180_s11 = scalar_lea.sflag [#allocation3], %s179_s28  ;;  %s948_s12 = smov 128  }
  0x12   : > { %s949_s13 = smov 8   ;;  %p214_p12 = pnand %p751_p10, %p213_p11 }
  0x13   : > { %812 = dma.hbm_to_vmem [thread:$0]  (!%p810_p9), %s192_s8, 4096, %s194_s10, %s180_s11, %s948_s12, %s948_s12, %s949_s13  }
  0x14   : > { %217 = sbr.rel (%p214_p12) target bundleno = 233 (0xe9), region = 36  ;;  %s219_s14 = sand.u32 (!%p214_p12), 1, %s930_s16  }
  0x15   : > { %s752_s15 = sshll.u32 (!%p214_p12), %s219_s14, 8  ;;  %s220_s21 = scalar_lea.sflag (!%p214_p12), [#allocation3], %s219_s14 }
  0x16   : > { %s1036_s23 = scalar_lea.vmem (!%p214_p12), [#allocation2], %s752_s15 }
  0x19   : > { %921 = dma.done.wait (%p1018_p7), %s220_s21, 4096  }
  0x1a   : > { %923 = vsyncadd (%p1018_p7), %s220_s21, 4294963200  ;;  %p260_p13 = scmp.lt.s32.totalorder %s938_s18, 1  ;;  %v794_v0 = vld [vmem:[%s1273_s3 + $0x18] sm:$0xff]  ;;  %v793_v1 = vld [vmem:[%s1273_s3 + $0x10] sm:$0xff]  ;;  %vm461_vm0 = vcmask 523264  }
  0x1b   : > { %v277_v2 = vld [vmem:[%s1036_s23] sm:$0xff]  ;;  %v278_v3 = vld [vmem:[%s1036_s23 + $0x8] sm:$0xff]  ;;  %514 = vmatpush.bf16.msra.mxu0 %v794_v0  ;;  %795 = vmatpush.bf16.msra.mxu1 %v794_v0  ;;  %v279_v40 = vld [vmem:[%s1036_s23 + $0x10] sm:$0xff] }
  0x1c   : > { %s1285_s18 = smov (!%p260_p13, %s938_s18), 1  ;;  %796 = vmatpush.bf16.msra.mxu2 %v794_v0  ;;  %797 = vmatpush.bf16.msra.mxu3 %v794_v0  ;;  %v285_v6 = vld [vmem:[%s1036_s23 + $0x40] sm:$0xff]  ;;  %v286_v7 = vld [vmem:[%s1036_s23 + $0x48] sm:$0xff]  ;;  %v280_v41 = vld [vmem:[%s1036_s23 + $0x18] sm:$0xff] }
  0x1d   : > { %s262_s28 = scalar_lea.vmem %s1271_s1, %s1285_s18  ;;  %s265_s6 = scalar_lea.vmem %s1272_s2, %s1285_s18  ;;  %v293_v12 = vld [vmem:[%s1036_s23 + $0x80] sm:$0xff]  ;;  %v294_v13 = vld [vmem:[%s1036_s23 + $0x88] sm:$0xff]  ;;  %v287_v44 = vld [vmem:[%s1036_s23 + $0x50] sm:$0xff] }
  0x1e   : > { %v1062_v4 = vld [vmem:[%s262_s28] ss:$0 sm:$0xff]  ;;  %v302_v17 = vld [vmem:[%s1036_s23 + $0xc8] sm:$0xff]  ;;  %v288_v45 = vld [vmem:[%s1036_s23 + $0x58] sm:$0xff]  ;;  %s790_s13 = sshll.u32 %s1285_s18, 8 }
  0x1f   : > { %v1064_v5 = vld [vmem:[%s265_s6] ss:$0 sm:$0xff]  ;;  %v314_v8 = vmul.f32 %v1062_v4, %v277_v2  ;;  %v315_v9 = vmul.f32 %v1062_v4, %v278_v3  ;;  %v322_v10 = vmul.f32 %v1062_v4, %v285_v6  ;;  %v323_v11 = vmul.f32 %v1062_v4, %v286_v7  ;;  %515 = vmatpush.bf16.msra.mxu0 %v793_v1  ;;  %v792_v19 = vld [vmem:[%s1273_s3 + $0x8] sm:$0xff]  ;;  %v295_v46 = vld [vmem:[%s1036_s23 + $0x90] sm:$0xff]  ;;  %s1186_s21 = scalar_lea.vmem %s1274_s4, %s790_s13 }
  0x20   : > { %v301_v14 = vld [vmem:[%s1036_s23 + $0xc0] sm:$0xff]  ;;  %v330_v15 = vmul.f32 %v1062_v4, %v293_v12  ;;  %v331_v16 = vmul.f32 %v1062_v4, %v294_v13  ;;  %798 = vmatpush.bf16.msra.mxu1 %v793_v1  ;;  %799 = vmatpush.bf16.msra.mxu2 %v793_v1  ;;  %v339_v27 = vmul.f32 %v1062_v4, %v302_v17  ;;  %v296_v47 = vld [vmem:[%s1036_s23 + $0x98] sm:$0xff]  ;;  %v303_v48 = vld [vmem:[%s1036_s23 + $0xd0] sm:$0xff] }
  0x21   : > { %v338_v18 = vmul.f32 %v1062_v4, %v301_v14  ;;  %v349_v20 = vadd.f32 %v1064_v5, %v314_v8  ;;  %v350_v21 = vadd.f32 %v1064_v5, %v315_v9  ;;  %v357_v22 = vadd.f32 %v1064_v5, %v322_v10  ;;  %800 = vmatpush.bf16.msra.mxu3 %v793_v1  ;;  %v791_v32 = vld [vmem:[%s1273_s3] sm:$0xff]  ;;  %v304_v49 = vld [vmem:[%s1036_s23 + $0xd8] sm:$0xff] }
  0x22   : > { %v358_v23 = vadd.f32 %v1064_v5, %v323_v11  ;;  %v365_v24 = vadd.f32 %v1064_v5, %v330_v15  ;;  %v366_v25 = vadd.f32 %v1064_v5, %v331_v16  ;;  %v374_v35 = vadd.f32 %v1064_v5, %v339_v27  ;;  %v281_v14 = vld [vmem:[%s1036_s23 + $0x20] sm:$0xff]  ;;  %v282_v15 = vld [vmem:[%s1036_s23 + $0x28] sm:$0xff] }
  0x23   : > { %v381_v26 = vmax.f32 %v349_v20, 0.0  ;;  %v382_v28 = vmax.f32 %v350_v21, 0.0  ;;  %v389_v29 = vmax.f32 %v357_v22, 0.0  ;;  %v373_v31 = vadd.f32 %v1064_v5, %v338_v18  ;;  %516 = vmatpush.bf16.msra.mxu0 %v792_v19  ;;  %v289_v18 = vld [vmem:[%s1036_s23 + $0x60] sm:$0xff]  ;;  %v298_v21 = vld [vmem:[%s1036_s23 + $0xa8] sm:$0xff] }
  0x24   : > { %v390_v30 = vmax.f32 %v358_v23, 0.0  ;;  %801 = vmatpush.bf16.msra.mxu1 %v792_v19  ;;  %v397_v33 = vmax.f32 %v365_v24, 0.0  ;;  %v398_v34 = vmax.f32 %v366_v25, 0.0  ;;  %802 = vmatpush.bf16.msra.mxu2 %v792_v19  ;;  %v406_v37 = vmax.f32 %v374_v35, 0.0  ;;  %v297_v20 = vld [vmem:[%s1036_s23 + $0xa0] sm:$0xff]  ;;  %v306_v23 = vld [vmem:[%s1036_s23 + $0xe8] sm:$0xff] }
  0x25   : > { %803 = vmatpush.bf16.msra.mxu3 %v792_v19  ;;  %v405_v36 = vmax.f32 %v373_v31, 0.0  ;;  %v413_v38 = vpack.c.bf16 %v382_v28, %v381_v26  ;;  %v316_v50 = vmul.f32 %v1062_v4, %v279_v40  ;;  %v317_v51 = vmul.f32 %v1062_v4, %v280_v41  ;;  %v290_v19 = vld [vmem:[%s1036_s23 + $0x68] sm:$0xff]  ;;  %v305_v22 = vld [vmem:[%s1036_s23 + $0xe0] sm:$0xff] }
  0x26   : > { %v417_v39 = vpack.c.bf16 %v390_v30, %v389_v29  ;;  %v421_v42 = vpack.c.bf16 %v398_v34, %v397_v33  ;;  %v324_v52 = vmul.f32 %v1062_v4, %v287_v44  ;;  %v325_v53 = vmul.f32 %v1062_v4, %v288_v45 }
  0x27   : > { %517 = vmatpush.bf16.msra.mxu0 %v791_v32  ;;  %v425_v43 = vpack.c.bf16 %v406_v37, %v405_v36  ;;  %v332_v54 = vmul.f32 %v1062_v4, %v295_v46  ;;  %v333_v55 = vmul.f32 %v1062_v4, %v296_v47  ;;  %v340_v56 = vmul.f32 %v1062_v4, %v303_v48 }
  0x28   : > { %804 = vmatpush.bf16.msra.mxu1 %v791_v32  ;;  %805 = vmatpush.bf16.msra.mxu2 %v791_v32  ;;  %v341_v57 = vmul.f32 %v1062_v4, %v304_v49  ;;  %v351_v58 = vadd.f32 %v1064_v5, %v316_v50  ;;  %v352_v59 = vadd.f32 %v1064_v5, %v317_v51  ;;  %v283_v50 = vld [vmem:[%s1036_s23 + $0x30] sm:$0xff]  ;;  %v284_v51 = vld [vmem:[%s1036_s23 + $0x38] sm:$0xff] }
  0x29   : > { %806 = vmatpush.bf16.msra.mxu3 %v791_v32  ;;  %v359_v60 = vadd.f32 %v1064_v5, %v324_v52  ;;  %v360_v61 = vadd.f32 %v1064_v5, %v325_v53  ;;  %v367_v62 = vadd.f32 %v1064_v5, %v332_v54  ;;  %v368_v63 = vadd.f32 %v1064_v5, %v333_v55  ;;  %v291_v54 = vld [vmem:[%s1036_s23 + $0x70] sm:$0xff]  ;;  %v292_v55 = vld [vmem:[%s1036_s23 + $0x78] sm:$0xff] }
  0x2a   : > { %771 = vmatmul.msk.bf16.vlgmr.msra.gmra.mxu0 %vm461_vm0, %v413_v38  ;;  %v375_v0 = vadd.f32 %v1064_v5, %v340_v56  ;;  %v376_v1 = vadd.f32 %v1064_v5, %v341_v57  ;;  %v383_v2 = vmax.f32 %v351_v58, 0.0  ;;  %v384_v3 = vmax.f32 %v352_v59, 0.0  ;;  %v299_v56 = vld [vmem:[%s1036_s23 + $0xb0] sm:$0xff]  ;;  %v300_v57 = vld [vmem:[%s1036_s23 + $0xb8] sm:$0xff] }
  0x2b   : > { %775 = vmatmul.msk.bf16.vlgmr.msra.gmra.mxu1 %vm461_vm0, %v417_v39  ;;  %779 = vmatmul.msk.bf16.vlgmr.msra.gmra.mxu2 %vm461_vm0, %v421_v42  ;;  %v391_v6 = vmax.f32 %v359_v60, 0.0  ;;  %v392_v7 = vmax.f32 %v360_v61, 0.0  ;;  %v399_v8 = vmax.f32 %v367_v62, 0.0  ;;  %v400_v9 = vmax.f32 %v368_v63, 0.0  ;;  %v307_v58 = vld [vmem:[%s1036_s23 + $0xf0] sm:$0xff]  ;;  %v308_v59 = vld [vmem:[%s1036_s23 + $0xf8] sm:$0xff] }
  0x2c   : > { %783 = vmatmul.msk.bf16.vlgmr.msra.gmra.mxu3 %vm461_vm0, %v425_v43  ;;  %v407_v10 = vmax.f32 %v375_v0, 0.0  ;;  %v408_v11 = vmax.f32 %v376_v1, 0.0  ;;  %v414_v12 = vpack.c.bf16 %v384_v3, %v383_v2  ;;  %v318_v24 = vmul.f32 %v1062_v4, %v281_v14 }
  0x2d   : > { %v418_v13 = vpack.c.bf16 %v392_v7, %v391_v6  ;;  %v422_v16 = vpack.c.bf16 %v400_v9, %v399_v8  ;;  %v319_v25 = vmul.f32 %v1062_v4, %v282_v15  ;;  %v326_v26 = vmul.f32 %v1062_v4, %v289_v18 }
  0x2e   : > { %v426_v17 = vpack.c.bf16 %v408_v11, %v407_v10  ;;  %v327_v27 = vmul.f32 %v1062_v4, %v290_v19  ;;  %v334_v28 = vmul.f32 %v1062_v4, %v297_v20  ;;  %v335_v29 = vmul.f32 %v1062_v4, %v298_v21 }
  0x2f   : > { %v342_v30 = vmul.f32 %v1062_v4, %v305_v22  ;;  %v343_v31 = vmul.f32 %v1062_v4, %v306_v23  ;;  %v353_v32 = vadd.f32 %v1064_v5, %v318_v24  ;;  %v354_v33 = vadd.f32 %v1064_v5, %v319_v25 }
  0x30   : > { %v361_v34 = vadd.f32 %v1064_v5, %v326_v26  ;;  %v362_v35 = vadd.f32 %v1064_v5, %v327_v27  ;;  %v369_v36 = vadd.f32 %v1064_v5, %v334_v28  ;;  %v370_v37 = vadd.f32 %v1064_v5, %v335_v29 }
  0x31   : > { %v377_v38 = vadd.f32 %v1064_v5, %v342_v30  ;;  %v378_v39 = vadd.f32 %v1064_v5, %v343_v31  ;;  %v385_v40 = vmax.f32 %v353_v32, 0.0  ;;  %v386_v41 = vmax.f32 %v354_v33, 0.0 }
  0x32   : > { %v393_v42 = vmax.f32 %v361_v34, 0.0  ;;  %v394_v43 = vmax.f32 %v362_v35, 0.0  ;;  %v401_v44 = vmax.f32 %v369_v36, 0.0  ;;  %v402_v45 = vmax.f32 %v370_v37, 0.0 }
  0x33   : > { %v409_v46 = vmax.f32 %v377_v38, 0.0  ;;  %v410_v47 = vmax.f32 %v378_v39, 0.0  ;;  %v415_v48 = vpack.c.bf16 %v386_v41, %v385_v40  ;;  %v320_v60 = vmul.f32 %v1062_v4, %v283_v50 }
  0x34   : > { %v419_v49 = vpack.c.bf16 %v394_v43, %v393_v42  ;;  %v423_v52 = vpack.c.bf16 %v402_v45, %v401_v44  ;;  %v321_v61 = vmul.f32 %v1062_v4, %v284_v51  ;;  %v328_v62 = vmul.f32 %v1062_v4, %v291_v54 }
  0x35   : > { %v427_v53 = vpack.c.bf16 %v410_v47, %v409_v46  ;;  %v329_v63 = vmul.f32 %v1062_v4, %v292_v55  ;;  %v336_v0 = vmul.f32 %v1062_v4, %v299_v56  ;;  %v337_v1 = vmul.f32 %v1062_v4, %v300_v57 }
  0x36   : > { %v344_v2 = vmul.f32 %v1062_v4, %v307_v58  ;;  %v345_v3 = vmul.f32 %v1062_v4, %v308_v59  ;;  %v355_v6 = vadd.f32 %v1064_v5, %v320_v60  ;;  %v356_v7 = vadd.f32 %v1064_v5, %v321_v61 }
  0x37   : > { %v363_v8 = vadd.f32 %v1064_v5, %v328_v62  ;;  %v364_v9 = vadd.f32 %v1064_v5, %v329_v63  ;;  %v371_v10 = vadd.f32 %v1064_v5, %v336_v0  ;;  %v372_v11 = vadd.f32 %v1064_v5, %v337_v1 }
  0x38   : > { %v387_v14 = vmax.f32 %v355_v6, 0.0  ;;  %v388_v15 = vmax.f32 %v356_v7, 0.0 }
  0x39   : > { %v395_v4 = vmax.f32 %v363_v8, 0.0  ;;  %v404_v18 = vmax.f32 %v372_v11, 0.0 }
  0x3a   : > { %772 = vmatmul.msk.bf16.gmra.mxu0 %vm461_vm0, %v414_v12  ;;  %v379_v12 = vadd.f32 %v1064_v5, %v344_v2  ;;  %v416_v21 = vpack.c.bf16 %v388_v15, %v387_v14 }
  0x3b   : > { %776 = vmatmul.msk.bf16.gmra.mxu1 %vm461_vm0, %v418_v13  ;;  %780 = vmatmul.msk.bf16.gmra.mxu2 %vm461_vm0, %v422_v16  ;;  %v380_v13 = vadd.f32 %v1064_v5, %v345_v3  ;;  %v396_v16 = vmax.f32 %v364_v9, 0.0 }
  0x3c   : > { %784 = vmatmul.msk.bf16.gmra.mxu3 %vm461_vm0, %v426_v17  ;;  %v403_v17 = vmax.f32 %v371_v10, 0.0  ;;  %v411_v19 = vmax.f32 %v379_v12, 0.0 }
  0x3d   : > { %v412_v20 = vmax.f32 %v380_v13, 0.0  ;;  %v420_v22 = vpack.c.bf16 %v396_v16, %v395_v4 }
  0x3e   : > { %v424_v23 = vpack.c.bf16 %v404_v18, %v403_v17 }
  0x3f   : > { %v428_v24 = vpack.c.bf16 %v412_v20, %v411_v19 }
  0x4a   : > { %773 = vmatmul.msk.bf16.gmra.mxu0 %vm461_vm0, %v415_v48 }
  0x4b   : > { %777 = vmatmul.msk.bf16.gmra.mxu1 %vm461_vm0, %v419_v49  ;;  %781 = vmatmul.msk.bf16.gmra.mxu2 %vm461_vm0, %v423_v52 }
  0x4c   : > { %785 = vmatmul.msk.bf16.gmra.mxu3 %vm461_vm0, %v427_v53 }
  0x5a   : > { %774 = vmatmul.msk.bf16.gmra.mxu0 %vm461_vm0, %v416_v21 }
  0x5b   : > { %778 = vmatmul.msk.bf16.gmra.mxu1 %vm461_vm0, %v420_v22  ;;  %782 = vmatmul.msk.bf16.gmra.mxu2 %vm461_vm0, %v424_v23 }
  0x5c   : > { %786 = vmatmul.msk.bf16.gmra.mxu3 %vm461_vm0, %v428_v24 }
  0xa7   : > { %v519_v5 = vpop.f32.mrf.mxu0 }
  0xa8   : > { %v539_v25 = vpop.f32.mrf.mxu1  ;;  %599 = vst.msk [vmem:[%s1186_s21] sm:$0xff] %vm461_vm0, %v519_v5 }
  0xa9   : > { %607 = vst.msk [vmem:[%s1186_s21 + $0x40] sm:$0xff] %vm461_vm0, %v539_v25 }
  0xae   : > { %v559_v26 = vpop.f32.mrf.mxu2 }
  0xaf   : > { %v579_v27 = vpop.f32.mrf.mxu3  ;;  %615 = vst.msk [vmem:[%s1186_s21 + $0x80] sm:$0xff] %vm461_vm0, %v559_v26  ;;  %v521_v28 = vpop.f32.mrf.mxu0 }
  0xb0   : > { %v541_v29 = vpop.f32.mrf.mxu1  ;;  %623 = vst.msk [vmem:[%s1186_s21 + $0xc0] sm:$0xff] %vm461_vm0, %v579_v27 }
  0xb1   : > { %600 = vst.msk [vmem:[%s1186_s21 + $0x8] sm:$0xff] %vm461_vm0, %v521_v28 }
  0xb2   : > { %608 = vst.msk [vmem:[%s1186_s21 + $0x48] sm:$0xff] %vm461_vm0, %v541_v29 }
  0xb6   : > { %v561_v30 = vpop.f32.mrf.mxu2 }
  0xb7   : > { %v581_v31 = vpop.f32.mrf.mxu3  ;;  %616 = vst.msk [vmem:[%s1186_s21 + $0x88] sm:$0xff] %vm461_vm0, %v561_v30  ;;  %v524_v32 = vpop.f32.mrf.mxu0 }
  0xb8   : > { %v544_v33 = vpop.f32.mrf.mxu1  ;;  %624 = vst.msk [vmem:[%s1186_s21 + $0xc8] sm:$0xff] %vm461_vm0, %v581_v31 }
  0xb9   : > { %601 = vst.msk [vmem:[%s1186_s21 + $0x10] sm:$0xff] %vm461_vm0, %v524_v32 }
  0xba   : > { %609 = vst.msk [vmem:[%s1186_s21 + $0x50] sm:$0xff] %vm461_vm0, %v544_v33 }
  0xbe   : > { %v564_v34 = vpop.f32.mrf.mxu2 }
  0xbf   : > { %v584_v35 = vpop.f32.mrf.mxu3  ;;  %617 = vst.msk [vmem:[%s1186_s21 + $0x90] sm:$0xff] %vm461_vm0, %v564_v34  ;;  %v526_v36 = vpop.f32.mrf.mxu0 }
  0xc0   : > { %v546_v37 = vpop.f32.mrf.mxu1  ;;  %625 = vst.msk [vmem:[%s1186_s21 + $0xd0] sm:$0xff] %vm461_vm0, %v584_v35 }
  0xc1   : > { %602 = vst.msk [vmem:[%s1186_s21 + $0x18] sm:$0xff] %vm461_vm0, %v526_v36 }
  0xc2   : > { %610 = vst.msk [vmem:[%s1186_s21 + $0x58] sm:$0xff] %vm461_vm0, %v546_v37 }
  0xc6   : > { %v566_v38 = vpop.f32.mrf.mxu2 }
  0xc7   : > { %v586_v39 = vpop.f32.mrf.mxu3  ;;  %618 = vst.msk [vmem:[%s1186_s21 + $0x98] sm:$0xff] %vm461_vm0, %v566_v38  ;;  %v529_v40 = vpop.f32.mrf.mxu0 }
  0xc8   : > { %v549_v41 = vpop.f32.mrf.mxu1  ;;  %626 = vst.msk [vmem:[%s1186_s21 + $0xd8] sm:$0xff] %vm461_vm0, %v586_v39 }
  0xc9   : > { %603 = vst.msk [vmem:[%s1186_s21 + $0x20] sm:$0xff] %vm461_vm0, %v529_v40 }
  0xca   : > { %611 = vst.msk [vmem:[%s1186_s21 + $0x60] sm:$0xff] %vm461_vm0, %v549_v41 }
  0xce   : > { %v569_v42 = vpop.f32.mrf.mxu2 }
  0xcf   : > { %v589_v43 = vpop.f32.mrf.mxu3  ;;  %619 = vst.msk [vmem:[%s1186_s21 + $0xa0] sm:$0xff] %vm461_vm0, %v569_v42  ;;  %v531_v44 = vpop.f32.mrf.mxu0 }
  0xd0   : > { %v551_v45 = vpop.f32.mrf.mxu1  ;;  %627 = vst.msk [vmem:[%s1186_s21 + $0xe0] sm:$0xff] %vm461_vm0, %v589_v43 }
  0xd1   : > { %604 = vst.msk [vmem:[%s1186_s21 + $0x28] sm:$0xff] %vm461_vm0, %v531_v44 }
  0xd2   : > { %612 = vst.msk [vmem:[%s1186_s21 + $0x68] sm:$0xff] %vm461_vm0, %v551_v45 }
  0xd6   : > { %v571_v46 = vpop.f32.mrf.mxu2 }
  0xd7   : > { %v591_v47 = vpop.f32.mrf.mxu3  ;;  %620 = vst.msk [vmem:[%s1186_s21 + $0xa8] sm:$0xff] %vm461_vm0, %v571_v46  ;;  %v534_v48 = vpop.f32.mrf.mxu0 }
  0xd8   : > { %v554_v49 = vpop.f32.mrf.mxu1  ;;  %628 = vst.msk [vmem:[%s1186_s21 + $0xe8] sm:$0xff] %vm461_vm0, %v591_v47 }
  0xd9   : > { %605 = vst.msk [vmem:[%s1186_s21 + $0x30] sm:$0xff] %vm461_vm0, %v534_v48 }
  0xda   : > { %613 = vst.msk [vmem:[%s1186_s21 + $0x70] sm:$0xff] %vm461_vm0, %v554_v49 }
  0xde   : > { %v574_v50 = vpop.f32.mrf.mxu2 }
  0xdf   : > { %v594_v51 = vpop.f32.mrf.mxu3  ;;  %621 = vst.msk [vmem:[%s1186_s21 + $0xb0] sm:$0xff] %vm461_vm0, %v574_v50  ;;  %v536_v52 = vpop.f32.mrf.mxu0 }
  0xe0   : > { %v556_v53 = vpop.f32.mrf.mxu1  ;;  %629 = vst.msk [vmem:[%s1186_s21 + $0xf0] sm:$0xff] %vm461_vm0, %v594_v51 }
  0xe1   : > { %606 = vst.msk [vmem:[%s1186_s21 + $0x38] sm:$0xff] %vm461_vm0, %v536_v52 }
  0xe2   : > { %614 = vst.msk [vmem:[%s1186_s21 + $0x78] sm:$0xff] %vm461_vm0, %v556_v53 }
  0xe6   : > { %v576_v54 = vpop.f32.mrf.mxu2 }
  0xe7   : > { %v596_v55 = vpop.f32.mrf.mxu3  ;;  %622 = vst.msk [vmem:[%s1186_s21 + $0xb8] sm:$0xff] %vm461_vm0, %v576_v54 }
  0xe8   : > { %630 = vst.msk [vmem:[%s1186_s21 + $0xf8] sm:$0xff] %vm461_vm0, %v596_v55 }
  0xe9 PF: > { %s17_s20 = sadd.s32 1, %s946_s20   ;;  %s1277_s15 = smov %s930_s16 }
  0xea   : > { %p14_p0 = scmp.ge.s32.totalorder %s17_s20, 4   ;;  %s1278_s16 = smov %s934_s17 }
  0xeb   : > { %s1279_s17 = smov %s1024_s27  ;;  %s1280_s18 = smov %s942_s19 }
  0xec   : > { %s1281_s19 = smov %s1283_s22  ;;  %16 = sbr.rel (!%p14_p0) target bundleno = 4 (0x4), region = 82 }
  0xf1   :  { %661 = vsyncpa [#allocation3], 1 }
  0xf2   :  { %663 = vsyncpa [#allocation3 + $0x1], 1 }

// kernel: _lambda_.16
= control target key start
LH: loop header
LB: loop body
LE: loop exit
PB: predicated region body
PF: predicated region fallthrough
CT: control target
= control target key end

     0   :  { %11 = vsyncpa [#allocation5], 0  ;;  %s850_s18 = smov 0   ;;  %s852_s19 = smov 0   ;;  %s1040_s0 = inlined_call_operand.vmem [shape: f32[2,256,64], index: 0, kind: input, shape index: {}]   ;;  %s1041_s1 = inlined_call_operand.vmem [shape: f32[1,64], index: 1, kind: input, shape index: {}]   ;;  %s1042_s2 = inlined_call_operand.hbm [shape: f32[1,64], index: 2, kind: input, shape index: {}]   ;;  %s1043_s3 = inlined_call_operand.vmem [shape: f32[64,64], index: 3, kind: input, shape index: {}]   ;;  %s1044_s4 = inlined_call_operand.vmem [shape: f32[2,1,64], index: 4, kind: output, shape index: {0}]   ;;  %s1045_s5 = inlined_call_operand.vmem [shape: f32[2,1,64], index: 5, kind: output, shape index: {1}]  }
   0x1   :  { %s854_s20 = smov 0  }
   0x2 LB: > { %s706_s21 = sadd.s32 4294967295, %s816_s20   ;;  %s29_s22 = sadd.s32 1, %s812_s19  ;;  %s816_s20 = sphi %s854_s20, %s17_s20   ;;  %s812_s19 = sphi %s852_s19, %s1047_s19   ;;  %s808_s18 = sphi %s850_s18, %s1046_s18  }
   0x3   : > { %p31_p0 = scmp.ge.s32.totalorder %s29_s22, 2  ;;  %p708_p1 = scmp.ge.s32.totalorder %s816_s20, 1 }
   0x4   : > { %p177_p2 = scmp.lt.s32.totalorder %s816_s20, 3  ;;  %p728_p4 = scmp.eq.s32.totalorder %s706_s21, 0 }
   0x5   : > { %s1049_s22 = smov (%p31_p0, %s29_s22), 0  ;;  %s192_s25 = sshll.u32 %s1042_s2, 4  ;;  %s193_s25 = int_to_ptr.hbm [resolvable:$true] %s192_s25 }
   0x6   : > { %p178_p3 = pnand %p708_p1, %p177_p2  ;;  %s818_s26 = smov [#allocation4]  }
   0x7   : > { %s194_s27 = sshll.u32 %s818_s26, 4  ;;  %s195_s27 = int_to_ptr.vmem [resolvable:$true] %s194_s27 }
   0x8   : > { %p724_p5 = pneg %p178_p3  ;;  %223 = sbr.rel (%p178_p3) target bundleno = 267 (0x10b), region = 36 }
   0xa   : > { %p725_p6 = pnand %p728_p4, %p724_p5 }
   0xc   : > { %727 = dma.hbm_to_vmem [thread:$0]  (!%p725_p6), %s193_s25, 16, %s195_s27, [#allocation5]  }
   0xd   : > { %803 = dma.done.wait (%p728_p4), [#allocation5], 16  }
   0xe   : > { %805 = vsyncadd (%p728_p4), [#allocation5], 4294967280  ;;  %p258_p7 = scmp.lt.s32.totalorder %s808_s18, 1  ;;  %vm277_vm0 = vcmask 516096   ;;  %v819_v0 = vmov 0.0   ;;  %vm313_vm1 = vcmask 523264  }
   0xf   : > { %278 = vst.msk [vmem:[#allocation2] sm:$0x1] %vm277_vm0, %v819_v0  ;;  %v500_v1 = vld [vmem:[%s1043_s3 + $0x38] sm:$0xff]  ;;  %v499_v2 = vld [vmem:[%s1043_s3 + $0x30] sm:$0xff]  ;;  %v498_v3 = vld [vmem:[%s1043_s3 + $0x28] sm:$0xff] }
  0x10   : > { %s1051_s18 = smov (!%p258_p7, %s808_s18), 1  ;;  %279 = vst.msk [vmem:[#allocation3] sm:$0x1] %vm277_vm0, %v819_v0  ;;  %513 = vmatpush.msra.mxu0 %v500_v1  ;;  %537 = vmatpush.msra.mxu1 %v500_v1  ;;  %v495_v4 = vld [vmem:[%s1043_s3 + $0x10] sm:$0xff]  ;;  %v494_v6 = vld [vmem:[%s1043_s3 + $0x8] sm:$0xff]  ;;  %v493_v7 = vld [vmem:[%s1043_s3] sm:$0xff] }
  0x11   : > { %s719_s28 = sshll.u32 %s1051_s18, 8  ;;  %v552_v5 = vsel %vm313_vm1, %v495_v4, 0.0  ;;  %v550_v9 = vsel %vm313_vm1, %v494_v6, 0.0  ;;  %v549_v10 = vsel %vm313_vm1, %v493_v7, 0.0  ;;  %v497_v15 = vld [vmem:[%s1043_s3 + $0x20] sm:$0xff]  ;;  %v496_v16 = vld [vmem:[%s1043_s3 + $0x18] sm:$0xff]  ;;  %s272_s9 = scalar_lea.vmem %s1045_s5, %s1051_s18 }
  0x12   : > { %s880_s6 = scalar_lea.vmem %s1040_s0, %s719_s28  ;;  %514 = vmatpush.msra.mxu0 %v499_v2  ;;  %538 = vmatpush.msra.mxu1 %v499_v2  ;;  %v551_v17 = vadd.f32 %v550_v9, %v549_v10  ;;  %v554_v20 = vsel %vm313_vm1, %v496_v16, 0.0  ;;  %v556_v25 = vsel %vm313_vm1, %v497_v15, 0.0  ;;  %v558_v30 = vsel %vm313_vm1, %v498_v3, 0.0 }
  0x13   : > { %v280_v8 = vld [vmem:[%s880_s6] sm:$0xff]  ;;  %v281_v11 = vld [vmem:[%s880_s6 + $0x8] sm:$0xff]  ;;  %v282_v12 = vld [vmem:[%s880_s6 + $0x10] sm:$0xff]  ;;  %v560_v35 = vsel %vm313_vm1, %v499_v2, 0.0  ;;  %v562_v40 = vsel %vm313_vm1, %v500_v1, 0.0 }
  0x14   : > { %v283_v13 = vld [vmem:[%s880_s6 + $0x18] sm:$0xff]  ;;  %v314_v14 = vsel %vm313_vm1, %v280_v8, 0.0  ;;  %v315_v18 = vsel %vm313_vm1, %v281_v11, 0.0  ;;  %v317_v19 = vsel %vm313_vm1, %v282_v12, 0.0  ;;  %515 = vmatpush.msra.mxu0 %v498_v3  ;;  %539 = vmatpush.msra.mxu1 %v498_v3  ;;  %v284_v21 = vld [vmem:[%s880_s6 + $0x20] sm:$0xff]  ;;  %v553_v23 = vadd.f32 %v552_v5, %v551_v17  ;;  %v285_v26 = vld [vmem:[%s880_s6 + $0x28] sm:$0xff] }
  0x15   : > { %v316_v22 = vadd.f32 %v315_v18, %v314_v14  ;;  %v319_v24 = vsel %vm313_vm1, %v283_v13, 0.0  ;;  %v321_v29 = vsel %vm313_vm1, %v284_v21, 0.0  ;;  %v286_v31 = vld [vmem:[%s880_s6 + $0x30] sm:$0xff]  ;;  %v323_v34 = vsel %vm313_vm1, %v285_v26, 0.0  ;;  %v287_v36 = vld [vmem:[%s880_s6 + $0x38] sm:$0xff]  ;;  %v288_v41 = vld [vmem:[%s880_s6 + $0x40] sm:$0xff] }
  0x16   : > { %516 = vmatpush.msra.mxu0 %v497_v15  ;;  %540 = vmatpush.msra.mxu1 %v497_v15  ;;  %v555_v28 = vadd.f32 %v554_v20, %v553_v23  ;;  %v325_v39 = vsel %vm313_vm1, %v286_v31, 0.0  ;;  %v327_v44 = vsel %vm313_vm1, %v287_v36, 0.0  ;;  %v289_v45 = vld [vmem:[%s880_s6 + $0x48] sm:$0xff]  ;;  %v387_v47 = vmul.f32 %v280_v8, %v280_v8  ;;  %v290_v52 = vld [vmem:[%s880_s6 + $0x50] sm:$0xff]  ;;  %v291_v56 = vld [vmem:[%s880_s6 + $0x58] sm:$0xff] }
  0x17   : > { %v318_v27 = vadd.f32 %v317_v19, %v316_v22  ;;  %v388_v48 = vmul.f32 %v281_v11, %v281_v11  ;;  %v329_v50 = vsel %vm313_vm1, %v288_v41, 0.0  ;;  %v389_v51 = vmul.f32 %v282_v12, %v282_v12  ;;  %v292_v0 = vld [vmem:[%s880_s6 + $0x60] sm:$0xff]  ;;  %v294_v12 = vld [vmem:[%s880_s6 + $0x70] sm:$0xff]  ;;  %v295_v18 = vld [vmem:[%s880_s6 + $0x78] sm:$0xff] }
  0x18   : > { %517 = vmatpush.msra.mxu0 %v496_v16  ;;  %541 = vmatpush.msra.mxu1 %v496_v16  ;;  %v557_v33 = vadd.f32 %v556_v25, %v555_v28  ;;  %v390_v54 = vmul.f32 %v283_v13, %v283_v13  ;;  %v331_v55 = vsel %vm313_vm1, %v289_v45, 0.0  ;;  %v391_v58 = vmul.f32 %v284_v21, %v284_v21 }
  0x19   : > { %v320_v32 = vadd.f32 %v319_v24, %v318_v27  ;;  %v419_v59 = vsel %vm313_vm1, %v387_v47, 0.0  ;;  %v420_v60 = vsel %vm313_vm1, %v388_v48, 0.0  ;;  %v333_v61 = vsel %vm313_vm1, %v290_v52, 0.0  ;;  %v296_v24 = vld [vmem:[%s880_s6 + $0x80] sm:$0xff] }
  0x1a   : > { %518 = vmatpush.msra.mxu0 %v495_v4  ;;  %542 = vmatpush.msra.mxu1 %v495_v4  ;;  %v559_v38 = vadd.f32 %v558_v30, %v557_v33  ;;  %v421_v62 = vadd.f32 %v420_v60, %v419_v59  ;;  %v422_v63 = vsel %vm313_vm1, %v389_v51, 0.0  ;;  %v392_v2 = vmul.f32 %v285_v26, %v285_v26  ;;  %v297_v30 = vld [vmem:[%s880_s6 + $0x88] sm:$0xff]  ;;  %v300_v48 = vld [vmem:[%s880_s6 + $0xa0] sm:$0xff] }
  0x1b   : > { %v322_v37 = vadd.f32 %v321_v29, %v320_v32  ;;  %v424_v3 = vsel %vm313_vm1, %v390_v54, 0.0  ;;  %v335_v4 = vsel %vm313_vm1, %v291_v56, 0.0  ;;  %v393_v8 = vmul.f32 %v286_v31, %v286_v31 }
  0x1c   : > { %519 = vmatpush.msra.mxu0 %v494_v6  ;;  %543 = vmatpush.msra.mxu1 %v494_v6  ;;  %v561_v43 = vadd.f32 %v560_v35, %v559_v38  ;;  %v423_v5 = vadd.f32 %v422_v63, %v421_v62  ;;  %v293_v6 = vld [vmem:[%s880_s6 + $0x68] sm:$0xff]  ;;  %v426_v9 = vsel %vm313_vm1, %v391_v58, 0.0  ;;  %v337_v10 = vsel %vm313_vm1, %v292_v0, 0.0 }
  0x1d   : > { %v324_v42 = vadd.f32 %v323_v34, %v322_v37  ;;  %v394_v14 = vmul.f32 %v287_v36, %v287_v36  ;;  %v428_v15 = vsel %vm313_vm1, %v392_v2, 0.0  ;;  %v339_v16 = vsel %vm313_vm1, %v293_v6, 0.0  ;;  %v298_v36 = vld [vmem:[%s880_s6 + $0x90] sm:$0xff] }
  0x1e   : > { %520 = vmatpush.msra.mxu0 %v493_v7  ;;  %544 = vmatpush.msra.mxu1 %v493_v7  ;;  %v932_v49 = vadd.f32 %v562_v40, %v561_v43  ;;  %v425_v11 = vadd.f32 %v424_v3, %v423_v5  ;;  %v395_v20 = vmul.f32 %v288_v41, %v288_v41  ;;  %v430_v21 = vsel %vm313_vm1, %v393_v8, 0.0  ;;  %v303_v3 = vld [vmem:[%s880_s6 + $0xb8] sm:$0xff] }
  0x1f   : > { %v326_v46 = vadd.f32 %v325_v39, %v324_v42  ;;  %v341_v22 = vsel %vm313_vm1, %v294_v12, 0.0  ;;  %v396_v26 = vmul.f32 %v289_v45, %v289_v45  ;;  %v432_v27 = vsel %vm313_vm1, %v394_v14, 0.0  ;;  %v299_v42 = vld [vmem:[%s880_s6 + $0x98] sm:$0xff] }
  0x20   : > { %v427_v17 = vadd.f32 %v426_v9, %v425_v11  ;;  %v343_v28 = vsel %vm313_vm1, %v295_v18, 0.0  ;;  %v397_v32 = vmul.f32 %v290_v52, %v290_v52  ;;  %v434_v33 = vsel %vm313_vm1, %v395_v20, 0.0  ;;  %v304_v9 = vld [vmem:[%s880_s6 + $0xc0] sm:$0xff] }
  0x21   : > { %v328_v53 = vadd.f32 %v327_v44, %v326_v46  ;;  %v345_v34 = vsel %vm313_vm1, %v296_v24, 0.0  ;;  %v398_v38 = vmul.f32 %v291_v56, %v291_v56  ;;  %v436_v39 = vsel %vm313_vm1, %v396_v26, 0.0 }
  0x22   : > { %v429_v23 = vadd.f32 %v428_v15, %v427_v17  ;;  %v347_v40 = vsel %vm313_vm1, %v297_v30, 0.0  ;;  %v399_v44 = vmul.f32 %v292_v0, %v292_v0  ;;  %v438_v45 = vsel %vm313_vm1, %v397_v32, 0.0  ;;  %v305_v15 = vld [vmem:[%s880_s6 + $0xc8] sm:$0xff] }
  0x23   : > { %v330_v57 = vadd.f32 %v329_v50, %v328_v53  ;;  %v349_v46 = vsel %vm313_vm1, %v298_v36, 0.0  ;;  %v400_v51 = vmul.f32 %v293_v6, %v293_v6  ;;  %v440_v52 = vsel %vm313_vm1, %v398_v38, 0.0 }
  0x24   : > { %v431_v29 = vadd.f32 %v430_v21, %v429_v23  ;;  %v351_v53 = vsel %vm313_vm1, %v299_v42, 0.0  ;;  %v442_v58 = vsel %vm313_vm1, %v399_v44, 0.0  ;;  %v353_v59 = vsel %vm313_vm1, %v300_v48, 0.0  ;;  %v306_v21 = vld [vmem:[%s880_s6 + $0xd0] sm:$0xff] }
  0x25   : > { %v332_v1 = vadd.f32 %v331_v55, %v330_v57  ;;  %v301_v55 = vld [vmem:[%s880_s6 + $0xa8] sm:$0xff]  ;;  %v401_v57 = vmul.f32 %v294_v12, %v294_v12  ;;  %v402_v63 = vmul.f32 %v295_v18, %v295_v18  ;;  %v444_v0 = vsel %vm313_vm1, %v400_v51, 0.0 }
  0x26   : > { %v433_v35 = vadd.f32 %v432_v27, %v431_v29  ;;  %v403_v5 = vmul.f32 %v296_v24, %v296_v24  ;;  %v404_v11 = vmul.f32 %v297_v30, %v297_v30  ;;  %v405_v17 = vmul.f32 %v298_v36, %v298_v36  ;;  %v307_v27 = vld [vmem:[%s880_s6 + $0xd8] sm:$0xff] }
  0x27   : > { %v334_v7 = vadd.f32 %v333_v61, %v332_v1  ;;  %v302_v61 = vld [vmem:[%s880_s6 + $0xb0] sm:$0xff]  ;;  %v355_v1 = vsel %vm313_vm1, %v301_v55, 0.0  ;;  %v446_v6 = vsel %vm313_vm1, %v401_v57, 0.0  ;;  %v448_v12 = vsel %vm313_vm1, %v402_v63, 0.0 }
  0x28   : > { %v435_v41 = vadd.f32 %v434_v33, %v433_v35  ;;  %v450_v18 = vsel %vm313_vm1, %v403_v5, 0.0  ;;  %v406_v23 = vmul.f32 %v299_v42, %v299_v42  ;;  %v452_v24 = vsel %vm313_vm1, %v404_v11, 0.0  ;;  %v308_v33 = vld [vmem:[%s880_s6 + $0xe0] sm:$0xff] }
  0x29   : > { %v336_v13 = vadd.f32 %v335_v4, %v334_v7  ;;  %v357_v7 = vsel %vm313_vm1, %v302_v61, 0.0  ;;  %v407_v29 = vmul.f32 %v300_v48, %v300_v48  ;;  %v454_v30 = vsel %vm313_vm1, %v405_v17, 0.0 }
  0x2a   : > { %v437_v47 = vadd.f32 %v436_v39, %v435_v41  ;;  %v408_v35 = vmul.f32 %v301_v55, %v301_v55  ;;  %v456_v36 = vsel %vm313_vm1, %v406_v23, 0.0  ;;  %v309_v39 = vld [vmem:[%s880_s6 + $0xe8] sm:$0xff]  ;;  %v409_v41 = vmul.f32 %v302_v61, %v302_v61 }
  0x2b   : > { %v338_v19 = vadd.f32 %v337_v10, %v336_v13  ;;  %v359_v13 = vsel %vm313_vm1, %v303_v3, 0.0  ;;  %v458_v42 = vsel %vm313_vm1, %v407_v29, 0.0 }
  0x2c   : > { %v439_v54 = vadd.f32 %v438_v45, %v437_v47  ;;  %v310_v45 = vld [vmem:[%s880_s6 + $0xf0] sm:$0xff]  ;;  %v410_v47 = vmul.f32 %v303_v3, %v303_v3  ;;  %v460_v48 = vsel %vm313_vm1, %v408_v35, 0.0  ;;  %v462_v55 = vsel %vm313_vm1, %v409_v41, 0.0 }
  0x2d   : > { %v340_v25 = vadd.f32 %v339_v16, %v338_v19  ;;  %v361_v19 = vsel %vm313_vm1, %v304_v9, 0.0 }
  0x2e   : > { %v441_v60 = vadd.f32 %v440_v52, %v439_v54  ;;  %v311_v52 = vld [vmem:[%s880_s6 + $0xf8] sm:$0xff]  ;;  %v411_v54 = vmul.f32 %v304_v9, %v304_v9  ;;  %s269_s6 = scalar_lea.vmem %s1044_s4, %s1051_s18 }
  0x2f   : > { %v342_v31 = vadd.f32 %v341_v22, %v340_v25  ;;  %v363_v25 = vsel %vm313_vm1, %v305_v15, 0.0  ;;  %v375_v61 = vsel %vm313_vm1, %v311_v52, 0.0 }
  0x30   : > { %v443_v2 = vadd.f32 %v442_v58, %v441_v60  ;;  %v464_v60 = vsel %vm313_vm1, %v410_v47, 0.0 }
  0x31   : > { %v344_v37 = vadd.f32 %v343_v28, %v342_v31  ;;  %v365_v31 = vsel %vm313_vm1, %v306_v21, 0.0 }
  0x32   : > { %v445_v8 = vadd.f32 %v444_v0, %v443_v2  ;;  %v413_v0 = vmul.f32 %v306_v21, %v306_v21 }
  0x33   : > { %v346_v43 = vadd.f32 %v345_v34, %v344_v37  ;;  %v367_v37 = vsel %vm313_vm1, %v307_v27, 0.0 }
  0x34   : > { %v447_v14 = vadd.f32 %v446_v6, %v445_v8  ;;  %v415_v8 = vmul.f32 %v308_v33, %v308_v33  ;;  %v470_v9 = vsel %vm313_vm1, %v413_v0, 0.0 }
  0x35   : > { %v348_v50 = vadd.f32 %v347_v40, %v346_v43  ;;  %v369_v43 = vsel %vm313_vm1, %v308_v33, 0.0 }
  0x36   : > { %v449_v20 = vadd.f32 %v448_v12, %v447_v14  ;;  %v416_v12 = vmul.f32 %v309_v39, %v309_v39  ;;  %v474_v17 = vsel %vm313_vm1, %v415_v8, 0.0  ;;  %v600_v8 = vld [vmem:[%s1041_s1] sm:$0x1] }
  0x37   : > { %v350_v56 = vadd.f32 %v349_v46, %v348_v50  ;;  %v371_v50 = vsel %vm313_vm1, %v309_v39, 0.0 }
  0x38   : > { %v451_v26 = vadd.f32 %v450_v18, %v449_v20  ;;  %v418_v20 = vmul.f32 %v311_v52, %v311_v52  ;;  %v476_v21 = vsel %vm313_vm1, %v416_v12, 0.0 }
  0x39   : > { %v352_v62 = vadd.f32 %v351_v53, %v350_v56  ;;  %v373_v56 = vsel %vm313_vm1, %v310_v45, 0.0 }
  0x3a   : > { %v453_v32 = vadd.f32 %v452_v24, %v451_v26 }
  0x3b   : > { %v354_v4 = vadd.f32 %v353_v59, %v352_v62  ;;  %v412_v59 = vmul.f32 %v305_v15, %v305_v15 }
  0x3c   : > { %v455_v38 = vadd.f32 %v454_v30, %v453_v32 }
  0x3d   : > { %v356_v10 = vadd.f32 %v355_v1, %v354_v4  ;;  %v466_v1 = vsel %vm313_vm1, %v411_v54, 0.0  ;;  %v414_v4 = vmul.f32 %v307_v27, %v307_v27  ;;  %v468_v5 = vsel %vm313_vm1, %v412_v59, 0.0 }
  0x3e   : > { %v457_v44 = vadd.f32 %v456_v36, %v455_v38  ;;  %v386_v38 = vld [vmem:[#allocation3] sm:$0x1] }
  0x3f   : > { %v358_v16 = vadd.f32 %v357_v7, %v356_v10 }
  0x40   : > { %v459_v51 = vadd.f32 %v458_v42, %v457_v44  ;;  %v564_v42 = vrot.slane %v932_v49, 4 }
  0x41   : > { %v360_v22 = vadd.f32 %v359_v13, %v358_v16  ;;  %v472_v13 = vsel %vm313_vm1, %v414_v4, 0.0  ;;  %v417_v16 = vmul.f32 %v310_v45, %v310_v45 }
  0x42   : > { %v461_v57 = vadd.f32 %v460_v48, %v459_v51 }
  0x43   : > { %v362_v28 = vadd.f32 %v361_v19, %v360_v22  ;;  %v478_v24 = vsel %vm313_vm1, %v417_v16, 0.0 }
  0x44   : > { %v463_v62 = vadd.f32 %v462_v55, %v461_v57 }
  0x45   : > { %v364_v34 = vadd.f32 %v363_v25, %v362_v28  ;;  %v312_v25 = vld [vmem:[#allocation2] sm:$0x1]  ;;  %v480_v28 = vsel %vm313_vm1, %v418_v20, 0.0 }
  0x46   : > { %v465_v2 = vadd.f32 %v464_v60, %v463_v62 }
  0x47   : > { %v366_v40 = vadd.f32 %v365_v31, %v364_v34 }
  0x48   : > { %v467_v6 = vadd.f32 %v466_v1, %v465_v2 }
  0x49   : > { %v368_v46 = vadd.f32 %v367_v37, %v366_v40 }
  0x4a   : > { %v469_v10 = vadd.f32 %v468_v5, %v467_v6 }
  0x4b   : > { %v370_v53 = vadd.f32 %v369_v43, %v368_v46  ;;  %v565_v43 = vadd.f32 %v564_v42, %v932_v49 }
  0x4c   : > { %v471_v14 = vadd.f32 %v470_v9, %v469_v10 }
  0x4d   : > { %v372_v58 = vadd.f32 %v371_v50, %v370_v53  ;;  %v566_v44 = vrot.slane %v565_v43, 2 }
  0x4e   : > { %v473_v18 = vadd.f32 %v472_v13, %v471_v14 }
  0x4f   : > { %v374_v63 = vadd.f32 %v373_v56, %v372_v58  ;;  %v567_v45 = vadd.f32 %v566_v44, %v565_v43 }
  0x50   : > { %v475_v22 = vadd.f32 %v474_v17, %v473_v18 }
  0x51   : > { %v376_v3 = vadd.f32 %v375_v61, %v374_v63  ;;  %v568_v46 = vrot.slane %v567_v45, 1 }
  0x52   : > { %v477_v26 = vadd.f32 %v476_v21, %v475_v22 }
  0x53   : > { %v377_v7 = vrot.slane %v376_v3, 4  ;;  %v569_v47 = vadd.f32 %v568_v46, %v567_v45 }
  0x54   : > { %v479_v29 = vadd.f32 %v478_v24, %v477_v26 }
  0x55   : > { %v378_v11 = vadd.f32 %v377_v7, %v376_v3  ;;  %v570_v48 = vmul.f32 256.0, %v569_v47 }
  0x56   : > { %v481_v31 = vadd.f32 %v480_v28, %v479_v29 }
  0x57   : > { %v379_v15 = vrot.slane %v378_v11, 2  ;;  %756 = vrcp.f32 %v570_v48  ;;  %vm576_vm2 = vweird.f32 %v570_v48  ;;  %v582_v54 = vand.u32 2147483648, %v570_v48 }
  0x58   : > { %v482_v32 = vrot.slane %v481_v31, 4  ;;  %v580_v56 = vand.u32 2147483647, %v570_v48 }
  0x59   : > { %v380_v19 = vadd.f32 %v379_v15, %v378_v11  ;;  %v583_v57 = vor.u32 1.1754944e-38, %v582_v54  ;;  %v602_v11 = vld [vmem:[#allocation4] sm:$0x1] }
  0x5a   : > { %v483_v33 = vadd.f32 %v482_v32, %v481_v31  ;;  %vm581_vm5 = vcmp.eq.f32.partialorder %v580_v56, 8.507059e+37 }
  0x5b   : > { %v381_v23 = vrot.slane %v380_v19, 1 }
  0x5c   : > { %v484_v34 = vrot.slane %v483_v33, 2 }
  0x5d   : > { %v382_v27 = vadd.f32 %v381_v23, %v380_v19  ;;  %v757_v50 = vpop.eup %756 }
  0x5e   : > { %v485_v36 = vadd.f32 %v484_v34, %v483_v33  ;;  %v572_v51 = vmul.f32 %v757_v50, %v570_v48  ;;  %vm577_vm3 = vweird.f32 %v757_v50 }
  0x5f   : > { %v383_v30 = vadd.f32 %v382_v27, %v312_v25  ;;  %vm578_vm4 = vmor %vm576_vm2, %vm577_vm3 }
  0x60   : > { %v486_v37 = vrot.slane %v485_v36, 1  ;;  %v573_v52 = vsub.f32 1.0, %v572_v51 }
  0x61   : > { %385 = vst.msk [vmem:[#allocation2] sm:$0x1] %vm277_vm0, %v383_v30 }
  0x62   : > { %v487_v39 = vadd.f32 %v486_v37, %v485_v36  ;;  %v574_v53 = vmul.f32 %v757_v50, %v573_v52 }
  0x64   : > { %v488_v40 = vadd.f32 %v487_v39, %v386_v38  ;;  %v575_v55 = vadd.f32 %v757_v50, %v574_v53 }
  0x66   : > { %489 = vst.msk [vmem:[#allocation3] sm:$0x1] %vm277_vm0, %v488_v40  ;;  %v579_v58 = vsel %vm578_vm4, %v757_v50, %v575_v55 }
  0x67   : > { %v584_v59 = vsel %vm581_vm5, %v583_v57, %v579_v58 }
  0x68   : > { %v501_v35 = vld [vmem:[#allocation2] sm:$0x1] }
  0x69   : > { %715 = vmatmul.msk.f32.vlgmr.msra.gmra.mxu0 %vm313_vm1, %v501_v35 }
  0x6d   : > { %v525_v41 = vld [vmem:[#allocation3] sm:$0x1] }
  0x6e   : > { %716 = vmatmul.msk.f32.vlgmr.msra.gmra.mxu1 %vm313_vm1, %v525_v41 }
  0xe6   : > { %v522_v49 = vpop.f32.mrf.mxu0 }
  0xe7   : > { %v585_v60 = vmul.f32 %v584_v59, %v522_v49 }
  0xe9   : > { %v587_v61 = vmul.f32 %v585_v60, %v585_v60 }
  0xeb   : > { %v546_v62 = vpop.f32.mrf.mxu1 }
  0xec   : > { %v586_v63 = vmul.f32 %v584_v59, %v546_v62 }
  0xee   : > { %v588_v0 = vsub.f32 %v586_v63, %v587_v61 }
  0xf0   : > { %v589_v1 = vadd.f32 1e-05, %v588_v0 }
  0xf2   : > { %758 = vrsqrt.f32 %v589_v1  ;;  %vm596_vm7 = vweird.f32 %v589_v1 }
  0xf8   : > { %v759_v2 = vpop.eup %758 }
  0xf9   : > { %v591_v3 = vmul.f32 %v759_v2, %v589_v1  ;;  %vm597_vm6 = vweird.f32 %v759_v2 }
  0xfa   : > { %vm598_vm8 = vmor %vm596_vm7, %vm597_vm6 }
  0xfb   : > { %v592_v4 = vmul.f32 %v759_v2, %v591_v3 }
  0xfd   : > { %v593_v5 = vmul.f32 0.5, %v592_v4 }
  0xff   : > { %v594_v6 = vsub.f32 1.5, %v593_v5 }
 0x101   : > { %v595_v7 = vmul.f32 %v759_v2, %v594_v6 }
 0x103   : > { %v599_v9 = vsel %vm598_vm8, %v759_v2, %v595_v7 }
 0x104   : > { %v601_v10 = vmul.f32 %v600_v8, %v599_v9 }
 0x106   : > { %v603_v12 = vmul.f32 %v601_v10, %v585_v60  ;;  %605 = vst.msk [vmem:[%s269_s6] sm:$0x1] %vm277_vm0, %v601_v10 }
 0x108   : > { %v604_v13 = vsub.f32 %v602_v11, %v603_v12 }
 0x10a   : > { %606 = vst.msk [vmem:[%s272_s9] sm:$0x1] %vm277_vm0, %v604_v13 }
 0x10b PF: > { %s17_s20 = sadd.s32 1, %s816_s20   ;;  %s1046_s18 = smov %s812_s19 }
 0x10c   : > { %p14_p8 = scmp.ge.s32.totalorder %s17_s20, 4   ;;  %s1047_s19 = smov %s1049_s22 }
 0x10e   :  { %16 = sbr.rel (!%p14_p8) target bundleno = 2 (0x2), region = 91 }
 0x113   :  { %636 = vsyncpa [#allocation5], 1 }
 0x114   :  { %638 = vsyncpa [#allocation5 + $0x1], 1 }

// kernel: _lambda_.13
= control target key start
LH: loop header
LB: loop body
LE: loop exit
PB: predicated region body
PF: predicated region fallthrough
CT: control target
= control target key end

     0   :  { %11 = vsyncpa [#allocation5], 0  ;;  %s1128_s0 = inlined_call_operand.hbm [shape: f32[2,256,64], index: 0, kind: input, shape index: {}]   ;;  %s1129_s1 = inlined_call_operand.vmem [shape: f32[1,64], index: 1, kind: input, shape index: {}]   ;;  %s1130_s2 = inlined_call_operand.vmem [shape: f32[1,64], index: 2, kind: input, shape index: {}]   ;;  %s1131_s3 = inlined_call_operand.vmem [shape: f32[64,64], index: 3, kind: input, shape index: {}]   ;;  %s1132_s4 = inlined_call_operand.vmem [shape: f32[2,1,64], index: 4, kind: output, shape index: {0}]   ;;  %s1133_s5 = inlined_call_operand.vmem [shape: f32[2,1,64], index: 5, kind: output, shape index: {1}]  }
   0x1   :  { %13 = vsyncpa [#allocation5 + $0x1], 0  ;;  %s889_s18 = smov 0   ;;  %s891_s19 = smov 0  }
   0x2   :  { %s893_s20 = smov 0   ;;  %s895_s21 = smov 0  }
   0x3   :  { %s897_s22 = smov 0   ;;  %s899_s23 = smov 0  }
   0x4 LB: > { %s698_s24 = sadd.s32 4294967295, %s854_s23   ;;  %s31_s25 = sadd.s32 1, %s850_s22  ;;  %s854_s23 = sphi %s899_s23, %s19_s23   ;;  %s850_s22 = sphi %s897_s22, %s1140_s22   ;;  %s846_s21 = sphi %s895_s21, %s1139_s21   ;;  %s842_s20 = sphi %s893_s20, %s1138_s20   ;;  %s838_s19 = sphi %s891_s19, %s1137_s19   ;;  %s834_s18 = sphi %s889_s18, %s1136_s18  }
   0x5   : > { %p33_p0 = scmp.ge.s32.totalorder %s31_s25, 2  ;;  %s40_s26 = sadd.s32 1, %s842_s20 }
   0x6   : > { %p47_p1 = scmp.ne.s32.totalorder %s842_s20, %s838_s19  ;;  %p48_p2 = scmp.eq.s32.totalorder %s854_s23, 0 }
   0x7   : > { %s1142_s25 = smov (%p33_p0, %s31_s25), 0  ;;  %p53_p4 = scmp.ne.s32.totalorder %s838_s19, %s834_s18 }
   0x8   : > { %p925_p3 = por %p48_p2, %p47_p1  ;;  %s35_s28 = ssub.s32 %s850_s22, %s1142_s25 }
   0x9   : > { %p54_p5 = scmp.eq.s32.totalorder %s698_s24, 0  ;;  %p38_p6 = scmp.eq.s32.totalorder %s35_s28, 0 }
   0xa   : > { %p718_p8 = scmp.lt.s32.totalorder %s854_s23, 2  ;;  %s201_s6 = sand.u32 1, %s842_s20  }
   0xb   : > { %p932_p7 = por %p54_p5, %p53_p4  ;;  %s711_s7 = sshll.u32 %s850_s22, 8 }
   0xc   : > { %s938_s30 = scalar_select %p38_p6, %s842_s20, %s40_s26  }
   0xd   : > { %s702_s8 = sshll.u32 %s201_s6, 8  ;;  %s212_s11 = scalar_lea.hbm %s1128_s0, %s711_s7 }
   0xe   : > { %s213_s12 = sshll.u32 %s212_s11, 4  ;;  %s205_s13 = scalar_lea.vmem [#allocation4], %s702_s8  ;;  %s214_s12 = int_to_ptr.hbm [resolvable:$true] %s213_s12 }
   0xf   : > { %s215_s14 = sshll.u32 %s205_s13, 4  ;;  %p715_p9 = pnand %p718_p8, %p925_p3  ;;  %s216_s14 = int_to_ptr.vmem [resolvable:$true] %s215_s14 }
  0x10   : > { %p705_p10 = scmp.ge.s32.totalorder %s854_s23, 1  ;;  %p223_p11 = scmp.lt.s32.totalorder %s854_s23, 3 }
  0x11   : > { %s202_s15 = scalar_lea.sflag [#allocation5], %s201_s6  ;;  %s856_s16 = smov 128  }
  0x12   : > { %s857_s17 = smov 8   ;;  %p224_p12 = pnand %p705_p10, %p223_p11 }
  0x13   : > { %717 = dma.hbm_to_vmem [thread:$0]  (!%p715_p9), %s214_s12, 4096, %s216_s14, %s202_s15, %s856_s16, %s856_s16, %s857_s17  }
  0x14   : > { %227 = sbr.rel (%p224_p12) target bundleno = 277 (0x115), region = 36  ;;  %s229_s18 = sand.u32 (!%p224_p12), 1, %s838_s19  }
  0x15   : > { %s706_s24 = sshll.u32 (!%p224_p12), %s229_s18, 8  ;;  %s230_s26 = scalar_lea.sflag (!%p224_p12), [#allocation5], %s229_s18 }
  0x16   : > { %s950_s28 = scalar_lea.vmem (!%p224_p12), [#allocation4], %s706_s24 }
  0x19   : > { %829 = dma.done.wait (%p932_p7), %s230_s26, 4096  }
  0x1a   : > { %831 = vsyncadd (%p932_p7), %s230_s26, 4294963200  ;;  %vm273_vm0 = vcmask 516096   ;;  %v858_v0 = vmov 0.0   ;;  %vm309_vm1 = vcmask 523264   ;;  %v496_v1 = vld [vmem:[%s1131_s3 + $0x38] sm:$0xff]  ;;  %v495_v2 = vld [vmem:[%s1131_s3 + $0x30] sm:$0xff] }
  0x1b   : > { %274 = vst.msk [vmem:[#allocation2] sm:$0x1] %vm273_vm0, %v858_v0  ;;  %509 = vmatpush.msra.mxu0 %v496_v1  ;;  %533 = vmatpush.msra.mxu1 %v496_v1  ;;  %v494_v3 = vld [vmem:[%s1131_s3 + $0x28] sm:$0xff]  ;;  %v491_v4 = vld [vmem:[%s1131_s3 + $0x10] sm:$0xff]  ;;  %v489_v7 = vld [vmem:[%s1131_s3] sm:$0xff]  ;;  %v556_v35 = vsel %vm309_vm1, %v495_v2, 0.0 }
  0x1c   : > { %275 = vst.msk [vmem:[#allocation3] sm:$0x1] %vm273_vm0, %v858_v0  ;;  %v548_v5 = vsel %vm309_vm1, %v491_v4, 0.0  ;;  %v490_v6 = vld [vmem:[%s1131_s3 + $0x8] sm:$0xff]  ;;  %v545_v10 = vsel %vm309_vm1, %v489_v7, 0.0  ;;  %v278_v12 = vld [vmem:[%s950_s28 + $0x10] sm:$0xff] }
  0x1d   : > { %v276_v8 = vld [vmem:[%s950_s28] sm:$0xff]  ;;  %510 = vmatpush.msra.mxu0 %v495_v2  ;;  %534 = vmatpush.msra.mxu1 %v495_v2  ;;  %v546_v9 = vsel %vm309_vm1, %v490_v6, 0.0  ;;  %v277_v11 = vld [vmem:[%s950_s28 + $0x8] sm:$0xff]  ;;  %v279_v13 = vld [vmem:[%s950_s28 + $0x18] sm:$0xff]  ;;  %v313_v19 = vsel %vm309_vm1, %v278_v12, 0.0  ;;  %v554_v30 = vsel %vm309_vm1, %v494_v3, 0.0  ;;  %v385_v51 = vmul.f32 %v278_v12, %v278_v12 }
  0x1e   : > { %v310_v14 = vsel %vm309_vm1, %v276_v8, 0.0  ;;  %v493_v15 = vld [vmem:[%s1131_s3 + $0x20] sm:$0xff]  ;;  %v492_v16 = vld [vmem:[%s1131_s3 + $0x18] sm:$0xff]  ;;  %v547_v17 = vadd.f32 %v546_v9, %v545_v10  ;;  %v311_v18 = vsel %vm309_vm1, %v277_v11, 0.0  ;;  %v315_v24 = vsel %vm309_vm1, %v279_v13, 0.0  ;;  %v281_v26 = vld [vmem:[%s950_s28 + $0x28] sm:$0xff] }
  0x1f   : > { %511 = vmatpush.msra.mxu0 %v494_v3  ;;  %535 = vmatpush.msra.mxu1 %v494_v3  ;;  %v550_v20 = vsel %vm309_vm1, %v492_v16, 0.0  ;;  %v280_v21 = vld [vmem:[%s950_s28 + $0x20] sm:$0xff]  ;;  %v312_v22 = vadd.f32 %v311_v18, %v310_v14  ;;  %v552_v25 = vsel %vm309_vm1, %v493_v15, 0.0  ;;  %v282_v31 = vld [vmem:[%s950_s28 + $0x30] sm:$0xff]  ;;  %v319_v34 = vsel %vm309_vm1, %v281_v26, 0.0  ;;  %v283_v36 = vld [vmem:[%s950_s28 + $0x38] sm:$0xff] }
  0x20   : > { %v549_v23 = vadd.f32 %v548_v5, %v547_v17  ;;  %v317_v29 = vsel %vm309_vm1, %v280_v21, 0.0  ;;  %v321_v39 = vsel %vm309_vm1, %v282_v31, 0.0  ;;  %v558_v40 = vsel %vm309_vm1, %v496_v1, 0.0  ;;  %v284_v41 = vld [vmem:[%s950_s28 + $0x40] sm:$0xff]  ;;  %v285_v45 = vld [vmem:[%s950_s28 + $0x48] sm:$0xff]  ;;  %v286_v52 = vld [vmem:[%s950_s28 + $0x50] sm:$0xff] }
  0x21   : > { %512 = vmatpush.msra.mxu0 %v493_v15  ;;  %536 = vmatpush.msra.mxu1 %v493_v15  ;;  %v314_v27 = vadd.f32 %v313_v19, %v312_v22  ;;  %v323_v44 = vsel %vm309_vm1, %v283_v36, 0.0  ;;  %v383_v47 = vmul.f32 %v276_v8, %v276_v8  ;;  %v384_v48 = vmul.f32 %v277_v11, %v277_v11  ;;  %v287_v56 = vld [vmem:[%s950_s28 + $0x58] sm:$0xff]  ;;  %v288_v0 = vld [vmem:[%s950_s28 + $0x60] sm:$0xff]  ;;  %v290_v12 = vld [vmem:[%s950_s28 + $0x70] sm:$0xff]  ;;  %p263_p13 = scmp.lt.s32.totalorder %s846_s21, 1 }
  0x22   : > { %v551_v28 = vadd.f32 %v550_v20, %v549_v23  ;;  %v325_v50 = vsel %vm309_vm1, %v284_v41, 0.0  ;;  %v386_v54 = vmul.f32 %v279_v13, %v279_v13  ;;  %v327_v55 = vsel %vm309_vm1, %v285_v45, 0.0  ;;  %v291_v18 = vld [vmem:[%s950_s28 + $0x78] sm:$0xff] }
  0x23   : > { %513 = vmatpush.msra.mxu0 %v492_v16  ;;  %537 = vmatpush.msra.mxu1 %v492_v16  ;;  %v316_v32 = vadd.f32 %v315_v24, %v314_v27  ;;  %v387_v58 = vmul.f32 %v280_v21, %v280_v21  ;;  %v415_v59 = vsel %vm309_vm1, %v383_v47, 0.0  ;;  %v416_v60 = vsel %vm309_vm1, %v384_v48, 0.0  ;;  %v292_v24 = vld [vmem:[%s950_s28 + $0x80] sm:$0xff]  ;;  %s1144_s21 = smov (!%p263_p13, %s846_s21), 1 }
  0x24   : > { %v553_v33 = vadd.f32 %v552_v25, %v551_v28  ;;  %v329_v61 = vsel %vm309_vm1, %v286_v52, 0.0  ;;  %v417_v62 = vadd.f32 %v416_v60, %v415_v59  ;;  %v418_v63 = vsel %vm309_vm1, %v385_v51, 0.0  ;;  %v296_v48 = vld [vmem:[%s950_s28 + $0xa0] sm:$0xff]  ;;  %s265_s7 = scalar_lea.vmem %s1132_s4, %s1144_s21  ;;  %s268_s11 = scalar_lea.vmem %s1133_s5, %s1144_s21 }
  0x25   : > { %514 = vmatpush.msra.mxu0 %v491_v4  ;;  %538 = vmatpush.msra.mxu1 %v491_v4  ;;  %v318_v37 = vadd.f32 %v317_v29, %v316_v32  ;;  %v388_v2 = vmul.f32 %v281_v26, %v281_v26  ;;  %v420_v3 = vsel %vm309_vm1, %v386_v54, 0.0  ;;  %v331_v4 = vsel %vm309_vm1, %v287_v56, 0.0 }
  0x26   : > { %v555_v38 = vadd.f32 %v554_v30, %v553_v33  ;;  %v419_v5 = vadd.f32 %v418_v63, %v417_v62  ;;  %v389_v8 = vmul.f32 %v282_v31, %v282_v31  ;;  %v422_v9 = vsel %vm309_vm1, %v387_v58, 0.0  ;;  %v293_v30 = vld [vmem:[%s950_s28 + $0x88] sm:$0xff] }
  0x27   : > { %515 = vmatpush.msra.mxu0 %v490_v6  ;;  %539 = vmatpush.msra.mxu1 %v490_v6  ;;  %v320_v42 = vadd.f32 %v319_v34, %v318_v37  ;;  %v289_v6 = vld [vmem:[%s950_s28 + $0x68] sm:$0xff]  ;;  %v333_v10 = vsel %vm309_vm1, %v288_v0, 0.0  ;;  %v390_v14 = vmul.f32 %v283_v36, %v283_v36  ;;  %v424_v15 = vsel %vm309_vm1, %v388_v2, 0.0  ;;  %v294_v36 = vld [vmem:[%s950_s28 + $0x90] sm:$0xff] }
  0x28   : > { %v557_v43 = vadd.f32 %v556_v35, %v555_v38  ;;  %v421_v11 = vadd.f32 %v420_v3, %v419_v5  ;;  %v335_v16 = vsel %vm309_vm1, %v289_v6, 0.0  ;;  %v391_v20 = vmul.f32 %v284_v41, %v284_v41  ;;  %v299_v3 = vld [vmem:[%s950_s28 + $0xb8] sm:$0xff] }
  0x29   : > { %516 = vmatpush.msra.mxu0 %v489_v7  ;;  %v322_v46 = vadd.f32 %v321_v39, %v320_v42  ;;  %540 = vmatpush.msra.mxu1 %v489_v7  ;;  %v426_v21 = vsel %vm309_vm1, %v389_v8, 0.0  ;;  %v337_v22 = vsel %vm309_vm1, %v290_v12, 0.0  ;;  %v392_v26 = vmul.f32 %v285_v45, %v285_v45  ;;  %v295_v42 = vld [vmem:[%s950_s28 + $0x98] sm:$0xff] }
  0x2a   : > { %v1008_v49 = vadd.f32 %v558_v40, %v557_v43  ;;  %v423_v17 = vadd.f32 %v422_v9, %v421_v11  ;;  %v428_v27 = vsel %vm309_vm1, %v390_v14, 0.0  ;;  %v339_v28 = vsel %vm309_vm1, %v291_v18, 0.0  ;;  %v300_v9 = vld [vmem:[%s950_s28 + $0xc0] sm:$0xff] }
  0x2b   : > { %v324_v53 = vadd.f32 %v323_v44, %v322_v46  ;;  %v393_v32 = vmul.f32 %v286_v52, %v286_v52  ;;  %v430_v33 = vsel %vm309_vm1, %v391_v20, 0.0  ;;  %v341_v34 = vsel %vm309_vm1, %v292_v24, 0.0 }
  0x2c   : > { %v425_v23 = vadd.f32 %v424_v15, %v423_v17  ;;  %v394_v38 = vmul.f32 %v287_v56, %v287_v56  ;;  %v432_v39 = vsel %vm309_vm1, %v392_v26, 0.0  ;;  %v343_v40 = vsel %vm309_vm1, %v293_v30, 0.0  ;;  %v301_v15 = vld [vmem:[%s950_s28 + $0xc8] sm:$0xff] }
  0x2d   : > { %v326_v57 = vadd.f32 %v325_v50, %v324_v53  ;;  %v395_v44 = vmul.f32 %v288_v0, %v288_v0  ;;  %v434_v45 = vsel %vm309_vm1, %v393_v32, 0.0  ;;  %v345_v46 = vsel %vm309_vm1, %v294_v36, 0.0 }
  0x2e   : > { %v427_v29 = vadd.f32 %v426_v21, %v425_v23  ;;  %v396_v51 = vmul.f32 %v289_v6, %v289_v6  ;;  %v436_v52 = vsel %vm309_vm1, %v394_v38, 0.0  ;;  %v347_v53 = vsel %vm309_vm1, %v295_v42, 0.0  ;;  %v302_v21 = vld [vmem:[%s950_s28 + $0xd0] sm:$0xff] }
  0x2f   : > { %v328_v1 = vadd.f32 %v327_v55, %v326_v57  ;;  %v297_v55 = vld [vmem:[%s950_s28 + $0xa8] sm:$0xff]  ;;  %v397_v57 = vmul.f32 %v290_v12, %v290_v12  ;;  %v438_v58 = vsel %vm309_vm1, %v395_v44, 0.0  ;;  %v349_v59 = vsel %vm309_vm1, %v296_v48, 0.0 }
  0x30   : > { %v429_v35 = vadd.f32 %v428_v27, %v427_v29  ;;  %v398_v63 = vmul.f32 %v291_v18, %v291_v18  ;;  %v440_v0 = vsel %vm309_vm1, %v396_v51, 0.0  ;;  %v399_v5 = vmul.f32 %v292_v24, %v292_v24  ;;  %v303_v27 = vld [vmem:[%s950_s28 + $0xd8] sm:$0xff] }
  0x31   : > { %v330_v7 = vadd.f32 %v329_v61, %v328_v1  ;;  %v298_v61 = vld [vmem:[%s950_s28 + $0xb0] sm:$0xff]  ;;  %v351_v1 = vsel %vm309_vm1, %v297_v55, 0.0  ;;  %v442_v6 = vsel %vm309_vm1, %v397_v57, 0.0  ;;  %v400_v11 = vmul.f32 %v293_v30, %v293_v30 }
  0x32   : > { %v431_v41 = vadd.f32 %v430_v33, %v429_v35  ;;  %v444_v12 = vsel %vm309_vm1, %v398_v63, 0.0  ;;  %v401_v17 = vmul.f32 %v294_v36, %v294_v36  ;;  %v446_v18 = vsel %vm309_vm1, %v399_v5, 0.0  ;;  %v304_v33 = vld [vmem:[%s950_s28 + $0xe0] sm:$0xff] }
  0x33   : > { %v332_v13 = vadd.f32 %v331_v4, %v330_v7  ;;  %v353_v7 = vsel %vm309_vm1, %v298_v61, 0.0  ;;  %v402_v23 = vmul.f32 %v295_v42, %v295_v42  ;;  %v448_v24 = vsel %vm309_vm1, %v400_v11, 0.0 }
  0x34   : > { %v433_v47 = vadd.f32 %v432_v39, %v431_v41  ;;  %v403_v29 = vmul.f32 %v296_v48, %v296_v48  ;;  %v450_v30 = vsel %vm309_vm1, %v401_v17, 0.0  ;;  %v404_v35 = vmul.f32 %v297_v55, %v297_v55  ;;  %v305_v39 = vld [vmem:[%s950_s28 + $0xe8] sm:$0xff] }
  0x35   : > { %v334_v19 = vadd.f32 %v333_v10, %v332_v13  ;;  %v355_v13 = vsel %vm309_vm1, %v299_v3, 0.0  ;;  %v452_v36 = vsel %vm309_vm1, %v402_v23, 0.0  ;;  %v405_v41 = vmul.f32 %v298_v61, %v298_v61 }
  0x36   : > { %v435_v54 = vadd.f32 %v434_v45, %v433_v47  ;;  %v454_v42 = vsel %vm309_vm1, %v403_v29, 0.0  ;;  %v306_v45 = vld [vmem:[%s950_s28 + $0xf0] sm:$0xff]  ;;  %v406_v47 = vmul.f32 %v299_v3, %v299_v3  ;;  %v456_v48 = vsel %vm309_vm1, %v404_v35, 0.0 }
  0x37   : > { %v336_v25 = vadd.f32 %v335_v16, %v334_v19  ;;  %v357_v19 = vsel %vm309_vm1, %v300_v9, 0.0  ;;  %v458_v55 = vsel %vm309_vm1, %v405_v41, 0.0 }
  0x38   : > { %v437_v60 = vadd.f32 %v436_v52, %v435_v54  ;;  %v307_v52 = vld [vmem:[%s950_s28 + $0xf8] sm:$0xff]  ;;  %v407_v54 = vmul.f32 %v300_v9, %v300_v9 }
  0x39   : > { %v338_v31 = vadd.f32 %v337_v22, %v336_v25  ;;  %v359_v25 = vsel %vm309_vm1, %v301_v15, 0.0  ;;  %v371_v61 = vsel %vm309_vm1, %v307_v52, 0.0 }
  0x3a   : > { %v439_v2 = vadd.f32 %v438_v58, %v437_v60  ;;  %v460_v60 = vsel %vm309_vm1, %v406_v47, 0.0 }
  0x3b   : > { %v340_v37 = vadd.f32 %v339_v28, %v338_v31  ;;  %v361_v31 = vsel %vm309_vm1, %v302_v21, 0.0 }
  0x3c   : > { %v441_v8 = vadd.f32 %v440_v0, %v439_v2  ;;  %v409_v0 = vmul.f32 %v302_v21, %v302_v21 }
  0x3d   : > { %v342_v43 = vadd.f32 %v341_v34, %v340_v37  ;;  %v363_v37 = vsel %vm309_vm1, %v303_v27, 0.0 }
  0x3e   : > { %v443_v14 = vadd.f32 %v442_v6, %v441_v8  ;;  %v411_v8 = vmul.f32 %v304_v33, %v304_v33  ;;  %v466_v9 = vsel %vm309_vm1, %v409_v0, 0.0 }
  0x3f   : > { %v344_v50 = vadd.f32 %v343_v40, %v342_v43  ;;  %v365_v43 = vsel %vm309_vm1, %v304_v33, 0.0 }
  0x40   : > { %v445_v20 = vadd.f32 %v444_v12, %v443_v14  ;;  %v412_v12 = vmul.f32 %v305_v39, %v305_v39  ;;  %v470_v17 = vsel %vm309_vm1, %v411_v8, 0.0  ;;  %v596_v8 = vld [vmem:[%s1129_s1] sm:$0x1] }
  0x41   : > { %v346_v56 = vadd.f32 %v345_v46, %v344_v50  ;;  %v367_v50 = vsel %vm309_vm1, %v305_v39, 0.0 }
  0x42   : > { %v447_v26 = vadd.f32 %v446_v18, %v445_v20  ;;  %v414_v20 = vmul.f32 %v307_v52, %v307_v52  ;;  %v472_v21 = vsel %vm309_vm1, %v412_v12, 0.0 }
  0x43   : > { %v348_v62 = vadd.f32 %v347_v53, %v346_v56  ;;  %v369_v56 = vsel %vm309_vm1, %v306_v45, 0.0 }
  0x44   : > { %v449_v32 = vadd.f32 %v448_v24, %v447_v26 }
  0x45   : > { %v350_v4 = vadd.f32 %v349_v59, %v348_v62  ;;  %v408_v59 = vmul.f32 %v301_v15, %v301_v15 }
  0x46   : > { %v451_v38 = vadd.f32 %v450_v30, %v449_v32 }
  0x47   : > { %v352_v10 = vadd.f32 %v351_v1, %v350_v4  ;;  %v462_v1 = vsel %vm309_vm1, %v407_v54, 0.0  ;;  %v410_v4 = vmul.f32 %v303_v27, %v303_v27  ;;  %v464_v5 = vsel %vm309_vm1, %v408_v59, 0.0 }
  0x48   : > { %v453_v44 = vadd.f32 %v452_v36, %v451_v38  ;;  %v382_v38 = vld [vmem:[#allocation3] sm:$0x1] }
  0x49   : > { %v354_v16 = vadd.f32 %v353_v7, %v352_v10 }
  0x4a   : > { %v455_v51 = vadd.f32 %v454_v42, %v453_v44  ;;  %v560_v42 = vrot.slane %v1008_v49, 4 }
  0x4b   : > { %v356_v22 = vadd.f32 %v355_v13, %v354_v16  ;;  %v468_v13 = vsel %vm309_vm1, %v410_v4, 0.0  ;;  %v413_v16 = vmul.f32 %v306_v45, %v306_v45 }
  0x4c   : > { %v457_v57 = vadd.f32 %v456_v48, %v455_v51 }
  0x4d   : > { %v358_v28 = vadd.f32 %v357_v19, %v356_v22  ;;  %v474_v24 = vsel %vm309_vm1, %v413_v16, 0.0 }
  0x4e   : > { %v459_v62 = vadd.f32 %v458_v55, %v457_v57 }
  0x4f   : > { %v360_v34 = vadd.f32 %v359_v25, %v358_v28  ;;  %v308_v25 = vld [vmem:[#allocation2] sm:$0x1]  ;;  %v476_v28 = vsel %vm309_vm1, %v414_v20, 0.0 }
  0x50   : > { %v461_v2 = vadd.f32 %v460_v60, %v459_v62 }
  0x51   : > { %v362_v40 = vadd.f32 %v361_v31, %v360_v34 }
  0x52   : > { %v463_v6 = vadd.f32 %v462_v1, %v461_v2 }
  0x53   : > { %v364_v46 = vadd.f32 %v363_v37, %v362_v40 }
  0x54   : > { %v465_v10 = vadd.f32 %v464_v5, %v463_v6 }
  0x55   : > { %v366_v53 = vadd.f32 %v365_v43, %v364_v46  ;;  %v561_v43 = vadd.f32 %v560_v42, %v1008_v49 }
  0x56   : > { %v467_v14 = vadd.f32 %v466_v9, %v465_v10 }
  0x57   : > { %v368_v58 = vadd.f32 %v367_v50, %v366_v53  ;;  %v562_v44 = vrot.slane %v561_v43, 2 }
  0x58   : > { %v469_v18 = vadd.f32 %v468_v13, %v467_v14 }
  0x59   : > { %v370_v63 = vadd.f32 %v369_v56, %v368_v58  ;;  %v563_v45 = vadd.f32 %v562_v44, %v561_v43 }
  0x5a   : > { %v471_v22 = vadd.f32 %v470_v17, %v469_v18 }
  0x5b   : > { %v372_v3 = vadd.f32 %v371_v61, %v370_v63  ;;  %v564_v46 = vrot.slane %v563_v45, 1 }
  0x5c   : > { %v473_v26 = vadd.f32 %v472_v21, %v471_v22 }
  0x5d   : > { %v373_v7 = vrot.slane %v372_v3, 4  ;;  %v565_v47 = vadd.f32 %v564_v46, %v563_v45 }
  0x5e   : > { %v475_v29 = vadd.f32 %v474_v24, %v473_v26 }
  0x5f   : > { %v374_v11 = vadd.f32 %v373_v7, %v372_v3  ;;  %v566_v48 = vmul.f32 256.0, %v565_v47 }
  0x60   : > { %v477_v31 = vadd.f32 %v476_v28, %v475_v29 }
  0x61   : > { %v375_v15 = vrot.slane %v374_v11, 2  ;;  %770 = vrcp.f32 %v566_v48  ;;  %vm572_vm2 = vweird.f32 %v566_v48  ;;  %v578_v54 = vand.u32 2147483648, %v566_v48 }
  0x62   : > { %v478_v32 = vrot.slane %v477_v31, 4  ;;  %v576_v56 = vand.u32 2147483647, %v566_v48 }
  0x63   : > { %v376_v19 = vadd.f32 %v375_v15, %v374_v11  ;;  %v579_v57 = vor.u32 1.1754944e-38, %v578_v54  ;;  %v598_v11 = vld [vmem:[%s1130_s2] sm:$0x1] }
  0x64   : > { %v479_v33 = vadd.f32 %v478_v32, %v477_v31  ;;  %vm577_vm5 = vcmp.eq.f32.partialorder %v576_v56, 8.507059e+37 }
  0x65   : > { %v377_v23 = vrot.slane %v376_v19, 1 }
  0x66   : > { %v480_v34 = vrot.slane %v479_v33, 2 }
  0x67   : > { %v378_v27 = vadd.f32 %v377_v23, %v376_v19  ;;  %v771_v50 = vpop.eup %770 }
  0x68   : > { %v481_v36 = vadd.f32 %v480_v34, %v479_v33  ;;  %v568_v51 = vmul.f32 %v771_v50, %v566_v48  ;;  %vm573_vm3 = vweird.f32 %v771_v50 }
  0x69   : > { %v379_v30 = vadd.f32 %v378_v27, %v308_v25  ;;  %vm574_vm4 = vmor %vm572_vm2, %vm573_vm3 }
  0x6a   : > { %v482_v37 = vrot.slane %v481_v36, 1  ;;  %v569_v52 = vsub.f32 1.0, %v568_v51 }
  0x6b   : > { %381 = vst.msk [vmem:[#allocation2] sm:$0x1] %vm273_vm0, %v379_v30 }
  0x6c   : > { %v483_v39 = vadd.f32 %v482_v37, %v481_v36  ;;  %v570_v53 = vmul.f32 %v771_v50, %v569_v52 }
  0x6e   : > { %v484_v40 = vadd.f32 %v483_v39, %v382_v38  ;;  %v571_v55 = vadd.f32 %v771_v50, %v570_v53 }
  0x70   : > { %485 = vst.msk [vmem:[#allocation3] sm:$0x1] %vm273_vm0, %v484_v40  ;;  %v575_v58 = vsel %vm574_vm4, %v771_v50, %v571_v55 }
  0x71   : > { %v580_v59 = vsel %vm577_vm5, %v579_v57, %v575_v58 }
  0x72   : > { %v497_v35 = vld [vmem:[#allocation2] sm:$0x1] }
  0x73   : > { %707 = vmatmul.msk.f32.vlgmr.msra.gmra.mxu0 %vm309_vm1, %v497_v35 }
  0x77   : > { %v521_v41 = vld [vmem:[#allocation3] sm:$0x1] }
  0x78   : > { %708 = vmatmul.msk.f32.vlgmr.msra.gmra.mxu1 %vm309_vm1, %v521_v41 }
  0xf0   : > { %v518_v49 = vpop.f32.mrf.mxu0 }
  0xf1   : > { %v581_v60 = vmul.f32 %v580_v59, %v518_v49 }
  0xf3   : > { %v583_v61 = vmul.f32 %v581_v60, %v581_v60 }
  0xf5   : > { %v542_v62 = vpop.f32.mrf.mxu1 }
  0xf6   : > { %v582_v63 = vmul.f32 %v580_v59, %v542_v62 }
  0xf8   : > { %v584_v0 = vsub.f32 %v582_v63, %v583_v61 }
  0xfa   : > { %v585_v1 = vadd.f32 1e-05, %v584_v0 }
  0xfc   : > { %772 = vrsqrt.f32 %v585_v1  ;;  %vm592_vm7 = vweird.f32 %v585_v1 }
 0x102   : > { %v773_v2 = vpop.eup %772 }
 0x103   : > { %v587_v3 = vmul.f32 %v773_v2, %v585_v1  ;;  %vm593_vm6 = vweird.f32 %v773_v2 }
 0x104   : > { %vm594_vm8 = vmor %vm592_vm7, %vm593_vm6 }
 0x105   : > { %v588_v4 = vmul.f32 %v773_v2, %v587_v3 }
 0x107   : > { %v589_v5 = vmul.f32 0.5, %v588_v4 }
 0x109   : > { %v590_v6 = vsub.f32 1.5, %v589_v5 }
 0x10b   : > { %v591_v7 = vmul.f32 %v773_v2, %v590_v6 }
 0x10d   : > { %v595_v9 = vsel %vm594_vm8, %v773_v2, %v591_v7 }
 0x10e   : > { %v597_v10 = vmul.f32 %v596_v8, %v595_v9 }
 0x110   : > { %v599_v12 = vmul.f32 %v597_v10, %v581_v60  ;;  %601 = vst.msk [vmem:[%s265_s7] sm:$0x1] %vm273_vm0, %v597_v10 }
 0x112   : > { %v600_v13 = vsub.f32 %v598_v11, %v599_v12 }
 0x114   : > { %602 = vst.msk [vmem:[%s268_s11] sm:$0x1] %vm273_vm0, %v600_v13 }
 0x115 PF: > { %s19_s23 = sadd.s32 1, %s854_s23   ;;  %s1136_s18 = smov %s838_s19 }
 0x116   : > { %p16_p0 = scmp.ge.s32.totalorder %s19_s23, 4   ;;  %s1137_s19 = smov %s842_s20 }
 0x117   : > { %s1138_s20 = smov %s938_s30  ;;  %s1139_s21 = smov %s850_s22 }
 0x118   : > { %s1140_s22 = smov %s1142_s25  ;;  %18 = sbr.rel (!%p16_p0) target bundleno = 4 (0x4), region = 96 }
 0x11d   :  { %632 = vsyncpa [#allocation5], 1 }
 0x11e   :  { %634 = vsyncpa [#allocation5 + $0x1], 1 }

// kernel: _lambda_.18
= control target key start
LH: loop header
LB: loop body
LE: loop exit
PB: predicated region body
PF: predicated region fallthrough
CT: control target
= control target key end

     0   :  { %s630_s18 = smov 0   ;;  %s632_s19 = smov 0   ;;  %s747_s0 = inlined_call_operand.vmem [shape: f32[2,64,64], index: 0, kind: input, shape index: {}]   ;;  %s748_s1 = inlined_call_operand.vmem [shape: f32[1,64], index: 1, kind: input, shape index: {}]   ;;  %s749_s2 = inlined_call_operand.vmem [shape: f32[1,64], index: 2, kind: input, shape index: {}]   ;;  %s750_s3 = inlined_call_operand.vmem [shape: f32[64,64], index: 3, kind: input, shape index: {}]   ;;  %s751_s4 = inlined_call_operand.vmem [shape: f32[2,1,64], index: 4, kind: output, shape index: {0}]   ;;  %s752_s5 = inlined_call_operand.vmem [shape: f32[2,1,64], index: 5, kind: output, shape index: {1}]  }
   0x1   :  { %s634_s20 = smov 0  }
   0x2 LB: > { %s28_s21 = sadd.s32 1, %s593_s19  ;;  %p538_p0 = scmp.ge.s32.totalorder %s597_s20, 1  ;;  %s597_s20 = sphi %s634_s20, %s16_s20   ;;  %s593_s19 = sphi %s632_s19, %s754_s19   ;;  %s589_s18 = sphi %s630_s18, %s753_s18  }
   0x3   : > { %p30_p1 = scmp.ge.s32.totalorder %s28_s21, 2  ;;  %p209_p2 = scmp.lt.s32.totalorder %s597_s20, 3 }
   0x5   : > { %s756_s21 = smov (%p30_p1, %s28_s21), 0  ;;  %p210_p3 = pnand %p538_p0, %p209_p2 }
   0x6   : > { %p243_p4 = scmp.lt.s32.totalorder (!%p210_p3), %s589_s18, 1 }
   0x7   : > { %213 = sbr.rel (%p210_p3) target bundleno = 214 (0xd6), region = 36 }
   0xc   : > { %vm274_vm0 = vcmask 523264   ;;  %v341_v0 = vld [vmem:[%s750_s3 + $0x38] sm:$0xff]  ;;  %v340_v1 = vld [vmem:[%s750_s3 + $0x30] sm:$0xff]  ;;  %v339_v2 = vld [vmem:[%s750_s3 + $0x28] sm:$0xff]  ;;  %vm262_vm1 = vcmask 516096   ;;  %s758_s18 = smov (!%p243_p4, %s589_s18), 1 }
   0xd   : > { %354 = vmatpush.msra.mxu0 %v341_v0  ;;  %v658_v3 = vsel %vm274_vm0, %v341_v0, 0.0  ;;  %v401_v4 = vsel %vm274_vm0, %v340_v1, 0.0  ;;  %378 = vmatpush.msra.mxu1 %v341_v0  ;;  %v399_v5 = vsel %vm274_vm0, %v339_v2, 0.0  ;;  %v338_v6 = vld [vmem:[%s750_s3 + $0x20] sm:$0xff]  ;;  %v337_v7 = vld [vmem:[%s750_s3 + $0x18] sm:$0xff]  ;;  %v336_v8 = vld [vmem:[%s750_s3 + $0x10] sm:$0xff]  ;;  %s254_s25 = scalar_lea.vmem %s751_s4, %s758_s18  ;;  %s257_s30 = scalar_lea.vmem %s752_s5, %s758_s18 }
   0xe   : > { %v397_v9 = vsel %vm274_vm0, %v338_v6, 0.0  ;;  %v395_v10 = vsel %vm274_vm0, %v337_v7, 0.0  ;;  %v393_v11 = vsel %vm274_vm0, %v336_v8, 0.0  ;;  %v335_v12 = vld [vmem:[%s750_s3 + $0x8] sm:$0xff]  ;;  %v334_v13 = vld [vmem:[%s750_s3] sm:$0xff]  ;;  %s545_s13 = sshll.u32 %s758_s18, 6 }
   0xf   : > { %355 = vmatpush.msra.mxu0 %v340_v1  ;;  %379 = vmatpush.msra.mxu1 %v340_v1  ;;  %v391_v14 = vsel %vm274_vm0, %v335_v12, 0.0  ;;  %v390_v15 = vsel %vm274_vm0, %v334_v13, 0.0  ;;  %v599_v17 = vmov 0.0   ;;  %s690_s16 = scalar_lea.vmem %s747_s0, %s545_s13 }
  0x10   : > { %v392_v16 = vadd.f32 %v391_v14, %v390_v15  ;;  %263 = vst.msk [vmem:[#allocation2] sm:$0x1] %vm262_vm1, %v599_v17  ;;  %v265_v19 = vld [vmem:[%s690_s16] sm:$0xff]  ;;  %v266_v20 = vld [vmem:[%s690_s16 + $0x8] sm:$0xff]  ;;  %v267_v21 = vld [vmem:[%s690_s16 + $0x10] sm:$0xff] }
  0x11   : > { %356 = vmatpush.msra.mxu0 %v339_v2  ;;  %380 = vmatpush.msra.mxu1 %v339_v2  ;;  %264 = vst.msk [vmem:[#allocation3] sm:$0x1] %vm262_vm1, %v599_v17  ;;  %v268_v22 = vld [vmem:[%s690_s16 + $0x18] sm:$0xff]  ;;  %v275_v23 = vsel %vm274_vm0, %v265_v19, 0.0  ;;  %v276_v24 = vsel %vm274_vm0, %v266_v20, 0.0  ;;  %v278_v25 = vsel %vm274_vm0, %v267_v21, 0.0  ;;  %v300_v26 = vmul.f32 %v265_v19, %v265_v19 }
  0x12   : > { %v394_v18 = vadd.f32 %v393_v11, %v392_v16  ;;  %v269_v28 = vld [vmem:[%s690_s16 + $0x20] sm:$0xff]  ;;  %v277_v29 = vadd.f32 %v276_v24, %v275_v23  ;;  %v280_v30 = vsel %vm274_vm0, %v268_v22, 0.0  ;;  %v301_v31 = vmul.f32 %v266_v20, %v266_v20  ;;  %v270_v33 = vld [vmem:[%s690_s16 + $0x28] sm:$0xff]  ;;  %v271_v40 = vld [vmem:[%s690_s16 + $0x30] sm:$0xff] }
  0x13   : > { %357 = vmatpush.msra.mxu0 %v338_v6  ;;  %381 = vmatpush.msra.mxu1 %v338_v6  ;;  %v302_v35 = vmul.f32 %v267_v21, %v267_v21  ;;  %v303_v36 = vmul.f32 %v268_v22, %v268_v22  ;;  %v282_v37 = vsel %vm274_vm0, %v269_v28, 0.0  ;;  %v308_v38 = vsel %vm274_vm0, %v300_v26, 0.0  ;;  %v272_v48 = vld [vmem:[%s690_s16 + $0x38] sm:$0xff] }
  0x14   : > { %v396_v27 = vadd.f32 %v395_v10, %v394_v18  ;;  %v279_v34 = vadd.f32 %v278_v25, %v277_v29  ;;  %v304_v42 = vmul.f32 %v269_v28, %v269_v28  ;;  %v309_v43 = vsel %vm274_vm0, %v301_v31, 0.0 }
  0x15   : > { %358 = vmatpush.msra.mxu0 %v337_v7  ;;  %382 = vmatpush.msra.mxu1 %v337_v7  ;;  %v284_v44 = vsel %vm274_vm0, %v270_v33, 0.0  ;;  %v310_v45 = vadd.f32 %v309_v43, %v308_v38  ;;  %v311_v46 = vsel %vm274_vm0, %v302_v35, 0.0  ;;  %v305_v50 = vmul.f32 %v270_v33, %v270_v33 }
  0x16   : > { %v398_v32 = vadd.f32 %v397_v9, %v396_v27  ;;  %v281_v41 = vadd.f32 %v280_v30, %v279_v34  ;;  %v313_v51 = vsel %vm274_vm0, %v303_v36, 0.0  ;;  %v286_v52 = vsel %vm274_vm0, %v271_v40, 0.0 }
  0x17   : > { %359 = vmatpush.msra.mxu0 %v336_v8  ;;  %383 = vmatpush.msra.mxu1 %v336_v8  ;;  %v312_v53 = vadd.f32 %v311_v46, %v310_v45  ;;  %v306_v56 = vmul.f32 %v271_v40, %v271_v40  ;;  %v315_v57 = vsel %vm274_vm0, %v304_v42, 0.0  ;;  %v288_v58 = vsel %vm274_vm0, %v272_v48, 0.0 }
  0x18   : > { %v400_v39 = vadd.f32 %v399_v5, %v398_v32  ;;  %v283_v49 = vadd.f32 %v282_v37, %v281_v41  ;;  %v307_v61 = vmul.f32 %v272_v48, %v272_v48  ;;  %v317_v62 = vsel %vm274_vm0, %v305_v50, 0.0  ;;  %v299_v19 = vld [vmem:[#allocation3] sm:$0x1] }
  0x19   : > { %360 = vmatpush.msra.mxu0 %v335_v12  ;;  %384 = vmatpush.msra.mxu1 %v335_v12  ;;  %v314_v59 = vadd.f32 %v313_v51, %v312_v53  ;;  %v319_v1 = vsel %vm274_vm0, %v306_v56, 0.0 }
  0x1a   : > { %v402_v47 = vadd.f32 %v401_v4, %v400_v39  ;;  %v285_v55 = vadd.f32 %v284_v44, %v283_v49  ;;  %v321_v5 = vsel %vm274_vm0, %v307_v61, 0.0 }
  0x1b   : > { %361 = vmatpush.msra.mxu0 %v334_v13  ;;  %385 = vmatpush.msra.mxu1 %v334_v13  ;;  %v316_v63 = vadd.f32 %v315_v57, %v314_v59  ;;  %v273_v13 = vld [vmem:[#allocation2] sm:$0x1] }
  0x1c   : > { %v404_v54 = vadd.f32 %v658_v3, %v402_v47  ;;  %v287_v60 = vadd.f32 %v286_v52, %v285_v55  ;;  %v443_v57 = vld [vmem:[%s749_s2] sm:$0x1] }
  0x1d   : > { %v318_v2 = vadd.f32 %v317_v62, %v316_v63 }
  0x1e   : > { %v289_v0 = vadd.f32 %v288_v58, %v287_v60  ;;  %v405_v24 = vrot.slane %v404_v54, 4 }
  0x1f   : > { %v320_v3 = vadd.f32 %v319_v1, %v318_v2 }
  0x20   : > { %v290_v4 = vrot.slane %v289_v0, 4  ;;  %v406_v25 = vadd.f32 %v405_v24, %v404_v54  ;;  %v441_v54 = vld [vmem:[%s748_s1] sm:$0x1] }
  0x21   : > { %v322_v7 = vadd.f32 %v321_v5, %v320_v3 }
  0x22   : > { %v291_v6 = vadd.f32 %v290_v4, %v289_v0  ;;  %v407_v26 = vrot.slane %v406_v25, 2 }
  0x23   : > { %v323_v9 = vrot.slane %v322_v7, 4 }
  0x24   : > { %v292_v8 = vrot.slane %v291_v6, 2  ;;  %v408_v27 = vadd.f32 %v407_v26, %v406_v25 }
  0x25   : > { %v324_v11 = vadd.f32 %v323_v9, %v322_v7 }
  0x26   : > { %v293_v10 = vadd.f32 %v292_v8, %v291_v6  ;;  %v409_v28 = vrot.slane %v408_v27, 1 }
  0x27   : > { %v325_v14 = vrot.slane %v324_v11, 2 }
  0x28   : > { %v294_v12 = vrot.slane %v293_v10, 1  ;;  %v410_v29 = vadd.f32 %v409_v28, %v408_v27 }
  0x29   : > { %v326_v16 = vadd.f32 %v325_v14, %v324_v11 }
  0x2a   : > { %v295_v15 = vadd.f32 %v294_v12, %v293_v10  ;;  %v411_v30 = vmul.f32 64.0, %v410_v29 }
  0x2b   : > { %v327_v18 = vrot.slane %v326_v16, 1 }
  0x2c   : > { %v296_v17 = vadd.f32 %v295_v15, %v273_v13  ;;  %571 = vrcp.f32 %v411_v30  ;;  %vm417_vm2 = vweird.f32 %v411_v30  ;;  %v423_v35 = vand.u32 2147483648, %v411_v30 }
  0x2d   : > { %v328_v20 = vadd.f32 %v327_v18, %v326_v16  ;;  %v421_v37 = vand.u32 2147483647, %v411_v30 }
  0x2e   : > { %298 = vst.msk [vmem:[#allocation2] sm:$0x1] %vm262_vm1, %v296_v17  ;;  %v424_v38 = vor.u32 1.1754944e-38, %v423_v35 }
  0x2f   : > { %v329_v21 = vadd.f32 %v328_v20, %v299_v19  ;;  %vm422_vm5 = vcmp.eq.f32.partialorder %v421_v37, 8.507059e+37 }
  0x31   : > { %330 = vst.msk [vmem:[#allocation3] sm:$0x1] %vm262_vm1, %v329_v21 }
  0x32   : > { %v572_v31 = vpop.eup %571 }
  0x33   : > { %v413_v32 = vmul.f32 %v572_v31, %v411_v30  ;;  %vm418_vm3 = vweird.f32 %v572_v31 }
  0x34   : > { %vm419_vm4 = vmor %vm417_vm2, %vm418_vm3 }
  0x35   : > { %v342_v22 = vld [vmem:[#allocation2] sm:$0x1]  ;;  %v414_v33 = vsub.f32 1.0, %v413_v32 }
  0x36   : > { %541 = vmatmul.msk.f32.vlgmr.msra.gmra.mxu0 %vm274_vm0, %v342_v22 }
  0x37   : > { %v415_v34 = vmul.f32 %v572_v31, %v414_v33 }
  0x38   : > { %v366_v23 = vld [vmem:[#allocation3] sm:$0x1] }
  0x39   : > { %542 = vmatmul.msk.f32.vlgmr.msra.gmra.mxu1 %vm274_vm0, %v366_v23  ;;  %v416_v36 = vadd.f32 %v572_v31, %v415_v34 }
  0x3b   : > { %v420_v39 = vsel %vm419_vm4, %v572_v31, %v416_v36 }
  0x3c   : > { %v425_v40 = vsel %vm422_vm5, %v424_v38, %v420_v39 }
  0xb3   : > { %v363_v41 = vpop.f32.mrf.mxu0 }
  0xb4   : > { %v426_v42 = vmul.f32 %v425_v40, %v363_v41 }
  0xb6   : > { %v428_v43 = vmul.f32 %v426_v42, %v426_v42  ;;  %v387_v44 = vpop.f32.mrf.mxu1 }
  0xb7   : > { %v427_v45 = vmul.f32 %v425_v40, %v387_v44 }
  0xb9   : > { %v429_v46 = vsub.f32 %v427_v45, %v428_v43 }
  0xbb   : > { %v430_v47 = vadd.f32 1e-05, %v429_v46 }
  0xbd   : > { %573 = vrsqrt.f32 %v430_v47  ;;  %vm437_vm7 = vweird.f32 %v430_v47 }
  0xc3   : > { %v574_v48 = vpop.eup %573 }
  0xc4   : > { %v432_v49 = vmul.f32 %v574_v48, %v430_v47  ;;  %vm438_vm6 = vweird.f32 %v574_v48 }
  0xc5   : > { %vm439_vm8 = vmor %vm437_vm7, %vm438_vm6 }
  0xc6   : > { %v433_v50 = vmul.f32 %v574_v48, %v432_v49 }
  0xc8   : > { %v434_v51 = vmul.f32 0.5, %v433_v50 }
  0xca   : > { %v435_v52 = vsub.f32 1.5, %v434_v51 }
  0xcc   : > { %v436_v53 = vmul.f32 %v574_v48, %v435_v52 }
  0xce   : > { %v440_v55 = vsel %vm439_vm8, %v574_v48, %v436_v53 }
  0xcf   : > { %v442_v56 = vmul.f32 %v441_v54, %v440_v55 }
  0xd1   : > { %v444_v58 = vmul.f32 %v442_v56, %v426_v42  ;;  %446 = vst.msk [vmem:[%s254_s25] sm:$0x1] %vm262_vm1, %v442_v56 }
  0xd3   : > { %v445_v59 = vsub.f32 %v443_v57, %v444_v58 }
  0xd5   : > { %447 = vst.msk [vmem:[%s257_s30] sm:$0x1] %vm262_vm1, %v445_v59 }
  0xd6 PF: > { %s16_s20 = sadd.s32 1, %s597_s20   ;;  %s753_s18 = smov %s593_s19 }
  0xd7   : > { %p13_p5 = scmp.ge.s32.totalorder %s16_s20, 4   ;;  %s754_s19 = smov %s756_s21 }
  0xd9   :  { %15 = sbr.rel (!%p13_p5) target bundleno = 2 (0x2), region = 86 }

// kernel: _lambda_.14
= control target key start
LH: loop header
LB: loop body
LE: loop exit
PB: predicated region body
PF: predicated region fallthrough
CT: control target
= control target key end

     0   :  { %s702_s15 = smov 0   ;;  %s704_s16 = smov 0   ;;  %s835_s0 = inlined_call_operand.vmem [shape: f32[2,64,64], index: 0, kind: input, shape index: {}]   ;;  %s836_s1 = inlined_call_operand.vmem [shape: f32[2,1,64], index: 1, kind: input, shape index: {}]   ;;  %s837_s2 = inlined_call_operand.vmem [shape: f32[2,1,64], index: 2, kind: input, shape index: {}]   ;;  %s838_s3 = inlined_call_operand.vmem [shape: bf16[64,256], index: 3, kind: input, shape index: {}]   ;;  %s839_s4 = inlined_call_operand.vmem [shape: f32[2,64,256], index: 4, kind: output, shape index: {}]  }
   0x1   :  { %s706_s17 = smov 0  }
   0x2 LB: > { %s26_s18 = sadd.s32 1, %s671_s16  ;;  %p562_p0 = scmp.ge.s32.totalorder %s675_s17, 1  ;;  %s675_s17 = sphi %s706_s17, %s14_s17   ;;  %s671_s16 = sphi %s704_s16, %s841_s16   ;;  %s667_s15 = sphi %s702_s15, %s840_s15  }
   0x3   : > { %p28_p1 = scmp.ge.s32.totalorder %s26_s18, 2  ;;  %p199_p2 = scmp.lt.s32.totalorder %s675_s17, 3 }
   0x5   : > { %s843_s18 = smov (%p28_p1, %s26_s18), 0  ;;  %p200_p3 = pnand %p562_p0, %p199_p2 }
   0x6   : > { %p241_p4 = scmp.lt.s32.totalorder (!%p200_p3), %s667_s15, 1 }
   0x7   : > { %203 = sbr.rel (%p200_p3) target bundleno = 188 (0xbc), region = 36 }
   0xc   : > { %v593_v0 = vld [vmem:[%s838_s3 + $0x30] sm:$0xf]  ;;  %v618_v1 = vld [vmem:[%s838_s3 + $0x34] sm:$0xf0]  ;;  %v617_v2 = vld [vmem:[%s838_s3 + $0x34] sm:$0xf] }
   0xd   : > { %v594_v3 = vor.u32 %v618_v1, %v593_v0  ;;  %v595_v4 = vld [vmem:[%s838_s3 + $0x38] sm:$0xf0]  ;;  %v585_v5 = vld [vmem:[%s838_s3 + $0x20] sm:$0xf]  ;;  %v616_v6 = vld [vmem:[%s838_s3 + $0x24] sm:$0xf0] }
   0xe   : > { %v598_v7 = vor.u32 %v617_v2, %v595_v4  ;;  %v615_v8 = vld [vmem:[%s838_s3 + $0x24] sm:$0xf]  ;;  %v587_v9 = vld [vmem:[%s838_s3 + $0x28] sm:$0xf0]  ;;  %v586_v10 = vor.u32 %v616_v6, %v585_v5  ;;  %v577_v12 = vld [vmem:[%s838_s3 + $0x10] sm:$0xf] }
   0xf   : > { %377 = vmatpush.bf16.msra.mxu0 %v594_v3  ;;  %619 = vmatpush.bf16.msra.mxu2 %v594_v3  ;;  %v590_v11 = vor.u32 %v615_v8, %v587_v9  ;;  %v614_v13 = vld [vmem:[%s838_s3 + $0x14] sm:$0xf0]  ;;  %v613_v14 = vld [vmem:[%s838_s3 + $0x14] sm:$0xf]  ;;  %v579_v15 = vld [vmem:[%s838_s3 + $0x18] sm:$0xf0] }
  0x10   : > { %406 = vmatpush.bf16.msra.mxu1 %v598_v7  ;;  %623 = vmatpush.bf16.msra.mxu3 %v598_v7  ;;  %v578_v16 = vor.u32 %v614_v13, %v577_v12  ;;  %s845_s15 = smov (!%p241_p4, %s667_s15), 1  ;;  %v582_v17 = vor.u32 %v613_v14, %v579_v15  ;;  %v569_v18 = vld [vmem:[%s838_s3] sm:$0xf]  ;;  %v612_v19 = vld [vmem:[%s838_s3 + $0x4] sm:$0xf0]  ;;  %vm360_vm0 = vcmask 523264  }
  0x11   : > { %v611_v20 = vld [vmem:[%s838_s3 + $0x4] sm:$0xf]  ;;  %v571_v21 = vld [vmem:[%s838_s3 + $0x8] sm:$0xf0]  ;;  %s609_s29 = sshll.u32 %s845_s15, 6  ;;  %s252_s6 = scalar_lea.vmem %s836_s1, %s845_s15  ;;  %v570_v23 = vor.u32 %v612_v19, %v569_v18 }
  0x12   : > { %s782_s9 = scalar_lea.vmem %s835_s0, %s609_s29  ;;  %s255_s12 = scalar_lea.vmem %s837_s2, %s845_s15  ;;  %v651_v22 = vld [vmem:[%s252_s6] ss:$0 sm:$0xff]  ;;  %v574_v26 = vor.u32 %v611_v20, %v571_v21 }
  0x13   : > { %378 = vmatpush.bf16.msra.mxu0 %v586_v10  ;;  %620 = vmatpush.bf16.msra.mxu2 %v586_v10  ;;  %v268_v24 = vld [vmem:[%s782_s9] sm:$0xff]  ;;  %v269_v25 = vld [vmem:[%s782_s9 + $0x8] sm:$0xff]  ;;  %v270_v42 = vld [vmem:[%s782_s9 + $0x10] sm:$0xff]  ;;  %s610_s13 = sshll.u32 %s845_s15, 7 }
  0x14   : > { %407 = vmatpush.bf16.msra.mxu1 %v590_v11  ;;  %624 = vmatpush.bf16.msra.mxu3 %v590_v11  ;;  %v281_v27 = vmul.f32 %v651_v22, %v268_v24  ;;  %v282_v28 = vmul.f32 %v651_v22, %v269_v25  ;;  %v652_v29 = vld [vmem:[%s255_s12] ss:$0 sm:$0xff]  ;;  %v273_v31 = vld [vmem:[%s782_s9 + $0x28] sm:$0xff]  ;;  %v271_v43 = vld [vmem:[%s782_s9 + $0x18] sm:$0xff]  ;;  %v283_v48 = vmul.f32 %v651_v22, %v270_v42  ;;  %s808_s20 = scalar_lea.vmem %s839_s4, %s610_s13 }
  0x15   : > { %v272_v30 = vld [vmem:[%s782_s9 + $0x20] sm:$0xff]  ;;  %v286_v33 = vmul.f32 %v651_v22, %v273_v31  ;;  %v274_v45 = vld [vmem:[%s782_s9 + $0x30] sm:$0xff]  ;;  %v275_v46 = vld [vmem:[%s782_s9 + $0x38] sm:$0xff]  ;;  %v284_v49 = vmul.f32 %v651_v22, %v271_v43 }
  0x16   : > { %v285_v32 = vmul.f32 %v651_v22, %v272_v30  ;;  %v292_v34 = vadd.f32 %v652_v29, %v281_v27  ;;  %v293_v35 = vadd.f32 %v652_v29, %v282_v28  ;;  %v287_v50 = vmul.f32 %v651_v22, %v274_v45 }
  0x17   : > { %379 = vmatpush.bf16.msra.mxu0 %v578_v16  ;;  %621 = vmatpush.bf16.msra.mxu2 %v578_v16  ;;  %v297_v37 = vadd.f32 %v652_v29, %v286_v33  ;;  %v288_v51 = vmul.f32 %v651_v22, %v275_v46  ;;  %v294_v52 = vadd.f32 %v652_v29, %v283_v48 }
  0x18   : > { %408 = vmatpush.bf16.msra.mxu1 %v582_v17  ;;  %625 = vmatpush.bf16.msra.mxu3 %v582_v17  ;;  %v296_v36 = vadd.f32 %v652_v29, %v285_v32  ;;  %v300_v38 = vmax.f32 %v292_v34, 0.0  ;;  %v301_v39 = vmax.f32 %v293_v35, 0.0  ;;  %v295_v53 = vadd.f32 %v652_v29, %v284_v49 }
  0x19   : > { %v305_v41 = vmax.f32 %v297_v37, 0.0  ;;  %v298_v54 = vadd.f32 %v652_v29, %v287_v50  ;;  %v299_v55 = vadd.f32 %v652_v29, %v288_v51  ;;  %v302_v56 = vmax.f32 %v294_v52, 0.0 }
  0x1a   : > { %v304_v40 = vmax.f32 %v296_v36, 0.0  ;;  %v308_v44 = vpack.c.bf16 %v301_v39, %v300_v38  ;;  %v303_v57 = vmax.f32 %v295_v53, 0.0 }
  0x1b   : > { %380 = vmatpush.bf16.msra.mxu0 %v570_v23  ;;  %622 = vmatpush.bf16.msra.mxu2 %v570_v23  ;;  %v306_v58 = vmax.f32 %v298_v54, 0.0  ;;  %v307_v59 = vmax.f32 %v299_v55, 0.0 }
  0x1c   : > { %409 = vmatpush.bf16.msra.mxu1 %v574_v26  ;;  %626 = vmatpush.bf16.msra.mxu3 %v574_v26  ;;  %v310_v47 = vpack.c.bf16 %v305_v41, %v304_v40  ;;  %v309_v60 = vpack.c.bf16 %v303_v57, %v302_v56 }
  0x1d   : > { %v311_v61 = vpack.c.bf16 %v307_v59, %v306_v58 }
  0x1e   : > { %599 = vmatmul.msk.bf16.vlgmr.msra.gmra.mxu0 %vm360_vm0, %v308_v44  ;;  %601 = vmatmul.msk.bf16.vlgmr.msra.gmra.mxu2 %vm360_vm0, %v310_v47 }
  0x1f   : > { %603 = vmatmul.msk.bf16.vlgmr.msra.gmra.mxu1 %vm360_vm0, %v308_v44  ;;  %605 = vmatmul.msk.bf16.vlgmr.msra.gmra.mxu3 %vm360_vm0, %v310_v47 }
  0x2e   : > { %600 = vmatmul.msk.bf16.gmra.mxu0 %vm360_vm0, %v309_v60  ;;  %602 = vmatmul.msk.bf16.gmra.mxu2 %vm360_vm0, %v311_v61 }
  0x2f   : > { %604 = vmatmul.msk.bf16.gmra.mxu1 %vm360_vm0, %v309_v60  ;;  %606 = vmatmul.msk.bf16.gmra.mxu3 %vm360_vm0, %v311_v61 }
  0x9b   : > { %v382_v62 = vpop.f32.mrf.mxu0 }
  0x9c   : > { %v411_v63 = vpop.f32.mrf.mxu1  ;;  %431 = vst [vmem:[%s808_s20] sm:$0xff] %v382_v62 }
  0x9d   : > { %432 = vst [vmem:[%s808_s20 + $0x8] sm:$0xff] %v411_v63 }
  0xa1   : > { %v392_v0 = vpop.f32.mrf.mxu2 }
  0xa2   : > { %v421_v1 = vpop.f32.mrf.mxu3  ;;  %439 = vst [vmem:[%s808_s20 + $0x40] sm:$0xff] %v392_v0 }
  0xa3   : > { %v384_v2 = vpop.f32.mrf.mxu0  ;;  %440 = vst [vmem:[%s808_s20 + $0x48] sm:$0xff] %v421_v1 }
  0xa4   : > { %v413_v3 = vpop.f32.mrf.mxu1  ;;  %433 = vst [vmem:[%s808_s20 + $0x10] sm:$0xff] %v384_v2 }
  0xa5   : > { %434 = vst [vmem:[%s808_s20 + $0x18] sm:$0xff] %v413_v3 }
  0xa9   : > { %v394_v4 = vpop.f32.mrf.mxu2 }
  0xaa   : > { %v423_v5 = vpop.f32.mrf.mxu3  ;;  %441 = vst [vmem:[%s808_s20 + $0x50] sm:$0xff] %v394_v4 }
  0xab   : > { %v387_v6 = vpop.f32.mrf.mxu0  ;;  %442 = vst [vmem:[%s808_s20 + $0x58] sm:$0xff] %v423_v5 }
  0xac   : > { %v416_v7 = vpop.f32.mrf.mxu1  ;;  %435 = vst [vmem:[%s808_s20 + $0x20] sm:$0xff] %v387_v6 }
  0xad   : > { %436 = vst [vmem:[%s808_s20 + $0x28] sm:$0xff] %v416_v7 }
  0xb1   : > { %v397_v8 = vpop.f32.mrf.mxu2 }
  0xb2   : > { %v426_v9 = vpop.f32.mrf.mxu3  ;;  %443 = vst [vmem:[%s808_s20 + $0x60] sm:$0xff] %v397_v8 }
  0xb3   : > { %v389_v10 = vpop.f32.mrf.mxu0  ;;  %444 = vst [vmem:[%s808_s20 + $0x68] sm:$0xff] %v426_v9 }
  0xb4   : > { %v418_v11 = vpop.f32.mrf.mxu1  ;;  %437 = vst [vmem:[%s808_s20 + $0x30] sm:$0xff] %v389_v10 }
  0xb5   : > { %438 = vst [vmem:[%s808_s20 + $0x38] sm:$0xff] %v418_v11 }
  0xb9   : > { %v399_v12 = vpop.f32.mrf.mxu2 }
  0xba   : > { %v428_v13 = vpop.f32.mrf.mxu3  ;;  %445 = vst [vmem:[%s808_s20 + $0x70] sm:$0xff] %v399_v12 }
  0xbb   : > { %446 = vst [vmem:[%s808_s20 + $0x78] sm:$0xff] %v428_v13 }
  0xbc PF: > { %s14_s17 = sadd.s32 1, %s675_s17   ;;  %s840_s15 = smov %s671_s16 }
  0xbd   : > { %p11_p5 = scmp.ge.s32.totalorder %s14_s17, 4   ;;  %s841_s16 = smov %s843_s18 }
  0xbf   :  { %13 = sbr.rel (!%p11_p5) target bundleno = 2 (0x2), region = 72 }

// kernel: _lambda_.19
= control target key start
LH: loop header
LB: loop body
LE: loop exit
PB: predicated region body
PF: predicated region fallthrough
CT: control target
= control target key end

     0   :  { %s813_s18 = smov 0   ;;  %s815_s19 = smov 0   ;;  %s967_s0 = inlined_call_operand.vmem [shape: f32[2,64,64], index: 0, kind: input, shape index: {}]   ;;  %s968_s1 = inlined_call_operand.vmem [shape: f32[2,1,64], index: 1, kind: input, shape index: {}]   ;;  %s969_s2 = inlined_call_operand.vmem [shape: f32[2,1,64], index: 2, kind: input, shape index: {}]   ;;  %s970_s3 = inlined_call_operand.vmem [shape: bf16[64,256], index: 3, kind: input, shape index: {}]   ;;  %s971_s4 = inlined_call_operand.vmem [shape: f32[2,64,256], index: 4, kind: input, shape index: {}]   ;;  %s972_s5 = inlined_call_operand.vmem [shape: f32[2,64,256], index: 5, kind: output, shape index: {}]  }
   0x1   :  { %s817_s20 = smov 0  }
   0x2 LB: > { %s27_s21 = sadd.s32 1, %s777_s19  ;;  %p665_p0 = scmp.ge.s32.totalorder %s781_s20, 1  ;;  %s781_s20 = sphi %s817_s20, %s15_s20   ;;  %s777_s19 = sphi %s815_s19, %s974_s19   ;;  %s773_s18 = sphi %s813_s18, %s973_s18  }
   0x3   : > { %p29_p1 = scmp.ge.s32.totalorder %s27_s21, 2  ;;  %p242_p2 = scmp.lt.s32.totalorder %s781_s20, 3 }
   0x5   : > { %s976_s21 = smov (%p29_p1, %s27_s21), 0  ;;  %p243_p3 = pnand %p665_p0, %p242_p2 }
   0x6   : > { %p296_p4 = scmp.lt.s32.totalorder (!%p243_p3), %s773_s18, 1 }
   0x7   : > { %246 = sbr.rel (%p243_p3) target bundleno = 190 (0xbe), region = 40 }
   0xc   : > { %v698_v0 = vld [vmem:[%s970_s3 + $0x30] sm:$0xf]  ;;  %v724_v1 = vld [vmem:[%s970_s3 + $0x34] sm:$0xf0]  ;;  %v723_v2 = vld [vmem:[%s970_s3 + $0x34] sm:$0xf] }
   0xd   : > { %v699_v3 = vor.u32 %v724_v1, %v698_v0  ;;  %v700_v4 = vld [vmem:[%s970_s3 + $0x38] sm:$0xf0]  ;;  %v690_v5 = vld [vmem:[%s970_s3 + $0x20] sm:$0xf]  ;;  %v722_v6 = vld [vmem:[%s970_s3 + $0x24] sm:$0xf0] }
   0xe   : > { %v703_v7 = vor.u32 %v723_v2, %v700_v4  ;;  %v721_v8 = vld [vmem:[%s970_s3 + $0x24] sm:$0xf]  ;;  %v692_v9 = vld [vmem:[%s970_s3 + $0x28] sm:$0xf0]  ;;  %v691_v10 = vor.u32 %v722_v6, %v690_v5  ;;  %v682_v12 = vld [vmem:[%s970_s3 + $0x10] sm:$0xf] }
   0xf   : > { %459 = vmatpush.bf16.msra.mxu0 %v699_v3  ;;  %725 = vmatpush.bf16.msra.mxu2 %v699_v3  ;;  %v695_v11 = vor.u32 %v721_v8, %v692_v9  ;;  %v720_v13 = vld [vmem:[%s970_s3 + $0x14] sm:$0xf0]  ;;  %v719_v14 = vld [vmem:[%s970_s3 + $0x14] sm:$0xf]  ;;  %v684_v15 = vld [vmem:[%s970_s3 + $0x18] sm:$0xf0] }
  0x10   : > { %488 = vmatpush.bf16.msra.mxu1 %v703_v7  ;;  %729 = vmatpush.bf16.msra.mxu3 %v703_v7  ;;  %v683_v16 = vor.u32 %v720_v13, %v682_v12  ;;  %s978_s18 = smov (!%p296_p4, %s773_s18), 1  ;;  %v687_v17 = vor.u32 %v719_v14, %v684_v15  ;;  %v674_v18 = vld [vmem:[%s970_s3] sm:$0xf]  ;;  %v718_v19 = vld [vmem:[%s970_s3 + $0x4] sm:$0xf0]  ;;  %vm442_vm0 = vcmask 523264  }
  0x11   : > { %v717_v20 = vld [vmem:[%s970_s3 + $0x4] sm:$0xf]  ;;  %v676_v21 = vld [vmem:[%s970_s3 + $0x8] sm:$0xf0]  ;;  %s714_s8 = sshll.u32 %s978_s18, 6  ;;  %s307_s11 = scalar_lea.vmem %s968_s1, %s978_s18  ;;  %v675_v23 = vor.u32 %v718_v19, %v674_v18 }
  0x12   : > { %s893_s14 = scalar_lea.vmem %s967_s0, %s714_s8  ;;  %s310_s17 = scalar_lea.vmem %s969_s2, %s978_s18  ;;  %v757_v22 = vld [vmem:[%s307_s11] ss:$0 sm:$0xff]  ;;  %v679_v26 = vor.u32 %v717_v20, %v676_v21 }
  0x13   : > { %460 = vmatpush.bf16.msra.mxu0 %v691_v10  ;;  %726 = vmatpush.bf16.msra.mxu2 %v691_v10  ;;  %v334_v24 = vld [vmem:[%s893_s14] sm:$0xff]  ;;  %v335_v25 = vld [vmem:[%s893_s14 + $0x8] sm:$0xff]  ;;  %v336_v42 = vld [vmem:[%s893_s14 + $0x10] sm:$0xff]  ;;  %s715_s22 = sshll.u32 %s978_s18, 7 }
  0x14   : > { %489 = vmatpush.bf16.msra.mxu1 %v695_v11  ;;  %730 = vmatpush.bf16.msra.mxu3 %v695_v11  ;;  %v347_v27 = vmul.f32 %v757_v22, %v334_v24  ;;  %v348_v28 = vmul.f32 %v757_v22, %v335_v25  ;;  %v758_v29 = vld [vmem:[%s310_s17] ss:$0 sm:$0xff]  ;;  %v339_v31 = vld [vmem:[%s893_s14 + $0x28] sm:$0xff]  ;;  %v337_v43 = vld [vmem:[%s893_s14 + $0x18] sm:$0xff]  ;;  %v349_v48 = vmul.f32 %v757_v22, %v336_v42  ;;  %s919_s25 = scalar_lea.vmem %s971_s4, %s715_s22  ;;  %s926_s28 = scalar_lea.vmem %s972_s5, %s715_s22 }
  0x15   : > { %v338_v30 = vld [vmem:[%s893_s14 + $0x20] sm:$0xff]  ;;  %v352_v33 = vmul.f32 %v757_v22, %v339_v31  ;;  %v340_v45 = vld [vmem:[%s893_s14 + $0x30] sm:$0xff]  ;;  %v341_v46 = vld [vmem:[%s893_s14 + $0x38] sm:$0xff]  ;;  %v350_v49 = vmul.f32 %v757_v22, %v337_v43 }
  0x16   : > { %v351_v32 = vmul.f32 %v757_v22, %v338_v30  ;;  %v358_v34 = vadd.f32 %v758_v29, %v347_v27  ;;  %v359_v35 = vadd.f32 %v758_v29, %v348_v28  ;;  %v353_v50 = vmul.f32 %v757_v22, %v340_v45  ;;  %v386_v62 = vld [vmem:[%s919_s25] sm:$0xff]  ;;  %v387_v63 = vld [vmem:[%s919_s25 + $0x8] sm:$0xff]  ;;  %v388_v6 = vld [vmem:[%s919_s25 + $0x10] sm:$0xff] }
  0x17   : > { %461 = vmatpush.bf16.msra.mxu0 %v683_v16  ;;  %727 = vmatpush.bf16.msra.mxu2 %v683_v16  ;;  %v363_v37 = vadd.f32 %v758_v29, %v352_v33  ;;  %v354_v51 = vmul.f32 %v757_v22, %v341_v46  ;;  %v360_v52 = vadd.f32 %v758_v29, %v349_v48  ;;  %v394_v4 = vld [vmem:[%s919_s25 + $0x40] sm:$0xff]  ;;  %v395_v5 = vld [vmem:[%s919_s25 + $0x48] sm:$0xff]  ;;  %v389_v7 = vld [vmem:[%s919_s25 + $0x18] sm:$0xff] }
  0x18   : > { %490 = vmatpush.bf16.msra.mxu1 %v687_v17  ;;  %731 = vmatpush.bf16.msra.mxu3 %v687_v17  ;;  %v362_v36 = vadd.f32 %v758_v29, %v351_v32  ;;  %v366_v38 = vmax.f32 %v358_v34, 0.0  ;;  %v367_v39 = vmax.f32 %v359_v35, 0.0  ;;  %v361_v53 = vadd.f32 %v758_v29, %v350_v49  ;;  %v396_v16 = vld [vmem:[%s919_s25 + $0x50] sm:$0xff]  ;;  %v397_v17 = vld [vmem:[%s919_s25 + $0x58] sm:$0xff]  ;;  %v390_v18 = vld [vmem:[%s919_s25 + $0x20] sm:$0xff] }
  0x19   : > { %v371_v41 = vmax.f32 %v363_v37, 0.0  ;;  %v364_v54 = vadd.f32 %v758_v29, %v353_v50  ;;  %v365_v55 = vadd.f32 %v758_v29, %v354_v51  ;;  %v368_v56 = vmax.f32 %v360_v52, 0.0  ;;  %v391_v19 = vld [vmem:[%s919_s25 + $0x28] sm:$0xff]  ;;  %v398_v28 = vld [vmem:[%s919_s25 + $0x60] sm:$0xff]  ;;  %v392_v30 = vld [vmem:[%s919_s25 + $0x30] sm:$0xff] }
  0x1a   : > { %v370_v40 = vmax.f32 %v362_v36, 0.0  ;;  %v374_v44 = vpack.c.bf16 %v367_v39, %v366_v38  ;;  %v369_v57 = vmax.f32 %v361_v53, 0.0  ;;  %v399_v29 = vld [vmem:[%s919_s25 + $0x68] sm:$0xff]  ;;  %v393_v31 = vld [vmem:[%s919_s25 + $0x38] sm:$0xff] }
  0x1b   : > { %462 = vmatpush.bf16.msra.mxu0 %v675_v23  ;;  %728 = vmatpush.bf16.msra.mxu2 %v675_v23  ;;  %v372_v58 = vmax.f32 %v364_v54, 0.0  ;;  %v373_v59 = vmax.f32 %v365_v55, 0.0 }
  0x1c   : > { %491 = vmatpush.bf16.msra.mxu1 %v679_v26  ;;  %732 = vmatpush.bf16.msra.mxu3 %v679_v26  ;;  %v376_v47 = vpack.c.bf16 %v371_v41, %v370_v40  ;;  %v375_v60 = vpack.c.bf16 %v369_v57, %v368_v56  ;;  %v400_v40 = vld [vmem:[%s919_s25 + $0x70] sm:$0xff]  ;;  %v401_v41 = vld [vmem:[%s919_s25 + $0x78] sm:$0xff] }
  0x1d   : > { %v377_v61 = vpack.c.bf16 %v373_v59, %v372_v58 }
  0x1e   : > { %704 = vmatmul.msk.bf16.vlgmr.msra.gmra.mxu0 %vm442_vm0, %v374_v44  ;;  %706 = vmatmul.msk.bf16.vlgmr.msra.gmra.mxu2 %vm442_vm0, %v376_v47 }
  0x1f   : > { %708 = vmatmul.msk.bf16.vlgmr.msra.gmra.mxu1 %vm442_vm0, %v374_v44  ;;  %710 = vmatmul.msk.bf16.vlgmr.msra.gmra.mxu3 %vm442_vm0, %v376_v47 }
  0x2e   : > { %705 = vmatmul.msk.bf16.gmra.mxu0 %vm442_vm0, %v375_v60  ;;  %707 = vmatmul.msk.bf16.gmra.mxu2 %vm442_vm0, %v377_v61 }
  0x2f   : > { %709 = vmatmul.msk.bf16.gmra.mxu1 %vm442_vm0, %v375_v60  ;;  %711 = vmatmul.msk.bf16.gmra.mxu3 %vm442_vm0, %v377_v61 }
  0x9b   : > { %v464_v0 = vpop.f32.mrf.mxu0 }
  0x9c   : > { %v493_v1 = vpop.f32.mrf.mxu1  ;;  %v465_v2 = vadd.f32 %v464_v0, %v386_v62 }
  0x9d   : > { %v494_v3 = vadd.f32 %v493_v1, %v387_v63 }
  0x9e   : > { %513 = vst [vmem:[%s926_s28] sm:$0xff] %v465_v2 }
  0x9f   : > { %514 = vst [vmem:[%s926_s28 + $0x8] sm:$0xff] %v494_v3 }
  0xa1   : > { %v474_v8 = vpop.f32.mrf.mxu2 }
  0xa2   : > { %v503_v9 = vpop.f32.mrf.mxu3  ;;  %v475_v10 = vadd.f32 %v474_v8, %v394_v4 }
  0xa3   : > { %v504_v11 = vadd.f32 %v503_v9, %v395_v5  ;;  %v466_v12 = vpop.f32.mrf.mxu0 }
  0xa4   : > { %v495_v13 = vpop.f32.mrf.mxu1  ;;  %v467_v14 = vadd.f32 %v466_v12, %v388_v6  ;;  %521 = vst [vmem:[%s926_s28 + $0x40] sm:$0xff] %v475_v10 }
  0xa5   : > { %v496_v15 = vadd.f32 %v495_v13, %v389_v7  ;;  %522 = vst [vmem:[%s926_s28 + $0x48] sm:$0xff] %v504_v11 }
  0xa6   : > { %515 = vst [vmem:[%s926_s28 + $0x10] sm:$0xff] %v467_v14 }
  0xa7   : > { %516 = vst [vmem:[%s926_s28 + $0x18] sm:$0xff] %v496_v15 }
  0xa9   : > { %v476_v20 = vpop.f32.mrf.mxu2 }
  0xaa   : > { %v505_v21 = vpop.f32.mrf.mxu3  ;;  %v477_v22 = vadd.f32 %v476_v20, %v396_v16 }
  0xab   : > { %v506_v23 = vadd.f32 %v505_v21, %v397_v17  ;;  %v469_v24 = vpop.f32.mrf.mxu0 }
  0xac   : > { %v498_v25 = vpop.f32.mrf.mxu1  ;;  %v470_v26 = vadd.f32 %v469_v24, %v390_v18  ;;  %523 = vst [vmem:[%s926_s28 + $0x50] sm:$0xff] %v477_v22 }
  0xad   : > { %v499_v27 = vadd.f32 %v498_v25, %v391_v19  ;;  %524 = vst [vmem:[%s926_s28 + $0x58] sm:$0xff] %v506_v23 }
  0xae   : > { %517 = vst [vmem:[%s926_s28 + $0x20] sm:$0xff] %v470_v26 }
  0xaf   : > { %518 = vst [vmem:[%s926_s28 + $0x28] sm:$0xff] %v499_v27 }
  0xb1   : > { %v479_v32 = vpop.f32.mrf.mxu2 }
  0xb2   : > { %v508_v33 = vpop.f32.mrf.mxu3  ;;  %v480_v34 = vadd.f32 %v479_v32, %v398_v28 }
  0xb3   : > { %v509_v35 = vadd.f32 %v508_v33, %v399_v29  ;;  %v471_v36 = vpop.f32.mrf.mxu0 }
  0xb4   : > { %v500_v37 = vpop.f32.mrf.mxu1  ;;  %v472_v38 = vadd.f32 %v471_v36, %v392_v30  ;;  %525 = vst [vmem:[%s926_s28 + $0x60] sm:$0xff] %v480_v34 }
  0xb5   : > { %v501_v39 = vadd.f32 %v500_v37, %v393_v31  ;;  %526 = vst [vmem:[%s926_s28 + $0x68] sm:$0xff] %v509_v35 }
  0xb6   : > { %519 = vst [vmem:[%s926_s28 + $0x30] sm:$0xff] %v472_v38 }
  0xb7   : > { %520 = vst [vmem:[%s926_s28 + $0x38] sm:$0xff] %v501_v39 }
  0xb9   : > { %v481_v42 = vpop.f32.mrf.mxu2 }
  0xba   : > { %v510_v43 = vpop.f32.mrf.mxu3  ;;  %v482_v44 = vadd.f32 %v481_v42, %v400_v40 }
  0xbb   : > { %v511_v45 = vadd.f32 %v510_v43, %v401_v41 }
  0xbc   : > { %527 = vst [vmem:[%s926_s28 + $0x70] sm:$0xff] %v482_v44 }
  0xbd   : > { %528 = vst [vmem:[%s926_s28 + $0x78] sm:$0xff] %v511_v45 }
  0xbe PF: > { %s15_s20 = sadd.s32 1, %s781_s20   ;;  %s973_s18 = smov %s777_s19 }
  0xbf   : > { %p12_p5 = scmp.ge.s32.totalorder %s15_s20, 4   ;;  %s974_s19 = smov %s976_s21 }
  0xc1   :  { %14 = sbr.rel (!%p12_p5) target bundleno = 2 (0x2), region = 79 }

// kernel: _lambda_.20
= control target key start
LH: loop header
LB: loop body
LE: loop exit
PB: predicated region body
PF: predicated region fallthrough
CT: control target
= control target key end

     0   :  { %s977_s18 = smov 0   ;;  %s979_s19 = smov 0   ;;  %s1579_s0 = inlined_call_operand.vmem [shape: f32[2,64,256], index: 0, kind: input, shape index: {}]   ;;  %s1580_s1 = inlined_call_operand.vmem [shape: f32[1,256], index: 1, kind: input, shape index: {}]   ;;  %s1581_s2 = inlined_call_operand.vmem [shape: f32[1,256], index: 2, kind: input, shape index: {}]   ;;  %s1582_s3 = inlined_call_operand.vmem [shape: f32[256,256], index: 3, kind: input, shape index: {}]   ;;  %s1583_s4 = inlined_call_operand.vmem [shape: f32[2,1,256], index: 4, kind: output, shape index: {0}]   ;;  %s1584_s5 = inlined_call_operand.vmem [shape: f32[2,1,256], index: 5, kind: output, shape index: {1}]  }
   0x1   :  { %s981_s20 = smov 0  }
   0x2 LB: > { %s28_s21 = sadd.s32 1, %s940_s19  ;;  %p881_p0 = scmp.ge.s32.totalorder %s944_s20, 1  ;;  %s944_s20 = sphi %s981_s20, %s16_s20   ;;  %s940_s19 = sphi %s979_s19, %s1703_s19   ;;  %s936_s18 = sphi %s977_s18, %s1702_s18  }
   0x3   : > { %p30_p1 = scmp.ge.s32.totalorder %s28_s21, 2  ;;  %p210_p2 = scmp.lt.s32.totalorder %s944_s20, 3 }
   0x5   : > { %s1705_s21 = smov (%p30_p1, %s28_s21), 0  ;;  %p211_p3 = pnand %p881_p0, %p210_p2 }
   0x7   : > { %214 = sbr.rel (%p211_p3) target bundleno = 265 (0x109), region = 36 }
   0xc   : > { %v1000_v0 = vld [vmem:[%s1582_s3 + $0xf0] sm:$0xff]  ;;  %v1010_v2 = vld [vmem:[%s1582_s3 + $0xf8] sm:$0xff]  ;;  %v1022_v4 = vld [vmem:[%s1582_s3 + $0xe0] sm:$0xff]  ;;  %v269_v9 = vlaneseq  ;;  %v1640_v15 = vmov 0  ;;  %v946_v18 = vmov 0.0   ;;  %p247_p4 = scmp.lt.s32.totalorder %s936_s18, 1 }
   0xd   : > { %v1005_v1 = vld [vmem:[%s1582_s3 + $0x1f0] sm:$0xff]  ;;  %453 = vmatpush.msra.mxu0 %v1000_v0  ;;  %v1017_v3 = vld [vmem:[%s1582_s3 + $0x1f8] sm:$0xff]  ;;  %v1027_v5 = vld [vmem:[%s1582_s3 + $0x1e0] sm:$0xff]  ;;  %493 = vmatpush.msra.mxu2 %v1010_v2  ;;  %vm321_vm1 = vcmask 1040384  }
   0xe   : > { %473 = vmatpush.msra.mxu1 %v1005_v1  ;;  %513 = vmatpush.msra.mxu3 %v1017_v3  ;;  %v1034_v6 = vld [vmem:[%s1582_s3 + $0xe8] sm:$0xff]  ;;  %v1044_v8 = vld [vmem:[%s1582_s3 + $0xd0] sm:$0xff]  ;;  %v1056_v11 = vld [vmem:[%s1582_s3 + $0xd8] sm:$0xff]  ;;  %vm1075_vm0 = vcmp.lt.s32.totalorder %v269_v9, 256  ;;  %s1707_s18 = smov (!%p247_p4, %s936_s18), 1 }
   0xf   : > { %v1039_v7 = vld [vmem:[%s1582_s3 + $0x1e8] sm:$0xff]  ;;  %454 = vmatpush.msra.mxu0 %v1022_v4  ;;  %v1051_v10 = vld [vmem:[%s1582_s3 + $0x1d0] sm:$0xff]  ;;  %v1061_v12 = vld [vmem:[%s1582_s3 + $0x1d8] sm:$0xff]  ;;  %494 = vmatpush.msra.mxu2 %v1034_v6  ;;  %v1641_v15 = vsel %vm1075_vm0, 4294967295, %v1640_v15  ;;  %273 = vst.msk [vmem:[#allocation2] sm:$0x3] %vm1075_vm0, %v946_v18 }
  0x10   : > { %474 = vmatpush.msra.mxu1 %v1027_v5  ;;  %514 = vmatpush.msra.mxu3 %v1039_v7  ;;  %v1068_v13 = vld [vmem:[%s1582_s3 + $0xc0] sm:$0xff]  ;;  %1642 = vst [vmem:[#allocation4_spill] sm:$0xff] %v1641_v15  ;;  %v1084_v16 = vld [vmem:[%s1582_s3 + $0xc8] sm:$0xff]  ;;  %v1098_v19 = vld [vmem:[%s1582_s3 + $0xb0] sm:$0xff]  ;;  %s888_s6 = sshll.u32 %s1707_s18, 7 }
  0x11   : > { %v1073_v14 = vld [vmem:[%s1582_s3 + $0x1c0] sm:$0xff]  ;;  %455 = vmatpush.msra.mxu0 %v1044_v8  ;;  %v1089_v17 = vld [vmem:[%s1582_s3 + $0x1c8] sm:$0xff]  ;;  %495 = vmatpush.msra.mxu2 %v1056_v11  ;;  %v1103_v20 = vld [vmem:[%s1582_s3 + $0x1b0] sm:$0xff]  ;;  %274 = vst.msk [vmem:[#allocation3] sm:$0x3] %vm1075_vm0, %v946_v18  ;;  %s1276_s7 = scalar_lea.vmem %s1579_s0, %s888_s6 }
  0x12   : > { %475 = vmatpush.msra.mxu1 %v1051_v10  ;;  %515 = vmatpush.msra.mxu3 %v1061_v12  ;;  %v1112_v21 = vld [vmem:[%s1582_s3 + $0xb8] sm:$0xff]  ;;  %v1125_v23 = vld [vmem:[%s1582_s3 + $0xa0] sm:$0xff]  ;;  %v1137_v25 = vld [vmem:[%s1582_s3 + $0xa8] sm:$0xff] }
  0x13   : > { %456 = vmatpush.msra.mxu0 %v1068_v13  ;;  %v1117_v22 = vld [vmem:[%s1582_s3 + $0x1b8] sm:$0xff]  ;;  %496 = vmatpush.msra.mxu2 %v1084_v16  ;;  %v1130_v24 = vld [vmem:[%s1582_s3 + $0x1a0] sm:$0xff]  ;;  %v1142_v26 = vld [vmem:[%s1582_s3 + $0x1a8] sm:$0xff] }
  0x14   : > { %476 = vmatpush.msra.mxu1 %v1073_v14  ;;  %516 = vmatpush.msra.mxu3 %v1089_v17  ;;  %v1149_v27 = vld [vmem:[%s1582_s3 + $0x90] sm:$0xff]  ;;  %v1161_v29 = vld [vmem:[%s1582_s3 + $0x98] sm:$0xff]  ;;  %v1178_v31 = vld [vmem:[%s1582_s3 + $0x80] sm:$0xff] }
  0x15   : > { %457 = vmatpush.msra.mxu0 %v1098_v19  ;;  %497 = vmatpush.msra.mxu2 %v1112_v21  ;;  %v1154_v28 = vld [vmem:[%s1582_s3 + $0x190] sm:$0xff]  ;;  %v1166_v30 = vld [vmem:[%s1582_s3 + $0x198] sm:$0xff]  ;;  %v1183_v32 = vld [vmem:[%s1582_s3 + $0x180] sm:$0xff] }
  0x16   : > { %477 = vmatpush.msra.mxu1 %v1103_v20  ;;  %517 = vmatpush.msra.mxu3 %v1117_v22  ;;  %v1190_v33 = vld [vmem:[%s1582_s3 + $0x88] sm:$0xff]  ;;  %v1202_v35 = vld [vmem:[%s1582_s3 + $0x70] sm:$0xff]  ;;  %v1214_v37 = vld [vmem:[%s1582_s3 + $0x78] sm:$0xff] }
  0x17   : > { %458 = vmatpush.msra.mxu0 %v1125_v23  ;;  %498 = vmatpush.msra.mxu2 %v1137_v25  ;;  %1643 = vst [vmem:[#allocation5_spill] sm:$0xff] %v1190_v33  ;;  %v1195_v34 = vld [vmem:[%s1582_s3 + $0x188] sm:$0xff]  ;;  %v1207_v36 = vld [vmem:[%s1582_s3 + $0x170] sm:$0xff]  ;;  %v1219_v38 = vld [vmem:[%s1582_s3 + $0x178] sm:$0xff] }
  0x18   : > { %478 = vmatpush.msra.mxu1 %v1130_v24  ;;  %518 = vmatpush.msra.mxu3 %v1142_v26  ;;  %1644 = vst [vmem:[#allocation6_spill] sm:$0xff] %v1195_v34  ;;  %v1227_v39 = vld [vmem:[%s1582_s3 + $0x60] sm:$0xff]  ;;  %v1237_v41 = vld [vmem:[%s1582_s3 + $0x68] sm:$0xff]  ;;  %v1249_v43 = vld [vmem:[%s1582_s3 + $0x50] sm:$0xff] }
  0x19   : > { %459 = vmatpush.msra.mxu0 %v1149_v27  ;;  %499 = vmatpush.msra.mxu2 %v1161_v29  ;;  %1645 = vst [vmem:[#allocation7_spill] sm:$0xff] %v1207_v36  ;;  %v1232_v40 = vld [vmem:[%s1582_s3 + $0x160] sm:$0xff]  ;;  %v1244_v42 = vld [vmem:[%s1582_s3 + $0x168] sm:$0xff]  ;;  %v1254_v44 = vld [vmem:[%s1582_s3 + $0x150] sm:$0xff] }
  0x1a   : > { %479 = vmatpush.msra.mxu1 %v1154_v28  ;;  %519 = vmatpush.msra.mxu3 %v1166_v30  ;;  %1646 = vst [vmem:[#allocation8_spill] sm:$0xff] %v1214_v37  ;;  %v1261_v45 = vld [vmem:[%s1582_s3 + $0x58] sm:$0xff]  ;;  %v1271_v47 = vld [vmem:[%s1582_s3 + $0x40] sm:$0xff]  ;;  %v1288_v49 = vld [vmem:[%s1582_s3 + $0x48] sm:$0xff] }
  0x1b   : > { %460 = vmatpush.msra.mxu0 %v1178_v31  ;;  %1647 = vst [vmem:[#allocation9_spill] sm:$0xff] %v1219_v38  ;;  %500 = vmatpush.msra.mxu2 %v1190_v33  ;;  %v1266_v46 = vld [vmem:[%s1582_s3 + $0x158] sm:$0xff]  ;;  %v1283_v48 = vld [vmem:[%s1582_s3 + $0x140] sm:$0xff]  ;;  %v1293_v50 = vld [vmem:[%s1582_s3 + $0x148] sm:$0xff] }
  0x1c   : > { %480 = vmatpush.msra.mxu1 %v1183_v32  ;;  %520 = vmatpush.msra.mxu3 %v1195_v34  ;;  %1648 = vst [vmem:[#allocation10_spill] sm:$0xff] %v1232_v40  ;;  %v1300_v51 = vld [vmem:[%s1582_s3 + $0x30] sm:$0xff]  ;;  %v1315_v54 = vld [vmem:[%s1582_s3] sm:$0xff]  ;;  %v276_v58 = vld [vmem:[%s1276_s7 + $0x8] sm:$0xff] }
  0x1d   : > { %1649 = vst [vmem:[#allocation11_spill] sm:$0xff] %v1237_v41  ;;  %461 = vmatpush.msra.mxu0 %v1202_v35  ;;  %501 = vmatpush.msra.mxu2 %v1214_v37  ;;  %v1305_v52 = vld [vmem:[%s1582_s3 + $0x130] sm:$0xff]  ;;  %v1322_v55 = vld [vmem:[%s1582_s3 + $0x20] sm:$0xff]  ;;  %v278_v60 = vld [vmem:[%s1276_s7 + $0x18] sm:$0xff] }
  0x1e   : > { %481 = vmatpush.msra.mxu1 %v1207_v36  ;;  %1650 = vst [vmem:[#allocation12_spill] sm:$0xff] %v1244_v42  ;;  %521 = vmatpush.msra.mxu3 %v1219_v38  ;;  %v1310_v53 = vld [vmem:[%s1582_s3 + $0x10] sm:$0xff]  ;;  %v275_v57 = vld [vmem:[%s1276_s7] sm:$0xff]  ;;  %v1338_v62 = vld [vmem:[%s1582_s3 + $0x38] sm:$0xff]  ;;  %v332_v36 = vmul.f32 %v276_v58, %v276_v58 }
  0x1f   : > { %1651 = vst [vmem:[#allocation13_spill] sm:$0xff] %v1249_v43  ;;  %462 = vmatpush.msra.mxu0 %v1227_v39  ;;  %502 = vmatpush.msra.mxu2 %v1237_v41  ;;  %v619_v56 = vadd.f32 %v1310_v53, %v1315_v54  ;;  %v277_v59 = vld [vmem:[%s1276_s7 + $0x10] sm:$0xff]  ;;  %v279_v61 = vld [vmem:[%s1276_s7 + $0x20] sm:$0xff]  ;;  %v1343_v63 = vld [vmem:[%s1582_s3 + $0x138] sm:$0xff]  ;;  %v331_v37 = vmul.f32 %v275_v57, %v275_v57 }
  0x20   : > { %1652 = vst [vmem:[#allocation14_spill] sm:$0xff] %v1254_v44  ;;  %482 = vmatpush.msra.mxu1 %v1232_v40  ;;  %522 = vmatpush.msra.mxu3 %v1244_v42  ;;  %v280_v18 = vld [vmem:[%s1276_s7 + $0x28] sm:$0xff]  ;;  %v292_v15 = vadd.f32 %v277_v59, %v275_v57  ;;  %v283_v40 = vld [vmem:[%s1276_s7 + $0x40] sm:$0xff]  ;;  %v335_v34 = vmul.f32 %v279_v61, %v279_v61 }
  0x21   : > { %1653 = vst [vmem:[#allocation15_spill] sm:$0xff] %v1261_v45  ;;  %463 = vmatpush.msra.mxu0 %v1249_v43  ;;  %503 = vmatpush.msra.mxu2 %v1261_v45  ;;  %v620_v9 = vadd.f32 %v619_v56, %v1322_v55  ;;  %v281_v45 = vld [vmem:[%s1276_s7 + $0x30] sm:$0xff]  ;;  %v1361_v56 = vld [vmem:[%s1582_s3 + $0x28] sm:$0xff]  ;;  %v1396_v57 = vld [vmem:[%s1582_s3 + $0x100] sm:$0xff] }
  0x22   : > { %1654 = vst [vmem:[#allocation16_spill] sm:$0xff] %v1266_v46  ;;  %483 = vmatpush.msra.mxu1 %v1254_v44  ;;  %523 = vmatpush.msra.mxu3 %v1266_v46  ;;  %v305_v46 = vadd.f32 %v278_v60, %v276_v58  ;;  %v282_v44 = vld [vmem:[%s1276_s7 + $0x38] sm:$0xff]  ;;  %v293_v42 = vadd.f32 %v292_v15, %v279_v61  ;;  %v284_v38 = vld [vmem:[%s1276_s7 + $0x48] sm:$0xff]  ;;  %v285_v58 = vld [vmem:[%s1276_s7 + $0x50] sm:$0xff] }
  0x23   : > { %1655 = vst [vmem:[#allocation17_spill] sm:$0xff] %v1271_v47  ;;  %464 = vmatpush.msra.mxu0 %v1271_v47  ;;  %504 = vmatpush.msra.mxu2 %v1288_v49  ;;  %v1383_v15 = vld [vmem:[%s1582_s3 + $0x18] sm:$0xff]  ;;  %v288_v61 = vld [vmem:[%s1276_s7 + $0x68] sm:$0xff] }
  0x24   : > { %1656 = vst [vmem:[#allocation18_spill] sm:$0xff] %v1283_v48  ;;  %484 = vmatpush.msra.mxu1 %v1283_v48  ;;  %524 = vmatpush.msra.mxu3 %v1293_v50  ;;  %v1352_v48 = vld [vmem:[%s1582_s3 + $0x120] sm:$0xff]  ;;  %v306_v41 = vadd.f32 %v305_v46, %v280_v18  ;;  %v1388_v46 = vld [vmem:[%s1582_s3 + $0x118] sm:$0xff] }
  0x25   : > { %1657 = vst [vmem:[#allocation19_spill] sm:$0xff] %v1288_v49  ;;  %465 = vmatpush.msra.mxu0 %v1300_v51  ;;  %v621_v49 = vadd.f32 %v620_v9, %v1300_v51  ;;  %505 = vmatpush.msra.mxu2 %v1338_v62 }
  0x26   : > { %1658 = vst [vmem:[#allocation20_spill] sm:$0xff] %v1293_v50  ;;  %485 = vmatpush.msra.mxu1 %v1305_v52  ;;  %v1366_v50 = vld [vmem:[%s1582_s3 + $0x128] sm:$0xff]  ;;  %525 = vmatpush.msra.mxu3 %v1343_v63 }
  0x27   : > { %1659 = vst [vmem:[#allocation21_spill] sm:$0xff] %v1300_v51  ;;  %466 = vmatpush.msra.mxu0 %v1322_v55  ;;  %v622_v9 = vadd.f32 %v621_v49, %v1271_v47  ;;  %506 = vmatpush.msra.mxu2 %v1361_v56  ;;  %v333_v51 = vmul.f32 %v277_v59, %v277_v59  ;;  %v1411_v49 = vld [vmem:[%s1582_s3 + $0x108] sm:$0xff] }
  0x28   : > { %1660 = vst [vmem:[#allocation22_spill] sm:$0xff] %v1305_v52  ;;  %v1374_v52 = vld [vmem:[%s1582_s3 + $0x110] sm:$0xff]  ;;  %486 = vmatpush.msra.mxu1 %v1352_v48  ;;  %526 = vmatpush.msra.mxu3 %v1366_v50 }
  0x29   : > { %1661 = vst [vmem:[#allocation23_spill] sm:$0xff] %v1310_v53  ;;  %467 = vmatpush.msra.mxu0 %v1310_v53  ;;  %507 = vmatpush.msra.mxu2 %v1383_v15  ;;  %v337_v53 = vmul.f32 %v281_v45, %v281_v45  ;;  %v347_v33 = vadd.f32 %v333_v51, %v331_v37 }
  0x2a   : > { %1662 = vst [vmem:[#allocation24_spill] sm:$0xff] %v1322_v55  ;;  %v286_v55 = vld [vmem:[%s1276_s7 + $0x58] sm:$0xff]  ;;  %487 = vmatpush.msra.mxu1 %v1374_v52  ;;  %527 = vmatpush.msra.mxu3 %v1388_v46 }
  0x2b   : > { %1663 = vst [vmem:[#allocation25_spill] sm:$0xff] %v1338_v62  ;;  %v307_v62 = vadd.f32 %v306_v41, %v282_v44  ;;  %v623_v41 = vadd.f32 %v622_v9, %v1249_v43  ;;  %v336_v9 = vmul.f32 %v280_v18, %v280_v18  ;;  %468 = vmatpush.msra.mxu0 %v1315_v54 }
  0x2c   : > { %1664 = vst [vmem:[#allocation26_spill] sm:$0xff] %v1343_v63  ;;  %v294_v63 = vadd.f32 %v293_v42, %v281_v45  ;;  %v1406_v42 = vld [vmem:[%s1582_s3 + $0x8] sm:$0xff]  ;;  %488 = vmatpush.msra.mxu1 %v1396_v57  ;;  %528 = vmatpush.msra.mxu3 %v1411_v49 }
  0x2d   : > { %1665 = vst [vmem:[#allocation27_spill] sm:$0xff] %v1352_v48  ;;  %v334_v48 = vmul.f32 %v278_v60, %v278_v60  ;;  %v308_v59 = vadd.f32 %v307_v62, %v284_v38  ;;  %v287_v60 = vld [vmem:[%s1276_s7 + $0x60] sm:$0xff]  ;;  %v624_v47 = vadd.f32 %v623_v41, %v1227_v39  ;;  %508 = vmatpush.msra.mxu2 %v1406_v42  ;;  %v289_v62 = vld [vmem:[%s1276_s7 + $0x70] sm:$0xff] }
  0x2e   : > { %1666 = vst [vmem:[#allocation28_spill] sm:$0xff] %v1361_v56  ;;  %v338_v56 = vmul.f32 %v282_v44, %v282_v44  ;;  %539 = vmatpush.msrb.mxu0 %v1000_v0  ;;  %559 = vmatpush.msrb.mxu1 %v1005_v1  ;;  %v348_v41 = vadd.f32 %v347_v33, %v335_v34 }
  0x2f   : > { %1667 = vst [vmem:[#allocation29_spill] sm:$0xff] %v1366_v50  ;;  %v295_v50 = vadd.f32 %v294_v63, %v283_v40  ;;  %v309_v63 = vadd.f32 %v308_v59, %v286_v55  ;;  %v625_v45 = vadd.f32 %v624_v47, %v1202_v35  ;;  %579 = vmatpush.msrb.mxu2 %v1010_v2 }
  0x30   : > { %1668 = vst [vmem:[#allocation30_spill] sm:$0xff] %v1374_v52  ;;  %v340_v52 = vmul.f32 %v284_v38, %v284_v38  ;;  %599 = vmatpush.msrb.mxu3 %v1017_v3  ;;  %v360_v59 = vadd.f32 %v334_v48, %v332_v36  ;;  %540 = vmatpush.msrb.mxu0 %v1022_v4 }
  0x31   : > { %1669 = vst [vmem:[#allocation31_spill] sm:$0xff] %v1383_v15  ;;  %v296_v43 = vadd.f32 %v295_v50, %v285_v58  ;;  %v290_v15 = vld [vmem:[%s1276_s7 + $0x78] sm:$0xff]  ;;  %v310_v18 = vadd.f32 %v309_v63, %v288_v61  ;;  %v341_v50 = vmul.f32 %v285_v58, %v285_v58  ;;  %560 = vmatpush.msrb.mxu1 %v1027_v5  ;;  %s884_s7 = sshll.u32 %s1707_s18, 1 }
  0x32   : > { %1670 = vst [vmem:[#allocation32_spill] sm:$0xff] %v1388_v46  ;;  %v339_v46 = vmul.f32 %v283_v40, %v283_v40  ;;  %580 = vmatpush.msrb.mxu2 %v1034_v6  ;;  %600 = vmatpush.msrb.mxu3 %v1039_v7  ;;  %v342_v40 = vmul.f32 %v286_v55, %v286_v55  ;;  %s260_s10 = scalar_lea.vmem %s1583_s4, %s884_s7  ;;  %s264_s6 = scalar_lea.vmem %s1584_s5, %s884_s7 }
  0x33   : > { %1671 = vst [vmem:[#allocation33_spill] sm:$0xff] %v1411_v49  ;;  %v297_v44 = vadd.f32 %v296_v43, %v287_v60  ;;  %v626_v49 = vadd.f32 %v625_v45, %v1178_v31  ;;  %v311_v38 = vadd.f32 %v310_v18, %v290_v15  ;;  %v349_v43 = vadd.f32 %v348_v41, %v337_v53 }
  0x34   : > { %v361_v47 = vadd.f32 %v360_v59, %v336_v9  ;;  %541 = vmatpush.msrb.mxu0 %v1044_v8  ;;  %561 = vmatpush.msrb.mxu1 %v1051_v10  ;;  %v343_v36 = vmul.f32 %v287_v60, %v287_v60  ;;  %v344_v48 = vmul.f32 %v288_v61, %v288_v61 }
  0x35   : > { %v298_v37 = vadd.f32 %v297_v44, %v289_v62  ;;  %v627_v51 = vadd.f32 %v626_v49, %v1149_v27  ;;  %v312_v34 = vrot.slane %v311_v38, 4  ;;  %581 = vmatpush.msrb.mxu2 %v1056_v11  ;;  %601 = vmatpush.msrb.mxu3 %v1061_v12  ;;  %v350_v58 = vadd.f32 %v349_v43, %v339_v46 }
  0x36   : > { %v362_v63 = vadd.f32 %v361_v47, %v338_v56  ;;  %542 = vmatpush.msrb.mxu0 %v1068_v13  ;;  %562 = vmatpush.msrb.mxu1 %v1073_v14  ;;  %v345_v60 = vmul.f32 %v289_v62, %v289_v62  ;;  %v346_v61 = vmul.f32 %v290_v15, %v290_v15  ;;  %v1672_v47 = vld [vmem:[#allocation5_spill] sm:$0xff] }
  0x37   : > { %v299_v33 = vrot.slane %v298_v37, 4  ;;  %v628_v55 = vadd.f32 %v627_v51, %v1125_v23  ;;  %v313_v49 = vadd.f32 %v312_v34, %v311_v38  ;;  %582 = vmatpush.msrb.mxu2 %v1084_v16  ;;  %602 = vmatpush.msrb.mxu3 %v1089_v17  ;;  %v351_v9 = vadd.f32 %v350_v58, %v341_v50  ;;  %v1676_v58 = vld [vmem:[#allocation9_spill] sm:$0xff] }
  0x38   : > { %v363_v45 = vadd.f32 %v362_v63, %v340_v52  ;;  %543 = vmatpush.msrb.mxu0 %v1098_v19  ;;  %563 = vmatpush.msrb.mxu1 %v1103_v20 }
  0x39   : > { %v300_v53 = vadd.f32 %v299_v33, %v298_v37  ;;  %v629_v44 = vadd.f32 %v628_v55, %v1098_v19  ;;  %v314_v46 = vrot.slane %v313_v49, 2  ;;  %583 = vmatpush.msrb.mxu2 %v1112_v21  ;;  %603 = vmatpush.msrb.mxu3 %v1117_v22  ;;  %v352_v18 = vadd.f32 %v351_v9, %v343_v36  ;;  %v1674_v36 = vld [vmem:[#allocation7_spill] sm:$0xff] }
  0x3a   : > { %v364_v41 = vadd.f32 %v363_v45, %v342_v40  ;;  %544 = vmatpush.msrb.mxu0 %v1125_v23  ;;  %564 = vmatpush.msrb.mxu1 %v1130_v24 }
  0x3b   : > { %v301_v56 = vrot.slane %v300_v53, 2  ;;  %v630_v59 = vadd.f32 %v629_v44, %v1068_v13  ;;  %v315_v62 = vadd.f32 %v314_v46, %v313_v49  ;;  %584 = vmatpush.msrb.mxu2 %v1137_v25  ;;  %604 = vmatpush.msrb.mxu3 %v1142_v26  ;;  %v353_v19 = vadd.f32 %v352_v18, %v345_v60  ;;  %v1677_v49 = vld [vmem:[#allocation10_spill] sm:$0xff]  ;;  %v1678_v60 = vld [vmem:[#allocation11_spill] sm:$0xff] }
  0x3c   : > { %v365_v50 = vadd.f32 %v364_v41, %v344_v48  ;;  %545 = vmatpush.msrb.mxu0 %v1149_v27  ;;  %565 = vmatpush.msrb.mxu1 %v1154_v28  ;;  %v1673_v27 = vld [vmem:[#allocation6_spill] sm:$0xff]  ;;  %v1683_v41 = vld [vmem:[#allocation15_spill] sm:$0xff] }
  0x3d   : > { %v302_v52 = vadd.f32 %v301_v56, %v300_v53  ;;  %v631_v37 = vadd.f32 %v630_v59, %v1044_v8  ;;  %v316_v13 = vrot.slane %v315_v62, 1  ;;  %585 = vmatpush.msrb.mxu2 %v1161_v29  ;;  %605 = vmatpush.msrb.mxu3 %v1166_v30  ;;  %v354_v23 = vrot.slane %v353_v19, 4  ;;  %v1680_v56 = vld [vmem:[#allocation30_spill] sm:$0xff] }
  0x3e   : > { %v366_v38 = vadd.f32 %v365_v50, %v346_v61  ;;  %546 = vmatpush.msrb.mxu0 %v1178_v31  ;;  %566 = vmatpush.msrb.mxu1 %v1183_v32  ;;  %v1675_v31 = vld [vmem:[#allocation8_spill] sm:$0xff]  ;;  %v1681_v61 = vld [vmem:[#allocation13_spill] sm:$0xff]  ;;  %v1682_v18 = vld [vmem:[#allocation14_spill] sm:$0xff] }
  0x3f   : > { %v303_v15 = vrot.slane %v302_v52, 1  ;;  %v632_v40 = vadd.f32 %v631_v37, %v1022_v4  ;;  %v317_v8 = vadd.f32 %v316_v13, %v315_v62  ;;  %586 = vmatpush.msrb.mxu2 %v1672_v47  ;;  %606 = vmatpush.msrb.mxu3 %v1673_v27  ;;  %v355_v51 = vadd.f32 %v354_v23, %v353_v19  ;;  %v291_v4 = vld [vmem:[#allocation2] sm:$0x3]  ;;  %v1687_v37 = vld [vmem:[#allocation17_spill] sm:$0xff]  ;;  %v1690_v23 = vld [vmem:[#allocation20_spill] sm:$0xff] }
  0x40   : > { %v367_v33 = vrot.slane %v366_v38, 4  ;;  %547 = vmatpush.msrb.mxu0 %v1202_v35  ;;  %567 = vmatpush.msrb.mxu1 %v1674_v36  ;;  %v1679_v35 = vld [vmem:[#allocation12_spill] sm:$0xff]  ;;  %v1686_v19 = vld [vmem:[#allocation27_spill] sm:$0xff] }
  0x41   : > { %v304_v43 = vadd.f32 %v303_v15, %v302_v52  ;;  %v633_v34 = vadd.f32 %v632_v40, %v1000_v0  ;;  %v320_v48 = vrot.slane %v317_v8, 7  ;;  %587 = vmatpush.msrb.mxu2 %v1675_v31  ;;  %607 = vmatpush.msrb.mxu3 %v1676_v58  ;;  %v356_v63 = vrot.slane %v355_v51, 2  ;;  %v1688_v15 = vld [vmem:[#allocation18_spill] sm:$0xff]  ;;  %v1689_v13 = vld [vmem:[#allocation19_spill] sm:$0xff]  ;;  %v1692_v8 = vld [vmem:[#allocation21_spill] sm:$0xff] }
  0x42   : > { %v368_v55 = vadd.f32 %v367_v33, %v366_v38  ;;  %548 = vmatpush.msrb.mxu0 %v1227_v39  ;;  %568 = vmatpush.msrb.mxu1 %v1677_v49  ;;  %v1684_v39 = vld [vmem:[#allocation16_spill] sm:$0xff]  ;;  %v1691_v40 = vld [vmem:[#allocation22_spill] sm:$0xff] }
  0x43   : > { %v634_v53 = vadd.f32 %v633_v34, %v1396_v57  ;;  %v322_v0 = vsel %vm321_vm1, %v304_v43, %v320_v48  ;;  %588 = vmatpush.msrb.mxu2 %v1678_v60  ;;  %608 = vmatpush.msrb.mxu3 %v1679_v35  ;;  %v357_v45 = vadd.f32 %v356_v63, %v355_v51  ;;  %v1693_v51 = vld [vmem:[#allocation25_spill] sm:$0xff]  ;;  %v1694_v33 = vld [vmem:[#allocation26_spill] sm:$0xff]  ;;  %v1695_v63 = vld [vmem:[#allocation24_spill] sm:$0xff] }
  0x44   : > { %v324_v9 = vadd.f32 %v322_v0, %v291_v4  ;;  %v369_v44 = vrot.slane %v368_v55, 2  ;;  %549 = vmatpush.msrb.mxu0 %v1681_v61  ;;  %569 = vmatpush.msrb.mxu1 %v1682_v18  ;;  %v330_v0 = vld [vmem:[#allocation3] sm:$0x3] }
  0x45   : > { %v635_v46 = vadd.f32 %v634_v53, %v1680_v56  ;;  %589 = vmatpush.msrb.mxu2 %v1683_v41  ;;  %609 = vmatpush.msrb.mxu3 %v1684_v39  ;;  %v358_v52 = vrot.slane %v357_v45, 1  ;;  %v1697_v53 = vld [vmem:[#allocation29_spill] sm:$0xff]  ;;  %v1698_v61 = vld [vmem:[#allocation23_spill] sm:$0xff] }
  0x46   : > { %329 = vst.msk [vmem:[#allocation2] sm:$0x3] %vm1075_vm0, %v324_v9  ;;  %v370_v62 = vadd.f32 %v369_v44, %v368_v55  ;;  %550 = vmatpush.msrb.mxu0 %v1687_v37  ;;  %570 = vmatpush.msrb.mxu1 %v1688_v15  ;;  %v1696_v55 = vld [vmem:[#allocation28_spill] sm:$0xff] }
  0x47   : > { %v636_v50 = vadd.f32 %v635_v46, %v1686_v19  ;;  %590 = vmatpush.msrb.mxu2 %v1689_v13  ;;  %610 = vmatpush.msrb.mxu3 %v1690_v23  ;;  %v359_v34 = vadd.f32 %v358_v52, %v357_v45 }
  0x48   : > { %v371_v38 = vrot.slane %v370_v62, 1  ;;  %551 = vmatpush.msrb.mxu0 %v1692_v8  ;;  %571 = vmatpush.msrb.mxu1 %v1691_v40 }
  0x49   : > { %v637_v43 = vadd.f32 %v636_v50, %v1691_v40  ;;  %591 = vmatpush.msrb.mxu2 %v1693_v51  ;;  %611 = vmatpush.msrb.mxu3 %v1694_v33  ;;  %v1700_v50 = vld [vmem:[#allocation32_spill] sm:$0xff] }
  0x4a   : > { %v372_v4 = vadd.f32 %v371_v38, %v370_v62  ;;  %552 = vmatpush.msrb.mxu0 %v1695_v63  ;;  %572 = vmatpush.msrb.mxu1 %v1686_v19  ;;  %v1699_v62 = vld [vmem:[#allocation31_spill] sm:$0xff] }
  0x4b   : > { %v638_v48 = vadd.f32 %v637_v43, %v1688_v15  ;;  %592 = vmatpush.msrb.mxu2 %v1696_v55  ;;  %612 = vmatpush.msrb.mxu3 %v1697_v53 }
  0x4c   : > { %v375_v9 = vrot.slane %v372_v4, 7  ;;  %553 = vmatpush.msrb.mxu0 %v1698_v61  ;;  %573 = vmatpush.msrb.mxu1 %v1680_v56  ;;  %v656_v56 = vadd.f32 %v1699_v62, %v1406_v42 }
  0x4d   : > { %v639_v44 = vadd.f32 %v638_v48, %v1682_v18  ;;  %v447_v46 = vld [vmem:[#allocation2] sm:$0x3]  ;;  %593 = vmatpush.msrb.mxu2 %v1699_v62  ;;  %613 = vmatpush.msrb.mxu3 %v1700_v50 }
  0x4e   : > { %v449_v45 = vperm.slane %v447_v46, 0  ;;  %v450_v52 = vperm.slane %v447_v46, 1  ;;  %v376_v19 = vsel %vm321_vm1, %v359_v34, %v375_v9  ;;  %554 = vmatpush.msrb.mxu0 %v1315_v54  ;;  %574 = vmatpush.msrb.mxu1 %v1396_v57  ;;  %v657_v57 = vadd.f32 %v656_v56, %v1696_v55 }
  0x4f   : > { %v640_v37 = vadd.f32 %v639_v44, %v1677_v49  ;;  %v378_v18 = vadd.f32 %v376_v19, %v330_v0  ;;  %594 = vmatpush.msrb.mxu2 %v1406_v42  ;;  %v1701_v49 = vld [vmem:[#allocation33_spill] sm:$0xff] }
  0x50   : > { %469 = vmatmul.f32.vlgmr.msra.gmra.mxu0 %v449_v45  ;;  %489 = vmatmul.f32.vlgmr.msra.gmra.mxu1 %v450_v52 }
  0x51   : > { %v641_v15 = vadd.f32 %v640_v37, %v1674_v36  ;;  %509 = vmatmul.f32.vlgmr.msra.gmra.mxu2 %v449_v45  ;;  %529 = vmatmul.f32.vlgmr.msra.gmra.mxu3 %v450_v52  ;;  %379 = vst.msk [vmem:[#allocation3] sm:$0x3] %vm1075_vm0, %v378_v18  ;;  %v658_v36 = vadd.f32 %v657_v57, %v1693_v51 }
  0x52   : > { %614 = vmatpush.msrb.mxu3 %v1701_v49 }
  0x53   : > { %v642_v54 = vadd.f32 %v641_v15, %v1183_v32  ;;  %v659_v43 = vadd.f32 %v658_v36, %v1689_v13 }
  0x55   : > { %v643_v38 = vadd.f32 %v642_v54, %v1154_v28  ;;  %v660_v4 = vadd.f32 %v659_v43, %v1683_v41 }
  0x57   : > { %v644_v40 = vadd.f32 %v643_v38, %v1130_v24  ;;  %v661_v63 = vadd.f32 %v660_v4, %v1678_v60 }
  0x58   : > { %v533_v8 = vld [vmem:[#allocation3] sm:$0x3] }
  0x59   : > { %v645_v34 = vadd.f32 %v644_v40, %v1103_v20  ;;  %v535_v42 = vperm.slane %v533_v8, 0  ;;  %v536_v48 = vperm.slane %v533_v8, 1  ;;  %v662_v28 = vadd.f32 %v661_v63, %v1675_v31 }
  0x5b   : > { %555 = vmatmul.f32.vlgmr.msrb.gmra.mxu0 %v535_v42  ;;  %575 = vmatmul.f32.vlgmr.msrb.gmra.mxu1 %v536_v48  ;;  %v663_v32 = vadd.f32 %v662_v28, %v1672_v47  ;;  %v646_v9 = vadd.f32 %v645_v34, %v1073_v14 }
  0x5c   : > { %595 = vmatmul.f32.vlgmr.msrb.gmra.mxu2 %v535_v42  ;;  %615 = vmatmul.f32.vlgmr.msrb.gmra.mxu3 %v536_v48 }
  0x5d   : > { %v664_v24 = vadd.f32 %v663_v32, %v1161_v29 }
  0x5f   : > { %v665_v13 = vadd.f32 %v664_v24, %v1137_v25 }
  0x61   : > { %v666_v20 = vadd.f32 %v665_v13, %v1112_v21 }
  0x63   : > { %v667_v41 = vadd.f32 %v666_v20, %v1084_v16 }
  0x65   : > { %v668_v51 = vadd.f32 %v667_v41, %v1056_v11 }
  0x67   : > { %v669_v60 = vadd.f32 %v668_v51, %v1034_v6 }
  0x69   : > { %v670_v55 = vadd.f32 %v669_v60, %v1010_v2 }
  0x6b   : > { %v671_v0 = vadd.f32 %v670_v55, %v1701_v49 }
  0x6d   : > { %v672_v31 = vadd.f32 %v671_v0, %v1700_v50 }
  0x6f   : > { %v673_v47 = vadd.f32 %v672_v31, %v1697_v53  ;;  %v647_v53 = vadd.f32 %v646_v9, %v1051_v10 }
  0x71   : > { %v674_v29 = vadd.f32 %v673_v47, %v1694_v33 }
  0x73   : > { %v675_v25 = vadd.f32 %v674_v29, %v1690_v23  ;;  %v648_v23 = vadd.f32 %v647_v53, %v1027_v5 }
  0x75   : > { %v676_v21 = vadd.f32 %v675_v25, %v1684_v39 }
  0x77   : > { %v677_v16 = vadd.f32 %v676_v21, %v1679_v35  ;;  %v649_v35 = vadd.f32 %v648_v23, %v1005_v1 }
  0x79   : > { %v678_v11 = vadd.f32 %v677_v16, %v1676_v58  ;;  %v650_v46 = vrot.slane %v649_v35, 4 }
  0x7b   : > { %v679_v6 = vadd.f32 %v678_v11, %v1673_v27 }
  0x7d   : > { %v680_v2 = vadd.f32 %v679_v6, %v1166_v30  ;;  %v651_v30 = vadd.f32 %v650_v46, %v649_v35 }
  0x7f   : > { %v681_v44 = vadd.f32 %v680_v2, %v1142_v26  ;;  %v652_v61 = vrot.slane %v651_v30, 2 }
  0x81   : > { %v682_v33 = vadd.f32 %v681_v44, %v1117_v22  ;;  %v653_v45 = vadd.f32 %v652_v61, %v651_v30 }
  0x83   : > { %v683_v39 = vadd.f32 %v682_v33, %v1089_v17  ;;  %v654_v52 = vrot.slane %v653_v45, 1 }
  0x85   : > { %v684_v58 = vadd.f32 %v683_v39, %v1061_v12  ;;  %v655_v62 = vadd.f32 %v654_v52, %v653_v45  ;;  %v753_v52 = vld [vmem:[%s1580_s1] sm:$0x3] }
  0x87   : > { %v685_v27 = vadd.f32 %v684_v58, %v1039_v7  ;;  %v693_v50 = vmul.f32 64.0, %v655_v62 }
  0x89   : > { %v686_v14 = vadd.f32 %v685_v27, %v1017_v3  ;;  %914 = vrcp.f32 %v693_v50  ;;  %vm700_vm2 = vweird.f32 %v693_v50  ;;  %v706_v56 = vand.u32 2147483648, %v693_v50 }
  0x8a   : > { %v704_v54 = vand.u32 2147483647, %v693_v50 }
  0x8b   : > { %v687_v26 = vrot.slane %v686_v14, 4  ;;  %v707_v38 = vor.u32 1.1754944e-38, %v706_v56 }
  0x8c   : > { %vm705_vm5 = vcmp.eq.f32.partialorder %v704_v54, 8.507059e+37 }
  0x8d   : > { %v688_v10 = vadd.f32 %v687_v26, %v686_v14 }
  0x8f   : > { %v689_v22 = vrot.slane %v688_v10, 2  ;;  %v915_v12 = vpop.eup %914 }
  0x90   : > { %v696_v37 = vmul.f32 %v915_v12, %v693_v50  ;;  %vm701_vm3 = vweird.f32 %v915_v12 }
  0x91   : > { %v690_v5 = vadd.f32 %v689_v22, %v688_v10  ;;  %vm702_vm4 = vmor %vm700_vm2, %vm701_vm3 }
  0x92   : > { %v697_v7 = vsub.f32 1.0, %v696_v37  ;;  %v760_v37 = vld [vmem:[%s1581_s2] sm:$0x3] }
  0x93   : > { %v691_v17 = vrot.slane %v690_v5, 1 }
  0x94   : > { %v698_v15 = vmul.f32 %v915_v12, %v697_v7 }
  0x95   : > { %v692_v1 = vadd.f32 %v691_v17, %v690_v5 }
  0x96   : > { %v699_v49 = vadd.f32 %v915_v12, %v698_v15 }
  0x97   : > { %v694_v19 = vmul.f32 64.0, %v692_v1 }
  0x98   : > { %v703_v43 = vsel %vm702_vm4, %v915_v12, %v699_v49 }
  0x99   : > { %916 = vrcp.f32 %v694_v19  ;;  %vm715_vm6 = vweird.f32 %v694_v19  ;;  %v708_v4 = vsel %vm705_vm5, %v707_v38, %v703_v43  ;;  %v721_v42 = vand.u32 2147483648, %v694_v19 }
  0x9a   : > { %v719_v63 = vand.u32 2147483647, %v694_v19 }
  0x9b   : > { %v722_v13 = vor.u32 1.1754944e-38, %v721_v42 }
  0x9c   : > { %vm720_vm9 = vcmp.eq.f32.partialorder %v719_v63, 8.507059e+37 }
  0x9f   : > { %v917_v18 = vpop.eup %916 }
  0xa0   : > { %v711_v3 = vmul.f32 %v917_v18, %v694_v19  ;;  %vm716_vm7 = vweird.f32 %v917_v18 }
  0xa1   : > { %vm717_vm8 = vmor %vm715_vm6, %vm716_vm7 }
  0xa2   : > { %v712_v57 = vsub.f32 1.0, %v711_v3 }
  0xa4   : > { %v713_v8 = vmul.f32 %v917_v18, %v712_v57 }
  0xa6   : > { %v714_v48 = vadd.f32 %v917_v18, %v713_v8 }
  0xa8   : > { %v718_v20 = vsel %vm717_vm8, %v917_v18, %v714_v48 }
  0xa9   : > { %v723_v31 = vsel %vm720_vm9, %v722_v13, %v718_v20 }
  0xcd   : > { %v470_v36 = vpop.f32.mrf.mxu0  ;;  %v490_v40 = vpop.f32.mrf.mxu1 }
  0xce   : > { %v491_v34 = vadd.f32 %v490_v40, %v470_v36 }
  0xd0   : > { %v709_v28 = vmul.f32 %v708_v4, %v491_v34 }
  0xd2   : > { %v727_v60 = vmul.f32 %v709_v28, %v709_v28 }
  0xd4   : > { %v510_v32 = vpop.f32.mrf.mxu2  ;;  %v530_v24 = vpop.f32.mrf.mxu3 }
  0xd5   : > { %v531_v0 = vadd.f32 %v530_v24, %v510_v32 }
  0xd7   : > { %v724_v25 = vmul.f32 %v723_v31, %v531_v0 }
  0xd8   : > { %v556_v41 = vpop.f32.mrf.mxu0  ;;  %v576_v51 = vpop.f32.mrf.mxu1 }
  0xd9   : > { %v577_v55 = vadd.f32 %v576_v51, %v556_v41  ;;  %v728_v2 = vmul.f32 %v724_v25, %v724_v25 }
  0xdb   : > { %v725_v47 = vmul.f32 %v708_v4, %v577_v55 }
  0xdd   : > { %v729_v29 = vsub.f32 %v725_v47, %v727_v60 }
  0xdf   : > { %v731_v21 = vadd.f32 1e-05, %v729_v29  ;;  %v596_v16 = vpop.f32.mrf.mxu2  ;;  %v616_v11 = vpop.f32.mrf.mxu3 }
  0xe0   : > { %v617_v6 = vadd.f32 %v616_v11, %v596_v16 }
  0xe1   : > { %918 = vrsqrt.f32 %v731_v21  ;;  %vm739_vm14 = vweird.f32 %v731_v21 }
  0xe2   : > { %v726_v9 = vmul.f32 %v723_v31, %v617_v6 }
  0xe4   : > { %v730_v44 = vsub.f32 %v726_v9, %v728_v2 }
  0xe6   : > { %v732_v53 = vadd.f32 1e-05, %v730_v44 }
  0xe7   : > { %v919_v33 = vpop.eup %918 }
  0xe8   : > { %v734_v23 = vmul.f32 %v919_v33, %v731_v21  ;;  %920 = vrsqrt.f32 %v732_v53  ;;  %vm740_vm11 = vweird.f32 %v919_v33  ;;  %vm749_vm12 = vweird.f32 %v732_v53 }
  0xe9   : > { %vm741_vm15 = vmor %vm739_vm14, %vm740_vm11 }
  0xea   : > { %v735_v39 = vmul.f32 %v919_v33, %v734_v23 }
  0xec   : > { %v736_v58 = vmul.f32 0.5, %v735_v39 }
  0xee   : > { %v921_v35 = vpop.eup %920  ;;  %v737_v30 = vsub.f32 1.5, %v736_v58 }
  0xef   : > { %v744_v46 = vmul.f32 %v921_v35, %v732_v53  ;;  %vm750_vm10 = vweird.f32 %v921_v35 }
  0xf0   : > { %v738_v26 = vmul.f32 %v919_v33, %v737_v30  ;;  %vm751_vm13 = vmor %vm749_vm12, %vm750_vm10 }
  0xf1   : > { %v745_v27 = vmul.f32 %v921_v35, %v744_v46 }
  0xf2   : > { %v742_v62 = vsel %vm741_vm15, %v919_v33, %v738_v26 }
  0xf3   : > { %v746_v14 = vmul.f32 0.5, %v745_v27 }
  0xf5   : > { %v747_v61 = vsub.f32 1.5, %v746_v14 }
  0xf7   : > { %v748_v45 = vmul.f32 %v921_v35, %v747_v61 }
  0xf9   : > { %v752_v10 = vsel %vm751_vm13, %v921_v35, %v748_v45 }
  0xfa   : > { %v756_v22 = vrot.slane %v752_v10, 7 }
  0xfc   : > { %v757_v5 = vsel %vm321_vm1, %v742_v62, %v756_v22 }
  0xfd   : > { %v759_v50 = vmul.f32 %v757_v5, %v753_v52 }
  0xff   : > { %v762_v17 = vperm.slane %v759_v50, 0  ;;  %v763_v1 = vperm.slane %v759_v50, 1  ;;  %774 = vst.msk [vmem:[%s260_s10] sm:$0x3] %vm1075_vm0, %v759_v50 }
 0x101   : > { %v766_v19 = vmul.f32 %v762_v17, %v709_v28  ;;  %v767_v12 = vmul.f32 %v763_v1, %v724_v25 }
 0x103   : > { %v770_v7 = vrot.slane %v767_v12, 7 }
 0x105   : > { %v771_v18 = vsel %vm321_vm1, %v766_v19, %v770_v7 }
 0x106   : > { %v773_v15 = vsub.f32 %v760_v37, %v771_v18 }
 0x108   : > { %775 = vst.msk [vmem:[%s264_s6] sm:$0x3] %vm1075_vm0, %v773_v15 }
 0x109 PF: > { %s16_s20 = sadd.s32 1, %s944_s20   ;;  %s1702_s18 = smov %s940_s19 }
 0x10a   : > { %p13_p5 = scmp.ge.s32.totalorder %s16_s20, 4   ;;  %s1703_s19 = smov %s1705_s21 }
 0x10c   :  { %15 = sbr.rel (!%p13_p5) target bundleno = 2 (0x2), region = 86 }

// kernel: _lambda_.21
= control target key start
LH: loop header
LB: loop body
LE: loop exit
PB: predicated region body
PF: predicated region fallthrough
CT: control target
= control target key end

     0   :  { %s851_s15 = smov 0   ;;  %s853_s16 = smov 0   ;;  %s1019_s0 = inlined_call_operand.vmem [shape: f32[2,64,256], index: 0, kind: input, shape index: {}]   ;;  %s1020_s1 = inlined_call_operand.vmem [shape: f32[2,1,256], index: 1, kind: input, shape index: {}]   ;;  %s1021_s2 = inlined_call_operand.vmem [shape: f32[2,1,256], index: 2, kind: input, shape index: {}]   ;;  %s1022_s3 = inlined_call_operand.vmem [shape: bf16[256,64], index: 3, kind: input, shape index: {}]   ;;  %s1023_s4 = inlined_call_operand.vmem [shape: f32[2,64,64], index: 4, kind: output, shape index: {}]  }
   0x1   :  { %s855_s17 = smov 0  }
   0x2 LB: > { %s26_s18 = sadd.s32 1, %s820_s16  ;;  %p671_p0 = scmp.ge.s32.totalorder %s824_s17, 1  ;;  %s824_s17 = sphi %s855_s17, %s14_s17   ;;  %s820_s16 = sphi %s853_s16, %s1025_s16   ;;  %s816_s15 = sphi %s851_s15, %s1024_s15  }
   0x3   : > { %p28_p1 = scmp.ge.s32.totalorder %s26_s18, 2  ;;  %p202_p2 = scmp.lt.s32.totalorder %s824_s17, 3 }
   0x5   : > { %s1027_s18 = smov (%p28_p1, %s26_s18), 0  ;;  %p203_p3 = pnand %p671_p0, %p202_p2 }
   0x6   : > { %p246_p4 = scmp.lt.s32.totalorder (!%p203_p3), %s816_s15, 1 }
   0x7   : > { %206 = sbr.rel (%p203_p3) target bundleno = 204 (0xcc), region = 36 }
   0xc   : > { %v753_v0 = vld [vmem:[%s1022_s3 + $0x38] sm:$0xff]  ;;  %v752_v2 = vld [vmem:[%s1022_s3 + $0x30] sm:$0xff]  ;;  %s1029_s15 = smov (!%p246_p4, %s816_s15), 1  ;;  %v751_v4 = vld [vmem:[%s1022_s3 + $0x28] sm:$0xff]  ;;  %vm544_vm0 = vcmask 523264  }
   0xd   : > { %v761_v1 = vld [vmem:[%s1022_s3 + $0x78] sm:$0xff]  ;;  %486 = vmatpush.bf16.msra.mxu0 %v753_v0  ;;  %762 = vmatpush.bf16.msra.mxu2 %v753_v0  ;;  %v760_v3 = vld [vmem:[%s1022_s3 + $0x70] sm:$0xff]  ;;  %s674_s27 = sshll.u32 %s1029_s15, 1  ;;  %v759_v5 = vld [vmem:[%s1022_s3 + $0x68] sm:$0xff]  ;;  %s744_s9 = sshll.u32 %s1029_s15, 7 }
   0xe   : > { %515 = vmatpush.bf16.msra.mxu1 %v761_v1  ;;  %770 = vmatpush.bf16.msra.mxu3 %v761_v1  ;;  %s259_s6 = scalar_lea.vmem %s1020_s1, %s674_s27  ;;  %v750_v7 = vld [vmem:[%s1022_s3 + $0x20] sm:$0xff]  ;;  %s900_s14 = scalar_lea.vmem %s1019_s0, %s744_s9  ;;  %v749_v9 = vld [vmem:[%s1022_s3 + $0x18] sm:$0xff]  ;;  %v748_v29 = vld [vmem:[%s1022_s3 + $0x10] sm:$0xff] }
   0xf   : > { %v290_v6 = vld [vmem:[%s259_s6] sm:$0x3]  ;;  %s263_s21 = scalar_lea.vmem %s1021_s2, %s674_s27  ;;  %v757_v11 = vld [vmem:[%s1022_s3 + $0x58] sm:$0xff]  ;;  %v276_v13 = vld [vmem:[%s900_s14 + $0x10] sm:$0xff] }
  0x10   : > { %v758_v8 = vld [vmem:[%s1022_s3 + $0x60] sm:$0xff]  ;;  %v911_v10 = vperm.slane %v290_v6, 0  ;;  %v918_v15 = vperm.slane %v290_v6, 1  ;;  %v284_v17 = vld [vmem:[%s900_s14 + $0x50] sm:$0xff]  ;;  %v275_v18 = vld [vmem:[%s900_s14 + $0x8] sm:$0xff] }
  0x11   : > { %487 = vmatpush.bf16.msra.mxu0 %v752_v2  ;;  %763 = vmatpush.bf16.msra.mxu2 %v752_v2  ;;  %v274_v12 = vld [vmem:[%s900_s14] sm:$0xff]  ;;  %v277_v19 = vld [vmem:[%s900_s14 + $0x18] sm:$0xff]  ;;  %v283_v20 = vld [vmem:[%s900_s14 + $0x48] sm:$0xff] }
  0x12   : > { %516 = vmatpush.bf16.msra.mxu1 %v760_v3  ;;  %771 = vmatpush.bf16.msra.mxu3 %v760_v3  ;;  %v291_v14 = vld [vmem:[%s263_s21] sm:$0x3]  ;;  %v285_v21 = vld [vmem:[%s900_s14 + $0x58] sm:$0xff]  ;;  %v297_v22 = vmul.f32 %v911_v10, %v274_v12  ;;  %v299_v25 = vmul.f32 %v911_v10, %v276_v13  ;;  %v307_v27 = vmul.f32 %v911_v10, %v284_v17  ;;  %v756_v33 = vld [vmem:[%s1022_s3 + $0x50] sm:$0xff] }
  0x13   : > { %v282_v16 = vld [vmem:[%s900_s14 + $0x40] sm:$0xff]  ;;  %v927_v23 = vperm.slane %v291_v14, 0  ;;  %v929_v24 = vperm.slane %v291_v14, 1  ;;  %v298_v28 = vmul.f32 %v918_v15, %v275_v18  ;;  %v300_v30 = vmul.f32 %v918_v15, %v277_v19  ;;  %v747_v39 = vld [vmem:[%s1022_s3 + $0x8] sm:$0xff]  ;;  %v280_v57 = vld [vmem:[%s900_s14 + $0x30] sm:$0xff] }
  0x14   : > { %v305_v26 = vmul.f32 %v911_v10, %v282_v16  ;;  %v306_v31 = vmul.f32 %v918_v15, %v283_v20  ;;  %v308_v32 = vmul.f32 %v918_v15, %v285_v21  ;;  %v755_v43 = vld [vmem:[%s1022_s3 + $0x48] sm:$0xff]  ;;  %v746_v48 = vld [vmem:[%s1022_s3] sm:$0xff]  ;;  %v288_v61 = vld [vmem:[%s900_s14 + $0x70] sm:$0xff]  ;;  %v303_v3 = vmul.f32 %v911_v10, %v280_v57 }
  0x15   : > { %488 = vmatpush.bf16.msra.mxu0 %v751_v4  ;;  %764 = vmatpush.bf16.msra.mxu2 %v751_v4  ;;  %v318_v34 = vadd.f32 %v927_v23, %v297_v22  ;;  %v320_v35 = vadd.f32 %v927_v23, %v299_v25  ;;  %v328_v37 = vadd.f32 %v927_v23, %v307_v27  ;;  %v754_v53 = vld [vmem:[%s1022_s3 + $0x40] sm:$0xff]  ;;  %v279_v62 = vld [vmem:[%s900_s14 + $0x28] sm:$0xff]  ;;  %v281_v63 = vld [vmem:[%s900_s14 + $0x38] sm:$0xff] }
  0x16   : > { %517 = vmatpush.bf16.msra.mxu1 %v759_v5  ;;  %772 = vmatpush.bf16.msra.mxu3 %v759_v5  ;;  %v326_v36 = vadd.f32 %v927_v23, %v305_v26  ;;  %v319_v38 = vadd.f32 %v929_v24, %v298_v28  ;;  %v321_v40 = vadd.f32 %v929_v24, %v300_v30  ;;  %v278_v56 = vld [vmem:[%s900_s14 + $0x20] sm:$0xff]  ;;  %v287_v0 = vld [vmem:[%s900_s14 + $0x68] sm:$0xff]  ;;  %v289_v1 = vld [vmem:[%s900_s14 + $0x78] sm:$0xff] }
  0x17   : > { %v327_v41 = vadd.f32 %v929_v24, %v306_v31  ;;  %v329_v42 = vadd.f32 %v929_v24, %v308_v32  ;;  %v334_v44 = vmax.f32 %v318_v34, 0.0  ;;  %v336_v45 = vmax.f32 %v320_v35, 0.0  ;;  %v286_v60 = vld [vmem:[%s900_s14 + $0x60] sm:$0xff]  ;;  %s745_s14 = sshll.u32 %s1029_s15, 6 }
  0x18   : > { %v342_v46 = vmax.f32 %v326_v36, 0.0  ;;  %v344_v47 = vmax.f32 %v328_v37, 0.0  ;;  %v335_v49 = vmax.f32 %v319_v38, 0.0  ;;  %v337_v50 = vmax.f32 %v321_v40, 0.0  ;;  %s992_s21 = scalar_lea.vmem %s1023_s4, %s745_s14 }
  0x19   : > { %489 = vmatpush.bf16.msra.mxu0 %v750_v7  ;;  %765 = vmatpush.bf16.msra.mxu2 %v750_v7  ;;  %v343_v51 = vmax.f32 %v327_v41, 0.0  ;;  %v345_v52 = vmax.f32 %v329_v42, 0.0  ;;  %v350_v54 = vpack.c.bf16 %v336_v45, %v334_v44  ;;  %v301_v2 = vmul.f32 %v911_v10, %v278_v56 }
  0x1a   : > { %518 = vmatpush.bf16.msra.mxu1 %v758_v8  ;;  %773 = vmatpush.bf16.msra.mxu3 %v758_v8  ;;  %v354_v55 = vpack.c.bf16 %v344_v47, %v342_v46  ;;  %v351_v58 = vpack.c.bf16 %v337_v50, %v335_v49  ;;  %v309_v4 = vmul.f32 %v911_v10, %v286_v60 }
  0x1b   : > { %v355_v59 = vpack.c.bf16 %v345_v52, %v343_v51  ;;  %v311_v5 = vmul.f32 %v911_v10, %v288_v61  ;;  %v302_v6 = vmul.f32 %v918_v15, %v279_v62  ;;  %v304_v7 = vmul.f32 %v918_v15, %v281_v63 }
  0x1c   : > { %v310_v8 = vmul.f32 %v918_v15, %v287_v0  ;;  %v324_v12 = vadd.f32 %v927_v23, %v303_v3  ;;  %v330_v13 = vadd.f32 %v927_v23, %v309_v4 }
  0x1d   : > { %490 = vmatpush.bf16.msra.mxu0 %v749_v9  ;;  %766 = vmatpush.bf16.msra.mxu2 %v749_v9  ;;  %v312_v9 = vmul.f32 %v918_v15, %v289_v1  ;;  %v332_v14 = vadd.f32 %v927_v23, %v311_v5  ;;  %v323_v10 = vadd.f32 %v929_v24, %v302_v6 }
  0x1e   : > { %519 = vmatpush.bf16.msra.mxu1 %v757_v11  ;;  %774 = vmatpush.bf16.msra.mxu3 %v757_v11  ;;  %v322_v11 = vadd.f32 %v927_v23, %v301_v2  ;;  %v325_v16 = vadd.f32 %v929_v24, %v304_v7  ;;  %v331_v17 = vadd.f32 %v929_v24, %v310_v8  ;;  %v340_v20 = vmax.f32 %v324_v12, 0.0 }
  0x1f   : > { %v333_v18 = vadd.f32 %v929_v24, %v312_v9  ;;  %v346_v15 = vmax.f32 %v330_v13, 0.0  ;;  %v348_v21 = vmax.f32 %v332_v14, 0.0  ;;  %v339_v22 = vmax.f32 %v323_v10, 0.0 }
  0x20   : > { %v338_v19 = vmax.f32 %v322_v11, 0.0  ;;  %v341_v25 = vmax.f32 %v325_v16, 0.0  ;;  %v347_v26 = vmax.f32 %v331_v17, 0.0 }
  0x21   : > { %491 = vmatpush.bf16.msra.mxu0 %v748_v29  ;;  %767 = vmatpush.bf16.msra.mxu2 %v748_v29  ;;  %v349_v27 = vmax.f32 %v333_v18, 0.0  ;;  %v356_v29 = vpack.c.bf16 %v348_v21, %v346_v15 }
  0x22   : > { %520 = vmatpush.bf16.msra.mxu1 %v756_v33  ;;  %775 = vmatpush.bf16.msra.mxu3 %v756_v33  ;;  %v352_v28 = vpack.c.bf16 %v340_v20, %v338_v19  ;;  %v353_v23 = vpack.c.bf16 %v341_v25, %v339_v22 }
  0x23   : > { %v357_v30 = vpack.c.bf16 %v349_v27, %v347_v26 }
  0x25   : > { %492 = vmatpush.bf16.msra.mxu0 %v747_v39  ;;  %768 = vmatpush.bf16.msra.mxu2 %v747_v39 }
  0x26   : > { %521 = vmatpush.bf16.msra.mxu1 %v755_v43  ;;  %776 = vmatpush.bf16.msra.mxu3 %v755_v43 }
  0x29   : > { %493 = vmatpush.bf16.msra.mxu0 %v746_v48  ;;  %769 = vmatpush.bf16.msra.mxu2 %v746_v48 }
  0x2a   : > { %522 = vmatpush.bf16.msra.mxu1 %v754_v53  ;;  %777 = vmatpush.bf16.msra.mxu3 %v754_v53 }
  0x2c   : > { %494 = vmatmul.bf16.vlgmr.msra.gmra.mxu0 %v350_v54  ;;  %504 = vmatmul.bf16.vlgmr.msra.gmra.mxu2 %v354_v55 }
  0x2d   : > { %523 = vmatmul.bf16.vlgmr.msra.gmra.mxu1 %v351_v58  ;;  %533 = vmatmul.bf16.vlgmr.msra.gmra.mxu3 %v355_v59 }
  0x3c   : > { %499 = vmatmul.bf16.gmra.mxu0 %v352_v28  ;;  %509 = vmatmul.bf16.gmra.mxu2 %v356_v29 }
  0x3d   : > { %528 = vmatmul.bf16.gmra.mxu1 %v353_v23  ;;  %538 = vmatmul.bf16.gmra.mxu3 %v357_v30 }
  0xa9   : > { %v495_v31 = vpop.f32.mrf.mxu0 }
  0xaa   : > { %v524_v24 = vpop.f32.mrf.mxu1 }
  0xab   : > { %v525_v32 = vadd.f32 %v524_v24, %v495_v31 }
  0xad   : > { %545 = vst.msk [vmem:[%s992_s21] sm:$0xff] %vm544_vm0, %v525_v32 }
  0xaf   : > { %v505_v33 = vpop.f32.mrf.mxu2 }
  0xb0   : > { %v534_v34 = vpop.f32.mrf.mxu3 }
  0xb1   : > { %v535_v35 = vadd.f32 %v534_v34, %v505_v33  ;;  %v497_v36 = vpop.f32.mrf.mxu0 }
  0xb2   : > { %v526_v37 = vpop.f32.mrf.mxu1 }
  0xb3   : > { %549 = vst.msk [vmem:[%s992_s21 + $0x20] sm:$0xff] %vm544_vm0, %v535_v35  ;;  %v527_v38 = vadd.f32 %v526_v37, %v497_v36 }
  0xb5   : > { %546 = vst.msk [vmem:[%s992_s21 + $0x8] sm:$0xff] %vm544_vm0, %v527_v38 }
  0xb7   : > { %v507_v39 = vpop.f32.mrf.mxu2 }
  0xb8   : > { %v536_v40 = vpop.f32.mrf.mxu3 }
  0xb9   : > { %v537_v41 = vadd.f32 %v536_v40, %v507_v39  ;;  %v500_v42 = vpop.f32.mrf.mxu0 }
  0xba   : > { %v529_v43 = vpop.f32.mrf.mxu1 }
  0xbb   : > { %550 = vst.msk [vmem:[%s992_s21 + $0x28] sm:$0xff] %vm544_vm0, %v537_v41  ;;  %v530_v44 = vadd.f32 %v529_v43, %v500_v42 }
  0xbd   : > { %547 = vst.msk [vmem:[%s992_s21 + $0x10] sm:$0xff] %vm544_vm0, %v530_v44 }
  0xbf   : > { %v510_v45 = vpop.f32.mrf.mxu2 }
  0xc0   : > { %v539_v46 = vpop.f32.mrf.mxu3 }
  0xc1   : > { %v540_v47 = vadd.f32 %v539_v46, %v510_v45  ;;  %v502_v48 = vpop.f32.mrf.mxu0 }
  0xc2   : > { %v531_v49 = vpop.f32.mrf.mxu1 }
  0xc3   : > { %551 = vst.msk [vmem:[%s992_s21 + $0x30] sm:$0xff] %vm544_vm0, %v540_v47  ;;  %v532_v50 = vadd.f32 %v531_v49, %v502_v48 }
  0xc5   : > { %548 = vst.msk [vmem:[%s992_s21 + $0x18] sm:$0xff] %vm544_vm0, %v532_v50 }
  0xc7   : > { %v512_v51 = vpop.f32.mrf.mxu2 }
  0xc8   : > { %v541_v52 = vpop.f32.mrf.mxu3 }
  0xc9   : > { %v542_v53 = vadd.f32 %v541_v52, %v512_v51 }
  0xcb   : > { %552 = vst.msk [vmem:[%s992_s21 + $0x38] sm:$0xff] %vm544_vm0, %v542_v53 }
  0xcc PF: > { %s14_s17 = sadd.s32 1, %s824_s17   ;;  %s1024_s15 = smov %s820_s16 }
  0xcd   : > { %p11_p5 = scmp.ge.s32.totalorder %s14_s17, 4   ;;  %s1025_s16 = smov %s1027_s18 }
  0xcf   :  { %13 = sbr.rel (!%p11_p5) target bundleno = 2 (0x2), region = 72 }

// kernel: _lambda_.25
= control target key start
LH: loop header
LB: loop body
LE: loop exit
PB: predicated region body
PF: predicated region fallthrough
CT: control target
= control target key end

     0   :  { %10 = vsyncpa [#allocation3], 0  ;;  %s1118_s0 = inlined_call_operand.vmem [shape: f32[2,64,64], index: 0, kind: input, shape index: {}]   ;;  %s1119_s1 = inlined_call_operand.vmem [shape: f32[2,1,64], index: 1, kind: input, shape index: {}]   ;;  %s1120_s2 = inlined_call_operand.vmem [shape: f32[2,1,64], index: 2, kind: input, shape index: {}]   ;;  %s1121_s3 = inlined_call_operand.vmem [shape: bf16[64,256], index: 3, kind: input, shape index: {}]   ;;  %s1122_s4 = inlined_call_operand.vmem [shape: f32[2,64,256], index: 4, kind: input, shape index: {}]   ;;  %s1123_s5 = inlined_call_operand.hbm [shape: f32[2,64,256], index: 5, kind: output, shape index: {}]  }
   0x1   :  { %12 = vsyncpa [#allocation3 + $0x1], 0  ;;  %s899_s18 = smov 0   ;;  %s901_s19 = smov 0  }
   0x2   :  { %s903_s20 = smov 0   ;;  %s905_s21 = smov 0  }
   0x3   :  { %s907_s22 = smov 0   ;;  %s909_s23 = smov 0  }
   0x4 LB: > { %s654_s24 = sadd.s32 4294967295, %s865_s23   ;;  %s655_s25 = sadd.s32 4294967294, %s865_s23   ;;  %s865_s23 = sphi %s909_s23, %s18_s23   ;;  %s861_s22 = sphi %s907_s22, %s1130_s22   ;;  %s857_s21 = sphi %s905_s21, %s1129_s21   ;;  %s853_s20 = sphi %s903_s20, %s1128_s20   ;;  %s849_s19 = sphi %s901_s19, %s1127_s19   ;;  %s845_s18 = sphi %s899_s18, %s1126_s18  }
   0x5   : > { %s30_s26 = sadd.s32 1, %s861_s22  ;;  %s168_s27 = sadd.s32 1, %s853_s20 }
   0x6   : > { %p32_p0 = scmp.ge.s32.totalorder %s30_s26, 2  ;;  %p178_p1 = scmp.ne.s32.totalorder %s853_s20, %s849_s19 }
   0x7   : > { %p179_p2 = scmp.eq.s32.totalorder %s654_s24, 1  ;;  %p184_p3 = scmp.ne.s32.totalorder %s849_s19, %s845_s18 }
   0x8   : > { %s1132_s26 = smov (%p32_p0, %s30_s26), 0  ;;  %p185_p5 = scmp.eq.s32.totalorder %s655_s25, 1 }
   0x9   : > { %p939_p4 = por %p179_p2, %p178_p1  ;;  %s163_s29 = ssub.s32 %s861_s22, %s1132_s26 }
   0xa   : > { %p658_p6 = scmp.ge.s32.totalorder %s865_s23, 1  ;;  %p166_p7 = scmp.eq.s32.totalorder %s163_s29, 0 }
   0xb   : > { %p946_p8 = por %p185_p5, %p184_p3  ;;  %p245_p9 = scmp.lt.s32.totalorder %s865_s23, 3 }
   0xc   : > { %s952_s6 = scalar_select %p166_p7, %s853_s20, %s168_s27  }
   0xd   : > { %p246_p10 = pnand %p658_p6, %p245_p9 }
   0xe   : > { %p294_p11 = scmp.lt.s32.totalorder (!%p246_p10), %s857_s21, 1  ;;  %s290_s7 = sand.u32 (!%p246_p10), 1, %s849_s19  }
   0xf   : > { %249 = sbr.rel (%p246_p10) target bundleno = 202 (0xca), region = 40  ;;  %s659_s11 = sshll.u32 (!%p246_p10), %s290_s7, 7 }
  0x10   : > { %s719_s12 = sshll.u32 (!%p246_p10), %s857_s21, 7  ;;  %s518_s24 = scalar_lea.sflag (!%p246_p10), [#allocation3], %s290_s7 }
  0x11   : > { %s532_s15 = scalar_lea.hbm (!%p246_p10), %s1123_s5, %s719_s12  ;;  %s807_s9 = scalar_lea.hbm (!%p246_p10), %s1123_s5, 256 }
  0x14   : > { %v690_v0 = vld [vmem:[%s1121_s3 + $0x30] sm:$0xf]  ;;  %v718_v1 = vld [vmem:[%s1121_s3 + $0x34] sm:$0xf0]  ;;  %v717_v2 = vld [vmem:[%s1121_s3 + $0x34] sm:$0xf] }
  0x15   : > { %v691_v3 = vor.u32 %v718_v1, %v690_v0  ;;  %v692_v4 = vld [vmem:[%s1121_s3 + $0x38] sm:$0xf0]  ;;  %v682_v5 = vld [vmem:[%s1121_s3 + $0x20] sm:$0xf]  ;;  %v716_v6 = vld [vmem:[%s1121_s3 + $0x24] sm:$0xf0] }
  0x16   : > { %v695_v7 = vor.u32 %v717_v2, %v692_v4  ;;  %v715_v8 = vld [vmem:[%s1121_s3 + $0x24] sm:$0xf]  ;;  %v684_v9 = vld [vmem:[%s1121_s3 + $0x28] sm:$0xf0]  ;;  %v683_v10 = vor.u32 %v716_v6, %v682_v5  ;;  %v674_v12 = vld [vmem:[%s1121_s3 + $0x10] sm:$0xf] }
  0x17   : > { %447 = vmatpush.bf16.msra.mxu0 %v691_v3  ;;  %720 = vmatpush.bf16.msra.mxu2 %v691_v3  ;;  %v687_v11 = vor.u32 %v715_v8, %v684_v9  ;;  %v714_v13 = vld [vmem:[%s1121_s3 + $0x14] sm:$0xf0]  ;;  %v713_v14 = vld [vmem:[%s1121_s3 + $0x14] sm:$0xf]  ;;  %v676_v15 = vld [vmem:[%s1121_s3 + $0x18] sm:$0xf0] }
  0x18   : > { %476 = vmatpush.bf16.msra.mxu1 %v695_v7  ;;  %724 = vmatpush.bf16.msra.mxu3 %v695_v7  ;;  %v675_v16 = vor.u32 %v714_v13, %v674_v12  ;;  %s992_s16 = scalar_select %p294_p11, %s857_s21, 1  ;;  %v679_v17 = vor.u32 %v713_v14, %v676_v15  ;;  %v666_v18 = vld [vmem:[%s1121_s3] sm:$0xf]  ;;  %v712_v19 = vld [vmem:[%s1121_s3 + $0x4] sm:$0xf0]  ;;  %vm430_vm0 = vcmask 523264  }
  0x19   : > { %v711_v20 = vld [vmem:[%s1121_s3 + $0x4] sm:$0xf]  ;;  %v668_v21 = vld [vmem:[%s1121_s3 + $0x8] sm:$0xf0]  ;;  %v667_v23 = vor.u32 %v712_v19, %v666_v18 }
  0x1a   : > { %s709_s10 = sshll.u32 %s992_s16, 6  ;;  %s305_s13 = scalar_lea.vmem %s1119_s1, %s992_s16  ;;  %v671_v26 = vor.u32 %v711_v20, %v668_v21 }
  0x1b   : > { %448 = vmatpush.bf16.msra.mxu0 %v683_v10  ;;  %721 = vmatpush.bf16.msra.mxu2 %v683_v10  ;;  %s1014_s17 = scalar_lea.vmem %s1118_s0, %s709_s10  ;;  %s308_s27 = scalar_lea.vmem %s1120_s2, %s992_s16  ;;  %v785_v22 = vld [vmem:[%s305_s13] ss:$0 sm:$0xff] }
  0x1c   : > { %477 = vmatpush.bf16.msra.mxu1 %v687_v11  ;;  %725 = vmatpush.bf16.msra.mxu3 %v687_v11  ;;  %v322_v24 = vld [vmem:[%s1014_s17] sm:$0xff]  ;;  %v323_v25 = vld [vmem:[%s1014_s17 + $0x8] sm:$0xff]  ;;  %v324_v42 = vld [vmem:[%s1014_s17 + $0x10] sm:$0xff]  ;;  %s710_s29 = sshll.u32 %s992_s16, 7  ;;  %s1047_s16 = scalar_lea.vmem [#allocation2], %s659_s11 }
  0x1d   : > { %v335_v27 = vmul.f32 %v785_v22, %v322_v24  ;;  %v336_v28 = vmul.f32 %v785_v22, %v323_v25  ;;  %v786_v29 = vld [vmem:[%s308_s27] ss:$0 sm:$0xff]  ;;  %v327_v31 = vld [vmem:[%s1014_s17 + $0x28] sm:$0xff]  ;;  %v325_v43 = vld [vmem:[%s1014_s17 + $0x18] sm:$0xff]  ;;  %v337_v48 = vmul.f32 %v785_v22, %v324_v42  ;;  %s1041_s10 = scalar_lea.vmem %s1122_s4, %s710_s29  ;;  %s533_s21 = sshll.u32 %s1047_s16, 4  ;;  %s534_s21 = int_to_ptr.vmem [resolvable:$true] %s533_s21 }
  0x1e   : > { %v326_v30 = vld [vmem:[%s1014_s17 + $0x20] sm:$0xff]  ;;  %v340_v33 = vmul.f32 %v785_v22, %v327_v31  ;;  %v328_v45 = vld [vmem:[%s1014_s17 + $0x30] sm:$0xff]  ;;  %v329_v46 = vld [vmem:[%s1014_s17 + $0x38] sm:$0xff]  ;;  %v338_v49 = vmul.f32 %v785_v22, %v325_v43  ;;  %s535_s17 = sshll.u32 %s532_s15, 4  ;;  %s536_s17 = int_to_ptr.hbm [resolvable:$true] %s535_s17 }
  0x1f   : > { %449 = vmatpush.bf16.msra.mxu0 %v675_v16  ;;  %722 = vmatpush.bf16.msra.mxu2 %v675_v16  ;;  %v339_v32 = vmul.f32 %v785_v22, %v326_v30  ;;  %v346_v34 = vadd.f32 %v786_v29, %v335_v27  ;;  %v347_v35 = vadd.f32 %v786_v29, %v336_v28  ;;  %v374_v62 = vld [vmem:[%s1041_s10] sm:$0xff]  ;;  %v375_v63 = vld [vmem:[%s1041_s10 + $0x8] sm:$0xff]  ;;  %v376_v6 = vld [vmem:[%s1041_s10 + $0x10] sm:$0xff]  ;;  %s801_s25 = sshra.s32 %s536_s17, 4  ;;  %s802_s25 = int_to_ptr.hbm [resolvable:$true] %s801_s25 }
  0x20   : > { %478 = vmatpush.bf16.msra.mxu1 %v679_v17  ;;  %726 = vmatpush.bf16.msra.mxu3 %v679_v17  ;;  %v351_v37 = vadd.f32 %v786_v29, %v340_v33  ;;  %v341_v50 = vmul.f32 %v785_v22, %v328_v45  ;;  %v342_v51 = vmul.f32 %v785_v22, %v329_v46  ;;  %v382_v4 = vld [vmem:[%s1041_s10 + $0x40] sm:$0xff]  ;;  %v383_v5 = vld [vmem:[%s1041_s10 + $0x48] sm:$0xff]  ;;  %v377_v7 = vld [vmem:[%s1041_s10 + $0x18] sm:$0xff]  ;;  %s803_s27 = scalar_lea.hbm %s802_s25, 128  ;;  %p808_p1 = scmp.lt.s32.totalorder %s802_s25, %s1123_s5 }
  0x21   : > { %v350_v36 = vadd.f32 %v786_v29, %v339_v32  ;;  %v354_v38 = vmax.f32 %v346_v34, 0.0  ;;  %v355_v39 = vmax.f32 %v347_v35, 0.0  ;;  %v348_v52 = vadd.f32 %v786_v29, %v337_v48  ;;  %v384_v16 = vld [vmem:[%s1041_s10 + $0x50] sm:$0xff]  ;;  %v385_v17 = vld [vmem:[%s1041_s10 + $0x58] sm:$0xff]  ;;  %v378_v18 = vld [vmem:[%s1041_s10 + $0x20] sm:$0xff]  ;;  %p804_p12 = scmp.ne.s32.totalorder %s802_s25, %s803_s27  ;;  %p809_p2 = scmp.lt.s32.totalorder %s807_s9, %s803_s27 }
  0x22   : > { %v359_v41 = vmax.f32 %v351_v37, 0.0  ;;  %v349_v53 = vadd.f32 %v786_v29, %v338_v49  ;;  %v352_v54 = vadd.f32 %v786_v29, %v341_v50  ;;  %v353_v55 = vadd.f32 %v786_v29, %v342_v51  ;;  %v379_v19 = vld [vmem:[%s1041_s10 + $0x28] sm:$0xff]  ;;  %v386_v28 = vld [vmem:[%s1041_s10 + $0x60] sm:$0xff]  ;;  %v380_v30 = vld [vmem:[%s1041_s10 + $0x30] sm:$0xff] }
  0x23   : > { %450 = vmatpush.bf16.msra.mxu0 %v667_v23  ;;  %723 = vmatpush.bf16.msra.mxu2 %v667_v23  ;;  %v358_v40 = vmax.f32 %v350_v36, 0.0  ;;  %v362_v44 = vpack.c.bf16 %v355_v39, %v354_v38  ;;  %v356_v56 = vmax.f32 %v348_v52, 0.0  ;;  %v387_v29 = vld [vmem:[%s1041_s10 + $0x68] sm:$0xff]  ;;  %v381_v31 = vld [vmem:[%s1041_s10 + $0x38] sm:$0xff]  ;;  %p805_p13 = pnand %p804_p12, %p939_p4  ;;  %p810_p3 = por %p809_p2, %p808_p1 }
  0x24   : > { %479 = vmatpush.bf16.msra.mxu1 %v671_v26  ;;  %727 = vmatpush.bf16.msra.mxu3 %v671_v26  ;;  %v357_v57 = vmax.f32 %v349_v53, 0.0  ;;  %v360_v58 = vmax.f32 %v352_v54, 0.0  ;;  %v361_v59 = vmax.f32 %v353_v55, 0.0 }
  0x25   : > { %v364_v47 = vpack.c.bf16 %v359_v41, %v358_v40  ;;  %v388_v40 = vld [vmem:[%s1041_s10 + $0x70] sm:$0xff]  ;;  %v389_v41 = vld [vmem:[%s1041_s10 + $0x78] sm:$0xff]  ;;  %p806_p0 = pneg %p805_p13 }
  0x26   : > { %696 = vmatmul.msk.bf16.vlgmr.msra.gmra.mxu0 %vm430_vm0, %v362_v44  ;;  %v363_v60 = vpack.c.bf16 %v357_v57, %v356_v56  ;;  %v365_v61 = vpack.c.bf16 %v361_v59, %v360_v58 }
  0x27   : > { %700 = vmatmul.msk.bf16.vlgmr.msra.gmra.mxu1 %vm430_vm0, %v362_v44  ;;  %698 = vmatmul.msk.bf16.vlgmr.msra.gmra.mxu2 %vm430_vm0, %v364_v47  ;;  %p811_p5 = pnand %p810_p3, %p806_p0 }
  0x28   : > { %702 = vmatmul.msk.bf16.vlgmr.msra.gmra.mxu3 %vm430_vm0, %v364_v47 }
  0x36   : > { %697 = vmatmul.msk.bf16.gmra.mxu0 %vm430_vm0, %v363_v60 }
  0x37   : > { %701 = vmatmul.msk.bf16.gmra.mxu1 %vm430_vm0, %v363_v60  ;;  %699 = vmatmul.msk.bf16.gmra.mxu2 %vm430_vm0, %v365_v61 }
  0x38   : > { %703 = vmatmul.msk.bf16.gmra.mxu3 %vm430_vm0, %v365_v61 }
  0xa3   : > { %v452_v0 = vpop.f32.mrf.mxu0 }
  0xa4   : > { %v481_v1 = vpop.f32.mrf.mxu1  ;;  %v453_v2 = vadd.f32 %v452_v0, %v374_v62 }
  0xa5   : > { %v482_v3 = vadd.f32 %v481_v1, %v375_v63 }
  0xa6   : > { %501 = vst [vmem:[%s1047_s16] sm:$0xff] %v453_v2 }
  0xa7   : > { %502 = vst [vmem:[%s1047_s16 + $0x8] sm:$0xff] %v482_v3 }
  0xaa   : > { %v462_v8 = vpop.f32.mrf.mxu2 }
  0xab   : > { %v491_v9 = vpop.f32.mrf.mxu3  ;;  %v463_v10 = vadd.f32 %v462_v8, %v382_v4  ;;  %v454_v12 = vpop.f32.mrf.mxu0 }
  0xac   : > { %v492_v11 = vadd.f32 %v491_v9, %v383_v5  ;;  %v483_v13 = vpop.f32.mrf.mxu1  ;;  %v455_v14 = vadd.f32 %v454_v12, %v376_v6 }
  0xad   : > { %v484_v15 = vadd.f32 %v483_v13, %v377_v7  ;;  %509 = vst [vmem:[%s1047_s16 + $0x40] sm:$0xff] %v463_v10 }
  0xae   : > { %510 = vst [vmem:[%s1047_s16 + $0x48] sm:$0xff] %v492_v11 }
  0xaf   : > { %503 = vst [vmem:[%s1047_s16 + $0x10] sm:$0xff] %v455_v14 }
  0xb0   : > { %504 = vst [vmem:[%s1047_s16 + $0x18] sm:$0xff] %v484_v15 }
  0xb2   : > { %v464_v20 = vpop.f32.mrf.mxu2 }
  0xb3   : > { %v493_v21 = vpop.f32.mrf.mxu3  ;;  %v465_v22 = vadd.f32 %v464_v20, %v384_v16  ;;  %v457_v24 = vpop.f32.mrf.mxu0 }
  0xb4   : > { %v494_v23 = vadd.f32 %v493_v21, %v385_v17  ;;  %v486_v25 = vpop.f32.mrf.mxu1  ;;  %v458_v26 = vadd.f32 %v457_v24, %v378_v18 }
  0xb5   : > { %v487_v27 = vadd.f32 %v486_v25, %v379_v19  ;;  %511 = vst [vmem:[%s1047_s16 + $0x50] sm:$0xff] %v465_v22 }
  0xb6   : > { %512 = vst [vmem:[%s1047_s16 + $0x58] sm:$0xff] %v494_v23 }
  0xb7   : > { %505 = vst [vmem:[%s1047_s16 + $0x20] sm:$0xff] %v458_v26 }
  0xb8   : > { %506 = vst [vmem:[%s1047_s16 + $0x28] sm:$0xff] %v487_v27 }
  0xba   : > { %v467_v32 = vpop.f32.mrf.mxu2 }
  0xbb   : > { %v496_v33 = vpop.f32.mrf.mxu3  ;;  %v468_v34 = vadd.f32 %v467_v32, %v386_v28  ;;  %v459_v36 = vpop.f32.mrf.mxu0 }
  0xbc   : > { %v497_v35 = vadd.f32 %v496_v33, %v387_v29  ;;  %v488_v37 = vpop.f32.mrf.mxu1  ;;  %v460_v38 = vadd.f32 %v459_v36, %v380_v30 }
  0xbd   : > { %v489_v39 = vadd.f32 %v488_v37, %v381_v31  ;;  %513 = vst [vmem:[%s1047_s16 + $0x60] sm:$0xff] %v468_v34 }
  0xbe   : > { %514 = vst [vmem:[%s1047_s16 + $0x68] sm:$0xff] %v497_v35 }
  0xbf   : > { %507 = vst [vmem:[%s1047_s16 + $0x30] sm:$0xff] %v460_v38 }
  0xc0   : > { %508 = vst [vmem:[%s1047_s16 + $0x38] sm:$0xff] %v489_v39 }
  0xc2   : > { %v469_v42 = vpop.f32.mrf.mxu2 }
  0xc3   : > { %v498_v43 = vpop.f32.mrf.mxu3  ;;  %v470_v44 = vadd.f32 %v469_v42, %v388_v40 }
  0xc4   : > { %v499_v45 = vadd.f32 %v498_v43, %v389_v41 }
  0xc5   : > { %515 = vst [vmem:[%s1047_s16 + $0x70] sm:$0xff] %v470_v44 }
  0xc6   : > { %516 = vst [vmem:[%s1047_s16 + $0x78] sm:$0xff] %v499_v45 }
  0xc7   : > { %814 = shalt.err (!%p811_p5)
}
  0xc8   : > { %s867_s7 = smov 256   ;;  %s868_s16 = smov 16  }
  0xc9   : > { %728 = dma.vmem_to_hbm [thread:$0]  (%p939_p4), %s534_s21, 2048, %s536_s17, %s518_s24, %s867_s7, %s867_s7, %s868_s16  }
  0xca PF: > { %p734_p6 = scmp.ge.s32.totalorder %s865_s23, 2  ;;  %s550_s12 = sand.u32 1, %s845_s18  }
  0xcb   : > { %s551_s13 = scalar_lea.sflag [#allocation3], %s550_s12 }
  0xcc   : > { %p731_p7 = pnand %p734_p6, %p946_p8 }
  0xce   : > { %p732_p9 = pneg %p731_p7 }
  0xd0   : > { %840 = dma.done.wait (%p732_p9), %s551_s13, 2048  }
  0xd1   : > { %842 = vsyncadd (%p732_p9), %s551_s13, 4294965248  ;;  %s18_s23 = sadd.s32 1, %s865_s23   ;;  %s1126_s18 = smov %s849_s19 }
  0xd2   : > { %p15_p10 = scmp.ge.s32.totalorder %s18_s23, 4   ;;  %s1127_s19 = smov %s853_s20 }
  0xd3   : > { %s1128_s20 = smov %s952_s6  ;;  %s1129_s21 = smov %s861_s22 }
  0xd4   : > { %s1130_s22 = smov %s1132_s26  ;;  %17 = sbr.rel (!%p15_p10) target bundleno = 4 (0x4), region = 84 }
  0xd9   :  { %557 = vsyncpa [#allocation3], 1 }
  0xda   :  { %559 = vsyncpa [#allocation3 + $0x1], 1 }

// kernel: _lambda_.17
= control target key start
LH: loop header
LB: loop body
LE: loop exit
PB: predicated region body
PF: predicated region fallthrough
CT: control target
= control target key end

     0   :  { %s3835_s15 = smov 0   ;;  %s4963_s0 = inlined_call_operand.vmem [shape: f32[2,16,16,64], index: 0, kind: input, shape index: {}]   ;;  %s4964_s1 = inlined_call_operand.vmem [shape: f32[2,1,64], index: 1, kind: input, shape index: {}]   ;;  %s4965_s2 = inlined_call_operand.vmem [shape: f32[2,1,64], index: 2, kind: input, shape index: {}]   ;;  %s4966_s3 = inlined_call_operand.vmem [shape: bf16[576,64], index: 3, kind: input, shape index: {}]   ;;  %s4967_s4 = inlined_call_operand.vmem [shape: f32[2,16,16,64], index: 4, kind: output, shape index: {}]  }
   0x1 LB: > { %s3439_s16 = sadd.s32 4294967295, %s3807_s15   ;;  %p3443_p0 = scmp.ge.s32.totalorder %s3807_s15, 1  ;;  %s3807_s15 = sphi %s3835_s15, %s14_s15  }
   0x2   : > { %p178_p1 = scmp.lt.s32.totalorder %s3807_s15, 3 }
   0x4   : > { %p179_p2 = pnand %p3443_p0, %p178_p1 }
   0x5   : > { %p210_p3 = scmp.lt.s32.totalorder (!%p179_p2), %s3439_s16, 1 }
   0x6   : > { %182 = sbr.rel (%p179_p2) target bundleno = 843 (0x34b), region = 36 }
   0xb   : > { %v3743_v0 = vld [vmem:[%s4966_s3 + $0x18] sm:$0xff]  ;;  %vm363_vm0 = vcmask 523264   ;;  %vm366_vm1 = vcmask 517120   ;;  %v3809_v1 = vmov 0.0   ;;  %v3742_v2 = vld [vmem:[%s4966_s3 + $0x10] sm:$0xff]  ;;  %s4969_s16 = smov (!%p210_p3, %s3439_s16), 1 }
   0xc   : > { %377 = vst.msk [vmem:[#allocation2 + $0x60] sm:$0xff] %vm363_vm0, %v3809_v1  ;;  %3776 = vmatpush.bf16.msra.mxu1 %v3743_v0  ;;  %3777 = vmatpush.bf16.msra.mxu2 %v3743_v0  ;;  %s3738_s21 = sshll.u32 %s4969_s16, 8  ;;  %s3862_s24 = scalar_lea.vmem %s4964_s1, %s4969_s16  ;;  %v3741_v3 = vld [vmem:[%s4966_s3 + $0x8] sm:$0xff]  ;;  %v3740_v12 = vld [vmem:[%s4966_s3] sm:$0xff]  ;;  %v3747_v18 = vld [vmem:[%s4966_s3 + $0x38] sm:$0xff] }
   0xd   : > { %378 = vst.msk [vmem:[#allocation2 + $0x68] sm:$0xff] %vm363_vm0, %v3809_v1  ;;  %3778 = vmatpush.bf16.msra.mxu3 %v3743_v0  ;;  %648 = vmatpush.bf16.msra.mxu0 %v3743_v0  ;;  %s3874_s29 = scalar_lea.vmem %s4963_s0, %s3738_s21  ;;  %s3880_s6 = scalar_lea.vmem %s4965_s2, %s4969_s16  ;;  %v3883_v4 = vld [vmem:[%s3862_s24] ss:$0 sm:$0xff]  ;;  %v3751_v19 = vld [vmem:[%s4966_s3 + $0x58] sm:$0xff]  ;;  %v3746_v44 = vld [vmem:[%s4966_s3 + $0x30] sm:$0xff] }
   0xe   : > { %379 = vst.msk [vmem:[#allocation2 + $0x70] sm:$0x3] %vm366_vm1, %v3809_v1  ;;  %v233_v5 = vld [vmem:[%s3874_s29 + $0x30] sm:$0xff]  ;;  %v234_v6 = vld [vmem:[%s3874_s29 + $0x38] sm:$0xff]  ;;  %v3894_v9 = vld [vmem:[%s3880_s6] ss:$0 sm:$0xff] }
   0xf   : > { %364 = vst.msk [vmem:[#allocation2] sm:$0xff] %vm363_vm0, %v3809_v1  ;;  %v270_v7 = vmul.f32 %v3883_v4, %v233_v5  ;;  %v271_v8 = vmul.f32 %v3883_v4, %v234_v6  ;;  %v3755_v20 = vld [vmem:[%s4966_s3 + $0x78] sm:$0xff]  ;;  %v241_v21 = vld [vmem:[%s3874_s29 + $0x70] sm:$0xff]  ;;  %v235_v27 = vld [vmem:[%s3874_s29 + $0x40] sm:$0xff] }
  0x10   : > { %365 = vst.msk [vmem:[#allocation2 + $0x8] sm:$0xff] %vm363_vm0, %v3809_v1  ;;  %3779 = vmatpush.bf16.msra.mxu1 %v3742_v2  ;;  %3780 = vmatpush.bf16.msra.mxu2 %v3742_v2  ;;  %v242_v22 = vld [vmem:[%s3874_s29 + $0x78] sm:$0xff]  ;;  %v249_v23 = vld [vmem:[%s3874_s29 + $0xb0] sm:$0xff]  ;;  %v278_v24 = vmul.f32 %v3883_v4, %v241_v21  ;;  %v236_v29 = vld [vmem:[%s3874_s29 + $0x48] sm:$0xff]  ;;  %v272_v34 = vmul.f32 %v3883_v4, %v235_v27 }
  0x11   : > { %367 = vst.msk [vmem:[#allocation2 + $0x10] sm:$0x3] %vm366_vm1, %v3809_v1  ;;  %3781 = vmatpush.bf16.msra.mxu3 %v3742_v2  ;;  %649 = vmatpush.bf16.msra.mxu0 %v3742_v2  ;;  %v305_v10 = vadd.f32 %v3894_v9, %v270_v7  ;;  %v306_v11 = vadd.f32 %v3894_v9, %v271_v8  ;;  %v250_v26 = vld [vmem:[%s3874_s29 + $0xb8] sm:$0xff]  ;;  %v243_v31 = vld [vmem:[%s3874_s29 + $0x80] sm:$0xff]  ;;  %v244_v35 = vld [vmem:[%s3874_s29 + $0x88] sm:$0xff] }
  0x12   : > { %368 = vst.msk [vmem:[#allocation2 + $0x18] sm:$0xff] %vm363_vm0, %v3809_v1  ;;  %v279_v25 = vmul.f32 %v3883_v4, %v242_v22  ;;  %v286_v28 = vmul.f32 %v3883_v4, %v249_v23  ;;  %v287_v30 = vmul.f32 %v3883_v4, %v250_v26  ;;  %v313_v32 = vadd.f32 %v3894_v9, %v278_v24  ;;  %v251_v37 = vld [vmem:[%s3874_s29 + $0xc0] sm:$0xff]  ;;  %v252_v40 = vld [vmem:[%s3874_s29 + $0xc8] sm:$0xff]  ;;  %v237_v41 = vld [vmem:[%s3874_s29 + $0x50] sm:$0xff] }
  0x13   : > { %369 = vst.msk [vmem:[#allocation2 + $0x20] sm:$0xff] %vm363_vm0, %v3809_v1  ;;  %v337_v13 = vmax.f32 %v305_v10, 0.0  ;;  %v338_v14 = vmax.f32 %v306_v11, 0.0  ;;  %v273_v36 = vmul.f32 %v3883_v4, %v236_v29  ;;  %v280_v39 = vmul.f32 %v3883_v4, %v243_v31  ;;  %v3750_v45 = vld [vmem:[%s4966_s3 + $0x50] sm:$0xff]  ;;  %v238_v52 = vld [vmem:[%s3874_s29 + $0x58] sm:$0xff]  ;;  %v227_v7 = vld [vmem:[%s3874_s29] sm:$0xff] }
  0x14   : > { %370 = vst.msk [vmem:[#allocation2 + $0x28] sm:$0x3] %vm366_vm1, %v3809_v1  ;;  %3782 = vmatpush.bf16.msra.mxu1 %v3741_v3  ;;  %3783 = vmatpush.bf16.msra.mxu2 %v3741_v3  ;;  %v314_v33 = vadd.f32 %v3894_v9, %v279_v25  ;;  %v321_v38 = vadd.f32 %v3894_v9, %v286_v28  ;;  %v345_v47 = vmax.f32 %v313_v32, 0.0  ;;  %v3754_v56 = vld [vmem:[%s4966_s3 + $0x70] sm:$0xff]  ;;  %v3759_v57 = vld [vmem:[%s4966_s3 + $0x98] sm:$0xff] }
  0x15   : > { %371 = vst.msk [vmem:[#allocation2 + $0x30] sm:$0xff] %vm363_vm0, %v3809_v1  ;;  %3784 = vmatpush.bf16.msra.mxu3 %v3741_v3  ;;  %650 = vmatpush.bf16.msra.mxu0 %v3741_v3  ;;  %v322_v42 = vadd.f32 %v3894_v9, %v287_v30  ;;  %v281_v43 = vmul.f32 %v3883_v4, %v244_v35  ;;  %v245_v58 = vld [vmem:[%s3874_s29 + $0x90] sm:$0xff]  ;;  %v246_v62 = vld [vmem:[%s3874_s29 + $0x98] sm:$0xff] }
  0x16   : > { %372 = vst.msk [vmem:[#allocation2 + $0x38] sm:$0xff] %vm363_vm0, %v3809_v1  ;;  %v484_v46 = vld [vmem:[#allocation2] sm:$0xff]  ;;  %v346_v48 = vmax.f32 %v314_v33, 0.0  ;;  %v307_v49 = vadd.f32 %v3894_v9, %v272_v34  ;;  %v288_v51 = vmul.f32 %v3883_v4, %v251_v37  ;;  %v308_v53 = vadd.f32 %v3894_v9, %v273_v36 }
  0x17   : > { %373 = vst.msk [vmem:[#allocation2 + $0x40] sm:$0x3] %vm366_vm1, %v3809_v1  ;;  %v485_v50 = vld [vmem:[#allocation2 + $0x8] sm:$0xff]  ;;  %v289_v55 = vmul.f32 %v3883_v4, %v252_v40  ;;  %v353_v59 = vmax.f32 %v321_v38, 0.0  ;;  %v315_v60 = vadd.f32 %v3894_v9, %v280_v39  ;;  %v274_v61 = vmul.f32 %v3883_v4, %v237_v41  ;;  %v239_v41 = vld [vmem:[%s3874_s29 + $0x60] sm:$0xff] }
  0x18   : > { %426 = vst.msk [vmem:[#allocation2 + $0x61] sm:$0xff] %vm363_vm0, %v337_v13  ;;  %3785 = vmatpush.bf16.msra.mxu1 %v3740_v12  ;;  %3786 = vmatpush.bf16.msra.mxu2 %v3740_v12  ;;  %v516_v54 = vpack.c.bf16 %v485_v50, %v484_v46  ;;  %v354_v63 = vmax.f32 %v322_v42, 0.0  ;;  %v316_v0 = vadd.f32 %v3894_v9, %v281_v43  ;;  %v339_v3 = vmax.f32 %v307_v49, 0.0  ;;  %v254_v13 = vld [vmem:[%s3874_s29 + $0xd8] sm:$0xff]  ;;  %v240_v42 = vld [vmem:[%s3874_s29 + $0x68] sm:$0xff] }
  0x19   : > { %427 = vst.msk [vmem:[#allocation2 + $0x69] sm:$0xff] %vm363_vm0, %v338_v14  ;;  %3787 = vmatpush.bf16.msra.mxu3 %v3740_v12  ;;  %651 = vmatpush.bf16.msra.mxu0 %v3740_v12  ;;  %v275_v2 = vmul.f32 %v3883_v4, %v238_v52  ;;  %v323_v5 = vadd.f32 %v3894_v9, %v288_v51  ;;  %v340_v8 = vmax.f32 %v308_v53, 0.0  ;;  %v253_v12 = vld [vmem:[%s3874_s29 + $0xd0] sm:$0xff]  ;;  %v347_v14 = vmax.f32 %v315_v60, 0.0  ;;  %v3749_v46 = vld [vmem:[%s4966_s3 + $0x48] sm:$0xff]  ;;  %v247_v53 = vld [vmem:[%s3874_s29 + $0xa0] sm:$0xff] }
  0x1a   : > { %374 = vst.msk [vmem:[#allocation2 + $0x48] sm:$0xff] %vm363_vm0, %v3809_v1  ;;  %v282_v6 = vmul.f32 %v3883_v4, %v245_v58  ;;  %v324_v10 = vadd.f32 %v3894_v9, %v289_v55  ;;  %v283_v11 = vmul.f32 %v3883_v4, %v246_v62  ;;  %v290_v23 = vmul.f32 %v3883_v4, %v253_v12 }
  0x1b   : > { %375 = vst.msk [vmem:[#allocation2 + $0x50] sm:$0xff] %vm363_vm0, %v3809_v1  ;;  %v355_v21 = vmax.f32 %v323_v5, 0.0  ;;  %v291_v24 = vmul.f32 %v3883_v4, %v254_v13  ;;  %v277_v49 = vmul.f32 %v3883_v4, %v240_v42  ;;  %v284_v60 = vmul.f32 %v3883_v4, %v247_v53  ;;  %v230_v5 = vld [vmem:[%s3874_s29 + $0x18] sm:$0xff] }
  0x1c   : > { %376 = vst.msk [vmem:[#allocation2 + $0x58] sm:$0x3] %vm366_vm1, %v3809_v1  ;;  %961 = vmatpush.bf16.msrb.mxu1 %v3747_v18  ;;  %1274 = vmatpush.bf16.msrb.mxu2 %v3751_v19  ;;  %v348_v18 = vmax.f32 %v316_v0, 0.0  ;;  %v310_v19 = vadd.f32 %v3894_v9, %v275_v2  ;;  %v317_v22 = vadd.f32 %v3894_v9, %v282_v6  ;;  %v356_v25 = vmax.f32 %v324_v10, 0.0 }
  0x1d   : > { %380 = vst.msk [vmem:[#allocation2 + $0x78] sm:$0xff] %vm363_vm0, %v3809_v1  ;;  %1587 = vmatpush.bf16.msrb.mxu3 %v3755_v20  ;;  %3464 = vmatmul.msk.bf16.vlgmr.msra.gmra.mxu0 %vm363_vm0, %v516_v54  ;;  %v318_v26 = vadd.f32 %v3894_v9, %v283_v11  ;;  %v325_v34 = vadd.f32 %v3894_v9, %v290_v23  ;;  %v248_v54 = vld [vmem:[%s3874_s29 + $0xa8] sm:$0xff] }
  0x1e   : > { %381 = vst.msk [vmem:[#allocation2 + $0x80] sm:$0xff] %vm363_vm0, %v3809_v1  ;;  %1900 = vmatpush.bf16.msrb.mxu0 %v3759_v57  ;;  %v342_v30 = vmax.f32 %v310_v19, 0.0  ;;  %v349_v33 = vmax.f32 %v317_v22, 0.0  ;;  %v326_v35 = vadd.f32 %v3894_v9, %v291_v24  ;;  %v3758_v57 = vld [vmem:[%s4966_s3 + $0x90] sm:$0xff]  ;;  %v319_v0 = vadd.f32 %v3894_v9, %v284_v60  ;;  %v3767_v60 = vld [vmem:[%s4966_s3 + $0xd8] sm:$0xff] }
  0x1f   : > { %v492_v15 = vld [vmem:[#allocation2 + $0x60] sm:$0xff]  ;;  %382 = vst.msk [vmem:[#allocation2 + $0x88] sm:$0x3] %vm366_vm1, %v3809_v1  ;;  %v350_v38 = vmax.f32 %v318_v26, 0.0  ;;  %v357_v51 = vmax.f32 %v325_v34, 0.0 }
  0x20   : > { %v493_v16 = vld [vmem:[#allocation2 + $0x68] sm:$0xff]  ;;  %383 = vst.msk [vmem:[#allocation2 + $0x90] sm:$0xff] %vm363_vm0, %v3809_v1  ;;  %962 = vmatpush.bf16.msrb.mxu1 %v3746_v44  ;;  %1275 = vmatpush.bf16.msrb.mxu2 %v3750_v45  ;;  %v358_v52 = vmax.f32 %v326_v35, 0.0  ;;  %v351_v10 = vmax.f32 %v319_v0, 0.0  ;;  %v3744_v35 = vld [vmem:[%s4966_s3 + $0x20] sm:$0xff] }
  0x21   : > { %v3929_v17 = vpack.c.bf16 %v493_v16, %v492_v15  ;;  %384 = vst.msk [vmem:[#allocation2 + $0x98] sm:$0xff] %vm363_vm0, %v3809_v1  ;;  %1588 = vmatpush.bf16.msrb.mxu3 %v3754_v56  ;;  %v309_v15 = vadd.f32 %v3894_v9, %v274_v61  ;;  %v264_v16 = vmul.f32 %v3883_v4, %v227_v7  ;;  %v3745_v45 = vld [vmem:[%s4966_s3 + $0x28] sm:$0xff] }
  0x22   : > { %385 = vst.msk [vmem:[#allocation2 + $0xa0] sm:$0x3] %vm366_vm1, %v3809_v1  ;;  %v3753_v56 = vld [vmem:[%s4966_s3 + $0x68] sm:$0xff]  ;;  %v285_v61 = vmul.f32 %v3883_v4, %v248_v54  ;;  %1901 = vmatpush.bf16.msrb.mxu0 %v3758_v57  ;;  %v267_v7 = vmul.f32 %v3883_v4, %v230_v5 }
  0x23   : > { %3468 = vmatmul.msk.bf16.vlgmr.msra.gmra.mxu1 %vm363_vm0, %v3929_v17  ;;  %386 = vst.msk [vmem:[#allocation2 + $0xa8] sm:$0xff] %vm363_vm0, %v3809_v1  ;;  %v341_v27 = vmax.f32 %v309_v15, 0.0  ;;  %v299_v28 = vadd.f32 %v3894_v9, %v264_v16 }
  0x24   : > { %387 = vst.msk [vmem:[#allocation2 + $0xb0] sm:$0xff] %vm363_vm0, %v3809_v1  ;;  %963 = vmatpush.bf16.msrb.mxu1 %v3745_v45  ;;  %1276 = vmatpush.bf16.msrb.mxu2 %v3749_v46  ;;  %v320_v2 = vadd.f32 %v3894_v9, %v285_v61  ;;  %v302_v15 = vadd.f32 %v3894_v9, %v267_v7  ;;  %v3756_v61 = vld [vmem:[%s4966_s3 + $0x80] sm:$0xff] }
  0x25   : > { %388 = vst.msk [vmem:[#allocation2 + $0xb8] sm:$0x3] %vm366_vm1, %v3809_v1  ;;  %v331_v40 = vmax.f32 %v299_v28, 0.0  ;;  %1589 = vmatpush.bf16.msrb.mxu3 %v3753_v56 }
  0x26   : > { %389 = vst.msk [vmem:[#allocation2 + $0xc0] sm:$0xff] %vm363_vm0, %v3809_v1  ;;  %v352_v11 = vmax.f32 %v320_v2, 0.0  ;;  %v334_v23 = vmax.f32 %v302_v15, 0.0  ;;  %v1111_v15 = vld [vmem:[#allocation2 + $0xa] sm:$0xff] }
  0x27   : > { %390 = vst.msk [vmem:[#allocation2 + $0xc8] sm:$0xff] %vm363_vm0, %v3809_v1 }
  0x28   : > { %391 = vst.msk [vmem:[#allocation2 + $0xd0] sm:$0x3] %vm366_vm1, %v3809_v1  ;;  %964 = vmatpush.bf16.msrb.mxu1 %v3744_v35 }
  0x29   : > { %392 = vst.msk [vmem:[#allocation2 + $0xd8] sm:$0xff] %vm363_vm0, %v3809_v1 }
  0x2a   : > { %393 = vst.msk [vmem:[#allocation2 + $0xe0] sm:$0xff] %vm363_vm0, %v3809_v1 }
  0x2b   : > { %394 = vst.msk [vmem:[#allocation2 + $0xe8] sm:$0x3] %vm366_vm1, %v3809_v1 }
  0x2c   : > { %395 = vst.msk [vmem:[#allocation2 + $0xf0] sm:$0xff] %vm363_vm0, %v3809_v1 }
  0x2d   : > { %396 = vst.msk [vmem:[#allocation2 + $0xf8] sm:$0xff] %vm363_vm0, %v3809_v1 }
  0x2e   : > { %397 = vst.msk [vmem:[#allocation2 + $0x100] sm:$0x3] %vm366_vm1, %v3809_v1 }
  0x2f   : > { %398 = vst.msk [vmem:[#allocation2 + $0x108] sm:$0xff] %vm363_vm0, %v3809_v1 }
  0x30   : > { %399 = vst.msk [vmem:[#allocation2 + $0x110] sm:$0xff] %vm363_vm0, %v3809_v1 }
  0x31   : > { %400 = vst.msk [vmem:[#allocation2 + $0x118] sm:$0x3] %vm366_vm1, %v3809_v1 }
  0x32   : > { %401 = vst.msk [vmem:[#allocation2 + $0x120] sm:$0xff] %vm363_vm0, %v3809_v1 }
  0x33   : > { %402 = vst.msk [vmem:[#allocation2 + $0x128] sm:$0xff] %vm363_vm0, %v3809_v1 }
  0x34   : > { %403 = vst.msk [vmem:[#allocation2 + $0x130] sm:$0x3] %vm366_vm1, %v3809_v1 }
  0x35   : > { %404 = vst.msk [vmem:[#allocation2 + $0x138] sm:$0xff] %vm363_vm0, %v3809_v1 }
  0x36   : > { %405 = vst.msk [vmem:[#allocation2 + $0x140] sm:$0xff] %vm363_vm0, %v3809_v1 }
  0x37   : > { %406 = vst.msk [vmem:[#allocation2 + $0x148] sm:$0x3] %vm366_vm1, %v3809_v1 }
  0x38   : > { %407 = vst.msk [vmem:[#allocation2 + $0x150] sm:$0xff] %vm363_vm0, %v3809_v1 }
  0x39   : > { %408 = vst.msk [vmem:[#allocation2 + $0x158] sm:$0xff] %vm363_vm0, %v3809_v1 }
  0x3a   : > { %409 = vst.msk [vmem:[#allocation2 + $0x160] sm:$0x3] %vm366_vm1, %v3809_v1 }
  0x3b   : > { %410 = vst.msk [vmem:[#allocation2 + $0x168] sm:$0xff] %vm363_vm0, %v3809_v1 }
  0x3c   : > { %411 = vst.msk [vmem:[#allocation2 + $0x170] sm:$0xff] %vm363_vm0, %v3809_v1 }
  0x3d   : > { %412 = vst.msk [vmem:[#allocation2 + $0x178] sm:$0x3] %vm366_vm1, %v3809_v1 }
  0x3e   : > { %413 = vst.msk [vmem:[#allocation2 + $0x180] sm:$0xff] %vm363_vm0, %v3809_v1 }
  0x3f   : > { %414 = vst.msk [vmem:[#allocation2 + $0x188] sm:$0xff] %vm363_vm0, %v3809_v1 }
  0x40   : > { %415 = vst.msk [vmem:[#allocation2 + $0x190] sm:$0x3] %vm366_vm1, %v3809_v1 }
  0x41   : > { %416 = vst.msk [vmem:[#allocation2 + $0x198] sm:$0xff] %vm363_vm0, %v3809_v1 }
  0x42   : > { %417 = vst.msk [vmem:[#allocation2 + $0x1a0] sm:$0xff] %vm363_vm0, %v3809_v1 }
  0x43   : > { %418 = vst.msk [vmem:[#allocation2 + $0x1a8] sm:$0x3] %vm366_vm1, %v3809_v1 }
  0x44   : > { %452 = vst.msk [vmem:[#allocation3] sm:$0xff] %vm363_vm0, %v3809_v1 }
  0x45   : > { %453 = vst.msk [vmem:[#allocation3 + $0x8] sm:$0xff] %vm363_vm0, %v3809_v1 }
  0x46   : > { %454 = vst.msk [vmem:[#allocation3 + $0x10] sm:$0xff] %vm363_vm0, %v3809_v1 }
  0x47   : > { %455 = vst.msk [vmem:[#allocation3 + $0x18] sm:$0xff] %vm363_vm0, %v3809_v1 }
  0x48   : > { %456 = vst.msk [vmem:[#allocation3 + $0x20] sm:$0xff] %vm363_vm0, %v3809_v1 }
  0x49   : > { %457 = vst.msk [vmem:[#allocation3 + $0x28] sm:$0xff] %vm363_vm0, %v3809_v1 }
  0x4a   : > { %458 = vst.msk [vmem:[#allocation3 + $0x30] sm:$0xff] %vm363_vm0, %v3809_v1 }
  0x4b   : > { %459 = vst.msk [vmem:[#allocation3 + $0x38] sm:$0xff] %vm363_vm0, %v3809_v1 }
  0x4c   : > { %460 = vst.msk [vmem:[#allocation3 + $0x40] sm:$0xff] %vm363_vm0, %v3809_v1 }
  0x4d   : > { %461 = vst.msk [vmem:[#allocation3 + $0x48] sm:$0xff] %vm363_vm0, %v3809_v1 }
  0x4e   : > { %462 = vst.msk [vmem:[#allocation3 + $0x50] sm:$0xff] %vm363_vm0, %v3809_v1 }
  0x4f   : > { %463 = vst.msk [vmem:[#allocation3 + $0x58] sm:$0xff] %vm363_vm0, %v3809_v1 }
  0x50   : > { %464 = vst.msk [vmem:[#allocation3 + $0x60] sm:$0xff] %vm363_vm0, %v3809_v1 }
  0x51   : > { %465 = vst.msk [vmem:[#allocation3 + $0x68] sm:$0xff] %vm363_vm0, %v3809_v1 }
  0x52   : > { %466 = vst.msk [vmem:[#allocation3 + $0x70] sm:$0xff] %vm363_vm0, %v3809_v1 }
  0x53   : > { %467 = vst.msk [vmem:[#allocation3 + $0x78] sm:$0xff] %vm363_vm0, %v3809_v1 }
  0x54   : > { %468 = vst.msk [vmem:[#allocation3 + $0x80] sm:$0xff] %vm363_vm0, %v3809_v1 }
  0x55   : > { %469 = vst.msk [vmem:[#allocation3 + $0x88] sm:$0xff] %vm363_vm0, %v3809_v1 }
  0x56   : > { %470 = vst.msk [vmem:[#allocation3 + $0x90] sm:$0xff] %vm363_vm0, %v3809_v1 }
  0x57   : > { %471 = vst.msk [vmem:[#allocation3 + $0x98] sm:$0xff] %vm363_vm0, %v3809_v1 }
  0x58   : > { %472 = vst.msk [vmem:[#allocation3 + $0xa0] sm:$0xff] %vm363_vm0, %v3809_v1 }
  0x59   : > { %473 = vst.msk [vmem:[#allocation3 + $0xa8] sm:$0xff] %vm363_vm0, %v3809_v1 }
  0x5a   : > { %474 = vst.msk [vmem:[#allocation3 + $0xb0] sm:$0xff] %vm363_vm0, %v3809_v1 }
  0x5b   : > { %475 = vst.msk [vmem:[#allocation3 + $0xb8] sm:$0xff] %vm363_vm0, %v3809_v1 }
  0x5c   : > { %476 = vst.msk [vmem:[#allocation3 + $0xc0] sm:$0xff] %vm363_vm0, %v3809_v1 }
  0x5d   : > { %477 = vst.msk [vmem:[#allocation3 + $0xc8] sm:$0xff] %vm363_vm0, %v3809_v1 }
  0x5e   : > { %478 = vst.msk [vmem:[#allocation3 + $0xd0] sm:$0xff] %vm363_vm0, %v3809_v1 }
  0x5f   : > { %479 = vst.msk [vmem:[#allocation3 + $0xd8] sm:$0xff] %vm363_vm0, %v3809_v1 }
  0x60   : > { %480 = vst.msk [vmem:[#allocation3 + $0xe0] sm:$0xff] %vm363_vm0, %v3809_v1 }
  0x61   : > { %481 = vst.msk [vmem:[#allocation3 + $0xe8] sm:$0xff] %vm363_vm0, %v3809_v1 }
  0x62   : > { %482 = vst.msk [vmem:[#allocation3 + $0xf0] sm:$0xff] %vm363_vm0, %v3809_v1 }
  0x63   : > { %483 = vst.msk [vmem:[#allocation3 + $0xf8] sm:$0xff] %vm363_vm0, %v3809_v1  ;;  %v228_v1 = vld [vmem:[%s3874_s29 + $0x8] sm:$0xff] }
  0x64   : > { %434 = vst.msk [vmem:[#allocation2 + $0xc1] sm:$0xff] %vm363_vm0, %v345_v47  ;;  %v265_v20 = vmul.f32 %v3883_v4, %v228_v1  ;;  %v255_v1 = vld [vmem:[%s3874_s29 + $0xe0] sm:$0xff] }
  0x65   : > { %435 = vst.msk [vmem:[#allocation2 + $0xc9] sm:$0xff] %vm363_vm0, %v346_v48  ;;  %v276_v48 = vmul.f32 %v3883_v4, %v239_v41  ;;  %v292_v12 = vmul.f32 %v3883_v4, %v255_v1  ;;  %v232_v41 = vld [vmem:[%s3874_s29 + $0x28] sm:$0xff] }
  0x66   : > { %442 = vst.msk [vmem:[#allocation2 + $0x121] sm:$0xff] %vm363_vm0, %v353_v59  ;;  %v300_v31 = vadd.f32 %v3894_v9, %v265_v20  ;;  %v312_v59 = vadd.f32 %v3894_v9, %v277_v49 }
  0x67   : > { %443 = vst.msk [vmem:[#allocation2 + $0x129] sm:$0xff] %vm363_vm0, %v354_v63  ;;  %v311_v58 = vadd.f32 %v3894_v9, %v276_v48  ;;  %v327_v19 = vadd.f32 %v3894_v9, %v292_v12 }
  0x68   : > { %428 = vst.msk [vmem:[#allocation2 + $0x79] sm:$0xff] %vm363_vm0, %v339_v3  ;;  %v332_v47 = vmax.f32 %v300_v31, 0.0  ;;  %v344_v63 = vmax.f32 %v312_v59, 0.0  ;;  %v229_v3 = vld [vmem:[%s3874_s29 + $0x10] sm:$0xff]  ;;  %v3763_v59 = vld [vmem:[%s4966_s3 + $0xb8] sm:$0xff] }
  0x69   : > { %429 = vst.msk [vmem:[#allocation2 + $0x81] sm:$0xff] %vm363_vm0, %v340_v8  ;;  %v343_v62 = vmax.f32 %v311_v58, 0.0  ;;  %v266_v6 = vmul.f32 %v3883_v4, %v229_v3  ;;  %v256_v8 = vld [vmem:[%s3874_s29 + $0xe8] sm:$0xff]  ;;  %2213 = vmatpush.bf16.msra.mxu1 %v3763_v59 }
  0x6a   : > { %436 = vst.msk [vmem:[#allocation2 + $0xd9] sm:$0xff] %vm363_vm0, %v347_v14  ;;  %v293_v13 = vmul.f32 %v3883_v4, %v256_v8  ;;  %v797_v8 = vld [vmem:[#allocation2 + $0x1] sm:$0xff] }
  0x6b   : > { %v500_v29 = vld [vmem:[#allocation2 + $0xc0] sm:$0xff]  ;;  %437 = vst.msk [vmem:[#allocation2 + $0xe1] sm:$0xff] %vm363_vm0, %v348_v18  ;;  %v301_v14 = vadd.f32 %v3894_v9, %v266_v6 }
  0x6c   : > { %v501_v32 = vld [vmem:[#allocation2 + $0xc8] sm:$0xff]  ;;  %444 = vst.msk [vmem:[#allocation2 + $0x139] sm:$0xff] %vm363_vm0, %v355_v21  ;;  %v328_v20 = vadd.f32 %v3894_v9, %v293_v13  ;;  %v3775_v13 = vld [vmem:[%s4966_s3 + $0x118] sm:$0xff] }
  0x6d   : > { %v4152_v36 = vpack.c.bf16 %v501_v32, %v500_v29  ;;  %v508_v37 = vld [vmem:[#allocation2 + $0x120] sm:$0xff]  ;;  %445 = vst.msk [vmem:[#allocation2 + $0x141] sm:$0xff] %vm363_vm0, %v356_v25  ;;  %v333_v22 = vmax.f32 %v301_v14, 0.0 }
  0x6e   : > { %v509_v39 = vld [vmem:[#allocation2 + $0x128] sm:$0xff]  ;;  %430 = vst.msk [vmem:[#allocation2 + $0x91] sm:$0xff] %vm363_vm0, %v341_v27  ;;  %v359_v27 = vmax.f32 %v327_v19, 0.0  ;;  %v360_v28 = vmax.f32 %v328_v20, 0.0 }
  0x6f   : > { %3472 = vmatmul.msk.bf16.vlgmr.msra.gmra.mxu2 %vm363_vm0, %v4152_v36  ;;  %v528_v43 = vpack.c.bf16 %v509_v39, %v508_v37  ;;  %v494_v44 = vld [vmem:[#allocation2 + $0x78] sm:$0xff]  ;;  %431 = vst.msk [vmem:[#allocation2 + $0x99] sm:$0xff] %vm363_vm0, %v342_v30  ;;  %v3748_v37 = vld [vmem:[%s4966_s3 + $0x40] sm:$0xff]  ;;  %v3757_v39 = vld [vmem:[%s4966_s3 + $0x88] sm:$0xff] }
  0x70   : > { %v495_v50 = vld [vmem:[#allocation2 + $0x80] sm:$0xff]  ;;  %438 = vst.msk [vmem:[#allocation2 + $0xf1] sm:$0xff] %vm363_vm0, %v349_v33  ;;  %1277 = vmatpush.bf16.msrb.mxu2 %v3748_v37  ;;  %1902 = vmatpush.bf16.msrb.mxu0 %v3757_v39  ;;  %v3762_v39 = vld [vmem:[%s4966_s3 + $0xb0] sm:$0xff] }
  0x71   : > { %3476 = vmatmul.msk.bf16.vlgmr.msra.gmra.mxu3 %vm363_vm0, %v528_v43  ;;  %v4173_v55 = vpack.c.bf16 %v495_v50, %v494_v44  ;;  %439 = vst.msk [vmem:[#allocation2 + $0xf9] sm:$0xff] %vm363_vm0, %v350_v38  ;;  %v502_v16 = vld [vmem:[#allocation2 + $0xd8] sm:$0xff]  ;;  %v3752_v38 = vld [vmem:[%s4966_s3 + $0x60] sm:$0xff]  ;;  %v269_v43 = vmul.f32 %v3883_v4, %v232_v41  ;;  %2214 = vmatpush.bf16.msra.mxu1 %v3762_v39 }
  0x72   : > { %420 = vst.msk [vmem:[#allocation2 + $0x19] sm:$0xff] %vm363_vm0, %v331_v40  ;;  %v503_v18 = vld [vmem:[#allocation2 + $0xe0] sm:$0xff]  ;;  %1590 = vmatpush.bf16.msrb.mxu3 %v3752_v38 }
  0x73   : > { %3469 = vmatmul.msk.bf16.gmra.mxu1 %vm363_vm0, %v4173_v55  ;;  %421 = vst.msk [vmem:[#allocation2 + $0x21] sm:$0xff] %vm363_vm0, %v332_v47  ;;  %v510_v24 = vld [vmem:[#allocation2 + $0x138] sm:$0xff]  ;;  %v4210_v29 = vpack.c.bf16 %v503_v18, %v502_v16  ;;  %v231_v40 = vld [vmem:[%s3874_s29 + $0x20] sm:$0xff]  ;;  %v304_v47 = vadd.f32 %v3894_v9, %v269_v43 }
  0x74   : > { %446 = vst.msk [vmem:[#allocation2 + $0x151] sm:$0xff] %vm363_vm0, %v357_v51  ;;  %v511_v25 = vld [vmem:[#allocation2 + $0x140] sm:$0xff]  ;;  %v268_v42 = vmul.f32 %v3883_v4, %v231_v40  ;;  %2527 = vmatpush.bf16.msra.mxu2 %v3767_v60  ;;  %1903 = vmatpush.bf16.msrb.mxu0 %v3756_v61  ;;  %v541_v40 = vld [vmem:[#allocation3 + $0x48] sm:$0xff] }
  0x75   : > { %447 = vst.msk [vmem:[#allocation2 + $0x159] sm:$0xff] %vm363_vm0, %v358_v52  ;;  %v496_v31 = vld [vmem:[#allocation2 + $0x90] sm:$0xff]  ;;  %v529_v33 = vpack.c.bf16 %v511_v25, %v510_v24  ;;  %v336_v52 = vmax.f32 %v304_v47, 0.0  ;;  %v1110_v14 = vld [vmem:[#allocation2 + $0x2] sm:$0xff] }
  0x76   : > { %432 = vst.msk [vmem:[#allocation2 + $0xa9] sm:$0xff] %vm363_vm0, %v343_v62  ;;  %v497_v32 = vld [vmem:[#allocation2 + $0x98] sm:$0xff]  ;;  %v303_v46 = vadd.f32 %v3894_v9, %v268_v42  ;;  %v1142_v19 = vpack.c.bf16 %v1111_v15, %v1110_v14  ;;  %v3766_v42 = vld [vmem:[%s4966_s3 + $0xd0] sm:$0xff]  ;;  %v808_v59 = vld [vmem:[#allocation2 + $0x81] sm:$0xff] }
  0x77   : > { %433 = vst.msk [vmem:[#allocation2 + $0xb1] sm:$0xff] %vm363_vm0, %v344_v63  ;;  %v4222_v34 = vpack.c.bf16 %v497_v32, %v496_v31  ;;  %v504_v48 = vld [vmem:[#allocation2 + $0xf0] sm:$0xff]  ;;  %v3771_v62 = vld [vmem:[%s4966_s3 + $0xf8] sm:$0xff]  ;;  %v1121_v15 = vld [vmem:[#allocation2 + $0x82] sm:$0xff] }
  0x78   : > { %440 = vst.msk [vmem:[#allocation2 + $0x109] sm:$0xff] %vm363_vm0, %v351_v10  ;;  %v505_v49 = vld [vmem:[#allocation2 + $0xf8] sm:$0xff]  ;;  %v335_v51 = vmax.f32 %v303_v46, 0.0  ;;  %2840 = vmatpush.bf16.msra.mxu3 %v3771_v62  ;;  %v798_v10 = vld [vmem:[#allocation2 + $0x9] sm:$0xff]  ;;  %3153 = vmatpush.bf16.msra.mxu0 %v3775_v13  ;;  %v805_v46 = vld [vmem:[#allocation2 + $0x61] sm:$0xff] }
  0x79   : > { %v486_v21 = vld [vmem:[#allocation2 + $0x18] sm:$0xff]  ;;  %441 = vst.msk [vmem:[#allocation2 + $0x111] sm:$0xff] %vm363_vm0, %v352_v11  ;;  %v4245_v56 = vpack.c.bf16 %v505_v49, %v504_v48  ;;  %v829_v12 = vpack.c.bf16 %v798_v10, %v797_v8  ;;  %2528 = vmatpush.bf16.msra.mxu2 %v3766_v42  ;;  %v806_v47 = vld [vmem:[#allocation2 + $0x69] sm:$0xff]  ;;  %v558_v39 = vld [vmem:[#allocation3 + $0xd0] sm:$0xff] }
  0x7a   : > { %v487_v26 = vld [vmem:[#allocation2 + $0x20] sm:$0xff]  ;;  %422 = vst.msk [vmem:[#allocation2 + $0x31] sm:$0xff] %vm363_vm0, %v333_v22  ;;  %v833_v49 = vpack.c.bf16 %v806_v47, %v805_v46  ;;  %v549_v13 = vld [vmem:[#allocation3 + $0x88] sm:$0xff] }
  0x7b   : > { %v4212_v30 = vpack.c.bf16 %v487_v26, %v486_v21  ;;  %423 = vst.msk [vmem:[#allocation2 + $0x39] sm:$0xff] %vm363_vm0, %v334_v23  ;;  %v512_v53 = vld [vmem:[#allocation2 + $0x150] sm:$0xff]  ;;  %v799_v16 = vld [vmem:[#allocation2 + $0x19] sm:$0xff]  ;;  %v800_v18 = vld [vmem:[#allocation2 + $0x21] sm:$0xff] }
  0x7c   : > { %448 = vst.msk [vmem:[#allocation2 + $0x169] sm:$0xff] %vm363_vm0, %v359_v27  ;;  %v513_v54 = vld [vmem:[#allocation2 + $0x158] sm:$0xff]  ;;  %v830_v20 = vpack.c.bf16 %v800_v18, %v799_v16  ;;  %v1113_v22 = vld [vmem:[#allocation2 + $0x22] sm:$0xff]  ;;  %v540_v27 = vld [vmem:[#allocation3 + $0x40] sm:$0xff] }
  0x7d   : > { %3465 = vmatmul.msk.bf16.gmra.mxu0 %vm363_vm0, %v4212_v30  ;;  %449 = vst.msk [vmem:[#allocation2 + $0x171] sm:$0xff] %vm363_vm0, %v360_v28  ;;  %v498_v57 = vld [vmem:[#allocation2 + $0xa8] sm:$0xff]  ;;  %v530_v4 = vpack.c.bf16 %v513_v54, %v512_v53  ;;  %v1112_v21 = vld [vmem:[#allocation2 + $0x1a] sm:$0xff]  ;;  %v1122_v46 = vld [vmem:[#allocation2 + $0x92] sm:$0xff] }
  0x7e   : > { %424 = vst.msk [vmem:[#allocation2 + $0x49] sm:$0xff] %vm363_vm0, %v335_v51  ;;  %v499_v58 = vld [vmem:[#allocation2 + $0xb0] sm:$0xff]  ;;  %v1143_v25 = vpack.c.bf16 %v1113_v22, %v1112_v21  ;;  %v1118_v54 = vld [vmem:[#allocation2 + $0x62] sm:$0xff]  ;;  %v1120_v14 = vld [vmem:[#allocation2 + $0x7a] sm:$0xff] }
  0x7f   : > { %3473 = vmatmul.msk.bf16.gmra.mxu2 %vm363_vm0, %v4210_v29  ;;  %425 = vst.msk [vmem:[#allocation2 + $0x51] sm:$0xff] %vm363_vm0, %v336_v52  ;;  %v4252_v9 = vpack.c.bf16 %v499_v58, %v498_v57  ;;  %v506_v2 = vld [vmem:[#allocation2 + $0x108] sm:$0xff]  ;;  %v532_v51 = vld [vmem:[#allocation3] sm:$0xff]  ;;  %v533_v57 = vld [vmem:[#allocation3 + $0x8] sm:$0xff] }
  0x80   : > { %v507_v3 = vld [vmem:[#allocation2 + $0x110] sm:$0xff]  ;;  %v810_v18 = vld [vmem:[#allocation2 + $0x99] sm:$0xff] }
  0x81   : > { %3477 = vmatmul.msk.bf16.gmra.mxu3 %vm363_vm0, %v529_v33  ;;  %v488_v44 = vld [vmem:[#allocation2 + $0x30] sm:$0xff]  ;;  %v4269_v1 = vpack.c.bf16 %v507_v3, %v506_v2  ;;  %v557_v22 = vld [vmem:[#allocation3 + $0xc8] sm:$0xff] }
  0x82   : > { %v489_v45 = vld [vmem:[#allocation2 + $0x38] sm:$0xff]  ;;  %v1119_v58 = vld [vmem:[#allocation2 + $0x6a] sm:$0xff] }
  0x83   : > { %3470 = vmatmul.msk.bf16.gmra.mxu1 %vm363_vm0, %v4222_v34  ;;  %v518_v50 = vpack.c.bf16 %v489_v45, %v488_v44  ;;  %v514_v6 = vld [vmem:[#allocation2 + $0x168] sm:$0xff]  ;;  %v801_v23 = vld [vmem:[#allocation2 + $0x31] sm:$0xff]  ;;  %v802_v24 = vld [vmem:[#allocation2 + $0x39] sm:$0xff]  ;;  %v1146_v62 = vpack.c.bf16 %v1119_v58, %v1118_v54 }
  0x84   : > { %v515_v7 = vld [vmem:[#allocation2 + $0x170] sm:$0xff]  ;;  %v831_v26 = vpack.c.bf16 %v802_v24, %v801_v23  ;;  %v1115_v32 = vld [vmem:[#allocation2 + $0x3a] sm:$0xff]  ;;  %v559_v54 = vld [vmem:[#allocation3 + $0xd8] sm:$0xff] }
  0x85   : > { %v490_v63 = vld [vmem:[#allocation2 + $0x48] sm:$0xff]  ;;  %v531_v11 = vpack.c.bf16 %v515_v7, %v514_v6  ;;  %v548_v2 = vld [vmem:[#allocation3 + $0x80] sm:$0xff]  ;;  %v1123_v47 = vld [vmem:[#allocation2 + $0x9a] sm:$0xff] }
  0x86   : > { %v491_v0 = vld [vmem:[#allocation2 + $0x50] sm:$0xff] }
  0x87   : > { %v519_v5 = vpack.c.bf16 %v491_v0, %v490_v63  ;;  %v803_v33 = vld [vmem:[#allocation2 + $0x49] sm:$0xff]  ;;  %v804_v35 = vld [vmem:[#allocation2 + $0x51] sm:$0xff]  ;;  %v542_v0 = vld [vmem:[#allocation3 + $0x50] sm:$0xff] }
  0x88   : > { %v832_v38 = vpack.c.bf16 %v804_v35, %v803_v33  ;;  %v1116_v44 = vld [vmem:[#allocation2 + $0x4a] sm:$0xff]  ;;  %v1117_v45 = vld [vmem:[#allocation2 + $0x52] sm:$0xff] }
  0x89   : > { %v1145_v48 = vpack.c.bf16 %v1117_v45, %v1116_v44  ;;  %v556_v7 = vld [vmem:[#allocation3 + $0xc0] sm:$0xff]  ;;  %v535_v35 = vld [vmem:[#allocation3 + $0x18] sm:$0xff]  ;;  %v545_v45 = vld [vmem:[#allocation3 + $0x68] sm:$0xff] }
  0x8d   : > { %3466 = vmatmul.msk.bf16.gmra.mxu0 %vm363_vm0, %v518_v50 }
  0x8f   : > { %3474 = vmatmul.msk.bf16.gmra.mxu2 %vm363_vm0, %v4245_v56 }
  0x91   : > { %3478 = vmatmul.msk.bf16.gmra.mxu3 %vm363_vm0, %v530_v4  ;;  %v807_v4 = vld [vmem:[#allocation2 + $0x79] sm:$0xff] }
  0x92   : > { %v834_v63 = vpack.c.bf16 %v808_v59, %v807_v4  ;;  %v1148_v4 = vpack.c.bf16 %v1123_v47, %v1122_v46  ;;  %v1126_v47 = vld [vmem:[#allocation2 + $0xc2] sm:$0xff] }
  0x93   : > { %3471 = vmatmul.msk.bf16.gmra.mxu1 %vm363_vm0, %v4252_v9 }
  0x9a   : > { %v653_v52 = vpop.f32.mrf.mxu0 }
  0x9b   : > { %v733_v53 = vadd.f32 %v653_v52, %v532_v51  ;;  %v536_v51 = vld [vmem:[#allocation3 + $0x20] sm:$0xff] }
  0x9d   : > { %3467 = vmatmul.msk.bf16.gmra.mxu0 %vm363_vm0, %v519_v5  ;;  %765 = vst.msk [vmem:[#allocation3] sm:$0xff] %vm363_vm0, %v733_v53 }
  0x9f   : > { %3475 = vmatmul.msk.bf16.gmra.mxu2 %vm363_vm0, %v4269_v1 }
  0xa0   : > { %v673_v28 = vpop.f32.mrf.mxu1 }
  0xa1   : > { %3479 = vmatmul.msk.bf16.gmra.mxu3 %vm363_vm0, %v531_v11  ;;  %v741_v31 = vadd.f32 %v673_v28, %v540_v27 }
  0xa2   : > { %v655_v60 = vpop.f32.mrf.mxu0 }
  0xa3   : > { %3496 = vmatmul.msk.bf16.vlgmr.msrb.gmra.mxu1 %vm363_vm0, %v829_v12  ;;  %773 = vst.msk [vmem:[#allocation3 + $0x40] sm:$0xff] %vm363_vm0, %v741_v31  ;;  %v734_v61 = vadd.f32 %v655_v60, %v533_v57  ;;  %v543_v12 = vld [vmem:[#allocation3 + $0x58] sm:$0xff] }
  0xa5   : > { %766 = vst.msk [vmem:[#allocation3 + $0x8] sm:$0xff] %vm363_vm0, %v734_v61 }
  0xa8   : > { %v675_v41 = vpop.f32.mrf.mxu1 }
  0xa9   : > { %v742_v43 = vadd.f32 %v675_v41, %v541_v40 }
  0xab   : > { %774 = vst.msk [vmem:[#allocation3 + $0x48] sm:$0xff] %vm363_vm0, %v742_v43 }
  0xad   : > { %3592 = vmatmul.msk.bf16.vlgmr.msrb.gmra.mxu0 %vm363_vm0, %v830_v20 }
  0xaf   : > { %3528 = vmatmul.msk.bf16.vlgmr.msrb.gmra.mxu2 %vm363_vm0, %v1142_v19  ;;  %v534_v19 = vld [vmem:[#allocation3 + $0x10] sm:$0xff] }
  0xb1   : > { %3560 = vmatmul.msk.bf16.vlgmr.msrb.gmra.mxu3 %vm363_vm0, %v4212_v30  ;;  %v1114_v30 = vld [vmem:[#allocation2 + $0x32] sm:$0xff] }
  0xb2   : > { %v1144_v37 = vpack.c.bf16 %v1115_v32, %v1114_v30  ;;  %v544_v30 = vld [vmem:[#allocation3 + $0x60] sm:$0xff]  ;;  %v550_v32 = vld [vmem:[#allocation3 + $0x90] sm:$0xff] }
  0xb3   : > { %3497 = vmatmul.msk.bf16.gmra.mxu1 %vm363_vm0, %v830_v20 }
  0xbd   : > { %3593 = vmatmul.msk.bf16.gmra.mxu0 %vm363_vm0, %v831_v26 }
  0xbf   : > { %3529 = vmatmul.msk.bf16.gmra.mxu2 %vm363_vm0, %v1143_v25  ;;  %v1147_v25 = vpack.c.bf16 %v1121_v15, %v1120_v14  ;;  %v3765_v14 = vld [vmem:[%s4966_s3 + $0xc8] sm:$0xff]  ;;  %v553_v15 = vld [vmem:[#allocation3 + $0xa8] sm:$0xff] }
  0xc0   : > { %2529 = vmatpush.bf16.msra.mxu2 %v3765_v14  ;;  %v817_v14 = vld [vmem:[#allocation2 + $0xf1] sm:$0xff] }
  0xc1   : > { %3561 = vmatmul.msk.bf16.gmra.mxu3 %vm363_vm0, %v518_v50  ;;  %v3770_v50 = vld [vmem:[%s4966_s3 + $0xf0] sm:$0xff] }
  0xc2   : > { %2841 = vmatpush.bf16.msra.mxu3 %v3770_v50  ;;  %v812_v50 = vld [vmem:[#allocation2 + $0xb1] sm:$0xff] }
  0xc3   : > { %3498 = vmatmul.msk.bf16.gmra.mxu1 %vm363_vm0, %v831_v26 }
  0xcd   : > { %3594 = vmatmul.msk.bf16.gmra.mxu0 %vm363_vm0, %v832_v38 }
  0xcf   : > { %3530 = vmatmul.msk.bf16.gmra.mxu2 %vm363_vm0, %v1144_v37 }
  0xd1   : > { %3562 = vmatmul.msk.bf16.gmra.mxu3 %vm363_vm0, %v519_v5 }
  0xd3   : > { %3499 = vmatmul.msk.bf16.gmra.mxu1 %vm363_vm0, %v832_v38 }
  0xdd   : > { %3595 = vmatmul.msk.bf16.gmra.mxu0 %vm363_vm0, %v833_v49 }
  0xdf   : > { %3531 = vmatmul.msk.bf16.gmra.mxu2 %vm363_vm0, %v1145_v48 }
  0xe1   : > { %3563 = vmatmul.msk.bf16.gmra.mxu3 %vm363_vm0, %v3929_v17  ;;  %v3774_v17 = vld [vmem:[%s4966_s3 + $0x110] sm:$0xff] }
  0xe2   : > { %3154 = vmatpush.bf16.msra.mxu0 %v3774_v17  ;;  %v3761_v17 = vld [vmem:[%s4966_s3 + $0xa8] sm:$0xff] }
  0xe3   : > { %3500 = vmatmul.msk.bf16.gmra.mxu1 %vm363_vm0, %v833_v49  ;;  %v811_v49 = vld [vmem:[#allocation2 + $0xa9] sm:$0xff] }
  0xe4   : > { %v836_v59 = vpack.c.bf16 %v812_v50, %v811_v49  ;;  %2215 = vmatpush.bf16.msra.mxu1 %v3761_v17  ;;  %v1127_v49 = vld [vmem:[#allocation2 + $0xca] sm:$0xff] }
  0xed   : > { %3596 = vmatmul.msk.bf16.gmra.mxu0 %vm363_vm0, %v834_v63 }
  0xef   : > { %3532 = vmatmul.msk.bf16.gmra.mxu2 %vm363_vm0, %v1146_v62 }
  0xf0   : > { %v678_v3 = vpop.f32.mrf.mxu1 }
  0xf1   : > { %3564 = vmatmul.msk.bf16.gmra.mxu3 %vm363_vm0, %v4173_v55  ;;  %v743_v5 = vadd.f32 %v678_v3, %v542_v0  ;;  %v809_v55 = vld [vmem:[#allocation2 + $0x91] sm:$0xff] }
  0xf2   : > { %v693_v6 = vpop.f32.mrf.mxu2  ;;  %v835_v26 = vpack.c.bf16 %v810_v18, %v809_v55  ;;  %v552_v0 = vld [vmem:[#allocation3 + $0xa0] sm:$0xff]  ;;  %v537_v3 = vld [vmem:[#allocation3 + $0x28] sm:$0xff] }
  0xf3   : > { %v749_v8 = vadd.f32 %v693_v6, %v548_v2  ;;  %775 = vst.msk [vmem:[#allocation3 + $0x50] sm:$0xff] %vm363_vm0, %v743_v5  ;;  %3501 = vmatmul.msk.bf16.gmra.mxu1 %vm363_vm0, %v834_v63  ;;  %v546_v63 = vld [vmem:[#allocation3 + $0x70] sm:$0xff]  ;;  %v1125_v55 = vld [vmem:[#allocation2 + $0xb2] sm:$0xff] }
  0xf4   : > { %v713_v10 = vpop.f32.mrf.mxu3 }
  0xf5   : > { %781 = vst.msk [vmem:[#allocation3 + $0x80] sm:$0xff] %vm363_vm0, %v749_v8  ;;  %v757_v11 = vadd.f32 %v713_v10, %v556_v7  ;;  %v560_v7 = vld [vmem:[#allocation3 + $0xe0] sm:$0xff] }
  0xf7   : > { %789 = vst.msk [vmem:[#allocation3 + $0xc0] sm:$0xff] %vm363_vm0, %v757_v11 }
  0xf8   : > { %v680_v16 = vpop.f32.mrf.mxu1 }
  0xf9   : > { %v744_v20 = vadd.f32 %v680_v16, %v543_v12  ;;  %v1124_v16 = vld [vmem:[#allocation2 + $0xaa] sm:$0xff] }
  0xfa   : > { %v695_v21 = vpop.f32.mrf.mxu2  ;;  %v658_v23 = vpop.f32.mrf.mxu0 }
  0xfb   : > { %v750_v24 = vadd.f32 %v695_v21, %v549_v13  ;;  %776 = vst.msk [vmem:[#allocation3 + $0x58] sm:$0xff] %vm363_vm0, %v744_v20  ;;  %v735_v27 = vadd.f32 %v658_v23, %v534_v19  ;;  %v813_v19 = vld [vmem:[#allocation2 + $0xc1] sm:$0xff]  ;;  %v814_v20 = vld [vmem:[#allocation2 + $0xc9] sm:$0xff] }
  0xfc   : > { %v715_v28 = vpop.f32.mrf.mxu3  ;;  %v538_v21 = vld [vmem:[#allocation3 + $0x30] sm:$0xff] }
  0xfd   : > { %782 = vst.msk [vmem:[#allocation3 + $0x88] sm:$0xff] %vm363_vm0, %v750_v24  ;;  %v758_v31 = vadd.f32 %v715_v28, %v557_v22  ;;  %3597 = vmatmul.msk.bf16.gmra.mxu0 %vm363_vm0, %v835_v26  ;;  %v561_v24 = vld [vmem:[#allocation3 + $0xe8] sm:$0xff]  ;;  %v837_v28 = vpack.c.bf16 %v814_v20, %v813_v19 }
  0xfe   : > { %767 = vst.msk [vmem:[#allocation3 + $0x10] sm:$0xff] %vm363_vm0, %v735_v27  ;;  %v1149_v27 = vpack.c.bf16 %v1125_v55, %v1124_v16 }
  0xff   : > { %3533 = vmatmul.msk.bf16.gmra.mxu2 %vm363_vm0, %v1147_v25  ;;  %790 = vst.msk [vmem:[#allocation3 + $0xc8] sm:$0xff] %vm363_vm0, %v758_v31 }
 0x100   : > { %v683_v33 = vpop.f32.mrf.mxu1 }
 0x101   : > { %3565 = vmatmul.msk.bf16.gmra.mxu3 %vm363_vm0, %v4222_v34  ;;  %v745_v37 = vadd.f32 %v683_v33, %v544_v30  ;;  %v551_v34 = vld [vmem:[#allocation3 + $0x98] sm:$0xff] }
 0x102   : > { %v698_v38 = vpop.f32.mrf.mxu2  ;;  %v660_v40 = vpop.f32.mrf.mxu0  ;;  %v3769_v33 = vld [vmem:[%s4966_s3 + $0xe8] sm:$0xff] }
 0x103   : > { %v751_v41 = vadd.f32 %v698_v38, %v550_v32  ;;  %777 = vst.msk [vmem:[#allocation3 + $0x60] sm:$0xff] %vm363_vm0, %v745_v37  ;;  %3502 = vmatmul.msk.bf16.gmra.mxu1 %vm363_vm0, %v835_v26  ;;  %v736_v42 = vadd.f32 %v660_v40, %v535_v35  ;;  %v554_v35 = vld [vmem:[#allocation3 + $0xb0] sm:$0xff]  ;;  %v845_v37 = vld [vmem:[#allocation3] sm:$0xff]  ;;  %2842 = vmatpush.bf16.msra.mxu3 %v3769_v33 }
 0x104   : > { %v718_v43 = vpop.f32.mrf.mxu3 }
 0x105   : > { %783 = vst.msk [vmem:[#allocation3 + $0x90] sm:$0xff] %vm363_vm0, %v751_v41  ;;  %v759_v44 = vadd.f32 %v718_v43, %v558_v39  ;;  %v539_v39 = vld [vmem:[#allocation3 + $0x38] sm:$0xff]  ;;  %v847_v17 = vld [vmem:[#allocation3 + $0x10] sm:$0xff] }
 0x106   : > { %768 = vst.msk [vmem:[#allocation3 + $0x18] sm:$0xff] %vm363_vm0, %v736_v42  ;;  %v562_v42 = vld [vmem:[#allocation3 + $0xf0] sm:$0xff] }
 0x107   : > { %791 = vst.msk [vmem:[#allocation3 + $0xd0] sm:$0xff] %vm363_vm0, %v759_v44 }
 0x108   : > { %v685_v48 = vpop.f32.mrf.mxu1 }
 0x109   : > { %v746_v52 = vadd.f32 %v685_v48, %v545_v45  ;;  %v846_v48 = vld [vmem:[#allocation3 + $0x8] sm:$0xff] }
 0x10a   : > { %v700_v53 = vpop.f32.mrf.mxu2  ;;  %v663_v57 = vpop.f32.mrf.mxu0 }
 0x10b   : > { %v752_v58 = vadd.f32 %v700_v53, %v551_v34  ;;  %778 = vst.msk [vmem:[#allocation3 + $0x68] sm:$0xff] %vm363_vm0, %v746_v52  ;;  %v737_v60 = vadd.f32 %v663_v57, %v536_v51  ;;  %v815_v51 = vld [vmem:[#allocation2 + $0xd9] sm:$0xff]  ;;  %v816_v52 = vld [vmem:[#allocation2 + $0xe1] sm:$0xff] }
 0x10c   : > { %v720_v61 = vpop.f32.mrf.mxu3  ;;  %v563_v57 = vld [vmem:[#allocation3 + $0xf8] sm:$0xff] }
 0x10d   : > { %784 = vst.msk [vmem:[#allocation3 + $0x98] sm:$0xff] %vm363_vm0, %v752_v58  ;;  %v760_v62 = vadd.f32 %v720_v61, %v559_v54  ;;  %3598 = vmatmul.msk.bf16.gmra.mxu0 %vm363_vm0, %v836_v59 }
 0x10e   : > { %769 = vst.msk [vmem:[#allocation3 + $0x20] sm:$0xff] %vm363_vm0, %v737_v60  ;;  %v838_v60 = vpack.c.bf16 %v816_v52, %v815_v51 }
 0x10f   : > { %3534 = vmatmul.msk.bf16.gmra.mxu2 %vm363_vm0, %v1148_v4  ;;  %792 = vst.msk [vmem:[#allocation3 + $0xd8] sm:$0xff] %vm363_vm0, %v760_v62 }
 0x110   : > { %v688_v2 = vpop.f32.mrf.mxu1 }
 0x111   : > { %3566 = vmatmul.msk.bf16.gmra.mxu3 %vm363_vm0, %v4252_v9  ;;  %v747_v5 = vadd.f32 %v688_v2, %v546_v63  ;;  %v547_v9 = vld [vmem:[#allocation3 + $0x78] sm:$0xff] }
 0x112   : > { %v703_v6 = vpop.f32.mrf.mxu2  ;;  %v665_v8 = vpop.f32.mrf.mxu0 }
 0x113   : > { %v753_v10 = vadd.f32 %v703_v6, %v552_v0  ;;  %779 = vst.msk [vmem:[#allocation3 + $0x70] sm:$0xff] %vm363_vm0, %v747_v5  ;;  %3503 = vmatmul.msk.bf16.gmra.mxu1 %vm363_vm0, %v836_v59  ;;  %v738_v11 = vadd.f32 %v665_v8, %v537_v3  ;;  %v1150_v59 = vpack.c.bf16 %v1127_v49, %v1126_v47  ;;  %v3773_v3 = vld [vmem:[%s4966_s3 + $0x108] sm:$0xff] }
 0x114   : > { %v723_v12 = vpop.f32.mrf.mxu3  ;;  %3155 = vmatpush.bf16.msra.mxu0 %v3773_v3  ;;  %v1132_v3 = vld [vmem:[#allocation2 + $0x10a] sm:$0xff] }
 0x115   : > { %785 = vst.msk [vmem:[#allocation3 + $0xa0] sm:$0xff] %vm363_vm0, %v753_v10  ;;  %v761_v13 = vadd.f32 %v723_v12, %v560_v7  ;;  %v1128_v10 = vld [vmem:[#allocation2 + $0xda] sm:$0xff] }
 0x116   : > { %770 = vst.msk [vmem:[#allocation3 + $0x28] sm:$0xff] %vm363_vm0, %v738_v11  ;;  %v1129_v11 = vld [vmem:[#allocation2 + $0xe2] sm:$0xff] }
 0x117   : > { %793 = vst.msk [vmem:[#allocation3 + $0xe0] sm:$0xff] %vm363_vm0, %v761_v13  ;;  %v1151_v19 = vpack.c.bf16 %v1129_v11, %v1128_v10  ;;  %v821_v10 = vld [vmem:[#allocation2 + $0x121] sm:$0xff]  ;;  %v822_v11 = vld [vmem:[#allocation2 + $0x129] sm:$0xff] }
 0x118   : > { %v690_v18 = vpop.f32.mrf.mxu1 }
 0x119   : > { %v748_v22 = vadd.f32 %v690_v18, %v547_v9  ;;  %v818_v9 = vld [vmem:[#allocation2 + $0xf9] sm:$0xff] }
 0x11a   : > { %v705_v23 = vpop.f32.mrf.mxu2  ;;  %v668_v25 = vpop.f32.mrf.mxu0  ;;  %v839_v20 = vpack.c.bf16 %v818_v9, %v817_v14  ;;  %v1445_v14 = vld [vmem:[#allocation2 + $0x120] sm:$0xff]  ;;  %v1446_v9 = vld [vmem:[#allocation2 + $0x128] sm:$0xff] }
 0x11b   : > { %v754_v26 = vadd.f32 %v705_v23, %v553_v15  ;;  %780 = vst.msk [vmem:[#allocation3 + $0x78] sm:$0xff] %vm363_vm0, %v748_v22  ;;  %v739_v31 = vadd.f32 %v668_v25, %v538_v21  ;;  %v849_v25 = vld [vmem:[#allocation3 + $0x20] sm:$0xff] }
 0x11c   : > { %v725_v30 = vpop.f32.mrf.mxu3 }
 0x11d   : > { %786 = vst.msk [vmem:[#allocation3 + $0xa8] sm:$0xff] %vm363_vm0, %v754_v26  ;;  %v762_v32 = vadd.f32 %v725_v30, %v561_v24  ;;  %3599 = vmatmul.msk.bf16.gmra.mxu0 %vm363_vm0, %v837_v28 }
 0x11e   : > { %771 = vst.msk [vmem:[#allocation3 + $0x30] sm:$0xff] %vm363_vm0, %v739_v31 }
 0x11f   : > { %3535 = vmatmul.msk.bf16.gmra.mxu2 %vm363_vm0, %v1149_v27  ;;  %794 = vst.msk [vmem:[#allocation3 + $0xe8] sm:$0xff] %vm363_vm0, %v762_v32 }
 0x120   : > { %v966_v38 = vpop.f32.mrf.mxu1 }
 0x121   : > { %3567 = vmatmul.msk.bf16.gmra.mxu3 %vm363_vm0, %v4152_v36  ;;  %v1046_v40 = vadd.f32 %v966_v38, %v845_v37  ;;  %v555_v36 = vld [vmem:[#allocation3 + $0xb8] sm:$0xff] }
 0x122   : > { %v708_v41 = vpop.f32.mrf.mxu2  ;;  %v670_v43 = vpop.f32.mrf.mxu0 }
 0x123   : > { %v755_v44 = vadd.f32 %v708_v41, %v554_v35  ;;  %1078 = vst.msk [vmem:[#allocation3] sm:$0xff] %vm363_vm0, %v1046_v40  ;;  %3504 = vmatmul.msk.bf16.gmra.mxu1 %vm363_vm0, %v837_v28  ;;  %v740_v45 = vadd.f32 %v670_v43, %v539_v39  ;;  %v1130_v39 = vld [vmem:[#allocation2 + $0xf2] sm:$0xff]  ;;  %v819_v43 = vld [vmem:[#allocation2 + $0x109] sm:$0xff] }
 0x124   : > { %v728_v34 = vpop.f32.mrf.mxu3  ;;  %v850_v40 = vld [vmem:[#allocation3 + $0x28] sm:$0xff] }
 0x125   : > { %787 = vst.msk [vmem:[#allocation3 + $0xb0] sm:$0xff] %vm363_vm0, %v755_v44  ;;  %v763_v46 = vadd.f32 %v728_v34, %v562_v42  ;;  %v820_v44 = vld [vmem:[#allocation2 + $0x111] sm:$0xff] }
 0x126   : > { %772 = vst.msk [vmem:[#allocation3 + $0x38] sm:$0xff] %vm363_vm0, %v740_v45 }
 0x127   : > { %795 = vst.msk [vmem:[#allocation3 + $0xf0] sm:$0xff] %vm363_vm0, %v763_v46 }
 0x128   : > { %v968_v50 = vpop.f32.mrf.mxu1 }
 0x129   : > { %v1047_v53 = vadd.f32 %v968_v50, %v846_v48  ;;  %v840_v48 = vpack.c.bf16 %v820_v44, %v819_v43 }
 0x12a   : > { %v710_v54 = vpop.f32.mrf.mxu2  ;;  %v1905_v58 = vpop.f32.mrf.mxu0  ;;  %v1158_v63 = vld [vmem:[#allocation3] sm:$0xff] }
 0x12b   : > { %v756_v4 = vadd.f32 %v710_v54, %v555_v36  ;;  %1079 = vst.msk [vmem:[#allocation3 + $0x8] sm:$0xff] %vm363_vm0, %v1047_v53 }
 0x12c   : > { %v730_v61 = vpop.f32.mrf.mxu3 }
 0x12d   : > { %788 = vst.msk [vmem:[#allocation3 + $0xb8] sm:$0xff] %vm363_vm0, %v756_v4  ;;  %v764_v62 = vadd.f32 %v730_v61, %v563_v57  ;;  %3600 = vmatmul.msk.bf16.gmra.mxu0 %vm363_vm0, %v838_v60  ;;  %v851_v57 = vld [vmem:[#allocation3 + $0x30] sm:$0xff] }
 0x12f   : > { %3536 = vmatmul.msk.bf16.gmra.mxu2 %vm363_vm0, %v1150_v59  ;;  %796 = vst.msk [vmem:[#allocation3 + $0xf8] sm:$0xff] %vm363_vm0, %v764_v62  ;;  %v3760_v59 = vld [vmem:[%s4966_s3 + $0xa0] sm:$0xff] }
 0x130   : > { %v971_v0 = vpop.f32.mrf.mxu1  ;;  %2216 = vmatpush.bf16.msra.mxu1 %v3760_v59 }
 0x131   : > { %3568 = vmatmul.msk.bf16.gmra.mxu3 %vm363_vm0, %v4210_v29  ;;  %v1048_v2 = vadd.f32 %v971_v0, %v847_v17  ;;  %v848_v29 = vld [vmem:[#allocation3 + $0x18] sm:$0xff] }
 0x132   : > { %v1279_v5 = vpop.f32.mrf.mxu2  ;;  %v4379_v6 = vpop.f32.mrf.mxu0  ;;  %v1159_v12 = vld [vmem:[#allocation3 + $0x8] sm:$0xff] }
 0x133   : > { %v1359_v7 = vadd.f32 %v1279_v5, %v1158_v63  ;;  %1080 = vst.msk [vmem:[#allocation3 + $0x10] sm:$0xff] %vm363_vm0, %v1048_v2  ;;  %3505 = vmatmul.msk.bf16.gmra.mxu1 %vm363_vm0, %v838_v60  ;;  %v1133_v5 = vld [vmem:[#allocation2 + $0x112] sm:$0xff] }
 0x134   : > { %v1592_v8 = vpop.f32.mrf.mxu3 }
 0x135   : > { %1391 = vst.msk [vmem:[#allocation3] sm:$0xff] %vm363_vm0, %v1359_v7 }
 0x138   : > { %v973_v13 = vpop.f32.mrf.mxu1 }
 0x139   : > { %v1049_v15 = vadd.f32 %v973_v13, %v848_v29 }
 0x13a   : > { %v1281_v16 = vpop.f32.mrf.mxu2  ;;  %v4384_v55 = vpop.f32.mrf.mxu0  ;;  %v1160_v24 = vld [vmem:[#allocation3 + $0x10] sm:$0xff] }
 0x13b   : > { %v1360_v18 = vadd.f32 %v1281_v16, %v1159_v12  ;;  %1081 = vst.msk [vmem:[#allocation3 + $0x18] sm:$0xff] %vm363_vm0, %v1049_v15  ;;  %v3764_v12 = vld [vmem:[%s4966_s3 + $0xc0] sm:$0xff] }
 0x13c   : > { %v1471_v21 = vld [vmem:[#allocation3] sm:$0xff]  ;;  %v1594_v22 = vpop.f32.mrf.mxu3  ;;  %2530 = vmatpush.bf16.msra.mxu2 %v3764_v12 }
 0x13d   : > { %v1672_v23 = vadd.f32 %v1592_v8, %v1471_v21  ;;  %1392 = vst.msk [vmem:[#allocation3 + $0x8] sm:$0xff] %vm363_vm0, %v1360_v18  ;;  %3601 = vmatmul.msk.bf16.gmra.mxu0 %vm363_vm0, %v839_v20  ;;  %v841_v18 = vpack.c.bf16 %v822_v11, %v821_v10  ;;  %v3799_v10 = vld [vmem:[%s3862_s24] ss:$0 sm:$0xff] }
 0x13f   : > { %1704 = vst.msk [vmem:[#allocation3] sm:$0xff] %vm363_vm0, %v1672_v23  ;;  %3537 = vmatmul.msk.bf16.gmra.mxu2 %vm363_vm0, %v1151_v19 }
 0x140   : > { %v976_v26 = vpop.f32.mrf.mxu1 }
 0x141   : > { %3569 = vmatmul.msk.bf16.gmra.mxu3 %vm363_vm0, %v4245_v56  ;;  %v1050_v27 = vadd.f32 %v976_v26, %v849_v25  ;;  %v1131_v56 = vld [vmem:[#allocation2 + $0xfa] sm:$0xff]  ;;  %v853_v26 = vld [vmem:[#allocation3 + $0x40] sm:$0xff] }
 0x142   : > { %v1284_v28 = vpop.f32.mrf.mxu2  ;;  %v4393_v31 = vpop.f32.mrf.mxu0  ;;  %v1161_v41 = vld [vmem:[#allocation3 + $0x18] sm:$0xff]  ;;  %v1152_v47 = vpack.c.bf16 %v1131_v56, %v1130_v39 }
 0x143   : > { %v1361_v30 = vadd.f32 %v1284_v28, %v1160_v24  ;;  %1082 = vst.msk [vmem:[#allocation3 + $0x20] sm:$0xff] %vm363_vm0, %v1050_v27  ;;  %3506 = vmatmul.msk.bf16.gmra.mxu1 %vm363_vm0, %v839_v20 }
 0x144   : > { %v1472_v32 = vld [vmem:[#allocation3 + $0x8] sm:$0xff]  ;;  %v1597_v33 = vpop.f32.mrf.mxu3 }
 0x145   : > { %v1673_v35 = vadd.f32 %v1594_v22, %v1472_v32  ;;  %1393 = vst.msk [vmem:[#allocation3 + $0x10] sm:$0xff] %vm363_vm0, %v1361_v30  ;;  %v1466_v22 = vpack.c.bf16 %v1446_v9, %v1445_v14  ;;  %v3768_v30 = vld [vmem:[%s4966_s3 + $0xe0] sm:$0xff] }
 0x146   : > { %v1784_v37 = vld [vmem:[#allocation3] sm:$0xff]  ;;  %2843 = vmatpush.bf16.msra.mxu3 %v3768_v30  ;;  %v1136_v14 = vld [vmem:[#allocation2 + $0x13a] sm:$0xff]  ;;  %v1137_v9 = vld [vmem:[#allocation2 + $0x142] sm:$0xff] }
 0x147   : > { %1705 = vst.msk [vmem:[#allocation3 + $0x8] sm:$0xff] %vm363_vm0, %v1673_v35  ;;  %v1985_v38 = vadd.f32 %v1905_v58, %v1784_v37 }
 0x148   : > { %v978_v42 = vpop.f32.mrf.mxu1 }
 0x149   : > { %2017 = vst.msk [vmem:[#allocation3] sm:$0xff] %vm363_vm0, %v1985_v38  ;;  %v1051_v45 = vadd.f32 %v978_v42, %v850_v40  ;;  %v1134_v40 = vld [vmem:[#allocation2 + $0x122] sm:$0xff]  ;;  %v854_v42 = vld [vmem:[#allocation3 + $0x48] sm:$0xff] }
 0x14a   : > { %v1286_v34 = vpop.f32.mrf.mxu2  ;;  %v4400_v46 = vpop.f32.mrf.mxu0  ;;  %v1162_v54 = vld [vmem:[#allocation3 + $0x20] sm:$0xff] }
 0x14b   : > { %v1362_v36 = vadd.f32 %v1286_v34, %v1161_v41  ;;  %1083 = vst.msk [vmem:[#allocation3 + $0x28] sm:$0xff] %vm363_vm0, %v1051_v45  ;;  %v1135_v41 = vld [vmem:[#allocation2 + $0x12a] sm:$0xff]  ;;  %v823_v45 = vld [vmem:[#allocation2 + $0x139] sm:$0xff]  ;;  %v824_v34 = vld [vmem:[#allocation2 + $0x141] sm:$0xff] }
 0x14c   : > { %v1473_v49 = vld [vmem:[#allocation3 + $0x10] sm:$0xff]  ;;  %v1599_v50 = vpop.f32.mrf.mxu3 }
 0x14d   : > { %v1674_v51 = vadd.f32 %v1597_v33, %v1473_v49  ;;  %1394 = vst.msk [vmem:[#allocation3 + $0x18] sm:$0xff] %vm363_vm0, %v1362_v36  ;;  %3602 = vmatmul.msk.bf16.gmra.mxu0 %vm363_vm0, %v840_v48  ;;  %v1448_v49 = vld [vmem:[#allocation2 + $0x140] sm:$0xff] }
 0x14e   : > { %v1785_v52 = vld [vmem:[#allocation3 + $0x8] sm:$0xff] }
 0x14f   : > { %1706 = vst.msk [vmem:[#allocation3 + $0x10] sm:$0xff] %vm363_vm0, %v1674_v51  ;;  %v1986_v53 = vadd.f32 %v4379_v6, %v1785_v52  ;;  %3538 = vmatmul.msk.bf16.gmra.mxu2 %vm363_vm0, %v1152_v47  ;;  %v852_v6 = vld [vmem:[#allocation3 + $0x38] sm:$0xff]  ;;  %v1154_v52 = vpack.c.bf16 %v1135_v41, %v1134_v40 }
 0x150   : > { %v981_v58 = vpop.f32.mrf.mxu1 }
 0x151   : > { %2018 = vst.msk [vmem:[#allocation3 + $0x8] sm:$0xff] %vm363_vm0, %v1986_v53  ;;  %3570 = vmatmul.msk.bf16.gmra.mxu3 %vm363_vm0, %v4269_v1  ;;  %v1052_v4 = vadd.f32 %v981_v58, %v851_v57 }
 0x152   : > { %v1289_v60 = vpop.f32.mrf.mxu2  ;;  %v4414_v61 = vpop.f32.mrf.mxu0  ;;  %v1163_v7 = vld [vmem:[#allocation3 + $0x28] sm:$0xff] }
 0x153   : > { %v1363_v62 = vadd.f32 %v1289_v60, %v1162_v54  ;;  %1084 = vst.msk [vmem:[#allocation3 + $0x30] sm:$0xff] %vm363_vm0, %v1052_v4  ;;  %3507 = vmatmul.msk.bf16.gmra.mxu1 %vm363_vm0, %v840_v48  ;;  %v1447_v48 = vld [vmem:[#allocation2 + $0x138] sm:$0xff] }
 0x154   : > { %v1474_v63 = vld [vmem:[#allocation3 + $0x18] sm:$0xff]  ;;  %v1602_v17 = vpop.f32.mrf.mxu3  ;;  %v1467_v58 = vpack.c.bf16 %v1448_v49, %v1447_v48 }
 0x155   : > { %v1675_v0 = vadd.f32 %v1599_v50, %v1474_v63  ;;  %1395 = vst.msk [vmem:[#allocation3 + $0x20] sm:$0xff] %vm363_vm0, %v1363_v62  ;;  %v855_v62 = vld [vmem:[#allocation3 + $0x50] sm:$0xff] }
 0x156   : > { %v1786_v1 = vld [vmem:[#allocation3 + $0x10] sm:$0xff] }
 0x157   : > { %1707 = vst.msk [vmem:[#allocation3 + $0x18] sm:$0xff] %vm363_vm0, %v1675_v0  ;;  %v1987_v2 = vadd.f32 %v4384_v55, %v1786_v1  ;;  %v1153_v55 = vpack.c.bf16 %v1133_v5, %v1132_v3  ;;  %v3772_v0 = vld [vmem:[%s4966_s3 + $0x100] sm:$0xff] }
 0x158   : > { %v983_v8 = vpop.f32.mrf.mxu1  ;;  %3156 = vmatpush.bf16.msra.mxu0 %v3772_v0 }
 0x159   : > { %2019 = vst.msk [vmem:[#allocation3 + $0x10] sm:$0xff] %vm363_vm0, %v1987_v2  ;;  %v1053_v29 = vadd.f32 %v983_v8, %v852_v6  ;;  %v257_v6 = vld [vmem:[%s3874_s29 + $0xf0] sm:$0xff] }
 0x15a   : > { %v1291_v13 = vpop.f32.mrf.mxu2  ;;  %v4425_v15 = vpop.f32.mrf.mxu0  ;;  %v1164_v25 = vld [vmem:[#allocation3 + $0x30] sm:$0xff]  ;;  %v294_v11 = vmul.f32 %v3799_v10, %v257_v6 }
 0x15b   : > { %v1364_v16 = vadd.f32 %v1291_v13, %v1163_v7  ;;  %1085 = vst.msk [vmem:[#allocation3 + $0x38] sm:$0xff] %vm363_vm0, %v1053_v29  ;;  %v258_v7 = vld [vmem:[%s3874_s29 + $0xf8] sm:$0xff] }
 0x15c   : > { %v1475_v19 = vld [vmem:[#allocation3 + $0x20] sm:$0xff]  ;;  %v1604_v20 = vpop.f32.mrf.mxu3  ;;  %v295_v29 = vmul.f32 %v3799_v10, %v258_v7 }
 0x15d   : > { %v1676_v21 = vadd.f32 %v1602_v17, %v1475_v19  ;;  %1396 = vst.msk [vmem:[#allocation3 + $0x28] sm:$0xff] %vm363_vm0, %v1364_v16  ;;  %3603 = vmatmul.msk.bf16.gmra.mxu0 %vm363_vm0, %v841_v18  ;;  %v856_v16 = vld [vmem:[#allocation3 + $0x58] sm:$0xff] }
 0x15e   : > { %v1787_v23 = vld [vmem:[#allocation3 + $0x18] sm:$0xff] }
 0x15f   : > { %1708 = vst.msk [vmem:[#allocation3 + $0x20] sm:$0xff] %vm363_vm0, %v1676_v21  ;;  %v1988_v24 = vadd.f32 %v4393_v31, %v1787_v23  ;;  %3539 = vmatmul.msk.bf16.gmra.mxu2 %vm363_vm0, %v1153_v55  ;;  %v3800_v55 = vld [vmem:[%s3880_s6] ss:$0 sm:$0xff]  ;;  %s4717_s6 = scalar_lea.vmem %s4967_s4, %s3738_s21 }
 0x160   : > { %v986_v27 = vpop.f32.mrf.mxu1  ;;  %v330_v19 = vadd.f32 %v3800_v55, %v295_v29  ;;  %v826_v23 = vld [vmem:[#allocation2 + $0x159] sm:$0xff] }
 0x161   : > { %2020 = vst.msk [vmem:[#allocation3 + $0x18] sm:$0xff] %vm363_vm0, %v1988_v24  ;;  %3571 = vmatmul.msk.bf16.gmra.mxu3 %vm363_vm0, %v1466_v22  ;;  %v1054_v28 = vadd.f32 %v986_v27, %v853_v26  ;;  %v825_v22 = vld [vmem:[#allocation2 + $0x151] sm:$0xff]  ;;  %v859_v29 = vld [vmem:[#allocation3 + $0x70] sm:$0xff] }
 0x162   : > { %v1294_v32 = vpop.f32.mrf.mxu2  ;;  %v4438_v33 = vpop.f32.mrf.mxu0  ;;  %v1165_v43 = vld [vmem:[#allocation3 + $0x38] sm:$0xff]  ;;  %v1449_v27 = vld [vmem:[#allocation2 + $0x150] sm:$0xff] }
 0x163   : > { %v1365_v35 = vadd.f32 %v1294_v32, %v1164_v25  ;;  %1086 = vst.msk [vmem:[#allocation3 + $0x40] sm:$0xff] %vm363_vm0, %v1054_v28  ;;  %3508 = vmatmul.msk.bf16.gmra.mxu1 %vm363_vm0, %v841_v18  ;;  %v329_v18 = vadd.f32 %v3800_v55, %v294_v11  ;;  %v1450_v28 = vld [vmem:[#allocation2 + $0x158] sm:$0xff] }
 0x164   : > { %v1476_v31 = vld [vmem:[#allocation3 + $0x28] sm:$0xff]  ;;  %v1607_v37 = vpop.f32.mrf.mxu3 }
 0x165   : > { %v1677_v38 = vadd.f32 %v1604_v20, %v1476_v31  ;;  %1397 = vst.msk [vmem:[#allocation3 + $0x30] sm:$0xff] %vm363_vm0, %v1365_v35  ;;  %v361_v25 = vmax.f32 %v329_v18, 0.0  ;;  %v1155_v35 = vpack.c.bf16 %v1137_v9, %v1136_v14  ;;  %v843_v31 = vpack.c.bf16 %v826_v23, %v825_v22  ;;  %v860_v23 = vld [vmem:[#allocation3 + $0x78] sm:$0xff] }
 0x166   : > { %v1788_v39 = vld [vmem:[#allocation3 + $0x20] sm:$0xff] }
 0x167   : > { %1709 = vst.msk [vmem:[#allocation3 + $0x28] sm:$0xff] %vm363_vm0, %v1677_v38  ;;  %v1989_v56 = vadd.f32 %v4400_v46, %v1788_v39  ;;  %v842_v46 = vpack.c.bf16 %v824_v34, %v823_v45 }
 0x168   : > { %v988_v44 = vpop.f32.mrf.mxu1  ;;  %450 = vst.msk [vmem:[#allocation2 + $0x181] sm:$0xff] %vm363_vm0, %v361_v25  ;;  %v1140_v25 = vld [vmem:[#allocation2 + $0x16a] sm:$0xff] }
 0x169   : > { %2021 = vst.msk [vmem:[#allocation3 + $0x20] sm:$0xff] %vm363_vm0, %v1989_v56  ;;  %v1055_v36 = vadd.f32 %v988_v44, %v854_v42  ;;  %v1468_v56 = vpack.c.bf16 %v1450_v28, %v1449_v27 }
 0x16a   : > { %v1296_v47 = vpop.f32.mrf.mxu2  ;;  %v4446_v50 = vpop.f32.mrf.mxu0  ;;  %v1166_v60 = vld [vmem:[#allocation3 + $0x40] sm:$0xff] }
 0x16b   : > { %v1366_v51 = vadd.f32 %v1296_v47, %v1165_v43  ;;  %1087 = vst.msk [vmem:[#allocation3 + $0x48] sm:$0xff] %vm363_vm0, %v1055_v36  ;;  %v857_v43 = vld [vmem:[#allocation3 + $0x60] sm:$0xff] }
 0x16c   : > { %v1477_v53 = vld [vmem:[#allocation3 + $0x30] sm:$0xff]  ;;  %v1609_v54 = vpop.f32.mrf.mxu3 }
 0x16d   : > { %v1678_v57 = vadd.f32 %v1607_v37, %v1477_v53  ;;  %1398 = vst.msk [vmem:[#allocation3 + $0x38] sm:$0xff] %vm363_vm0, %v1366_v51  ;;  %3604 = vmatmul.msk.bf16.gmra.mxu0 %vm363_vm0, %v842_v46  ;;  %v1139_v53 = vld [vmem:[#allocation2 + $0x15a] sm:$0xff] }
 0x16e   : > { %v1789_v4 = vld [vmem:[#allocation3 + $0x28] sm:$0xff] }
 0x16f   : > { %1710 = vst.msk [vmem:[#allocation3 + $0x30] sm:$0xff] %vm363_vm0, %v1678_v57  ;;  %v1990_v59 = vadd.f32 %v4414_v61, %v1789_v4  ;;  %3540 = vmatmul.msk.bf16.gmra.mxu2 %vm363_vm0, %v1154_v52  ;;  %v827_v4 = vld [vmem:[#allocation2 + $0x169] sm:$0xff] }
 0x170   : > { %v991_v63 = vpop.f32.mrf.mxu1 }
 0x171   : > { %2022 = vst.msk [vmem:[#allocation3 + $0x28] sm:$0xff] %vm363_vm0, %v1990_v59  ;;  %3572 = vmatmul.msk.bf16.gmra.mxu3 %vm363_vm0, %v1467_v58  ;;  %v1056_v17 = vadd.f32 %v991_v63, %v855_v62  ;;  %v828_v59 = vld [vmem:[#allocation2 + $0x171] sm:$0xff]  ;;  %v1451_v63 = vld [vmem:[#allocation2 + $0x168] sm:$0xff] }
 0x172   : > { %v1299_v1 = vpop.f32.mrf.mxu2  ;;  %v4459_v2 = vpop.f32.mrf.mxu0  ;;  %v1167_v20 = vld [vmem:[#allocation3 + $0x48] sm:$0xff] }
 0x173   : > { %v1367_v61 = vadd.f32 %v1299_v1, %v1166_v60  ;;  %1088 = vst.msk [vmem:[#allocation3 + $0x50] sm:$0xff] %vm363_vm0, %v1056_v17  ;;  %3509 = vmatmul.msk.bf16.gmra.mxu1 %vm363_vm0, %v842_v46  ;;  %v1138_v46 = vld [vmem:[#allocation2 + $0x152] sm:$0xff] }
 0x174   : > { %v1478_v3 = vld [vmem:[#allocation3 + $0x38] sm:$0xff]  ;;  %v1612_v5 = vpop.f32.mrf.mxu3  ;;  %v1452_v17 = vld [vmem:[#allocation2 + $0x170] sm:$0xff] }
 0x175   : > { %v1679_v8 = vadd.f32 %v1609_v54, %v1478_v3  ;;  %1399 = vst.msk [vmem:[#allocation3 + $0x40] sm:$0xff] %vm363_vm0, %v1367_v61  ;;  %v858_v54 = vld [vmem:[#allocation3 + $0x68] sm:$0xff]  ;;  %v1156_v61 = vpack.c.bf16 %v1139_v53, %v1138_v46  ;;  %v1469_v7 = vpack.c.bf16 %v1452_v17, %v1451_v63 }
 0x176   : > { %v1790_v12 = vld [vmem:[#allocation3 + $0x30] sm:$0xff]  ;;  %v2051_v17 = vld [vmem:[#allocation2 + $0x32] sm:$0xff] }
 0x177   : > { %1711 = vst.msk [vmem:[#allocation3 + $0x38] sm:$0xff] %vm363_vm0, %v1679_v8  ;;  %v1991_v13 = vadd.f32 %v4425_v15, %v1790_v12  ;;  %v362_v15 = vmax.f32 %v330_v19, 0.0 }
 0x178   : > { %v993_v21 = vpop.f32.mrf.mxu1 }
 0x179   : > { %2023 = vst.msk [vmem:[#allocation3 + $0x30] sm:$0xff] %vm363_vm0, %v1991_v13  ;;  %v1057_v24 = vadd.f32 %v993_v21, %v856_v16 }
 0x17a   : > { %v1301_v26 = vpop.f32.mrf.mxu2  ;;  %v4471_v30 = vpop.f32.mrf.mxu0  ;;  %451 = vst.msk [vmem:[#allocation2 + $0x189] sm:$0xff] %vm363_vm0, %v362_v15  ;;  %v1168_v42 = vld [vmem:[#allocation3 + $0x50] sm:$0xff] }
 0x17b   : > { %v1368_v32 = vadd.f32 %v1301_v26, %v1167_v20  ;;  %1089 = vst.msk [vmem:[#allocation3 + $0x58] sm:$0xff] %vm363_vm0, %v1057_v24  ;;  %v1766_v20 = vld [vmem:[#allocation2 + $0x181] sm:$0xff]  ;;  %v1141_v26 = vld [vmem:[#allocation2 + $0x172] sm:$0xff] }
 0x17c   : > { %v1479_v37 = vld [vmem:[#allocation3 + $0x40] sm:$0xff]  ;;  %v1614_v38 = vpop.f32.mrf.mxu3 }
 0x17d   : > { %v1680_v39 = vadd.f32 %v1612_v5, %v1479_v37  ;;  %1400 = vst.msk [vmem:[#allocation3 + $0x48] sm:$0xff] %vm363_vm0, %v1368_v32  ;;  %3605 = vmatmul.msk.bf16.gmra.mxu0 %vm363_vm0, %v843_v31 }
 0x17e   : > { %v1791_v40 = vld [vmem:[#allocation3 + $0x38] sm:$0xff] }
 0x17f   : > { %1712 = vst.msk [vmem:[#allocation3 + $0x40] sm:$0xff] %vm363_vm0, %v1680_v39  ;;  %v1992_v41 = vadd.f32 %v4438_v33, %v1791_v40  ;;  %3541 = vmatmul.msk.bf16.gmra.mxu2 %vm363_vm0, %v1155_v35  ;;  %v1453_v35 = vld [vmem:[#allocation2 + $0x180] sm:$0xff]  ;;  %v1157_v39 = vpack.c.bf16 %v1141_v26, %v1140_v25  ;;  %v2365_v26 = vld [vmem:[#allocation2 + $0x48] sm:$0xff] }
 0x180   : > { %v996_v44 = vpop.f32.mrf.mxu1  ;;  %v2049_v40 = vld [vmem:[#allocation2 + $0x1a] sm:$0xff] }
 0x181   : > { %2024 = vst.msk [vmem:[#allocation3 + $0x38] sm:$0xff] %vm363_vm0, %v1992_v41  ;;  %3573 = vmatmul.msk.bf16.gmra.mxu3 %vm363_vm0, %v1468_v56  ;;  %v1058_v45 = vadd.f32 %v996_v44, %v857_v43  ;;  %v1767_v21 = vld [vmem:[#allocation2 + $0x189] sm:$0xff] }
 0x182   : > { %v1304_v34 = vpop.f32.mrf.mxu2  ;;  %v4483_v36 = vpop.f32.mrf.mxu0  ;;  %v1169_v57 = vld [vmem:[#allocation3 + $0x58] sm:$0xff]  ;;  %v1783_v15 = vpack.c.bf16 %v1767_v21, %v1766_v20 }
 0x183   : > { %v1369_v47 = vadd.f32 %v1304_v34, %v1168_v42  ;;  %1090 = vst.msk [vmem:[#allocation3 + $0x60] sm:$0xff] %vm363_vm0, %v1058_v45  ;;  %3510 = vmatmul.msk.bf16.gmra.mxu1 %vm363_vm0, %v843_v31  ;;  %v1454_v31 = vld [vmem:[#allocation2 + $0x188] sm:$0xff] }
 0x184   : > { %v1480_v48 = vld [vmem:[#allocation3 + $0x48] sm:$0xff]  ;;  %v1617_v33 = vpop.f32.mrf.mxu3  ;;  %v2050_v41 = vld [vmem:[#allocation2 + $0x22] sm:$0xff]  ;;  %v1470_v43 = vpack.c.bf16 %v1454_v31, %v1453_v35  ;;  %v2053_v35 = vld [vmem:[#allocation2 + $0x4a] sm:$0xff] }
 0x185   : > { %v1681_v49 = vadd.f32 %v1614_v38, %v1480_v48  ;;  %1401 = vst.msk [vmem:[#allocation3 + $0x50] sm:$0xff] %vm363_vm0, %v1369_v47  ;;  %v2081_v34 = vpack.c.bf16 %v2050_v41, %v2049_v40  ;;  %v861_v48 = vld [vmem:[#allocation3 + $0x80] sm:$0xff] }
 0x186   : > { %v1792_v51 = vld [vmem:[#allocation3 + $0x40] sm:$0xff] }
 0x187   : > { %1713 = vst.msk [vmem:[#allocation3 + $0x48] sm:$0xff] %vm363_vm0, %v1681_v49  ;;  %v1993_v52 = vadd.f32 %v4446_v50, %v1792_v51  ;;  %v844_v50 = vpack.c.bf16 %v828_v59, %v827_v4  ;;  %v2363_v4 = vld [vmem:[#allocation2 + $0x30] sm:$0xff]  ;;  %v2364_v59 = vld [vmem:[#allocation2 + $0x38] sm:$0xff] }
 0x188   : > { %v998_v58 = vpop.f32.mrf.mxu1  ;;  %v2054_v31 = vld [vmem:[#allocation2 + $0x52] sm:$0xff] }
 0x189   : > { %2025 = vst.msk [vmem:[#allocation3 + $0x40] sm:$0xff] %vm363_vm0, %v1993_v52  ;;  %v1059_v60 = vadd.f32 %v998_v58, %v858_v54 }
 0x18a   : > { %v1306_v62 = vpop.f32.mrf.mxu2  ;;  %v4491_v0 = vpop.f32.mrf.mxu0  ;;  %v1170_v11 = vld [vmem:[#allocation3 + $0x60] sm:$0xff] }
 0x18b   : > { %v1370_v1 = vadd.f32 %v1306_v62, %v1169_v57  ;;  %1091 = vst.msk [vmem:[#allocation3 + $0x68] sm:$0xff] %vm363_vm0, %v1059_v60  ;;  %v862_v60 = vld [vmem:[#allocation3 + $0x88] sm:$0xff] }
 0x18c   : > { %v1481_v3 = vld [vmem:[#allocation3 + $0x50] sm:$0xff]  ;;  %v1619_v5 = vpop.f32.mrf.mxu3 }
 0x18d   : > { %v1682_v6 = vadd.f32 %v1617_v33, %v1481_v3  ;;  %1402 = vst.msk [vmem:[#allocation3 + $0x58] sm:$0xff] %vm363_vm0, %v1370_v1  ;;  %3606 = vmatmul.msk.bf16.gmra.mxu0 %vm363_vm0, %v844_v50  ;;  %v2052_v1 = vld [vmem:[#allocation2 + $0x3a] sm:$0xff]  ;;  %v2676_v3 = vld [vmem:[#allocation2 + $0x31] sm:$0xff] }
 0x18e   : > { %v1793_v8 = vld [vmem:[#allocation3 + $0x48] sm:$0xff] }
 0x18f   : > { %1714 = vst.msk [vmem:[#allocation3 + $0x50] sm:$0xff] %vm363_vm0, %v1682_v6  ;;  %v1994_v10 = vadd.f32 %v4459_v2, %v1793_v8  ;;  %3542 = vmatmul.msk.bf16.gmra.mxu2 %vm363_vm0, %v1156_v61  ;;  %v2395_v8 = vpack.c.bf16 %v2364_v59, %v2363_v4 }
 0x190   : > { %v1001_v12 = vpop.f32.mrf.mxu1 }
 0x191   : > { %2026 = vst.msk [vmem:[#allocation3 + $0x48] sm:$0xff] %vm363_vm0, %v1994_v10  ;;  %3574 = vmatmul.msk.bf16.gmra.mxu3 %vm363_vm0, %v1469_v7  ;;  %v1060_v13 = vadd.f32 %v1001_v12, %v859_v29 }
 0x192   : > { %v1309_v14 = vpop.f32.mrf.mxu2  ;;  %v4501_v9 = vpop.f32.mrf.mxu0  ;;  %v1171_v24 = vld [vmem:[#allocation3 + $0x68] sm:$0xff] }
 0x193   : > { %v1371_v16 = vadd.f32 %v1309_v14, %v1170_v11  ;;  %1092 = vst.msk [vmem:[#allocation3 + $0x70] sm:$0xff] %vm363_vm0, %v1060_v13  ;;  %3511 = vmatmul.msk.bf16.gmra.mxu1 %vm363_vm0, %v844_v50 }
 0x194   : > { %v1482_v55 = vld [vmem:[#allocation3 + $0x58] sm:$0xff]  ;;  %v1622_v2 = vpop.f32.mrf.mxu3 }
 0x195   : > { %v1683_v18 = vadd.f32 %v1619_v5, %v1482_v55  ;;  %1403 = vst.msk [vmem:[#allocation3 + $0x60] sm:$0xff] %vm363_vm0, %v1371_v16  ;;  %v2677_v5 = vld [vmem:[#allocation2 + $0x39] sm:$0xff] }
 0x196   : > { %v1794_v19 = vld [vmem:[#allocation3 + $0x50] sm:$0xff]  ;;  %v2708_v12 = vpack.c.bf16 %v2677_v5, %v2676_v3 }
 0x197   : > { %1715 = vst.msk [vmem:[#allocation3 + $0x58] sm:$0xff] %vm363_vm0, %v1683_v18  ;;  %v1995_v22 = vadd.f32 %v4471_v30, %v1794_v19  ;;  %v863_v55 = vld [vmem:[#allocation3 + $0x90] sm:$0xff] }
 0x198   : > { %v1003_v27 = vpop.f32.mrf.mxu1 }
 0x199   : > { %2027 = vst.msk [vmem:[#allocation3 + $0x50] sm:$0xff] %vm363_vm0, %v1995_v22  ;;  %v1061_v28 = vadd.f32 %v1003_v27, %v860_v23  ;;  %v2366_v27 = vld [vmem:[#allocation2 + $0x50] sm:$0xff] }
 0x19a   : > { %v1311_v32 = vpop.f32.mrf.mxu2  ;;  %v4509_v37 = vpop.f32.mrf.mxu0  ;;  %v1172_v47 = vld [vmem:[#allocation3 + $0x70] sm:$0xff] }
 0x19b   : > { %v1372_v38 = vadd.f32 %v1311_v32, %v1171_v24  ;;  %1093 = vst.msk [vmem:[#allocation3 + $0x78] sm:$0xff] %vm363_vm0, %v1061_v28  ;;  %v864_v28 = vld [vmem:[#allocation3 + $0x98] sm:$0xff] }
 0x19c   : > { %v1483_v56 = vld [vmem:[#allocation3 + $0x60] sm:$0xff]  ;;  %v1624_v30 = vpop.f32.mrf.mxu3 }
 0x19d   : > { %v1684_v42 = vadd.f32 %v1622_v2, %v1483_v56  ;;  %1404 = vst.msk [vmem:[#allocation3 + $0x68] sm:$0xff] %vm363_vm0, %v1372_v38  ;;  %3607 = vmatmul.msk.bf16.gmra.mxu0 %vm363_vm0, %v1783_v15  ;;  %v2678_v56 = vld [vmem:[#allocation2 + $0x49] sm:$0xff] }
 0x19e   : > { %v1795_v44 = vld [vmem:[#allocation3 + $0x58] sm:$0xff] }
 0x19f   : > { %1716 = vst.msk [vmem:[#allocation3 + $0x60] sm:$0xff] %vm363_vm0, %v1684_v42  ;;  %v1996_v45 = vadd.f32 %v4483_v36, %v1795_v44  ;;  %3543 = vmatmul.msk.bf16.gmra.mxu2 %vm363_vm0, %v1157_v39  ;;  %v2396_v42 = vpack.c.bf16 %v2366_v27, %v2365_v26 }
 0x1a0   : > { %v1006_v33 = vpop.f32.mrf.mxu1 }
 0x1a1   : > { %2028 = vst.msk [vmem:[#allocation3 + $0x58] sm:$0xff] %vm363_vm0, %v1996_v45  ;;  %3575 = vmatmul.msk.bf16.gmra.mxu3 %vm363_vm0, %v1470_v43  ;;  %v1062_v49 = vadd.f32 %v1006_v33, %v861_v48 }
 0x1a2   : > { %v1314_v51 = vpop.f32.mrf.mxu2  ;;  %v4519_v52 = vpop.f32.mrf.mxu0  ;;  %v1173_v62 = vld [vmem:[#allocation3 + $0x78] sm:$0xff] }
 0x1a3   : > { %v1373_v46 = vadd.f32 %v1314_v51, %v1172_v47  ;;  %1094 = vst.msk [vmem:[#allocation3 + $0x80] sm:$0xff] %vm363_vm0, %v1062_v49  ;;  %3624 = vmatmul.msk.bf16.vlgmr.msra.gmra.mxu1 %vm363_vm0, %v2081_v34  ;;  %v865_v49 = vld [vmem:[#allocation3 + $0xa0] sm:$0xff] }
 0x1a4   : > { %v1484_v36 = vld [vmem:[#allocation3 + $0x68] sm:$0xff]  ;;  %v1627_v53 = vpop.f32.mrf.mxu3 }
 0x1a5   : > { %v1685_v54 = vadd.f32 %v1624_v30, %v1484_v36  ;;  %1405 = vst.msk [vmem:[#allocation3 + $0x70] sm:$0xff] %vm363_vm0, %v1373_v46  ;;  %v2679_v30 = vld [vmem:[#allocation2 + $0x51] sm:$0xff] }
 0x1a6   : > { %v1796_v57 = vld [vmem:[#allocation3 + $0x60] sm:$0xff]  ;;  %v2709_v34 = vpack.c.bf16 %v2679_v30, %v2678_v56 }
 0x1a7   : > { %1717 = vst.msk [vmem:[#allocation3 + $0x68] sm:$0xff] %vm363_vm0, %v1685_v54  ;;  %v1997_v58 = vadd.f32 %v4491_v0, %v1796_v57  ;;  %v2082_v0 = vpack.c.bf16 %v2052_v1, %v2051_v17 }
 0x1a8   : > { %v1008_v63 = vpop.f32.mrf.mxu1 }
 0x1a9   : > { %2029 = vst.msk [vmem:[#allocation3 + $0x60] sm:$0xff] %vm363_vm0, %v1997_v58  ;;  %v1063_v61 = vadd.f32 %v1008_v63, %v862_v60  ;;  %v2367_v60 = vld [vmem:[#allocation2 + $0x60] sm:$0xff]  ;;  %v866_v63 = vld [vmem:[#allocation3 + $0xa8] sm:$0xff] }
 0x1aa   : > { %v1316_v50 = vpop.f32.mrf.mxu2  ;;  %v4527_v6 = vpop.f32.mrf.mxu0  ;;  %v1174_v16 = vld [vmem:[#allocation3 + $0x80] sm:$0xff] }
 0x1ab   : > { %v1374_v7 = vadd.f32 %v1316_v50, %v1173_v62  ;;  %1095 = vst.msk [vmem:[#allocation3 + $0x88] sm:$0xff] %vm363_vm0, %v1063_v61  ;;  %v2368_v62 = vld [vmem:[#allocation2 + $0x68] sm:$0xff] }
 0x1ac   : > { %v1485_v10 = vld [vmem:[#allocation3 + $0x70] sm:$0xff]  ;;  %v1629_v11 = vpop.f32.mrf.mxu3  ;;  %v2056_v50 = vld [vmem:[#allocation2 + $0x6a] sm:$0xff] }
 0x1ad   : > { %v1686_v29 = vadd.f32 %v1627_v53, %v1485_v10  ;;  %1406 = vst.msk [vmem:[#allocation3 + $0x78] sm:$0xff] %vm363_vm0, %v1374_v7  ;;  %3720 = vmatmul.msk.bf16.vlgmr.msra.gmra.mxu0 %vm363_vm0, %v2082_v0  ;;  %v2055_v61 = vld [vmem:[#allocation2 + $0x62] sm:$0xff] }
 0x1ae   : > { %v1797_v13 = vld [vmem:[#allocation3 + $0x68] sm:$0xff]  ;;  %v2680_v7 = vld [vmem:[#allocation2 + $0x61] sm:$0xff] }
 0x1af   : > { %1718 = vst.msk [vmem:[#allocation3 + $0x70] sm:$0xff] %vm363_vm0, %v1686_v29  ;;  %v1998_v14 = vadd.f32 %v4501_v9, %v1797_v13  ;;  %3656 = vmatmul.msk.bf16.vlgmr.msra.gmra.mxu2 %vm363_vm0, %v2395_v8  ;;  %v2681_v8 = vld [vmem:[#allocation2 + $0x69] sm:$0xff] }
 0x1b0   : > { %v1011_v2 = vpop.f32.mrf.mxu1 }
 0x1b1   : > { %2030 = vst.msk [vmem:[#allocation3 + $0x68] sm:$0xff] %vm363_vm0, %v1998_v14  ;;  %3688 = vmatmul.msk.bf16.vlgmr.msra.gmra.mxu3 %vm363_vm0, %v2708_v12  ;;  %v1064_v18 = vadd.f32 %v1011_v2, %v863_v55  ;;  %v2710_v14 = vpack.c.bf16 %v2681_v8, %v2680_v7 }
 0x1b2   : > { %v1319_v19 = vpop.f32.mrf.mxu2  ;;  %v4537_v20 = vpop.f32.mrf.mxu0  ;;  %v1175_v15 = vld [vmem:[#allocation3 + $0x88] sm:$0xff] }
 0x1b3   : > { %v1375_v21 = vadd.f32 %v1319_v19, %v1174_v16  ;;  %1096 = vst.msk [vmem:[#allocation3 + $0x90] sm:$0xff] %vm363_vm0, %v1064_v18  ;;  %3625 = vmatmul.msk.bf16.gmra.mxu1 %vm363_vm0, %v2082_v0  ;;  %v867_v18 = vld [vmem:[#allocation3 + $0xb0] sm:$0xff] }
 0x1b4   : > { %v1486_v22 = vld [vmem:[#allocation3 + $0x78] sm:$0xff]  ;;  %v1632_v9 = vpop.f32.mrf.mxu3 }
 0x1b5   : > { %v1687_v23 = vadd.f32 %v1629_v11, %v1486_v22  ;;  %1407 = vst.msk [vmem:[#allocation3 + $0x80] sm:$0xff] %vm363_vm0, %v1375_v21  ;;  %v2397_v11 = vpack.c.bf16 %v2368_v62, %v2367_v60 }
 0x1b6   : > { %v1798_v24 = vld [vmem:[#allocation3 + $0x70] sm:$0xff] }
 0x1b7   : > { %1719 = vst.msk [vmem:[#allocation3 + $0x78] sm:$0xff] %vm363_vm0, %v1687_v23  ;;  %v1999_v25 = vadd.f32 %v4509_v37, %v1798_v24  ;;  %v2083_v37 = vpack.c.bf16 %v2054_v31, %v2053_v35 }
 0x1b8   : > { %v1013_v32 = vpop.f32.mrf.mxu1 }
 0x1b9   : > { %2031 = vst.msk [vmem:[#allocation3 + $0x70] sm:$0xff] %vm363_vm0, %v1999_v25  ;;  %v1065_v38 = vadd.f32 %v1013_v32, %v864_v28  ;;  %v2369_v28 = vld [vmem:[#allocation2 + $0x78] sm:$0xff]  ;;  %v868_v32 = vld [vmem:[#allocation3 + $0xb8] sm:$0xff] }
 0x1ba   : > { %v1321_v39 = vpop.f32.mrf.mxu2  ;;  %v4545_v40 = vpop.f32.mrf.mxu0  ;;  %v1176_v33 = vld [vmem:[#allocation3 + $0x90] sm:$0xff] }
 0x1bb   : > { %v1376_v41 = vadd.f32 %v1321_v39, %v1175_v15  ;;  %1097 = vst.msk [vmem:[#allocation3 + $0x98] sm:$0xff] %vm363_vm0, %v1065_v38  ;;  %v2370_v15 = vld [vmem:[#allocation2 + $0x80] sm:$0xff] }
 0x1bc   : > { %v1487_v43 = vld [vmem:[#allocation3 + $0x80] sm:$0xff]  ;;  %v1634_v44 = vpop.f32.mrf.mxu3  ;;  %v2057_v38 = vld [vmem:[#allocation2 + $0x7a] sm:$0xff]  ;;  %v2058_v39 = vld [vmem:[#allocation2 + $0x82] sm:$0xff] }
 0x1bd   : > { %v1688_v45 = vadd.f32 %v1632_v9, %v1487_v43  ;;  %1408 = vst.msk [vmem:[#allocation3 + $0x88] sm:$0xff] %vm363_vm0, %v1376_v41  ;;  %3721 = vmatmul.msk.bf16.gmra.mxu0 %vm363_vm0, %v2083_v37  ;;  %v2682_v41 = vld [vmem:[#allocation2 + $0x79] sm:$0xff] }
 0x1be   : > { %v1799_v47 = vld [vmem:[#allocation3 + $0x78] sm:$0xff] }
 0x1bf   : > { %1720 = vst.msk [vmem:[#allocation3 + $0x80] sm:$0xff] %vm363_vm0, %v1688_v45  ;;  %v2000_v48 = vadd.f32 %v4519_v52, %v1799_v47  ;;  %3657 = vmatmul.msk.bf16.gmra.mxu2 %vm363_vm0, %v2396_v42  ;;  %v2683_v42 = vld [vmem:[#allocation2 + $0x81] sm:$0xff] }
 0x1c0   : > { %v1016_v51 = vpop.f32.mrf.mxu1 }
 0x1c1   : > { %2032 = vst.msk [vmem:[#allocation3 + $0x78] sm:$0xff] %vm363_vm0, %v2000_v48  ;;  %3689 = vmatmul.msk.bf16.gmra.mxu3 %vm363_vm0, %v2709_v34  ;;  %v1066_v46 = vadd.f32 %v1016_v51, %v865_v49  ;;  %v2711_v48 = vpack.c.bf16 %v2683_v42, %v2682_v41 }
 0x1c2   : > { %v1324_v36 = vpop.f32.mrf.mxu2  ;;  %v4555_v53 = vpop.f32.mrf.mxu0  ;;  %v1177_v17 = vld [vmem:[#allocation3 + $0x98] sm:$0xff] }
 0x1c3   : > { %v1377_v54 = vadd.f32 %v1324_v36, %v1176_v33  ;;  %1098 = vst.msk [vmem:[#allocation3 + $0xa0] sm:$0xff] %vm363_vm0, %v1066_v46  ;;  %3626 = vmatmul.msk.bf16.gmra.mxu1 %vm363_vm0, %v2083_v37  ;;  %v869_v46 = vld [vmem:[#allocation3 + $0xc0] sm:$0xff] }
 0x1c4   : > { %v1488_v57 = vld [vmem:[#allocation3 + $0x88] sm:$0xff]  ;;  %v1637_v52 = vpop.f32.mrf.mxu3 }
 0x1c5   : > { %v1689_v58 = vadd.f32 %v1634_v44, %v1488_v57  ;;  %1409 = vst.msk [vmem:[#allocation3 + $0x90] sm:$0xff] %vm363_vm0, %v1377_v54  ;;  %v2398_v44 = vpack.c.bf16 %v2370_v15, %v2369_v28 }
 0x1c6   : > { %v1800_v4 = vld [vmem:[#allocation3 + $0x80] sm:$0xff] }
 0x1c7   : > { %1721 = vst.msk [vmem:[#allocation3 + $0x88] sm:$0xff] %vm363_vm0, %v1689_v58  ;;  %v2001_v59 = vadd.f32 %v4527_v6, %v1800_v4  ;;  %v2084_v6 = vpack.c.bf16 %v2056_v50, %v2055_v61 }
 0x1c8   : > { %v1018_v1 = vpop.f32.mrf.mxu1 }
 0x1c9   : > { %2033 = vst.msk [vmem:[#allocation3 + $0x80] sm:$0xff] %vm363_vm0, %v2001_v59  ;;  %v1067_v3 = vadd.f32 %v1018_v1, %v866_v63  ;;  %v2371_v63 = vld [vmem:[#allocation2 + $0x90] sm:$0xff]  ;;  %v870_v1 = vld [vmem:[#allocation3 + $0xc8] sm:$0xff] }
 0x1ca   : > { %v1326_v5 = vpop.f32.mrf.mxu2  ;;  %v4563_v0 = vpop.f32.mrf.mxu0  ;;  %v1178_v2 = vld [vmem:[#allocation3 + $0xa0] sm:$0xff] }
 0x1cb   : > { %v1378_v10 = vadd.f32 %v1326_v5, %v1177_v17  ;;  %1099 = vst.msk [vmem:[#allocation3 + $0xa8] sm:$0xff] %vm363_vm0, %v1067_v3  ;;  %v2372_v17 = vld [vmem:[#allocation2 + $0x98] sm:$0xff] }
 0x1cc   : > { %v1489_v29 = vld [vmem:[#allocation3 + $0x90] sm:$0xff]  ;;  %v1639_v12 = vpop.f32.mrf.mxu3  ;;  %v2059_v3 = vld [vmem:[#allocation2 + $0x92] sm:$0xff] }
 0x1cd   : > { %v1690_v13 = vadd.f32 %v1637_v52, %v1489_v29  ;;  %1410 = vst.msk [vmem:[#allocation3 + $0x98] sm:$0xff] %vm363_vm0, %v1378_v10  ;;  %3722 = vmatmul.msk.bf16.gmra.mxu0 %vm363_vm0, %v2084_v6  ;;  %v2060_v5 = vld [vmem:[#allocation2 + $0x9a] sm:$0xff]  ;;  %v2684_v10 = vld [vmem:[#allocation2 + $0x91] sm:$0xff] }
 0x1ce   : > { %v1801_v16 = vld [vmem:[#allocation3 + $0x88] sm:$0xff] }
 0x1cf   : > { %1722 = vst.msk [vmem:[#allocation3 + $0x90] sm:$0xff] %vm363_vm0, %v1690_v13  ;;  %v2002_v55 = vadd.f32 %v4537_v20, %v1801_v16  ;;  %3658 = vmatmul.msk.bf16.gmra.mxu2 %vm363_vm0, %v2397_v11  ;;  %v2685_v11 = vld [vmem:[#allocation2 + $0x99] sm:$0xff] }
 0x1d0   : > { %v1021_v19 = vpop.f32.mrf.mxu1 }
 0x1d1   : > { %2034 = vst.msk [vmem:[#allocation3 + $0x88] sm:$0xff] %vm363_vm0, %v2002_v55  ;;  %3690 = vmatmul.msk.bf16.gmra.mxu3 %vm363_vm0, %v2710_v14  ;;  %v1068_v21 = vadd.f32 %v1021_v19, %v867_v18  ;;  %v2712_v55 = vpack.c.bf16 %v2685_v11, %v2684_v10 }
 0x1d2   : > { %v1329_v22 = vpop.f32.mrf.mxu2  ;;  %v4573_v9 = vpop.f32.mrf.mxu0  ;;  %v1179_v35 = vld [vmem:[#allocation3 + $0xa8] sm:$0xff] }
 0x1d3   : > { %v1379_v23 = vadd.f32 %v1329_v22, %v1178_v2  ;;  %1100 = vst.msk [vmem:[#allocation3 + $0xb0] sm:$0xff] %vm363_vm0, %v1068_v21  ;;  %3627 = vmatmul.msk.bf16.gmra.mxu1 %vm363_vm0, %v2084_v6  ;;  %v871_v21 = vld [vmem:[#allocation3 + $0xd0] sm:$0xff] }
 0x1d4   : > { %v1490_v24 = vld [vmem:[#allocation3 + $0x98] sm:$0xff]  ;;  %v1642_v20 = vpop.f32.mrf.mxu3 }
 0x1d5   : > { %v1691_v25 = vadd.f32 %v1639_v12, %v1490_v24  ;;  %1411 = vst.msk [vmem:[#allocation3 + $0xa0] sm:$0xff] %vm363_vm0, %v1379_v23  ;;  %v2399_v12 = vpack.c.bf16 %v2372_v17, %v2371_v63 }
 0x1d6   : > { %v1802_v26 = vld [vmem:[#allocation3 + $0x90] sm:$0xff] }
 0x1d7   : > { %1723 = vst.msk [vmem:[#allocation3 + $0x98] sm:$0xff] %vm363_vm0, %v1691_v25  ;;  %v2003_v27 = vadd.f32 %v4545_v40, %v1802_v26  ;;  %v2085_v40 = vpack.c.bf16 %v2058_v39, %v2057_v38 }
 0x1d8   : > { %v1023_v31 = vpop.f32.mrf.mxu1 }
 0x1d9   : > { %2035 = vst.msk [vmem:[#allocation3 + $0x90] sm:$0xff] %vm363_vm0, %v2003_v27  ;;  %v1069_v56 = vadd.f32 %v1023_v31, %v868_v32  ;;  %v2373_v32 = vld [vmem:[#allocation2 + $0xa8] sm:$0xff] }
 0x1da   : > { %v1331_v30 = vpop.f32.mrf.mxu2  ;;  %v4581_v37 = vpop.f32.mrf.mxu0  ;;  %v1180_v51 = vld [vmem:[#allocation3 + $0xb0] sm:$0xff]  ;;  %v872_v31 = vld [vmem:[#allocation3 + $0xd8] sm:$0xff] }
 0x1db   : > { %v1380_v43 = vadd.f32 %v1331_v30, %v1179_v35  ;;  %1101 = vst.msk [vmem:[#allocation3 + $0xb8] sm:$0xff] %vm363_vm0, %v1069_v56  ;;  %v2374_v35 = vld [vmem:[#allocation2 + $0xb0] sm:$0xff] }
 0x1dc   : > { %v1491_v45 = vld [vmem:[#allocation3 + $0xa0] sm:$0xff]  ;;  %v1644_v34 = vpop.f32.mrf.mxu3 }
 0x1dd   : > { %v1692_v47 = vadd.f32 %v1642_v20, %v1491_v45  ;;  %1412 = vst.msk [vmem:[#allocation3 + $0xa8] sm:$0xff] %vm363_vm0, %v1380_v43  ;;  %3723 = vmatmul.msk.bf16.gmra.mxu0 %vm363_vm0, %v2085_v40  ;;  %v2061_v56 = vld [vmem:[#allocation2 + $0xaa] sm:$0xff]  ;;  %v2062_v30 = vld [vmem:[#allocation2 + $0xb2] sm:$0xff] }
 0x1de   : > { %v1803_v33 = vld [vmem:[#allocation3 + $0x98] sm:$0xff] }
 0x1df   : > { %1724 = vst.msk [vmem:[#allocation3 + $0xa0] sm:$0xff] %vm363_vm0, %v1692_v47  ;;  %v2004_v49 = vadd.f32 %v4555_v53, %v1803_v33  ;;  %3659 = vmatmul.msk.bf16.gmra.mxu2 %vm363_vm0, %v2398_v44  ;;  %v2686_v43 = vld [vmem:[#allocation2 + $0xa9] sm:$0xff]  ;;  %v2687_v44 = vld [vmem:[#allocation2 + $0xb1] sm:$0xff] }
 0x1e0   : > { %v1026_v36 = vpop.f32.mrf.mxu1 }
 0x1e1   : > { %2036 = vst.msk [vmem:[#allocation3 + $0x98] sm:$0xff] %vm363_vm0, %v2004_v49  ;;  %3691 = vmatmul.msk.bf16.gmra.mxu3 %vm363_vm0, %v2711_v48  ;;  %v1070_v54 = vadd.f32 %v1026_v36, %v869_v46  ;;  %v2713_v49 = vpack.c.bf16 %v2687_v44, %v2686_v43 }
 0x1e2   : > { %v1334_v57 = vpop.f32.mrf.mxu2  ;;  %v4591_v52 = vpop.f32.mrf.mxu0  ;;  %v1181_v61 = vld [vmem:[#allocation3 + $0xb8] sm:$0xff] }
 0x1e3   : > { %v1381_v58 = vadd.f32 %v1334_v57, %v1180_v51  ;;  %1102 = vst.msk [vmem:[#allocation3 + $0xc0] sm:$0xff] %vm363_vm0, %v1070_v54  ;;  %3628 = vmatmul.msk.bf16.gmra.mxu1 %vm363_vm0, %v2085_v40  ;;  %v873_v54 = vld [vmem:[#allocation3 + $0xe0] sm:$0xff] }
 0x1e4   : > { %v1492_v4 = vld [vmem:[#allocation3 + $0xa8] sm:$0xff]  ;;  %v1647_v53 = vpop.f32.mrf.mxu3 }
 0x1e5   : > { %v1693_v59 = vadd.f32 %v1644_v34, %v1492_v4  ;;  %1413 = vst.msk [vmem:[#allocation3 + $0xb0] sm:$0xff] %vm363_vm0, %v1381_v58  ;;  %v2400_v34 = vpack.c.bf16 %v2374_v35, %v2373_v32 }
 0x1e6   : > { %v1804_v60 = vld [vmem:[#allocation3 + $0xa0] sm:$0xff] }
 0x1e7   : > { %1725 = vst.msk [vmem:[#allocation3 + $0xa8] sm:$0xff] %vm363_vm0, %v1693_v59  ;;  %v2005_v62 = vadd.f32 %v4563_v0, %v1804_v60  ;;  %v2086_v0 = vpack.c.bf16 %v2060_v5, %v2059_v3 }
 0x1e8   : > { %v1028_v50 = vpop.f32.mrf.mxu1 }
 0x1e9   : > { %2037 = vst.msk [vmem:[#allocation3 + $0xa0] sm:$0xff] %vm363_vm0, %v2005_v62  ;;  %v1071_v7 = vadd.f32 %v1028_v50, %v870_v1  ;;  %v2375_v1 = vld [vmem:[#allocation2 + $0xc0] sm:$0xff]  ;;  %v874_v50 = vld [vmem:[#allocation3 + $0xe8] sm:$0xff] }
 0x1ea   : > { %v1336_v8 = vpop.f32.mrf.mxu2  ;;  %v4599_v6 = vpop.f32.mrf.mxu0  ;;  %v1182_v19 = vld [vmem:[#allocation3 + $0xc0] sm:$0xff] }
 0x1eb   : > { %v1382_v29 = vadd.f32 %v1336_v8, %v1181_v61  ;;  %1103 = vst.msk [vmem:[#allocation3 + $0xc8] sm:$0xff] %vm363_vm0, %v1071_v7  ;;  %v2376_v61 = vld [vmem:[#allocation2 + $0xc8] sm:$0xff] }
 0x1ec   : > { %v1493_v13 = vld [vmem:[#allocation3 + $0xb0] sm:$0xff]  ;;  %v1649_v14 = vpop.f32.mrf.mxu3  ;;  %v2064_v8 = vld [vmem:[#allocation2 + $0xca] sm:$0xff] }
 0x1ed   : > { %v1694_v16 = vadd.f32 %v1647_v53, %v1493_v13  ;;  %1414 = vst.msk [vmem:[#allocation3 + $0xb8] sm:$0xff] %vm363_vm0, %v1382_v29  ;;  %3724 = vmatmul.msk.bf16.gmra.mxu0 %vm363_vm0, %v2086_v0  ;;  %v2063_v7 = vld [vmem:[#allocation2 + $0xc2] sm:$0xff] }
 0x1ee   : > { %v1805_v2 = vld [vmem:[#allocation3 + $0xa8] sm:$0xff]  ;;  %v2688_v29 = vld [vmem:[#allocation2 + $0xc1] sm:$0xff] }
 0x1ef   : > { %1726 = vst.msk [vmem:[#allocation3 + $0xb0] sm:$0xff] %vm363_vm0, %v1694_v16  ;;  %v2006_v18 = vadd.f32 %v4573_v9, %v1805_v2  ;;  %3660 = vmatmul.msk.bf16.gmra.mxu2 %vm363_vm0, %v2399_v12  ;;  %v2689_v12 = vld [vmem:[#allocation2 + $0xc9] sm:$0xff] }
 0x1f0   : > { %v1031_v22 = vpop.f32.mrf.mxu1 }
 0x1f1   : > { %2038 = vst.msk [vmem:[#allocation3 + $0xa8] sm:$0xff] %vm363_vm0, %v2006_v18  ;;  %3692 = vmatmul.msk.bf16.gmra.mxu3 %vm363_vm0, %v2712_v55  ;;  %v1072_v23 = vadd.f32 %v1031_v22, %v871_v21  ;;  %v2714_v18 = vpack.c.bf16 %v2689_v12, %v2688_v29 }
 0x1f2   : > { %v1339_v24 = vpop.f32.mrf.mxu2  ;;  %v4609_v20 = vpop.f32.mrf.mxu0  ;;  %v1183_v38 = vld [vmem:[#allocation3 + $0xc8] sm:$0xff] }
 0x1f3   : > { %v1383_v25 = vadd.f32 %v1339_v24, %v1182_v19  ;;  %1104 = vst.msk [vmem:[#allocation3 + $0xd0] sm:$0xff] %vm363_vm0, %v1072_v23  ;;  %3629 = vmatmul.msk.bf16.gmra.mxu1 %vm363_vm0, %v2086_v0  ;;  %v875_v23 = vld [vmem:[#allocation3 + $0xf0] sm:$0xff] }
 0x1f4   : > { %v1494_v26 = vld [vmem:[#allocation3 + $0xb8] sm:$0xff]  ;;  %v1652_v9 = vpop.f32.mrf.mxu3 }
 0x1f5   : > { %v1695_v27 = vadd.f32 %v1649_v14, %v1494_v26  ;;  %1415 = vst.msk [vmem:[#allocation3 + $0xc0] sm:$0xff] %vm363_vm0, %v1383_v25  ;;  %v2401_v14 = vpack.c.bf16 %v2376_v61, %v2375_v1 }
 0x1f6   : > { %v1806_v28 = vld [vmem:[#allocation3 + $0xb0] sm:$0xff] }
 0x1f7   : > { %1727 = vst.msk [vmem:[#allocation3 + $0xb8] sm:$0xff] %vm363_vm0, %v1695_v27  ;;  %v2007_v15 = vadd.f32 %v4581_v37, %v1806_v28  ;;  %v2087_v37 = vpack.c.bf16 %v2062_v30, %v2061_v56 }
 0x1f8   : > { %v1033_v39 = vpop.f32.mrf.mxu1 }
 0x1f9   : > { %2039 = vst.msk [vmem:[#allocation3 + $0xb0] sm:$0xff] %vm363_vm0, %v2007_v15  ;;  %v1073_v41 = vadd.f32 %v1033_v39, %v872_v31  ;;  %v2377_v31 = vld [vmem:[#allocation2 + $0xd8] sm:$0xff]  ;;  %v876_v39 = vld [vmem:[#allocation3 + $0xf8] sm:$0xff] }
 0x1fa   : > { %v1341_v42 = vpop.f32.mrf.mxu2  ;;  %v4617_v40 = vpop.f32.mrf.mxu0  ;;  %v1184_v36 = vld [vmem:[#allocation3 + $0xd0] sm:$0xff] }
 0x1fb   : > { %v1384_v45 = vadd.f32 %v1341_v42, %v1183_v38  ;;  %1105 = vst.msk [vmem:[#allocation3 + $0xd8] sm:$0xff] %vm363_vm0, %v1073_v41  ;;  %v2378_v38 = vld [vmem:[#allocation2 + $0xe0] sm:$0xff] }
 0x1fc   : > { %v1495_v47 = vld [vmem:[#allocation3 + $0xc0] sm:$0xff]  ;;  %v1654_v48 = vpop.f32.mrf.mxu3  ;;  %v2065_v41 = vld [vmem:[#allocation2 + $0xda] sm:$0xff]  ;;  %v2066_v42 = vld [vmem:[#allocation2 + $0xe2] sm:$0xff] }
 0x1fd   : > { %v1696_v33 = vadd.f32 %v1652_v9, %v1495_v47  ;;  %1416 = vst.msk [vmem:[#allocation3 + $0xc8] sm:$0xff] %vm363_vm0, %v1384_v45  ;;  %3725 = vmatmul.msk.bf16.gmra.mxu0 %vm363_vm0, %v2087_v37  ;;  %v2690_v45 = vld [vmem:[#allocation2 + $0xd9] sm:$0xff] }
 0x1fe   : > { %v1807_v51 = vld [vmem:[#allocation3 + $0xb8] sm:$0xff] }
 0x1ff   : > { %1728 = vst.msk [vmem:[#allocation3 + $0xc0] sm:$0xff] %vm363_vm0, %v1696_v33  ;;  %v2008_v46 = vadd.f32 %v4591_v52, %v1807_v51  ;;  %3661 = vmatmul.msk.bf16.gmra.mxu2 %vm363_vm0, %v2400_v34  ;;  %v2691_v34 = vld [vmem:[#allocation2 + $0xe1] sm:$0xff] }
 0x200   : > { %v1036_v57 = vpop.f32.mrf.mxu1 }
 0x201   : > { %2040 = vst.msk [vmem:[#allocation3 + $0xb8] sm:$0xff] %vm363_vm0, %v2008_v46  ;;  %3693 = vmatmul.msk.bf16.gmra.mxu3 %vm363_vm0, %v2713_v49  ;;  %v1074_v58 = vadd.f32 %v1036_v57, %v873_v54  ;;  %v2715_v46 = vpack.c.bf16 %v2691_v34, %v2690_v45 }
 0x202   : > { %v1344_v4 = vpop.f32.mrf.mxu2  ;;  %v4627_v53 = vpop.f32.mrf.mxu0  ;;  %v1185_v3 = vld [vmem:[#allocation3 + $0xd8] sm:$0xff] }
 0x203   : > { %v1385_v59 = vadd.f32 %v1344_v4, %v1184_v36  ;;  %1106 = vst.msk [vmem:[#allocation3 + $0xe0] sm:$0xff] %vm363_vm0, %v1074_v58  ;;  %3630 = vmatmul.msk.bf16.gmra.mxu1 %vm363_vm0, %v2087_v37  ;;  %v2097_v58 = vld [vmem:[#allocation3] sm:$0xff] }
 0x204   : > { %v1496_v60 = vld [vmem:[#allocation3 + $0xc8] sm:$0xff]  ;;  %v1657_v52 = vpop.f32.mrf.mxu3 }
 0x205   : > { %v1697_v62 = vadd.f32 %v1654_v48, %v1496_v60  ;;  %1417 = vst.msk [vmem:[#allocation3 + $0xd0] sm:$0xff] %vm363_vm0, %v1385_v59  ;;  %v2402_v48 = vpack.c.bf16 %v2378_v38, %v2377_v31 }
 0x206   : > { %v1808_v63 = vld [vmem:[#allocation3 + $0xc0] sm:$0xff] }
 0x207   : > { %1729 = vst.msk [vmem:[#allocation3 + $0xc8] sm:$0xff] %vm363_vm0, %v1697_v62  ;;  %v2009_v17 = vadd.f32 %v4599_v6, %v1808_v63  ;;  %v2088_v6 = vpack.c.bf16 %v2064_v8, %v2063_v7 }
 0x208   : > { %v1038_v5 = vpop.f32.mrf.mxu1 }
 0x209   : > { %2041 = vst.msk [vmem:[#allocation3 + $0xc0] sm:$0xff] %vm363_vm0, %v2009_v17  ;;  %v1075_v10 = vadd.f32 %v1038_v5, %v874_v50  ;;  %v2379_v50 = vld [vmem:[#allocation2 + $0xf0] sm:$0xff]  ;;  %v2098_v5 = vld [vmem:[#allocation3 + $0x8] sm:$0xff] }
 0x20a   : > { %v1346_v11 = vpop.f32.mrf.mxu2  ;;  %v4635_v0 = vpop.f32.mrf.mxu0  ;;  %v1186_v22 = vld [vmem:[#allocation3 + $0xe0] sm:$0xff] }
 0x20b   : > { %v1386_v13 = vadd.f32 %v1346_v11, %v1185_v3  ;;  %1107 = vst.msk [vmem:[#allocation3 + $0xe8] sm:$0xff] %vm363_vm0, %v1075_v10  ;;  %v2380_v3 = vld [vmem:[#allocation2 + $0xf8] sm:$0xff] }
 0x20c   : > { %v1497_v16 = vld [vmem:[#allocation3 + $0xd0] sm:$0xff]  ;;  %v1659_v55 = vpop.f32.mrf.mxu3  ;;  %v2067_v10 = vld [vmem:[#allocation2 + $0xf2] sm:$0xff] }
 0x20d   : > { %v1698_v2 = vadd.f32 %v1657_v52, %v1497_v16  ;;  %1418 = vst.msk [vmem:[#allocation3 + $0xd8] sm:$0xff] %vm363_vm0, %v1386_v13  ;;  %3726 = vmatmul.msk.bf16.gmra.mxu0 %vm363_vm0, %v2088_v6  ;;  %v2068_v11 = vld [vmem:[#allocation2 + $0xfa] sm:$0xff]  ;;  %v2692_v13 = vld [vmem:[#allocation2 + $0xf1] sm:$0xff] }
 0x20e   : > { %v1809_v19 = vld [vmem:[#allocation3 + $0xc8] sm:$0xff] }
 0x20f   : > { %1730 = vst.msk [vmem:[#allocation3 + $0xd0] sm:$0xff] %vm363_vm0, %v1698_v2  ;;  %v2010_v21 = vadd.f32 %v4609_v20, %v1809_v19  ;;  %3662 = vmatmul.msk.bf16.gmra.mxu2 %vm363_vm0, %v2401_v14  ;;  %v2693_v14 = vld [vmem:[#allocation2 + $0xf9] sm:$0xff] }
 0x210   : > { %v1041_v24 = vpop.f32.mrf.mxu1 }
 0x211   : > { %2042 = vst.msk [vmem:[#allocation3 + $0xc8] sm:$0xff] %vm363_vm0, %v2010_v21  ;;  %3694 = vmatmul.msk.bf16.gmra.mxu3 %vm363_vm0, %v2714_v18  ;;  %v1076_v25 = vadd.f32 %v1041_v24, %v875_v23  ;;  %v2716_v21 = vpack.c.bf16 %v2693_v14, %v2692_v13 }
 0x212   : > { %v1349_v26 = vpop.f32.mrf.mxu2  ;;  %v4645_v9 = vpop.f32.mrf.mxu0  ;;  %v1187_v56 = vld [vmem:[#allocation3 + $0xe8] sm:$0xff] }
 0x213   : > { %v1387_v27 = vadd.f32 %v1349_v26, %v1186_v22  ;;  %1108 = vst.msk [vmem:[#allocation3 + $0xf0] sm:$0xff] %vm363_vm0, %v1076_v25  ;;  %3631 = vmatmul.msk.bf16.gmra.mxu1 %vm363_vm0, %v2088_v6  ;;  %v2099_v25 = vld [vmem:[#allocation3 + $0x10] sm:$0xff] }
 0x214   : > { %v1498_v28 = vld [vmem:[#allocation3 + $0xd8] sm:$0xff]  ;;  %v1662_v20 = vpop.f32.mrf.mxu3 }
 0x215   : > { %v1699_v15 = vadd.f32 %v1659_v55, %v1498_v28  ;;  %1419 = vst.msk [vmem:[#allocation3 + $0xe0] sm:$0xff] %vm363_vm0, %v1387_v27  ;;  %v2403_v55 = vpack.c.bf16 %v2380_v3, %v2379_v50 }
 0x216   : > { %v1810_v32 = vld [vmem:[#allocation3 + $0xd0] sm:$0xff] }
 0x217   : > { %1731 = vst.msk [vmem:[#allocation3 + $0xd8] sm:$0xff] %vm363_vm0, %v1699_v15  ;;  %v2011_v35 = vadd.f32 %v4617_v40, %v1810_v32  ;;  %v2089_v40 = vpack.c.bf16 %v2066_v42, %v2065_v41 }
 0x218   : > { %v1043_v30 = vpop.f32.mrf.mxu1 }
 0x219   : > { %2043 = vst.msk [vmem:[#allocation3 + $0xd0] sm:$0xff] %vm363_vm0, %v2011_v35  ;;  %v1077_v43 = vadd.f32 %v1043_v30, %v876_v39  ;;  %v2381_v39 = vld [vmem:[#allocation2 + $0x108] sm:$0xff] }
 0x21a   : > { %v1351_v44 = vpop.f32.mrf.mxu2  ;;  %v4653_v37 = vpop.f32.mrf.mxu0  ;;  %v1188_v57 = vld [vmem:[#allocation3 + $0xf0] sm:$0xff]  ;;  %v2100_v30 = vld [vmem:[#allocation3 + $0x18] sm:$0xff] }
 0x21b   : > { %v1388_v47 = vadd.f32 %v1351_v44, %v1187_v56  ;;  %1109 = vst.msk [vmem:[#allocation3 + $0xf8] sm:$0xff] %vm363_vm0, %v1077_v43  ;;  %v2382_v56 = vld [vmem:[#allocation2 + $0x110] sm:$0xff] }
 0x21c   : > { %v1499_v33 = vld [vmem:[#allocation3 + $0xe0] sm:$0xff]  ;;  %v1664_v49 = vpop.f32.mrf.mxu3 }
 0x21d   : > { %v1700_v51 = vadd.f32 %v1662_v20, %v1499_v33  ;;  %1420 = vst.msk [vmem:[#allocation3 + $0xe8] sm:$0xff] %vm363_vm0, %v1388_v47  ;;  %3727 = vmatmul.msk.bf16.gmra.mxu0 %vm363_vm0, %v2089_v40  ;;  %v2069_v43 = vld [vmem:[#allocation2 + $0x10a] sm:$0xff]  ;;  %v2070_v44 = vld [vmem:[#allocation2 + $0x112] sm:$0xff] }
 0x21e   : > { %v1811_v36 = vld [vmem:[#allocation3 + $0xd8] sm:$0xff] }
 0x21f   : > { %1732 = vst.msk [vmem:[#allocation3 + $0xe0] sm:$0xff] %vm363_vm0, %v1700_v51  ;;  %v2012_v54 = vadd.f32 %v4627_v53, %v1811_v36  ;;  %3663 = vmatmul.msk.bf16.gmra.mxu2 %vm363_vm0, %v2402_v48  ;;  %v2694_v47 = vld [vmem:[#allocation2 + $0x109] sm:$0xff]  ;;  %v2695_v48 = vld [vmem:[#allocation2 + $0x111] sm:$0xff] }
 0x220   : > { %v2218_v4 = vpop.f32.mrf.mxu1 }
 0x221   : > { %2044 = vst.msk [vmem:[#allocation3 + $0xd8] sm:$0xff] %vm363_vm0, %v2012_v54  ;;  %3695 = vmatmul.msk.bf16.gmra.mxu3 %vm363_vm0, %v2715_v46  ;;  %v2298_v59 = vadd.f32 %v2218_v4, %v2097_v58  ;;  %v2717_v54 = vpack.c.bf16 %v2695_v48, %v2694_v47  ;;  %v2074_v47 = vld [vmem:[#allocation2 + $0x142] sm:$0xff] }
 0x222   : > { %v1354_v60 = vpop.f32.mrf.mxu2  ;;  %v4663_v52 = vpop.f32.mrf.mxu0  ;;  %v1189_v7 = vld [vmem:[#allocation3 + $0xf8] sm:$0xff] }
 0x223   : > { %v1389_v62 = vadd.f32 %v1354_v60, %v1188_v57  ;;  %2330 = vst.msk [vmem:[#allocation3] sm:$0xff] %vm363_vm0, %v2298_v59  ;;  %3632 = vmatmul.msk.bf16.gmra.mxu1 %vm363_vm0, %v2089_v40  ;;  %v2101_v59 = vld [vmem:[#allocation3 + $0x20] sm:$0xff] }
 0x224   : > { %v1500_v63 = vld [vmem:[#allocation3 + $0xe8] sm:$0xff]  ;;  %v1667_v53 = vpop.f32.mrf.mxu3 }
 0x225   : > { %v1701_v17 = vadd.f32 %v1664_v49, %v1500_v63  ;;  %1421 = vst.msk [vmem:[#allocation3 + $0xf0] sm:$0xff] %vm363_vm0, %v1389_v62  ;;  %v2404_v49 = vpack.c.bf16 %v2382_v56, %v2381_v39 }
 0x226   : > { %v1812_v1 = vld [vmem:[#allocation3 + $0xe0] sm:$0xff] }
 0x227   : > { %1733 = vst.msk [vmem:[#allocation3 + $0xe8] sm:$0xff] %vm363_vm0, %v1701_v17  ;;  %v2013_v61 = vadd.f32 %v4635_v0, %v1812_v1  ;;  %v2090_v0 = vpack.c.bf16 %v2068_v11, %v2067_v10 }
 0x228   : > { %v2220_v8 = vpop.f32.mrf.mxu1 }
 0x229   : > { %2045 = vst.msk [vmem:[#allocation3 + $0xe0] sm:$0xff] %vm363_vm0, %v2013_v61  ;;  %v2299_v29 = vadd.f32 %v2220_v8, %v2098_v5  ;;  %v2383_v5 = vld [vmem:[#allocation2 + $0x120] sm:$0xff]  ;;  %v2102_v8 = vld [vmem:[#allocation3 + $0x28] sm:$0xff] }
 0x22a   : > { %v1356_v12 = vpop.f32.mrf.mxu2  ;;  %v4671_v6 = vpop.f32.mrf.mxu0  ;;  %v2411_v24 = vld [vmem:[#allocation3] sm:$0xff] }
 0x22b   : > { %v1390_v16 = vadd.f32 %v1356_v12, %v1189_v7  ;;  %2331 = vst.msk [vmem:[#allocation3 + $0x8] sm:$0xff] %vm363_vm0, %v2299_v29  ;;  %v2384_v7 = vld [vmem:[#allocation2 + $0x128] sm:$0xff] }
 0x22c   : > { %v1501_v2 = vld [vmem:[#allocation3 + $0xf0] sm:$0xff]  ;;  %v1669_v18 = vpop.f32.mrf.mxu3  ;;  %v2072_v12 = vld [vmem:[#allocation2 + $0x12a] sm:$0xff] }
 0x22d   : > { %v1702_v19 = vadd.f32 %v1667_v53, %v1501_v2  ;;  %1422 = vst.msk [vmem:[#allocation3 + $0xf8] sm:$0xff] %vm363_vm0, %v1390_v16  ;;  %3728 = vmatmul.msk.bf16.gmra.mxu0 %vm363_vm0, %v2090_v0  ;;  %v2071_v29 = vld [vmem:[#allocation2 + $0x122] sm:$0xff] }
 0x22e   : > { %v1813_v22 = vld [vmem:[#allocation3 + $0xe8] sm:$0xff]  ;;  %v2696_v16 = vld [vmem:[#allocation2 + $0x121] sm:$0xff] }
 0x22f   : > { %1734 = vst.msk [vmem:[#allocation3 + $0xf0] sm:$0xff] %vm363_vm0, %v1702_v19  ;;  %v2014_v23 = vadd.f32 %v4645_v9, %v1813_v22  ;;  %3664 = vmatmul.msk.bf16.gmra.mxu2 %vm363_vm0, %v2403_v55  ;;  %v2697_v55 = vld [vmem:[#allocation2 + $0x129] sm:$0xff] }
 0x230   : > { %v2223_v26 = vpop.f32.mrf.mxu1 }
 0x231   : > { %2046 = vst.msk [vmem:[#allocation3 + $0xe8] sm:$0xff] %vm363_vm0, %v2014_v23  ;;  %3696 = vmatmul.msk.bf16.gmra.mxu3 %vm363_vm0, %v2716_v21  ;;  %v2300_v27 = vadd.f32 %v2223_v26, %v2099_v25  ;;  %v2718_v23 = vpack.c.bf16 %v2697_v55, %v2696_v16  ;;  %v2075_v55 = vld [vmem:[#allocation2 + $0x152] sm:$0xff] }
 0x232   : > { %v2532_v28 = vpop.f32.mrf.mxu2  ;;  %v4681_v20 = vpop.f32.mrf.mxu0  ;;  %v2412_v41 = vld [vmem:[#allocation3 + $0x8] sm:$0xff] }
 0x233   : > { %v2612_v15 = vadd.f32 %v2532_v28, %v2411_v24  ;;  %2332 = vst.msk [vmem:[#allocation3 + $0x10] sm:$0xff] %vm363_vm0, %v2300_v27  ;;  %3633 = vmatmul.msk.bf16.gmra.mxu1 %vm363_vm0, %v2090_v0  ;;  %v2103_v28 = vld [vmem:[#allocation3 + $0x30] sm:$0xff] }
 0x234   : > { %v1502_v32 = vld [vmem:[#allocation3 + $0xf8] sm:$0xff]  ;;  %v2845_v9 = vpop.f32.mrf.mxu3 }
 0x235   : > { %v1703_v35 = vadd.f32 %v1669_v18, %v1502_v32  ;;  %2644 = vst.msk [vmem:[#allocation3] sm:$0xff] %vm363_vm0, %v2612_v15  ;;  %v2405_v18 = vpack.c.bf16 %v2384_v7, %v2383_v5 }
 0x236   : > { %v1814_v31 = vld [vmem:[#allocation3 + $0xf0] sm:$0xff] }
 0x237   : > { %1735 = vst.msk [vmem:[#allocation3 + $0xf8] sm:$0xff] %vm363_vm0, %v1703_v35  ;;  %v2015_v38 = vadd.f32 %v4653_v37, %v1814_v31  ;;  %v2091_v37 = vpack.c.bf16 %v2070_v44, %v2069_v43  ;;  %v2104_v43 = vld [vmem:[#allocation3 + $0x38] sm:$0xff] }
 0x238   : > { %v2225_v42 = vpop.f32.mrf.mxu1 }
 0x239   : > { %2047 = vst.msk [vmem:[#allocation3 + $0xf0] sm:$0xff] %vm363_vm0, %v2015_v38  ;;  %v2301_v45 = vadd.f32 %v2225_v42, %v2100_v30  ;;  %v2386_v42 = vld [vmem:[#allocation2 + $0x140] sm:$0xff] }
 0x23a   : > { %v2534_v34 = vpop.f32.mrf.mxu2  ;;  %v4689_v40 = vpop.f32.mrf.mxu0  ;;  %v2413_v4 = vld [vmem:[#allocation3 + $0x10] sm:$0xff] }
 0x23b   : > { %v2613_v33 = vadd.f32 %v2534_v34, %v2412_v41  ;;  %2333 = vst.msk [vmem:[#allocation3 + $0x18] sm:$0xff] %vm363_vm0, %v2301_v45  ;;  %v2385_v41 = vld [vmem:[#allocation2 + $0x138] sm:$0xff] }
 0x23c   : > { %v2724_v51 = vld [vmem:[#allocation3] sm:$0xff]  ;;  %v2847_v46 = vpop.f32.mrf.mxu3  ;;  %v2073_v34 = vld [vmem:[#allocation2 + $0x13a] sm:$0xff] }
 0x23d   : > { %v2925_v36 = vadd.f32 %v2845_v9, %v2724_v51  ;;  %2645 = vst.msk [vmem:[#allocation3 + $0x8] sm:$0xff] %vm363_vm0, %v2613_v33  ;;  %3729 = vmatmul.msk.bf16.gmra.mxu0 %vm363_vm0, %v2091_v37  ;;  %v2699_v51 = vld [vmem:[#allocation2 + $0x141] sm:$0xff] }
 0x23e   : > { %v1815_v57 = vld [vmem:[#allocation3 + $0xf8] sm:$0xff] }
 0x23f   : > { %2957 = vst.msk [vmem:[#allocation3] sm:$0xff] %vm363_vm0, %v2925_v36  ;;  %v2016_v58 = vadd.f32 %v4663_v52, %v1815_v57  ;;  %3665 = vmatmul.msk.bf16.gmra.mxu2 %vm363_vm0, %v2404_v49 }
 0x240   : > { %v2228_v60 = vpop.f32.mrf.mxu1 }
 0x241   : > { %2048 = vst.msk [vmem:[#allocation3 + $0xf8] sm:$0xff] %vm363_vm0, %v2016_v58  ;;  %3697 = vmatmul.msk.bf16.gmra.mxu3 %vm363_vm0, %v2717_v54  ;;  %v2302_v62 = vadd.f32 %v2228_v60, %v2101_v59  ;;  %v2093_v54 = vpack.c.bf16 %v2074_v47, %v2073_v34  ;;  %v2389_v47 = vld [vmem:[#allocation2 + $0x168] sm:$0xff] }
 0x242   : > { %v2537_v63 = vpop.f32.mrf.mxu2  ;;  %v4699_v53 = vpop.f32.mrf.mxu0  ;;  %v2414_v10 = vld [vmem:[#allocation3 + $0x18] sm:$0xff] }
 0x243   : > { %v2614_v17 = vadd.f32 %v2537_v63, %v2413_v4  ;;  %2334 = vst.msk [vmem:[#allocation3 + $0x20] sm:$0xff] %vm363_vm0, %v2302_v62  ;;  %3634 = vmatmul.msk.bf16.gmra.mxu1 %vm363_vm0, %v2091_v37  ;;  %v2698_v37 = vld [vmem:[#allocation2 + $0x139] sm:$0xff] }
 0x244   : > { %v2725_v1 = vld [vmem:[#allocation3 + $0x8] sm:$0xff]  ;;  %v2850_v52 = vpop.f32.mrf.mxu3  ;;  %v2719_v59 = vpack.c.bf16 %v2699_v51, %v2698_v37  ;;  %v2077_v51 = vld [vmem:[#allocation2 + $0x16a] sm:$0xff] }
 0x245   : > { %v2926_v61 = vadd.f32 %v2847_v46, %v2725_v1  ;;  %2646 = vst.msk [vmem:[#allocation3 + $0x10] sm:$0xff] %vm363_vm0, %v2614_v17  ;;  %v2105_v1 = vld [vmem:[#allocation3 + $0x40] sm:$0xff] }
 0x246   : > { %v3037_v50 = vld [vmem:[#allocation3] sm:$0xff] }
 0x247   : > { %2958 = vst.msk [vmem:[#allocation3 + $0x8] sm:$0xff] %vm363_vm0, %v2926_v61  ;;  %v3238_v3 = vadd.f32 %v4671_v6, %v3037_v50  ;;  %v2092_v6 = vpack.c.bf16 %v2072_v12, %v2071_v29  ;;  %v2387_v29 = vld [vmem:[#allocation2 + $0x150] sm:$0xff]  ;;  %v2388_v12 = vld [vmem:[#allocation2 + $0x158] sm:$0xff] }
 0x248   : > { %v2230_v11 = vpop.f32.mrf.mxu1 }
 0x249   : > { %3270 = vst.msk [vmem:[#allocation3] sm:$0xff] %vm363_vm0, %v3238_v3  ;;  %v2303_v13 = vadd.f32 %v2230_v11, %v2102_v8 }
 0x24a   : > { %v2539_v14 = vpop.f32.mrf.mxu2  ;;  %v4707_v0 = vpop.f32.mrf.mxu0  ;;  %v2415_v27 = vld [vmem:[#allocation3 + $0x20] sm:$0xff] }
 0x24b   : > { %v2615_v2 = vadd.f32 %v2539_v14, %v2414_v10  ;;  %2335 = vst.msk [vmem:[#allocation3 + $0x28] sm:$0xff] %vm363_vm0, %v2303_v13  ;;  %v2106_v13 = vld [vmem:[#allocation3 + $0x48] sm:$0xff] }
 0x24c   : > { %v2726_v19 = vld [vmem:[#allocation3 + $0x10] sm:$0xff]  ;;  %v2852_v21 = vpop.f32.mrf.mxu3 }
 0x24d   : > { %v2927_v22 = vadd.f32 %v2850_v52, %v2726_v19  ;;  %2647 = vst.msk [vmem:[#allocation3 + $0x18] sm:$0xff] %vm363_vm0, %v2615_v2  ;;  %3730 = vmatmul.msk.bf16.gmra.mxu0 %vm363_vm0, %v2092_v6  ;;  %v2076_v2 = vld [vmem:[#allocation2 + $0x15a] sm:$0xff] }
 0x24e   : > { %v3038_v24 = vld [vmem:[#allocation3 + $0x8] sm:$0xff] }
 0x24f   : > { %2959 = vst.msk [vmem:[#allocation3 + $0x10] sm:$0xff] %vm363_vm0, %v2927_v22  ;;  %v3239_v25 = vadd.f32 %v4681_v20, %v3038_v24  ;;  %3666 = vmatmul.msk.bf16.gmra.mxu2 %vm363_vm0, %v2405_v18  ;;  %v2701_v22 = vld [vmem:[#allocation2 + $0x159] sm:$0xff] }
 0x250   : > { %v3302_v26 = vld [vmem:[#allocation3] sm:$0xff]  ;;  %v2233_v15 = vpop.f32.mrf.mxu1 }
 0x251   : > { %3334 = vst.msk [vmem:[%s4717_s6] sm:$0xff] %vm363_vm0, %v3302_v26  ;;  %3698 = vmatmul.msk.bf16.gmra.mxu3 %vm363_vm0, %v2718_v23  ;;  %v2304_v32 = vadd.f32 %v2233_v15, %v2103_v28 }
 0x252   : > { %3271 = vst.msk [vmem:[#allocation3 + $0x8] sm:$0xff] %vm363_vm0, %v3239_v25  ;;  %v2542_v9 = vpop.f32.mrf.mxu2  ;;  %v4726_v35 = vpop.f32.mrf.mxu0  ;;  %v2416_v44 = vld [vmem:[#allocation3 + $0x28] sm:$0xff]  ;;  %v2094_v25 = vpack.c.bf16 %v2076_v2, %v2075_v55  ;;  %v2391_v2 = vld [vmem:[#allocation2 + $0x180] sm:$0xff] }
 0x253   : > { %v2616_v31 = vadd.f32 %v2542_v9, %v2415_v27  ;;  %2336 = vst.msk [vmem:[#allocation3 + $0x30] sm:$0xff] %vm363_vm0, %v2304_v32  ;;  %3635 = vmatmul.msk.bf16.gmra.mxu1 %vm363_vm0, %v2092_v6 }
 0x254   : > { %v2727_v20 = vld [vmem:[#allocation3 + $0x18] sm:$0xff]  ;;  %v2855_v38 = vpop.f32.mrf.mxu3 }
 0x255   : > { %v2928_v39 = vadd.f32 %v2852_v21, %v2727_v20  ;;  %2648 = vst.msk [vmem:[#allocation3 + $0x20] sm:$0xff] %vm363_vm0, %v2616_v31  ;;  %v2700_v21 = vld [vmem:[#allocation2 + $0x151] sm:$0xff] }
 0x256   : > { %v3039_v56 = vld [vmem:[#allocation3 + $0x10] sm:$0xff]  ;;  %v2720_v15 = vpack.c.bf16 %v2701_v22, %v2700_v21 }
 0x257   : > { %2960 = vst.msk [vmem:[#allocation3 + $0x18] sm:$0xff] %vm363_vm0, %v2928_v39  ;;  %v3240_v30 = vadd.f32 %v4689_v40, %v3039_v56  ;;  %v2406_v40 = vpack.c.bf16 %v2386_v42, %v2385_v41  ;;  %v2079_v22 = vld [vmem:[#allocation2 + $0x182] sm:$0xff] }
 0x258   : > { %v2235_v45 = vpop.f32.mrf.mxu1 }
 0x259   : > { %v3303_v48 = vld [vmem:[#allocation3 + $0x8] sm:$0xff]  ;;  %3272 = vst.msk [vmem:[#allocation3 + $0x10] sm:$0xff] %vm363_vm0, %v3240_v30  ;;  %v2305_v33 = vadd.f32 %v2235_v45, %v2104_v43 }
 0x25a   : > { %3335 = vst.msk [vmem:[%s4717_s6 + $0x8] sm:$0xff] %vm363_vm0, %v3303_v48  ;;  %v2544_v49 = vpop.f32.mrf.mxu2  ;;  %v4736_v46 = vpop.f32.mrf.mxu0  ;;  %v2417_v17 = vld [vmem:[#allocation3 + $0x30] sm:$0xff]  ;;  %v2390_v48 = vld [vmem:[#allocation2 + $0x170] sm:$0xff] }
 0x25b   : > { %v2617_v36 = vadd.f32 %v2544_v49, %v2416_v44  ;;  %2337 = vst.msk [vmem:[#allocation3 + $0x38] sm:$0xff] %vm363_vm0, %v2305_v33  ;;  %v2108_v33 = vld [vmem:[#allocation3 + $0x58] sm:$0xff] }
 0x25c   : > { %v2728_v57 = vld [vmem:[#allocation3 + $0x20] sm:$0xff]  ;;  %v2857_v58 = vpop.f32.mrf.mxu3 }
 0x25d   : > { %v2929_v4 = vadd.f32 %v2855_v38, %v2728_v57  ;;  %2649 = vst.msk [vmem:[#allocation3 + $0x28] sm:$0xff] %vm363_vm0, %v2617_v36  ;;  %3731 = vmatmul.msk.bf16.gmra.mxu0 %vm363_vm0, %v2093_v54  ;;  %v2107_v38 = vld [vmem:[#allocation3 + $0x50] sm:$0xff]  ;;  %v2078_v36 = vld [vmem:[#allocation2 + $0x172] sm:$0xff] }
 0x25e   : > { %v3040_v60 = vld [vmem:[#allocation3 + $0x18] sm:$0xff] }
 0x25f   : > { %2961 = vst.msk [vmem:[#allocation3 + $0x20] sm:$0xff] %vm363_vm0, %v2929_v4  ;;  %v3241_v62 = vadd.f32 %v4699_v53, %v3040_v60  ;;  %3667 = vmatmul.msk.bf16.gmra.mxu2 %vm363_vm0, %v2406_v40  ;;  %v2703_v4 = vld [vmem:[#allocation2 + $0x171] sm:$0xff] }
 0x260   : > { %v3304_v63 = vld [vmem:[#allocation3 + $0x10] sm:$0xff]  ;;  %v2238_v52 = vpop.f32.mrf.mxu1 }
 0x261   : > { %3336 = vst.msk [vmem:[%s4717_s6 + $0x10] sm:$0xff] %vm363_vm0, %v3304_v63  ;;  %3699 = vmatmul.msk.bf16.gmra.mxu3 %vm363_vm0, %v2719_v59  ;;  %v2306_v61 = vadd.f32 %v2238_v52, %v2105_v1 }
 0x262   : > { %3273 = vst.msk [vmem:[#allocation3 + $0x18] sm:$0xff] %vm363_vm0, %v3241_v62  ;;  %v2547_v50 = vpop.f32.mrf.mxu2  ;;  %v4748_v3 = vpop.f32.mrf.mxu0  ;;  %v2418_v14 = vld [vmem:[#allocation3 + $0x38] sm:$0xff]  ;;  %v2095_v62 = vpack.c.bf16 %v2078_v36, %v2077_v51  ;;  %v3019_v51 = vld [vmem:[#allocation2 + $0x19a] sm:$0xff] }
 0x263   : > { %v2618_v5 = vadd.f32 %v2547_v50, %v2417_v17  ;;  %2338 = vst.msk [vmem:[#allocation3 + $0x40] sm:$0xff] %vm363_vm0, %v2306_v61  ;;  %3636 = vmatmul.msk.bf16.gmra.mxu1 %vm363_vm0, %v2093_v54  ;;  %v3020_v36 = vld [vmem:[#allocation2 + $0x1a2] sm:$0xff] }
 0x264   : > { %v2729_v53 = vld [vmem:[#allocation3 + $0x28] sm:$0xff]  ;;  %v2860_v7 = vpop.f32.mrf.mxu3 }
 0x265   : > { %v2930_v8 = vadd.f32 %v2857_v58, %v2729_v53  ;;  %2650 = vst.msk [vmem:[#allocation3 + $0x30] sm:$0xff] %vm363_vm0, %v2618_v5  ;;  %v2702_v58 = vld [vmem:[#allocation2 + $0x169] sm:$0xff] }
 0x266   : > { %v3041_v10 = vld [vmem:[#allocation3 + $0x20] sm:$0xff]  ;;  %v2721_v52 = vpack.c.bf16 %v2703_v4, %v2702_v58  ;;  %v2393_v58 = vld [vmem:[#allocation2 + $0x198] sm:$0xff]  ;;  %v2394_v4 = vld [vmem:[#allocation2 + $0x1a0] sm:$0xff] }
 0x267   : > { %2962 = vst.msk [vmem:[#allocation3 + $0x28] sm:$0xff] %vm363_vm0, %v2930_v8  ;;  %v3242_v11 = vadd.f32 %v4707_v0, %v3041_v10  ;;  %v2407_v0 = vpack.c.bf16 %v2388_v12, %v2387_v29 }
 0x268   : > { %v2240_v16 = vpop.f32.mrf.mxu1 }
 0x269   : > { %v3305_v18 = vld [vmem:[#allocation3 + $0x18] sm:$0xff]  ;;  %3274 = vst.msk [vmem:[#allocation3 + $0x20] sm:$0xff] %vm363_vm0, %v3242_v11  ;;  %v2307_v6 = vadd.f32 %v2240_v16, %v2106_v13 }
 0x26a   : > { %3337 = vst.msk [vmem:[%s4717_s6 + $0x18] sm:$0xff] %vm363_vm0, %v3305_v18  ;;  %v2549_v19 = vpop.f32.mrf.mxu2  ;;  %v4758_v23 = vpop.f32.mrf.mxu0  ;;  %v2419_v20 = vld [vmem:[#allocation3 + $0x40] sm:$0xff]  ;;  %v2392_v18 = vld [vmem:[#allocation2 + $0x188] sm:$0xff] }
 0x26b   : > { %v2619_v24 = vadd.f32 %v2549_v19, %v2418_v14  ;;  %2339 = vst.msk [vmem:[#allocation3 + $0x48] sm:$0xff] %vm363_vm0, %v2307_v6  ;;  %v2110_v6 = vld [vmem:[#allocation3 + $0x68] sm:$0xff] }
 0x26c   : > { %v2730_v26 = vld [vmem:[#allocation3 + $0x30] sm:$0xff]  ;;  %v2862_v27 = vpop.f32.mrf.mxu3 }
 0x26d   : > { %v2931_v28 = vadd.f32 %v2860_v7, %v2730_v26  ;;  %2651 = vst.msk [vmem:[#allocation3 + $0x38] sm:$0xff] %vm363_vm0, %v2619_v24  ;;  %3732 = vmatmul.msk.bf16.gmra.mxu0 %vm363_vm0, %v2094_v25  ;;  %v2109_v7 = vld [vmem:[#allocation3 + $0x60] sm:$0xff] }
 0x26e   : > { %v3042_v32 = vld [vmem:[#allocation3 + $0x28] sm:$0xff]  ;;  %v2080_v24 = vld [vmem:[#allocation2 + $0x18a] sm:$0xff] }
 0x26f   : > { %2963 = vst.msk [vmem:[#allocation3 + $0x30] sm:$0xff] %vm363_vm0, %v2931_v28  ;;  %v3243_v9 = vadd.f32 %v4726_v35, %v3042_v32  ;;  %3668 = vmatmul.msk.bf16.gmra.mxu2 %vm363_vm0, %v2407_v0  ;;  %v2705_v28 = vld [vmem:[#allocation2 + $0x189] sm:$0xff] }
 0x270   : > { %v3306_v31 = vld [vmem:[#allocation3 + $0x20] sm:$0xff]  ;;  %v2243_v39 = vpop.f32.mrf.mxu1 }
 0x271   : > { %3338 = vst.msk [vmem:[%s4717_s6 + $0x20] sm:$0xff] %vm363_vm0, %v3306_v31  ;;  %3700 = vmatmul.msk.bf16.gmra.mxu3 %vm363_vm0, %v2720_v15  ;;  %v2308_v56 = vadd.f32 %v2243_v39, %v2107_v38 }
 0x272   : > { %3275 = vst.msk [vmem:[#allocation3 + $0x28] sm:$0xff] %vm363_vm0, %v3243_v9  ;;  %v2552_v30 = vpop.f32.mrf.mxu2  ;;  %v4770_v41 = vpop.f32.mrf.mxu0  ;;  %v2420_v49 = vld [vmem:[#allocation3 + $0x48] sm:$0xff]  ;;  %v2096_v9 = vpack.c.bf16 %v2080_v24, %v2079_v22 }
 0x273   : > { %v2620_v42 = vadd.f32 %v2552_v30, %v2419_v20  ;;  %2340 = vst.msk [vmem:[#allocation3 + $0x50] sm:$0xff] %vm363_vm0, %v2308_v56  ;;  %3637 = vmatmul.msk.bf16.gmra.mxu1 %vm363_vm0, %v2094_v25 }
 0x274   : > { %v2731_v35 = vld [vmem:[#allocation3 + $0x38] sm:$0xff]  ;;  %v2865_v43 = vpop.f32.mrf.mxu3 }
 0x275   : > { %v2932_v44 = vadd.f32 %v2862_v27, %v2731_v35  ;;  %2652 = vst.msk [vmem:[#allocation3 + $0x40] sm:$0xff] %vm363_vm0, %v2620_v42  ;;  %v2704_v27 = vld [vmem:[#allocation2 + $0x181] sm:$0xff] }
 0x276   : > { %v3043_v45 = vld [vmem:[#allocation3 + $0x30] sm:$0xff]  ;;  %v2722_v39 = vpack.c.bf16 %v2705_v28, %v2704_v27 }
 0x277   : > { %2964 = vst.msk [vmem:[#allocation3 + $0x38] sm:$0xff] %vm363_vm0, %v2932_v44  ;;  %v3244_v34 = vadd.f32 %v4736_v46, %v3043_v45  ;;  %v2408_v46 = vpack.c.bf16 %v2390_v48, %v2389_v47 }
 0x278   : > { %v2245_v37 = vpop.f32.mrf.mxu1 }
 0x279   : > { %v3307_v40 = vld [vmem:[#allocation3 + $0x28] sm:$0xff]  ;;  %3276 = vst.msk [vmem:[#allocation3 + $0x30] sm:$0xff] %vm363_vm0, %v3244_v34  ;;  %v2309_v54 = vadd.f32 %v2245_v37, %v2108_v33 }
 0x27a   : > { %3339 = vst.msk [vmem:[%s4717_s6 + $0x28] sm:$0xff] %vm363_vm0, %v3307_v40  ;;  %v2554_v57 = vpop.f32.mrf.mxu2  ;;  %v4780_v59 = vpop.f32.mrf.mxu0  ;;  %v2421_v53 = vld [vmem:[#allocation3 + $0x50] sm:$0xff] }
 0x27b   : > { %v2621_v60 = vadd.f32 %v2554_v57, %v2420_v49  ;;  %2341 = vst.msk [vmem:[#allocation3 + $0x58] sm:$0xff] %vm363_vm0, %v2309_v54  ;;  %v2112_v54 = vld [vmem:[#allocation3 + $0x78] sm:$0xff] }
 0x27c   : > { %v2732_v63 = vld [vmem:[#allocation3 + $0x40] sm:$0xff]  ;;  %v2867_v17 = vpop.f32.mrf.mxu3 }
 0x27d   : > { %v2933_v1 = vadd.f32 %v2865_v43, %v2732_v63  ;;  %2653 = vst.msk [vmem:[#allocation3 + $0x48] sm:$0xff] %vm363_vm0, %v2621_v60  ;;  %3733 = vmatmul.msk.bf16.gmra.mxu0 %vm363_vm0, %v2095_v62  ;;  %v2111_v43 = vld [vmem:[#allocation3 + $0x70] sm:$0xff]  ;;  %v3036_v63 = vpack.c.bf16 %v3020_v36, %v3019_v51 }
 0x27e   : > { %v3044_v61 = vld [vmem:[#allocation3 + $0x38] sm:$0xff] }
 0x27f   : > { %2965 = vst.msk [vmem:[#allocation3 + $0x40] sm:$0xff] %vm363_vm0, %v2933_v1  ;;  %v3245_v50 = vadd.f32 %v4748_v3, %v3044_v61  ;;  %3669 = vmatmul.msk.bf16.gmra.mxu2 %vm363_vm0, %v2408_v46  ;;  %v2706_v1 = vld [vmem:[#allocation2 + $0x199] sm:$0xff] }
 0x280   : > { %v3308_v5 = vld [vmem:[#allocation3 + $0x30] sm:$0xff]  ;;  %v2248_v8 = vpop.f32.mrf.mxu1 }
 0x281   : > { %3340 = vst.msk [vmem:[%s4717_s6 + $0x30] sm:$0xff] %vm363_vm0, %v3308_v5  ;;  %3701 = vmatmul.msk.bf16.gmra.mxu3 %vm363_vm0, %v2721_v52  ;;  %v2310_v10 = vadd.f32 %v2248_v8, %v2109_v7  ;;  %v2707_v52 = vld [vmem:[#allocation2 + $0x1a1] sm:$0xff]  ;;  %v2410_v5 = vpack.c.bf16 %v2394_v4, %v2393_v58 }
 0x282   : > { %3277 = vst.msk [vmem:[#allocation3 + $0x38] sm:$0xff] %vm363_vm0, %v3245_v50  ;;  %v2557_v11 = vpop.f32.mrf.mxu2  ;;  %v4792_v29 = vpop.f32.mrf.mxu0  ;;  %v2422_v19 = vld [vmem:[#allocation3 + $0x58] sm:$0xff]  ;;  %v2723_v8 = vpack.c.bf16 %v2707_v52, %v2706_v1  ;;  %v2117_v52 = vld [vmem:[#allocation3 + $0xa0] sm:$0xff] }
 0x283   : > { %v2622_v12 = vadd.f32 %v2557_v11, %v2421_v53  ;;  %2342 = vst.msk [vmem:[#allocation3 + $0x60] sm:$0xff] %vm363_vm0, %v2310_v10  ;;  %3638 = vmatmul.msk.bf16.gmra.mxu1 %vm363_vm0, %v2095_v62 }
 0x284   : > { %v2733_v3 = vld [vmem:[#allocation3 + $0x48] sm:$0xff]  ;;  %v2870_v13 = vpop.f32.mrf.mxu3 }
 0x285   : > { %v2934_v14 = vadd.f32 %v2867_v17, %v2733_v3  ;;  %2654 = vst.msk [vmem:[#allocation3 + $0x50] sm:$0xff] %vm363_vm0, %v2622_v12 }
 0x286   : > { %v3045_v16 = vld [vmem:[#allocation3 + $0x40] sm:$0xff] }
 0x287   : > { %2966 = vst.msk [vmem:[#allocation3 + $0x48] sm:$0xff] %vm363_vm0, %v2934_v14  ;;  %v3246_v55 = vadd.f32 %v4758_v23, %v3045_v16  ;;  %v2409_v23 = vpack.c.bf16 %v2392_v18, %v2391_v2 }
 0x288   : > { %v2250_v21 = vpop.f32.mrf.mxu1 }
 0x289   : > { %v3309_v0 = vld [vmem:[#allocation3 + $0x38] sm:$0xff]  ;;  %3278 = vst.msk [vmem:[#allocation3 + $0x40] sm:$0xff] %vm363_vm0, %v3246_v55  ;;  %v2311_v25 = vadd.f32 %v2250_v21, %v2110_v6 }
 0x28a   : > { %3341 = vst.msk [vmem:[%s4717_s6 + $0x38] sm:$0xff] %vm363_vm0, %v3309_v0  ;;  %v2559_v26 = vpop.f32.mrf.mxu2  ;;  %v4802_v15 = vpop.f32.mrf.mxu0  ;;  %v2423_v35 = vld [vmem:[#allocation3 + $0x60] sm:$0xff]  ;;  %v2114_v0 = vld [vmem:[#allocation3 + $0x88] sm:$0xff] }
 0x28b   : > { %v2623_v32 = vadd.f32 %v2559_v26, %v2422_v19  ;;  %2343 = vst.msk [vmem:[#allocation3 + $0x68] sm:$0xff] %vm363_vm0, %v2311_v25 }
 0x28c   : > { %v2734_v31 = vld [vmem:[#allocation3 + $0x50] sm:$0xff]  ;;  %v2872_v20 = vpop.f32.mrf.mxu3 }
 0x28d   : > { %v2935_v38 = vadd.f32 %v2870_v13, %v2734_v31  ;;  %2655 = vst.msk [vmem:[#allocation3 + $0x58] sm:$0xff] %vm363_vm0, %v2623_v32  ;;  %3734 = vmatmul.msk.bf16.gmra.mxu0 %vm363_vm0, %v2096_v9  ;;  %v2113_v13 = vld [vmem:[#allocation3 + $0x80] sm:$0xff] }
 0x28e   : > { %v3046_v56 = vld [vmem:[#allocation3 + $0x48] sm:$0xff] }
 0x28f   : > { %2967 = vst.msk [vmem:[#allocation3 + $0x50] sm:$0xff] %vm363_vm0, %v2935_v38  ;;  %v3247_v30 = vadd.f32 %v4770_v41, %v3046_v56  ;;  %3670 = vmatmul.msk.bf16.gmra.mxu2 %vm363_vm0, %v2409_v23 }
 0x290   : > { %v3310_v42 = vld [vmem:[#allocation3 + $0x40] sm:$0xff]  ;;  %v2253_v44 = vpop.f32.mrf.mxu1 }
 0x291   : > { %3342 = vst.msk [vmem:[%s4717_s6 + $0x40] sm:$0xff] %vm363_vm0, %v3310_v42  ;;  %3702 = vmatmul.msk.bf16.gmra.mxu3 %vm363_vm0, %v2722_v39  ;;  %v2312_v45 = vadd.f32 %v2253_v44, %v2111_v43 }
 0x292   : > { %3279 = vst.msk [vmem:[#allocation3 + $0x48] sm:$0xff] %vm363_vm0, %v3247_v30  ;;  %v2562_v34 = vpop.f32.mrf.mxu2  ;;  %v4814_v47 = vpop.f32.mrf.mxu0  ;;  %v2424_v57 = vld [vmem:[#allocation3 + $0x68] sm:$0xff]  ;;  %v2115_v30 = vld [vmem:[#allocation3 + $0x90] sm:$0xff] }
 0x293   : > { %v2624_v48 = vadd.f32 %v2562_v34, %v2423_v35  ;;  %2344 = vst.msk [vmem:[#allocation3 + $0x70] sm:$0xff] %vm363_vm0, %v2312_v45  ;;  %3639 = vmatmul.msk.bf16.gmra.mxu1 %vm363_vm0, %v2096_v9 }
 0x294   : > { %v2735_v41 = vld [vmem:[#allocation3 + $0x58] sm:$0xff]  ;;  %v2875_v33 = vpop.f32.mrf.mxu3 }
 0x295   : > { %v2936_v49 = vadd.f32 %v2872_v20, %v2735_v41  ;;  %2656 = vst.msk [vmem:[#allocation3 + $0x60] sm:$0xff] %vm363_vm0, %v2624_v48 }
 0x296   : > { %v3047_v37 = vld [vmem:[#allocation3 + $0x50] sm:$0xff] }
 0x297   : > { %2968 = vst.msk [vmem:[#allocation3 + $0x58] sm:$0xff] %vm363_vm0, %v2936_v49  ;;  %v3248_v40 = vadd.f32 %v4780_v59, %v3047_v37  ;;  %v2116_v37 = vld [vmem:[#allocation3 + $0x98] sm:$0xff] }
 0x298   : > { %v2255_v60 = vpop.f32.mrf.mxu1 }
 0x299   : > { %v3311_v46 = vld [vmem:[#allocation3 + $0x48] sm:$0xff]  ;;  %3280 = vst.msk [vmem:[#allocation3 + $0x50] sm:$0xff] %vm363_vm0, %v3248_v40  ;;  %v2313_v62 = vadd.f32 %v2255_v60, %v2112_v54 }
 0x29a   : > { %3343 = vst.msk [vmem:[%s4717_s6 + $0x48] sm:$0xff] %vm363_vm0, %v3311_v46  ;;  %v2564_v17 = vpop.f32.mrf.mxu2  ;;  %v4824_v61 = vpop.f32.mrf.mxu0  ;;  %v2425_v3 = vld [vmem:[#allocation3 + $0x70] sm:$0xff] }
 0x29b   : > { %v2625_v50 = vadd.f32 %v2564_v17, %v2424_v57  ;;  %2345 = vst.msk [vmem:[#allocation3 + $0x78] sm:$0xff] %vm363_vm0, %v2313_v62 }
 0x29c   : > { %v2736_v59 = vld [vmem:[#allocation3 + $0x60] sm:$0xff]  ;;  %v2877_v53 = vpop.f32.mrf.mxu3 }
 0x29d   : > { %v2937_v7 = vadd.f32 %v2875_v33, %v2736_v59  ;;  %2657 = vst.msk [vmem:[#allocation3 + $0x68] sm:$0xff] %vm363_vm0, %v2625_v50  ;;  %3735 = vmatmul.msk.bf16.gmra.mxu0 %vm363_vm0, %v3036_v63 }
 0x29e   : > { %v3048_v10 = vld [vmem:[#allocation3 + $0x58] sm:$0xff] }
 0x29f   : > { %2969 = vst.msk [vmem:[#allocation3 + $0x60] sm:$0xff] %vm363_vm0, %v2937_v7  ;;  %v3249_v11 = vadd.f32 %v4792_v29, %v3048_v10  ;;  %3671 = vmatmul.msk.bf16.gmra.mxu2 %vm363_vm0, %v2410_v5 }
 0x2a0   : > { %v3312_v12 = vld [vmem:[#allocation3 + $0x50] sm:$0xff]  ;;  %v2258_v14 = vpop.f32.mrf.mxu1 }
 0x2a1   : > { %3344 = vst.msk [vmem:[%s4717_s6 + $0x50] sm:$0xff] %vm363_vm0, %v3312_v12  ;;  %3703 = vmatmul.msk.bf16.gmra.mxu3 %vm363_vm0, %v2723_v8  ;;  %v2314_v16 = vadd.f32 %v2258_v14, %v2113_v13  ;;  %v2118_v13 = vld [vmem:[#allocation3 + $0xa8] sm:$0xff] }
 0x2a2   : > { %3281 = vst.msk [vmem:[#allocation3 + $0x58] sm:$0xff] %vm363_vm0, %v3249_v11  ;;  %v2567_v55 = vpop.f32.mrf.mxu2  ;;  %v4836_v2 = vpop.f32.mrf.mxu0  ;;  %v2426_v24 = vld [vmem:[#allocation3 + $0x78] sm:$0xff] }
 0x2a3   : > { %v2626_v18 = vadd.f32 %v2567_v55, %v2425_v3  ;;  %2346 = vst.msk [vmem:[#allocation3 + $0x80] sm:$0xff] %vm363_vm0, %v2314_v16 }
 0x2a4   : > { %v2737_v29 = vld [vmem:[#allocation3 + $0x68] sm:$0xff]  ;;  %v2880_v6 = vpop.f32.mrf.mxu3 }
 0x2a5   : > { %v2938_v19 = vadd.f32 %v2877_v53, %v2737_v29  ;;  %2658 = vst.msk [vmem:[#allocation3 + $0x70] sm:$0xff] %vm363_vm0, %v2626_v18 }
 0x2a6   : > { %v3049_v21 = vld [vmem:[#allocation3 + $0x60] sm:$0xff] }
 0x2a7   : > { %2970 = vst.msk [vmem:[#allocation3 + $0x68] sm:$0xff] %vm363_vm0, %v2938_v19  ;;  %v3250_v22 = vadd.f32 %v4802_v15, %v3049_v21 }
 0x2a8   : > { %v2260_v25 = vpop.f32.mrf.mxu1 }
 0x2a9   : > { %v3313_v26 = vld [vmem:[#allocation3 + $0x58] sm:$0xff]  ;;  %3282 = vst.msk [vmem:[#allocation3 + $0x60] sm:$0xff] %vm363_vm0, %v3250_v22  ;;  %v2315_v27 = vadd.f32 %v2260_v25, %v2114_v0 }
 0x2aa   : > { %3345 = vst.msk [vmem:[%s4717_s6 + $0x58] sm:$0xff] %vm363_vm0, %v3313_v26  ;;  %v2569_v28 = vpop.f32.mrf.mxu2  ;;  %v4845_v32 = vpop.f32.mrf.mxu0  ;;  %v2427_v56 = vld [vmem:[#allocation3 + $0x80] sm:$0xff]  ;;  %v2119_v26 = vld [vmem:[#allocation3 + $0xb0] sm:$0xff] }
 0x2ab   : > { %v2627_v23 = vadd.f32 %v2569_v28, %v2426_v24  ;;  %2347 = vst.msk [vmem:[#allocation3 + $0x88] sm:$0xff] %vm363_vm0, %v2315_v27 }
 0x2ac   : > { %v2738_v9 = vld [vmem:[#allocation3 + $0x70] sm:$0xff]  ;;  %v2882_v31 = vpop.f32.mrf.mxu3 }
 0x2ad   : > { %v2939_v20 = vadd.f32 %v2880_v6, %v2738_v9  ;;  %2659 = vst.msk [vmem:[#allocation3 + $0x78] sm:$0xff] %vm363_vm0, %v2627_v23 }
 0x2ae   : > { %v3050_v15 = vld [vmem:[#allocation3 + $0x68] sm:$0xff] }
 0x2af   : > { %2971 = vst.msk [vmem:[#allocation3 + $0x70] sm:$0xff] %vm363_vm0, %v2939_v20  ;;  %v3251_v38 = vadd.f32 %v4814_v47, %v3050_v15 }
 0x2b0   : > { %v3314_v39 = vld [vmem:[#allocation3 + $0x60] sm:$0xff]  ;;  %v2263_v42 = vpop.f32.mrf.mxu1 }
 0x2b1   : > { %3346 = vst.msk [vmem:[%s4717_s6 + $0x60] sm:$0xff] %vm363_vm0, %v3314_v39  ;;  %v2316_v35 = vadd.f32 %v2263_v42, %v2115_v30 }
 0x2b2   : > { %3283 = vst.msk [vmem:[#allocation3 + $0x68] sm:$0xff] %vm363_vm0, %v3251_v38  ;;  %v2572_v43 = vpop.f32.mrf.mxu2  ;;  %v3200_v44 = vpop.f32.mrf.mxu0  ;;  %v2428_v49 = vld [vmem:[#allocation3 + $0x88] sm:$0xff] }
 0x2b3   : > { %v2628_v45 = vadd.f32 %v2572_v43, %v2427_v56  ;;  %2348 = vst.msk [vmem:[#allocation3 + $0x90] sm:$0xff] %vm363_vm0, %v2316_v35  ;;  %v2120_v56 = vld [vmem:[#allocation3 + $0xb8] sm:$0xff] }
 0x2b4   : > { %v2739_v34 = vld [vmem:[#allocation3 + $0x78] sm:$0xff]  ;;  %v2885_v48 = vpop.f32.mrf.mxu3 }
 0x2b5   : > { %v2940_v41 = vadd.f32 %v2882_v31, %v2739_v34  ;;  %2660 = vst.msk [vmem:[#allocation3 + $0x80] sm:$0xff] %vm363_vm0, %v2628_v45 }
 0x2b6   : > { %v3051_v47 = vld [vmem:[#allocation3 + $0x70] sm:$0xff] }
 0x2b7   : > { %2972 = vst.msk [vmem:[#allocation3 + $0x78] sm:$0xff] %vm363_vm0, %v2940_v41  ;;  %v3252_v33 = vadd.f32 %v4824_v61, %v3051_v47 }
 0x2b8   : > { %v2265_v51 = vpop.f32.mrf.mxu1 }
 0x2b9   : > { %v3315_v36 = vld [vmem:[#allocation3 + $0x68] sm:$0xff]  ;;  %3284 = vst.msk [vmem:[#allocation3 + $0x70] sm:$0xff] %vm363_vm0, %v3252_v33  ;;  %v2317_v40 = vadd.f32 %v2265_v51, %v2116_v37  ;;  %v2121_v51 = vld [vmem:[#allocation3 + $0xc0] sm:$0xff] }
 0x2ba   : > { %3347 = vst.msk [vmem:[%s4717_s6 + $0x68] sm:$0xff] %vm363_vm0, %v3315_v36  ;;  %v2574_v54 = vpop.f32.mrf.mxu2  ;;  %v3203_v58 = vpop.f32.mrf.mxu0  ;;  %v2429_v1 = vld [vmem:[#allocation3 + $0x90] sm:$0xff] }
 0x2bb   : > { %v2629_v57 = vadd.f32 %v2574_v54, %v2428_v49  ;;  %2349 = vst.msk [vmem:[#allocation3 + $0x98] sm:$0xff] %vm363_vm0, %v2317_v40 }
 0x2bc   : > { %v2740_v4 = vld [vmem:[#allocation3 + $0x80] sm:$0xff]  ;;  %v2887_v60 = vpop.f32.mrf.mxu3 }
 0x2bd   : > { %v2941_v46 = vadd.f32 %v2885_v48, %v2740_v4  ;;  %2661 = vst.msk [vmem:[#allocation3 + $0x88] sm:$0xff] %vm363_vm0, %v2629_v57 }
 0x2be   : > { %v3052_v62 = vld [vmem:[#allocation3 + $0x78] sm:$0xff] }
 0x2bf   : > { %2973 = vst.msk [vmem:[#allocation3 + $0x80] sm:$0xff] %vm363_vm0, %v2941_v46  ;;  %v3253_v63 = vadd.f32 %v4836_v2, %v3052_v62 }
 0x2c0   : > { %v3316_v17 = vld [vmem:[#allocation3 + $0x70] sm:$0xff]  ;;  %v2268_v61 = vpop.f32.mrf.mxu1 }
 0x2c1   : > { %3348 = vst.msk [vmem:[%s4717_s6 + $0x70] sm:$0xff] %vm363_vm0, %v3316_v17  ;;  %v2318_v50 = vadd.f32 %v2268_v61, %v2117_v52 }
 0x2c2   : > { %3285 = vst.msk [vmem:[#allocation3 + $0x78] sm:$0xff] %vm363_vm0, %v3253_v63  ;;  %v2577_v5 = vpop.f32.mrf.mxu2  ;;  %v3205_v10 = vpop.f32.mrf.mxu0  ;;  %v2430_v3 = vld [vmem:[#allocation3 + $0x98] sm:$0xff] }
 0x2c3   : > { %v2630_v59 = vadd.f32 %v2577_v5, %v2429_v1  ;;  %2350 = vst.msk [vmem:[#allocation3 + $0xa0] sm:$0xff] %vm363_vm0, %v2318_v50  ;;  %v2122_v1 = vld [vmem:[#allocation3 + $0xc8] sm:$0xff] }
 0x2c4   : > { %v2741_v53 = vld [vmem:[#allocation3 + $0x88] sm:$0xff]  ;;  %v2890_v7 = vpop.f32.mrf.mxu3 }
 0x2c5   : > { %v2942_v8 = vadd.f32 %v2887_v60, %v2741_v53  ;;  %2662 = vst.msk [vmem:[#allocation3 + $0x90] sm:$0xff] %vm363_vm0, %v2630_v59 }
 0x2c6   : > { %v3053_v11 = vld [vmem:[#allocation3 + $0x80] sm:$0xff] }
 0x2c7   : > { %2974 = vst.msk [vmem:[#allocation3 + $0x88] sm:$0xff] %vm363_vm0, %v2942_v8  ;;  %v3254_v12 = vadd.f32 %v4845_v32, %v3053_v11 }
 0x2c8   : > { %v2270_v14 = vpop.f32.mrf.mxu1 }
 0x2c9   : > { %v3317_v16 = vld [vmem:[#allocation3 + $0x78] sm:$0xff]  ;;  %3286 = vst.msk [vmem:[#allocation3 + $0x80] sm:$0xff] %vm363_vm0, %v3254_v12  ;;  %v2319_v55 = vadd.f32 %v2270_v14, %v2118_v13  ;;  %v2123_v14 = vld [vmem:[#allocation3 + $0xd0] sm:$0xff] }
 0x2ca   : > { %3349 = vst.msk [vmem:[%s4717_s6 + $0x78] sm:$0xff] %vm363_vm0, %v3317_v16  ;;  %v2579_v2 = vpop.f32.mrf.mxu2  ;;  %v3208_v24 = vpop.f32.mrf.mxu0  ;;  %v2431_v25 = vld [vmem:[#allocation3 + $0xa0] sm:$0xff] }
 0x2cb   : > { %v2631_v18 = vadd.f32 %v2579_v2, %v2430_v3  ;;  %2351 = vst.msk [vmem:[#allocation3 + $0xa8] sm:$0xff] %vm363_vm0, %v2319_v55 }
 0x2cc   : > { %v2742_v29 = vld [vmem:[#allocation3 + $0x90] sm:$0xff]  ;;  %v2892_v6 = vpop.f32.mrf.mxu3 }
 0x2cd   : > { %v2943_v19 = vadd.f32 %v2890_v7, %v2742_v29  ;;  %2663 = vst.msk [vmem:[#allocation3 + $0x98] sm:$0xff] %vm363_vm0, %v2631_v18 }
 0x2ce   : > { %v3054_v21 = vld [vmem:[#allocation3 + $0x88] sm:$0xff] }
 0x2cf   : > { %2975 = vst.msk [vmem:[#allocation3 + $0x90] sm:$0xff] %vm363_vm0, %v2943_v19  ;;  %v3255_v22 = vadd.f32 %v3200_v44, %v3054_v21 }
 0x2d0   : > { %v3318_v0 = vld [vmem:[#allocation3 + $0x80] sm:$0xff]  ;;  %v2273_v27 = vpop.f32.mrf.mxu1 }
 0x2d1   : > { %3350 = vst.msk [vmem:[%s4717_s6 + $0x80] sm:$0xff] %vm363_vm0, %v3318_v0  ;;  %v2320_v28 = vadd.f32 %v2273_v27, %v2119_v26 }
 0x2d2   : > { %3287 = vst.msk [vmem:[#allocation3 + $0x88] sm:$0xff] %vm363_vm0, %v3255_v22  ;;  %v2582_v32 = vpop.f32.mrf.mxu2  ;;  %v2432_v39 = vld [vmem:[#allocation3 + $0xa8] sm:$0xff]  ;;  %v3210_v43 = vpop.f32.mrf.mxu0 }
 0x2d3   : > { %v2632_v23 = vadd.f32 %v2582_v32, %v2431_v25  ;;  %2352 = vst.msk [vmem:[#allocation3 + $0xb0] sm:$0xff] %vm363_vm0, %v2320_v28  ;;  %v2124_v25 = vld [vmem:[#allocation3 + $0xd8] sm:$0xff] }
 0x2d4   : > { %v2743_v9 = vld [vmem:[#allocation3 + $0x98] sm:$0xff]  ;;  %v2895_v31 = vpop.f32.mrf.mxu3 }
 0x2d5   : > { %v2944_v20 = vadd.f32 %v2892_v6, %v2743_v9  ;;  %2664 = vst.msk [vmem:[#allocation3 + $0xa0] sm:$0xff] %vm363_vm0, %v2632_v23 }
 0x2d6   : > { %v3055_v15 = vld [vmem:[#allocation3 + $0x90] sm:$0xff] }
 0x2d7   : > { %2976 = vst.msk [vmem:[#allocation3 + $0x98] sm:$0xff] %vm363_vm0, %v2944_v20  ;;  %v3256_v38 = vadd.f32 %v3203_v58, %v3055_v15 }
 0x2d8   : > { %v2275_v30 = vpop.f32.mrf.mxu1 }
 0x2d9   : > { %v3319_v42 = vld [vmem:[#allocation3 + $0x88] sm:$0xff]  ;;  %3288 = vst.msk [vmem:[#allocation3 + $0x90] sm:$0xff] %vm363_vm0, %v3256_v38  ;;  %v2321_v35 = vadd.f32 %v2275_v30, %v2120_v56  ;;  %v2125_v30 = vld [vmem:[#allocation3 + $0xe0] sm:$0xff] }
 0x2da   : > { %3351 = vst.msk [vmem:[%s4717_s6 + $0x88] sm:$0xff] %vm363_vm0, %v3319_v42  ;;  %v2584_v44 = vpop.f32.mrf.mxu2  ;;  %v2433_v37 = vld [vmem:[#allocation3 + $0xb0] sm:$0xff]  ;;  %v3213_v58 = vpop.f32.mrf.mxu0 }
 0x2db   : > { %v2633_v45 = vadd.f32 %v2584_v44, %v2432_v39  ;;  %2353 = vst.msk [vmem:[#allocation3 + $0xb8] sm:$0xff] %vm363_vm0, %v2321_v35 }
 0x2dc   : > { %v2744_v34 = vld [vmem:[#allocation3 + $0xa0] sm:$0xff]  ;;  %v2897_v48 = vpop.f32.mrf.mxu3 }
 0x2dd   : > { %v2945_v41 = vadd.f32 %v2895_v31, %v2744_v34  ;;  %2665 = vst.msk [vmem:[#allocation3 + $0xa8] sm:$0xff] %vm363_vm0, %v2633_v45 }
 0x2de   : > { %v3056_v47 = vld [vmem:[#allocation3 + $0x98] sm:$0xff] }
 0x2df   : > { %2977 = vst.msk [vmem:[#allocation3 + $0xa0] sm:$0xff] %vm363_vm0, %v2945_v41  ;;  %v3257_v33 = vadd.f32 %v3205_v10, %v3056_v47 }
 0x2e0   : > { %v3320_v49 = vld [vmem:[#allocation3 + $0x90] sm:$0xff]  ;;  %v2278_v36 = vpop.f32.mrf.mxu1 }
 0x2e1   : > { %3352 = vst.msk [vmem:[%s4717_s6 + $0x90] sm:$0xff] %vm363_vm0, %v3320_v49  ;;  %v2322_v40 = vadd.f32 %v2278_v36, %v2121_v51 }
 0x2e2   : > { %3289 = vst.msk [vmem:[#allocation3 + $0x98] sm:$0xff] %vm363_vm0, %v3257_v33  ;;  %v2587_v54 = vpop.f32.mrf.mxu2  ;;  %v2434_v17 = vld [vmem:[#allocation3 + $0xb8] sm:$0xff]  ;;  %v3215_v10 = vpop.f32.mrf.mxu0 }
 0x2e3   : > { %v2634_v57 = vadd.f32 %v2587_v54, %v2433_v37  ;;  %2354 = vst.msk [vmem:[#allocation3 + $0xc0] sm:$0xff] %vm363_vm0, %v2322_v40  ;;  %v2126_v37 = vld [vmem:[#allocation3 + $0xe8] sm:$0xff] }
 0x2e4   : > { %v2745_v4 = vld [vmem:[#allocation3 + $0xa8] sm:$0xff]  ;;  %v2900_v60 = vpop.f32.mrf.mxu3 }
 0x2e5   : > { %v2946_v46 = vadd.f32 %v2897_v48, %v2745_v4  ;;  %2666 = vst.msk [vmem:[#allocation3 + $0xb0] sm:$0xff] %vm363_vm0, %v2634_v57 }
 0x2e6   : > { %v3057_v62 = vld [vmem:[#allocation3 + $0xa0] sm:$0xff] }
 0x2e7   : > { %2978 = vst.msk [vmem:[#allocation3 + $0xa8] sm:$0xff] %vm363_vm0, %v2946_v46  ;;  %v3258_v63 = vadd.f32 %v3208_v24, %v3057_v62 }
 0x2e8   : > { %v2280_v52 = vpop.f32.mrf.mxu1 }
 0x2e9   : > { %v3321_v61 = vld [vmem:[#allocation3 + $0x98] sm:$0xff]  ;;  %3290 = vst.msk [vmem:[#allocation3 + $0xa0] sm:$0xff] %vm363_vm0, %v3258_v63  ;;  %v2323_v50 = vadd.f32 %v2280_v52, %v2122_v1  ;;  %v2127_v52 = vld [vmem:[#allocation3 + $0xf0] sm:$0xff] }
 0x2ea   : > { %3353 = vst.msk [vmem:[%s4717_s6 + $0x98] sm:$0xff] %vm363_vm0, %v3321_v61  ;;  %v2589_v5 = vpop.f32.mrf.mxu2  ;;  %v2435_v13 = vld [vmem:[#allocation3 + $0xc0] sm:$0xff]  ;;  %v3218_v24 = vpop.f32.mrf.mxu0 }
 0x2eb   : > { %v2635_v59 = vadd.f32 %v2589_v5, %v2434_v17  ;;  %2355 = vst.msk [vmem:[#allocation3 + $0xc8] sm:$0xff] %vm363_vm0, %v2323_v50 }
 0x2ec   : > { %v2746_v53 = vld [vmem:[#allocation3 + $0xb0] sm:$0xff]  ;;  %v2902_v7 = vpop.f32.mrf.mxu3 }
 0x2ed   : > { %v2947_v8 = vadd.f32 %v2900_v60, %v2746_v53  ;;  %2667 = vst.msk [vmem:[#allocation3 + $0xb8] sm:$0xff] %vm363_vm0, %v2635_v59 }
 0x2ee   : > { %v3058_v11 = vld [vmem:[#allocation3 + $0xa8] sm:$0xff] }
 0x2ef   : > { %2979 = vst.msk [vmem:[#allocation3 + $0xb0] sm:$0xff] %vm363_vm0, %v2947_v8  ;;  %v3259_v12 = vadd.f32 %v3210_v43, %v3058_v11 }
 0x2f0   : > { %v3322_v3 = vld [vmem:[#allocation3 + $0xa0] sm:$0xff]  ;;  %v2283_v16 = vpop.f32.mrf.mxu1 }
 0x2f1   : > { %3354 = vst.msk [vmem:[%s4717_s6 + $0xa0] sm:$0xff] %vm363_vm0, %v3322_v3  ;;  %v2324_v55 = vadd.f32 %v2283_v16, %v2123_v14 }
 0x2f2   : > { %3291 = vst.msk [vmem:[#allocation3 + $0xa8] sm:$0xff] %vm363_vm0, %v3259_v12  ;;  %v2592_v2 = vpop.f32.mrf.mxu2  ;;  %v2436_v0 = vld [vmem:[#allocation3 + $0xc8] sm:$0xff]  ;;  %v3220_v35 = vpop.f32.mrf.mxu0 }
 0x2f3   : > { %v2636_v18 = vadd.f32 %v2592_v2, %v2435_v13  ;;  %2356 = vst.msk [vmem:[#allocation3 + $0xd0] sm:$0xff] %vm363_vm0, %v2324_v55  ;;  %v2128_v13 = vld [vmem:[#allocation3 + $0xf8] sm:$0xff] }
 0x2f4   : > { %v2747_v29 = vld [vmem:[#allocation3 + $0xb8] sm:$0xff]  ;;  %v2905_v6 = vpop.f32.mrf.mxu3 }
 0x2f5   : > { %v2948_v19 = vadd.f32 %v2902_v7, %v2747_v29  ;;  %2668 = vst.msk [vmem:[#allocation3 + $0xc0] sm:$0xff] %vm363_vm0, %v2636_v18 }
 0x2f6   : > { %v3059_v21 = vld [vmem:[#allocation3 + $0xb0] sm:$0xff] }
 0x2f7   : > { %2980 = vst.msk [vmem:[#allocation3 + $0xb8] sm:$0xff] %vm363_vm0, %v2948_v19  ;;  %v3260_v22 = vadd.f32 %v3213_v58, %v3059_v21 }
 0x2f8   : > { %v2285_v26 = vpop.f32.mrf.mxu1 }
 0x2f9   : > { %v3323_v27 = vld [vmem:[#allocation3 + $0xa8] sm:$0xff]  ;;  %3292 = vst.msk [vmem:[#allocation3 + $0xb0] sm:$0xff] %vm363_vm0, %v3260_v22  ;;  %v2325_v28 = vadd.f32 %v2285_v26, %v2124_v25 }
 0x2fa   : > { %3355 = vst.msk [vmem:[%s4717_s6 + $0xa8] sm:$0xff] %vm363_vm0, %v3323_v27  ;;  %v2594_v32 = vpop.f32.mrf.mxu2  ;;  %v2437_v56 = vld [vmem:[#allocation3 + $0xd0] sm:$0xff]  ;;  %v3223_v58 = vpop.f32.mrf.mxu0 }
 0x2fb   : > { %v2637_v23 = vadd.f32 %v2594_v32, %v2436_v0  ;;  %2357 = vst.msk [vmem:[#allocation3 + $0xd8] sm:$0xff] %vm363_vm0, %v2325_v28 }
 0x2fc   : > { %v2748_v9 = vld [vmem:[#allocation3 + $0xc0] sm:$0xff]  ;;  %v2907_v31 = vpop.f32.mrf.mxu3 }
 0x2fd   : > { %v2949_v20 = vadd.f32 %v2905_v6, %v2748_v9  ;;  %2669 = vst.msk [vmem:[#allocation3 + $0xc8] sm:$0xff] %vm363_vm0, %v2637_v23 }
 0x2fe   : > { %v3060_v15 = vld [vmem:[#allocation3 + $0xb8] sm:$0xff] }
 0x2ff   : > { %2981 = vst.msk [vmem:[#allocation3 + $0xc0] sm:$0xff] %vm363_vm0, %v2949_v20  ;;  %v3261_v38 = vadd.f32 %v3215_v10, %v3060_v15 }
 0x300   : > { %v3324_v39 = vld [vmem:[#allocation3 + $0xb0] sm:$0xff]  ;;  %v2288_v42 = vpop.f32.mrf.mxu1 }
 0x301   : > { %3356 = vst.msk [vmem:[%s4717_s6 + $0xb0] sm:$0xff] %vm363_vm0, %v3324_v39  ;;  %v2326_v43 = vadd.f32 %v2288_v42, %v2125_v30 }
 0x302   : > { %3293 = vst.msk [vmem:[#allocation3 + $0xb8] sm:$0xff] %vm363_vm0, %v3261_v38  ;;  %v2597_v44 = vpop.f32.mrf.mxu2  ;;  %v2438_v49 = vld [vmem:[#allocation3 + $0xd8] sm:$0xff]  ;;  %v3225_v8 = vpop.f32.mrf.mxu0 }
 0x303   : > { %v2638_v45 = vadd.f32 %v2597_v44, %v2437_v56  ;;  %2358 = vst.msk [vmem:[#allocation3 + $0xe0] sm:$0xff] %vm363_vm0, %v2326_v43 }
 0x304   : > { %v2749_v34 = vld [vmem:[#allocation3 + $0xc8] sm:$0xff]  ;;  %v2910_v48 = vpop.f32.mrf.mxu3 }
 0x305   : > { %v2950_v41 = vadd.f32 %v2907_v31, %v2749_v34  ;;  %2670 = vst.msk [vmem:[#allocation3 + $0xd0] sm:$0xff] %vm363_vm0, %v2638_v45 }
 0x306   : > { %v3061_v47 = vld [vmem:[#allocation3 + $0xc0] sm:$0xff] }
 0x307   : > { %2982 = vst.msk [vmem:[#allocation3 + $0xc8] sm:$0xff] %vm363_vm0, %v2950_v41  ;;  %v3262_v33 = vadd.f32 %v3218_v24, %v3061_v47 }
 0x308   : > { %v2290_v51 = vpop.f32.mrf.mxu1 }
 0x309   : > { %v3325_v36 = vld [vmem:[#allocation3 + $0xb8] sm:$0xff]  ;;  %3294 = vst.msk [vmem:[#allocation3 + $0xc0] sm:$0xff] %vm363_vm0, %v3262_v33  ;;  %v2327_v40 = vadd.f32 %v2290_v51, %v2126_v37 }
 0x30a   : > { %3357 = vst.msk [vmem:[%s4717_s6 + $0xb8] sm:$0xff] %vm363_vm0, %v3325_v36  ;;  %v2599_v54 = vpop.f32.mrf.mxu2  ;;  %v2439_v1 = vld [vmem:[#allocation3 + $0xe0] sm:$0xff]  ;;  %v3228_v22 = vpop.f32.mrf.mxu0 }
 0x30b   : > { %v2639_v57 = vadd.f32 %v2599_v54, %v2438_v49  ;;  %2359 = vst.msk [vmem:[#allocation3 + $0xe8] sm:$0xff] %vm363_vm0, %v2327_v40 }
 0x30c   : > { %v2750_v4 = vld [vmem:[#allocation3 + $0xd0] sm:$0xff]  ;;  %v2912_v60 = vpop.f32.mrf.mxu3 }
 0x30d   : > { %v2951_v46 = vadd.f32 %v2910_v48, %v2750_v4  ;;  %2671 = vst.msk [vmem:[#allocation3 + $0xd8] sm:$0xff] %vm363_vm0, %v2639_v57 }
 0x30e   : > { %v3062_v62 = vld [vmem:[#allocation3 + $0xc8] sm:$0xff] }
 0x30f   : > { %2983 = vst.msk [vmem:[#allocation3 + $0xd0] sm:$0xff] %vm363_vm0, %v2951_v46  ;;  %v3263_v63 = vadd.f32 %v3220_v35, %v3062_v62 }
 0x310   : > { %v3326_v17 = vld [vmem:[#allocation3 + $0xc0] sm:$0xff]  ;;  %v2293_v61 = vpop.f32.mrf.mxu1 }
 0x311   : > { %3358 = vst.msk [vmem:[%s4717_s6 + $0xc0] sm:$0xff] %vm363_vm0, %v3326_v17  ;;  %v2328_v50 = vadd.f32 %v2293_v61, %v2127_v52 }
 0x312   : > { %3295 = vst.msk [vmem:[#allocation3 + $0xc8] sm:$0xff] %vm363_vm0, %v3263_v63  ;;  %v2602_v5 = vpop.f32.mrf.mxu2  ;;  %v2440_v3 = vld [vmem:[#allocation3 + $0xe8] sm:$0xff]  ;;  %v3230_v15 = vpop.f32.mrf.mxu0 }
 0x313   : > { %v2640_v59 = vadd.f32 %v2602_v5, %v2439_v1  ;;  %2360 = vst.msk [vmem:[#allocation3 + $0xf0] sm:$0xff] %vm363_vm0, %v2328_v50 }
 0x314   : > { %v2751_v53 = vld [vmem:[#allocation3 + $0xd8] sm:$0xff]  ;;  %v2915_v11 = vpop.f32.mrf.mxu3 }
 0x315   : > { %v2952_v7 = vadd.f32 %v2912_v60, %v2751_v53  ;;  %2672 = vst.msk [vmem:[#allocation3 + $0xe0] sm:$0xff] %vm363_vm0, %v2640_v59 }
 0x316   : > { %v3063_v10 = vld [vmem:[#allocation3 + $0xd0] sm:$0xff] }
 0x317   : > { %2984 = vst.msk [vmem:[#allocation3 + $0xd8] sm:$0xff] %vm363_vm0, %v2952_v7  ;;  %v3264_v12 = vadd.f32 %v3223_v58, %v3063_v10 }
 0x318   : > { %v2295_v14 = vpop.f32.mrf.mxu1 }
 0x319   : > { %v3327_v16 = vld [vmem:[#allocation3 + $0xc8] sm:$0xff]  ;;  %3296 = vst.msk [vmem:[#allocation3 + $0xd0] sm:$0xff] %vm363_vm0, %v3264_v12  ;;  %v2329_v55 = vadd.f32 %v2295_v14, %v2128_v13 }
 0x31a   : > { %3359 = vst.msk [vmem:[%s4717_s6 + $0xc8] sm:$0xff] %vm363_vm0, %v3327_v16  ;;  %v2604_v2 = vpop.f32.mrf.mxu2  ;;  %v2441_v25 = vld [vmem:[#allocation3 + $0xf0] sm:$0xff]  ;;  %v3233_v48 = vpop.f32.mrf.mxu0 }
 0x31b   : > { %v2641_v18 = vadd.f32 %v2604_v2, %v2440_v3  ;;  %2361 = vst.msk [vmem:[#allocation3 + $0xf8] sm:$0xff] %vm363_vm0, %v2329_v55 }
 0x31c   : > { %v2752_v29 = vld [vmem:[#allocation3 + $0xe0] sm:$0xff]  ;;  %v2917_v0 = vpop.f32.mrf.mxu3 }
 0x31d   : > { %v2953_v6 = vadd.f32 %v2915_v11, %v2752_v29  ;;  %2673 = vst.msk [vmem:[#allocation3 + $0xe8] sm:$0xff] %vm363_vm0, %v2641_v18 }
 0x31e   : > { %v3064_v19 = vld [vmem:[#allocation3 + $0xd8] sm:$0xff] }
 0x31f   : > { %2985 = vst.msk [vmem:[#allocation3 + $0xe0] sm:$0xff] %vm363_vm0, %v2953_v6  ;;  %v3265_v21 = vadd.f32 %v3225_v8, %v3064_v19 }
 0x320   : > { %v3328_v24 = vld [vmem:[#allocation3 + $0xd0] sm:$0xff] }
 0x321   : > { %3360 = vst.msk [vmem:[%s4717_s6 + $0xd0] sm:$0xff] %vm363_vm0, %v3328_v24 }
 0x322   : > { %3297 = vst.msk [vmem:[#allocation3 + $0xd8] sm:$0xff] %vm363_vm0, %v3265_v21  ;;  %v2607_v26 = vpop.f32.mrf.mxu2  ;;  %v2442_v31 = vld [vmem:[#allocation3 + $0xf8] sm:$0xff]  ;;  %v3235_v51 = vpop.f32.mrf.mxu0 }
 0x323   : > { %v2642_v27 = vadd.f32 %v2607_v26, %v2441_v25 }
 0x324   : > { %v2753_v28 = vld [vmem:[#allocation3 + $0xe8] sm:$0xff]  ;;  %v2920_v38 = vpop.f32.mrf.mxu3 }
 0x325   : > { %v2954_v32 = vadd.f32 %v2917_v0, %v2753_v28  ;;  %2674 = vst.msk [vmem:[#allocation3 + $0xf0] sm:$0xff] %vm363_vm0, %v2642_v27 }
 0x326   : > { %v3065_v23 = vld [vmem:[#allocation3 + $0xe0] sm:$0xff] }
 0x327   : > { %2986 = vst.msk [vmem:[#allocation3 + $0xe8] sm:$0xff] %vm363_vm0, %v2954_v32  ;;  %v3266_v9 = vadd.f32 %v3228_v22, %v3065_v23 }
 0x329   : > { %v3329_v20 = vld [vmem:[#allocation3 + $0xd8] sm:$0xff]  ;;  %3298 = vst.msk [vmem:[#allocation3 + $0xe0] sm:$0xff] %vm363_vm0, %v3266_v9 }
 0x32a   : > { %3361 = vst.msk [vmem:[%s4717_s6 + $0xd8] sm:$0xff] %vm363_vm0, %v3329_v20  ;;  %v2609_v39 = vpop.f32.mrf.mxu2 }
 0x32b   : > { %v2643_v56 = vadd.f32 %v2609_v39, %v2442_v31 }
 0x32c   : > { %v2754_v30 = vld [vmem:[#allocation3 + $0xf0] sm:$0xff]  ;;  %v2922_v34 = vpop.f32.mrf.mxu3 }
 0x32d   : > { %v2955_v42 = vadd.f32 %v2920_v38, %v2754_v30  ;;  %2675 = vst.msk [vmem:[#allocation3 + $0xf8] sm:$0xff] %vm363_vm0, %v2643_v56 }
 0x32e   : > { %v3066_v35 = vld [vmem:[#allocation3 + $0xe8] sm:$0xff] }
 0x32f   : > { %2987 = vst.msk [vmem:[#allocation3 + $0xf0] sm:$0xff] %vm363_vm0, %v2955_v42  ;;  %v3267_v43 = vadd.f32 %v3230_v15, %v3066_v35 }
 0x330   : > { %v3330_v44 = vld [vmem:[#allocation3 + $0xe0] sm:$0xff] }
 0x331   : > { %3362 = vst.msk [vmem:[%s4717_s6 + $0xe0] sm:$0xff] %vm363_vm0, %v3330_v44 }
 0x332   : > { %3299 = vst.msk [vmem:[#allocation3 + $0xe8] sm:$0xff] %vm363_vm0, %v3267_v43 }
 0x334   : > { %v2755_v45 = vld [vmem:[#allocation3 + $0xf8] sm:$0xff] }
 0x335   : > { %v2956_v41 = vadd.f32 %v2922_v34, %v2755_v45 }
 0x336   : > { %v3067_v47 = vld [vmem:[#allocation3 + $0xf0] sm:$0xff] }
 0x337   : > { %2988 = vst.msk [vmem:[#allocation3 + $0xf8] sm:$0xff] %vm363_vm0, %v2956_v41  ;;  %v3268_v33 = vadd.f32 %v3233_v48, %v3067_v47 }
 0x339   : > { %v3331_v49 = vld [vmem:[#allocation3 + $0xe8] sm:$0xff]  ;;  %3300 = vst.msk [vmem:[#allocation3 + $0xf0] sm:$0xff] %vm363_vm0, %v3268_v33 }
 0x33a   : > { %3363 = vst.msk [vmem:[%s4717_s6 + $0xe8] sm:$0xff] %vm363_vm0, %v3331_v49 }
 0x33e   : > { %v3068_v37 = vld [vmem:[#allocation3 + $0xf8] sm:$0xff] }
 0x33f   : > { %v3269_v36 = vadd.f32 %v3235_v51, %v3068_v37 }
 0x340   : > { %v3332_v40 = vld [vmem:[#allocation3 + $0xf0] sm:$0xff] }
 0x341   : > { %3364 = vst.msk [vmem:[%s4717_s6 + $0xf0] sm:$0xff] %vm363_vm0, %v3332_v40 }
 0x342   : > { %3301 = vst.msk [vmem:[#allocation3 + $0xf8] sm:$0xff] %vm363_vm0, %v3269_v36 }
 0x349   : > { %v3333_v54 = vld [vmem:[#allocation3 + $0xf8] sm:$0xff] }
 0x34a   : > { %3365 = vst.msk [vmem:[%s4717_s6 + $0xf8] sm:$0xff] %vm363_vm0, %v3333_v54 }
 0x34b PF: > { %s14_s15 = sadd.s32 1, %s3807_s15  }
 0x34c   : > { %p11_p4 = scmp.ge.s32.totalorder %s14_s15, 4  }
 0x34e   :  { %13 = sbr.rel (!%p11_p4) target bundleno = 1 (0x1), region = 74 }

// kernel: _lambda_.23
= control target key start
LH: loop header
LB: loop body
LE: loop exit
PB: predicated region body
PF: predicated region fallthrough
CT: control target
= control target key end

     0   :  { %s1663_s15 = smov 0   ;;  %s2067_s0 = inlined_call_operand.vmem [shape: f32[2,8,8,64], index: 0, kind: input, shape index: {}]   ;;  %s2068_s1 = inlined_call_operand.vmem [shape: f32[2,1,64], index: 1, kind: input, shape index: {}]   ;;  %s2069_s2 = inlined_call_operand.vmem [shape: f32[2,1,64], index: 2, kind: input, shape index: {}]   ;;  %s2070_s3 = inlined_call_operand.vmem [shape: bf16[576,64], index: 3, kind: input, shape index: {}]   ;;  %s2071_s4 = inlined_call_operand.vmem [shape: f32[2,8,8,64], index: 4, kind: output, shape index: {}]  }
   0x1 LB: > { %s1377_s16 = sadd.s32 4294967295, %s1635_s15   ;;  %p1381_p0 = scmp.ge.s32.totalorder %s1635_s15, 1  ;;  %s1635_s15 = sphi %s1663_s15, %s14_s15  }
   0x2   : > { %p178_p1 = scmp.lt.s32.totalorder %s1635_s15, 3 }
   0x4   : > { %p179_p2 = pnand %p1381_p0, %p178_p1 }
   0x5   : > { %p210_p3 = scmp.lt.s32.totalorder (!%p179_p2), %s1377_s16, 1 }
   0x6   : > { %182 = sbr.rel (%p179_p2) target bundleno = 353 (0x161), region = 36 }
   0xb   : > { %v1573_v0 = vld [vmem:[%s2070_s3 + $0x18] sm:$0xff]  ;;  %vm267_vm0 = vcmask 523264   ;;  %vm269_vm1 = vcmask 517120   ;;  %v1637_v1 = vmov 0.0   ;;  %v1572_v2 = vld [vmem:[%s2070_s3 + $0x10] sm:$0xff]  ;;  %s2073_s16 = smov (!%p210_p3, %s1377_s16), 1 }
   0xc   : > { %273 = vst.msk [vmem:[#allocation2 + $0x20] sm:$0xff] %vm267_vm0, %v1637_v1  ;;  %1606 = vmatpush.bf16.msra.mxu1 %v1573_v0  ;;  %1607 = vmatpush.bf16.msra.mxu2 %v1573_v0  ;;  %s1568_s21 = sshll.u32 %s2073_s16, 6  ;;  %s217_s24 = scalar_lea.vmem %s2068_s1, %s2073_s16  ;;  %v1571_v3 = vld [vmem:[%s2070_s3 + $0x8] sm:$0xff]  ;;  %v1570_v12 = vld [vmem:[%s2070_s3] sm:$0xff]  ;;  %v1577_v15 = vld [vmem:[%s2070_s3 + $0x38] sm:$0xff] }
   0xd   : > { %274 = vst.msk [vmem:[#allocation2 + $0x28] sm:$0x3] %vm269_vm1, %v1637_v1  ;;  %374 = vmatpush.bf16.msra.mxu0 %v1573_v0  ;;  %1608 = vmatpush.bf16.msra.mxu3 %v1573_v0  ;;  %s1700_s29 = scalar_lea.vmem %s2067_s0, %s1568_s21  ;;  %s220_s6 = scalar_lea.vmem %s2069_s2, %s2073_s16  ;;  %v1706_v4 = vld [vmem:[%s217_s24] ss:$0 sm:$0xff]  ;;  %v1581_v16 = vld [vmem:[%s2070_s3 + $0x58] sm:$0xff]  ;;  %v1576_v18 = vld [vmem:[%s2070_s3 + $0x30] sm:$0xff] }
   0xe   : > { %275 = vst.msk [vmem:[#allocation2 + $0x30] sm:$0xff] %vm267_vm0, %v1637_v1  ;;  %v228_v5 = vld [vmem:[%s1700_s29 + $0x8] sm:$0xff]  ;;  %v229_v6 = vld [vmem:[%s1700_s29 + $0x10] sm:$0xff]  ;;  %v1716_v9 = vld [vmem:[%s220_s6] ss:$0 sm:$0xff]  ;;  %s2027_s8 = scalar_lea.vmem %s2071_s4, %s1568_s21 }
   0xf   : > { %276 = vst.msk [vmem:[#allocation2 + $0x38] sm:$0x3] %vm269_vm1, %v1637_v1  ;;  %v241_v7 = vmul.f32 %v1706_v4, %v228_v5  ;;  %v242_v8 = vmul.f32 %v1706_v4, %v229_v6  ;;  %v1585_v17 = vld [vmem:[%s2070_s3 + $0x78] sm:$0xff]  ;;  %v1580_v19 = vld [vmem:[%s2070_s3 + $0x50] sm:$0xff]  ;;  %v231_v21 = vld [vmem:[%s1700_s29 + $0x20] sm:$0xff] }
  0x10   : > { %268 = vst.msk [vmem:[#allocation2] sm:$0xff] %vm267_vm0, %v1637_v1  ;;  %1609 = vmatpush.bf16.msra.mxu1 %v1572_v2  ;;  %1610 = vmatpush.bf16.msra.mxu2 %v1572_v2  ;;  %v230_v20 = vld [vmem:[%s1700_s29 + $0x18] sm:$0xff]  ;;  %v1584_v22 = vld [vmem:[%s2070_s3 + $0x70] sm:$0xff]  ;;  %v227_v23 = vld [vmem:[%s1700_s29] sm:$0xff]  ;;  %v244_v29 = vmul.f32 %v1706_v4, %v231_v21 }
  0x11   : > { %270 = vst.msk [vmem:[#allocation2 + $0x8] sm:$0x3] %vm269_vm1, %v1637_v1  ;;  %375 = vmatpush.bf16.msra.mxu0 %v1572_v2  ;;  %1611 = vmatpush.bf16.msra.mxu3 %v1572_v2  ;;  %v252_v10 = vadd.f32 %v1716_v9, %v241_v7  ;;  %v253_v11 = vadd.f32 %v1716_v9, %v242_v8  ;;  %v232_v25 = vld [vmem:[%s1700_s29 + $0x28] sm:$0xff]  ;;  %v233_v30 = vld [vmem:[%s1700_s29 + $0x30] sm:$0xff]  ;;  %v1574_v38 = vld [vmem:[%s2070_s3 + $0x20] sm:$0xff] }
  0x12   : > { %271 = vst.msk [vmem:[#allocation2 + $0x10] sm:$0xff] %vm267_vm0, %v1637_v1  ;;  %v243_v24 = vmul.f32 %v1706_v4, %v230_v20  ;;  %v1575_v26 = vld [vmem:[%s2070_s3 + $0x28] sm:$0xff]  ;;  %v240_v32 = vmul.f32 %v1706_v4, %v227_v23  ;;  %v245_v35 = vmul.f32 %v1706_v4, %v232_v25  ;;  %v246_v37 = vmul.f32 %v1706_v4, %v233_v30  ;;  %v1578_v39 = vld [vmem:[%s2070_s3 + $0x40] sm:$0xff]  ;;  %v1593_v43 = vld [vmem:[%s2070_s3 + $0xb8] sm:$0xff] }
  0x13   : > { %272 = vst.msk [vmem:[#allocation2 + $0x18] sm:$0x3] %vm269_vm1, %v1637_v1  ;;  %v260_v13 = vmax.f32 %v252_v10, 0.0  ;;  %v261_v14 = vmax.f32 %v253_v11, 0.0  ;;  %v1579_v27 = vld [vmem:[%s2070_s3 + $0x48] sm:$0xff]  ;;  %v255_v40 = vadd.f32 %v1716_v9, %v244_v29  ;;  %v1582_v44 = vld [vmem:[%s2070_s3 + $0x60] sm:$0xff] }
  0x14   : > { %277 = vst.msk [vmem:[#allocation2 + $0x40] sm:$0xff] %vm267_vm0, %v1637_v1  ;;  %1612 = vmatpush.bf16.msra.mxu1 %v1571_v3  ;;  %1613 = vmatpush.bf16.msra.mxu2 %v1571_v3  ;;  %v1583_v33 = vld [vmem:[%s2070_s3 + $0x68] sm:$0xff]  ;;  %v254_v36 = vadd.f32 %v1716_v9, %v243_v24  ;;  %v251_v41 = vadd.f32 %v1716_v9, %v240_v32  ;;  %v1589_v49 = vld [vmem:[%s2070_s3 + $0x98] sm:$0xff]  ;;  %v1588_v52 = vld [vmem:[%s2070_s3 + $0x90] sm:$0xff] }
  0x15   : > { %278 = vst.msk [vmem:[#allocation2 + $0x48] sm:$0x3] %vm269_vm1, %v1637_v1  ;;  %376 = vmatpush.bf16.msra.mxu0 %v1571_v3  ;;  %1614 = vmatpush.bf16.msra.mxu3 %v1571_v3  ;;  %v256_v42 = vadd.f32 %v1716_v9, %v245_v35  ;;  %v257_v46 = vadd.f32 %v1716_v9, %v246_v37  ;;  %v263_v47 = vmax.f32 %v255_v40, 0.0  ;;  %v1587_v53 = vld [vmem:[%s2070_s3 + $0x88] sm:$0xff]  ;;  %v1597_v61 = vld [vmem:[%s2070_s3 + $0xd8] sm:$0xff]  ;;  %v1592_v3 = vld [vmem:[%s2070_s3 + $0xb0] sm:$0xff] }
  0x16   : > { %279 = vst.msk [vmem:[#allocation2 + $0x50] sm:$0xff] %vm267_vm0, %v1637_v1  ;;  %v262_v45 = vmax.f32 %v254_v36, 0.0  ;;  %v259_v48 = vmax.f32 %v251_v41, 0.0  ;;  %v1586_v5 = vld [vmem:[%s2070_s3 + $0x80] sm:$0xff]  ;;  %v1596_v7 = vld [vmem:[%s2070_s3 + $0xd0] sm:$0xff]  ;;  %v1605_v8 = vld [vmem:[%s2070_s3 + $0x118] sm:$0xff] }
  0x17   : > { %280 = vst.msk [vmem:[#allocation2 + $0x58] sm:$0x3] %vm269_vm1, %v1637_v1  ;;  %v264_v50 = vmax.f32 %v256_v42, 0.0  ;;  %v265_v51 = vmax.f32 %v257_v46, 0.0  ;;  %v306_v55 = vld [vmem:[#allocation2] sm:$0xff]  ;;  %v1600_v10 = vld [vmem:[%s2070_s3 + $0xf0] sm:$0xff] }
  0x18   : > { %291 = vst.msk [vmem:[#allocation2 + $0x21] sm:$0xff] %vm267_vm0, %v260_v13  ;;  %1615 = vmatpush.bf16.msra.mxu1 %v1570_v12  ;;  %1616 = vmatpush.bf16.msra.mxu2 %v1570_v12  ;;  %v415_v56 = vld [vmem:[#allocation2 + $0x1] sm:$0xff]  ;;  %v234_v23 = vld [vmem:[%s1700_s29 + $0x38] sm:$0xff] }
  0x19   : > { %292 = vst.msk [vmem:[#allocation2 + $0x31] sm:$0xff] %vm267_vm0, %v261_v14  ;;  %377 = vmatpush.bf16.msra.mxu0 %v1570_v12  ;;  %1617 = vmatpush.bf16.msra.mxu3 %v1570_v12  ;;  %v524_v11 = vld [vmem:[#allocation2 + $0x2] sm:$0xff]  ;;  %v247_v24 = vmul.f32 %v1706_v4, %v234_v23 }
  0x1a   : > { %281 = vst.msk [vmem:[#allocation2 + $0x60] sm:$0xff] %vm267_vm0, %v1637_v1  ;;  %v1595_v20 = vld [vmem:[%s2070_s3 + $0xc8] sm:$0xff]  ;;  %v1590_v4 = vld [vmem:[%s2070_s3 + $0xa0] sm:$0xff] }
  0x1b   : > { %282 = vst.msk [vmem:[#allocation2 + $0x68] sm:$0x3] %vm269_vm1, %v1637_v1  ;;  %v1599_v21 = vld [vmem:[%s2070_s3 + $0xe8] sm:$0xff]  ;;  %v258_v25 = vadd.f32 %v1716_v9, %v247_v24  ;;  %v1594_v9 = vld [vmem:[%s2070_s3 + $0xc0] sm:$0xff] }
  0x1c   : > { %483 = vmatpush.bf16.msrb.mxu1 %v1577_v15  ;;  %592 = vmatpush.bf16.msrb.mxu2 %v1581_v16  ;;  %283 = vst.msk [vmem:[#allocation2 + $0x70] sm:$0xff] %vm267_vm0, %v1637_v1  ;;  %v1603_v37 = vld [vmem:[%s2070_s3 + $0x108] sm:$0xff]  ;;  %v1602_v46 = vld [vmem:[%s2070_s3 + $0x100] sm:$0xff] }
  0x1d   : > { %701 = vmatpush.bf16.msrb.mxu3 %v1585_v17  ;;  %284 = vst.msk [vmem:[#allocation2 + $0x78] sm:$0x3] %vm269_vm1, %v1637_v1  ;;  %810 = vmatpush.bf16.msrb.mxu0 %v1589_v49  ;;  %v266_v30 = vmax.f32 %v258_v25, 0.0 }
  0x1e   : > { %285 = vst.msk [vmem:[#allocation2 + $0x80] sm:$0xff] %vm267_vm0, %v1637_v1 }
  0x1f   : > { %v1776_v28 = vld [vmem:[#allocation2 + $0x20] sm:$0xff]  ;;  %286 = vst.msk [vmem:[#allocation2 + $0x88] sm:$0x3] %vm269_vm1, %v1637_v1 }
  0x20   : > { %484 = vmatpush.bf16.msrb.mxu1 %v1576_v18  ;;  %593 = vmatpush.bf16.msrb.mxu2 %v1580_v19  ;;  %v1782_v31 = vld [vmem:[#allocation2 + $0x30] sm:$0xff]  ;;  %287 = vst.msk [vmem:[#allocation2 + $0x90] sm:$0xff] %vm267_vm0, %v1637_v1  ;;  %v417_v13 = vld [vmem:[#allocation2 + $0x21] sm:$0xff] }
  0x21   : > { %702 = vmatpush.bf16.msrb.mxu3 %v1584_v22  ;;  %v1792_v34 = vpack.c.bf16 %v1782_v31, %v1776_v28  ;;  %288 = vst.msk [vmem:[#allocation2 + $0x98] sm:$0x3] %vm269_vm1, %v1637_v1  ;;  %811 = vmatpush.bf16.msrb.mxu0 %v1588_v52  ;;  %v418_v14 = vld [vmem:[#allocation2 + $0x31] sm:$0xff]  ;;  %v1591_v19 = vld [vmem:[%s2070_s3 + $0xa8] sm:$0xff] }
  0x22   : > { %298 = vst.msk [vmem:[#allocation3] sm:$0xff] %vm267_vm0, %v1637_v1  ;;  %v1893_v16 = vpack.c.bf16 %v418_v14, %v417_v13  ;;  %v1604_v22 = vld [vmem:[%s2070_s3 + $0x110] sm:$0xff] }
  0x23   : > { %1403 = vmatmul.msk.bf16.vlgmr.msra.gmra.mxu1 %vm267_vm0, %v1792_v34  ;;  %299 = vst.msk [vmem:[#allocation3 + $0x8] sm:$0xff] %vm267_vm0, %v1637_v1 }
  0x24   : > { %485 = vmatpush.bf16.msrb.mxu1 %v1575_v26  ;;  %594 = vmatpush.bf16.msrb.mxu2 %v1579_v27  ;;  %300 = vst.msk [vmem:[#allocation3 + $0x10] sm:$0xff] %vm267_vm0, %v1637_v1  ;;  %v526_v26 = vld [vmem:[#allocation2 + $0x22] sm:$0xff]  ;;  %v527_v27 = vld [vmem:[#allocation2 + $0x32] sm:$0xff] }
  0x25   : > { %703 = vmatpush.bf16.msrb.mxu3 %v1583_v33  ;;  %301 = vst.msk [vmem:[#allocation3 + $0x18] sm:$0xff] %vm267_vm0, %v1637_v1  ;;  %812 = vmatpush.bf16.msrb.mxu0 %v1587_v53  ;;  %v533_v32 = vpack.c.bf16 %v527_v27, %v526_v26 }
  0x26   : > { %302 = vst.msk [vmem:[#allocation3 + $0x20] sm:$0xff] %vm267_vm0, %v1637_v1 }
  0x27   : > { %303 = vst.msk [vmem:[#allocation3 + $0x28] sm:$0xff] %vm267_vm0, %v1637_v1 }
  0x28   : > { %486 = vmatpush.bf16.msrb.mxu1 %v1574_v38  ;;  %595 = vmatpush.bf16.msrb.mxu2 %v1578_v39  ;;  %304 = vst.msk [vmem:[#allocation3 + $0x30] sm:$0xff] %vm267_vm0, %v1637_v1 }
  0x29   : > { %704 = vmatpush.bf16.msrb.mxu3 %v1582_v44  ;;  %305 = vst.msk [vmem:[#allocation3 + $0x38] sm:$0xff] %vm267_vm0, %v1637_v1  ;;  %v1601_v1 = vld [vmem:[%s2070_s3 + $0xf8] sm:$0xff]  ;;  %813 = vmatpush.bf16.msrb.mxu0 %v1586_v5 }
  0x2a   : > { %293 = vst.msk [vmem:[#allocation2 + $0x41] sm:$0xff] %vm267_vm0, %v262_v45  ;;  %v1077_v5 = vld [vmem:[#allocation2 + $0x91] sm:$0xff] }
  0x2b   : > { %294 = vst.msk [vmem:[#allocation2 + $0x51] sm:$0xff] %vm267_vm0, %v263_v47 }
  0x2c   : > { %919 = vmatpush.bf16.msra.mxu1 %v1593_v43  ;;  %290 = vst.msk [vmem:[#allocation2 + $0x11] sm:$0xff] %vm267_vm0, %v259_v48 }
  0x2d   : > { %295 = vst.msk [vmem:[#allocation2 + $0x61] sm:$0xff] %vm267_vm0, %v264_v50 }
  0x2e   : > { %296 = vst.msk [vmem:[#allocation2 + $0x71] sm:$0xff] %vm267_vm0, %v265_v51  ;;  %v323_v23 = vld [vmem:[#allocation3 + $0x28] sm:$0xff] }
  0x2f   : > { %297 = vst.msk [vmem:[#allocation2 + $0x81] sm:$0xff] %vm267_vm0, %v266_v30 }
  0x30   : > { %920 = vmatpush.bf16.msra.mxu1 %v1592_v3  ;;  %v318_v3 = vld [vmem:[#allocation3] sm:$0xff] }
  0x31   : > { %v1847_v54 = vld [vmem:[#allocation2 + $0x40] sm:$0xff] }
  0x32   : > { %v1849_v57 = vld [vmem:[#allocation2 + $0x50] sm:$0xff]  ;;  %v642_v36 = vpack.c.bf16 %v1847_v54, %v1782_v31  ;;  %v1598_v31 = vld [vmem:[%s2070_s3 + $0xe0] sm:$0xff] }
  0x33   : > { %v1853_v58 = vpack.c.bf16 %v1849_v57, %v1847_v54  ;;  %v307_v59 = vld [vmem:[#allocation2 + $0x10] sm:$0xff]  ;;  %v528_v38 = vld [vmem:[#allocation2 + $0x42] sm:$0xff] }
  0x34   : > { %v416_v60 = vld [vmem:[#allocation2 + $0x11] sm:$0xff]  ;;  %v314_v62 = vpack.c.bf16 %v307_v59, %v306_v55  ;;  %v1858_v63 = vld [vmem:[#allocation2 + $0x60] sm:$0xff]  ;;  %v641_v18 = vpack.c.bf16 %v1776_v28, %v307_v59  ;;  %921 = vmatpush.bf16.msra.mxu1 %v1591_v19  ;;  %v860_v55 = vpack.c.bf16 %v528_v38, %v527_v27 }
  0x35   : > { %v423_v0 = vpack.c.bf16 %v416_v60, %v415_v56  ;;  %1404 = vmatmul.msk.bf16.vlgmr.msra.gmra.mxu2 %vm267_vm0, %v1853_v58  ;;  %v1865_v2 = vld [vmem:[#allocation2 + $0x70] sm:$0xff]  ;;  %v750_v17 = vpack.c.bf16 %v417_v13, %v416_v60  ;;  %v419_v28 = vld [vmem:[#allocation2 + $0x41] sm:$0xff]  ;;  %v643_v45 = vpack.c.bf16 %v1858_v63, %v1849_v57  ;;  %v325_v27 = vld [vmem:[#allocation3 + $0x38] sm:$0xff] }
  0x36   : > { %1402 = vmatmul.msk.bf16.vlgmr.msra.gmra.mxu0 %vm267_vm0, %v314_v62  ;;  %v1876_v6 = vpack.c.bf16 %v1865_v2, %v1858_v63  ;;  %1029 = vmatpush.bf16.msra.mxu2 %v1597_v61  ;;  %v1890_v12 = vld [vmem:[#allocation2 + $0x12] sm:$0xff]  ;;  %v751_v35 = vpack.c.bf16 %v419_v28, %v418_v14  ;;  %v421_v40 = vld [vmem:[#allocation2 + $0x61] sm:$0xff] }
  0x37   : > { %1422 = vmatmul.msk.bf16.vlgmr.msrb.gmra.mxu1 %vm267_vm0, %v423_v0  ;;  %1247 = vmatpush.bf16.msra.mxu0 %v1605_v8  ;;  %v532_v15 = vpack.c.bf16 %v1890_v12, %v524_v11  ;;  %v420_v29 = vld [vmem:[#allocation2 + $0x51] sm:$0xff]  ;;  %v530_v47 = vld [vmem:[#allocation2 + $0x62] sm:$0xff]  ;;  %v859_v52 = vpack.c.bf16 %v526_v26, %v1890_v12 }
  0x38   : > { %1405 = vmatmul.msk.bf16.vlgmr.msra.gmra.mxu3 %vm267_vm0, %v1876_v6  ;;  %v425_v33 = vpack.c.bf16 %v420_v29, %v419_v28  ;;  %922 = vmatpush.bf16.msra.mxu1 %v1590_v4  ;;  %v529_v39 = vld [vmem:[#allocation2 + $0x52] sm:$0xff]  ;;  %v752_v44 = vpack.c.bf16 %v421_v40, %v420_v29  ;;  %v749_v49 = vld [vmem:[#allocation2 + $0x81] sm:$0xff] }
  0x39   : > { %1138 = vmatpush.bf16.msra.mxu3 %v1601_v1  ;;  %v422_v41 = vld [vmem:[#allocation2 + $0x71] sm:$0xff]  ;;  %v534_v42 = vpack.c.bf16 %v529_v39, %v528_v38  ;;  %v640_v51 = vld [vmem:[#allocation2 + $0x80] sm:$0xff]  ;;  %v861_v56 = vpack.c.bf16 %v530_v47, %v529_v39  ;;  %v1081_v11 = vpack.c.bf16 %v1077_v5, %v749_v49 }
  0x3a   : > { %1030 = vmatpush.bf16.msra.mxu2 %v1596_v7  ;;  %v426_v43 = vpack.c.bf16 %v422_v41, %v421_v40  ;;  %v531_v48 = vld [vmem:[#allocation2 + $0x72] sm:$0xff]  ;;  %v753_v53 = vpack.c.bf16 %v749_v49, %v422_v41  ;;  %v644_v54 = vpack.c.bf16 %v640_v51, %v1865_v2  ;;  %v858_v59 = vld [vmem:[#allocation2 + $0x82] sm:$0xff] }
  0x3b   : > { %1248 = vmatpush.bf16.msra.mxu0 %v1604_v22  ;;  %v535_v50 = vpack.c.bf16 %v531_v48, %v530_v47  ;;  %v320_v57 = vld [vmem:[#allocation3 + $0x10] sm:$0xff]  ;;  %v862_v61 = vpack.c.bf16 %v858_v59, %v531_v48  ;;  %v321_v62 = vld [vmem:[#allocation3 + $0x18] sm:$0xff]  ;;  %v322_v12 = vld [vmem:[#allocation3 + $0x20] sm:$0xff] }
  0x3c   : > { %v968_v0 = vld [vmem:[#allocation2 + $0x90] sm:$0xff] }
  0x3d   : > { %1139 = vmatpush.bf16.msra.mxu3 %v1600_v10  ;;  %v1186_v1 = vld [vmem:[#allocation2 + $0x92] sm:$0xff]  ;;  %v972_v2 = vpack.c.bf16 %v968_v0, %v640_v51 }
  0x3e   : > { %1031 = vmatpush.bf16.msra.mxu2 %v1595_v20  ;;  %v1190_v7 = vpack.c.bf16 %v1186_v1, %v858_v59 }
  0x3f   : > { %1249 = vmatpush.bf16.msra.mxu0 %v1603_v37 }
  0x41   : > { %1140 = vmatpush.bf16.msra.mxu3 %v1599_v21 }
  0x42   : > { %1032 = vmatpush.bf16.msra.mxu2 %v1594_v9 }
  0x43   : > { %1250 = vmatpush.bf16.msra.mxu0 %v1602_v46 }
  0x45   : > { %1442 = vmatmul.msk.bf16.vlgmr.msrb.gmra.mxu2 %vm267_vm0, %v532_v15  ;;  %1141 = vmatpush.bf16.msra.mxu3 %v1598_v31  ;;  %v324_v15 = vld [vmem:[#allocation3 + $0x30] sm:$0xff] }
  0x46   : > { %1482 = vmatmul.msk.bf16.vlgmr.msrb.gmra.mxu0 %vm267_vm0, %v750_v17 }
  0x47   : > { %1423 = vmatmul.msk.bf16.gmra.mxu1 %vm267_vm0, %v1893_v16 }
  0x48   : > { %1462 = vmatmul.msk.bf16.vlgmr.msrb.gmra.mxu3 %vm267_vm0, %v641_v18 }
  0x55   : > { %1443 = vmatmul.msk.bf16.gmra.mxu2 %vm267_vm0, %v533_v32 }
  0x56   : > { %1483 = vmatmul.msk.bf16.gmra.mxu0 %vm267_vm0, %v751_v35 }
  0x57   : > { %1424 = vmatmul.msk.bf16.gmra.mxu1 %vm267_vm0, %v425_v33 }
  0x58   : > { %1463 = vmatmul.msk.bf16.gmra.mxu3 %vm267_vm0, %v642_v36 }
  0x65   : > { %1444 = vmatmul.msk.bf16.gmra.mxu2 %vm267_vm0, %v534_v42 }
  0x66   : > { %1484 = vmatmul.msk.bf16.gmra.mxu0 %vm267_vm0, %v752_v44 }
  0x67   : > { %1425 = vmatmul.msk.bf16.gmra.mxu1 %vm267_vm0, %v426_v43 }
  0x68   : > { %1464 = vmatmul.msk.bf16.gmra.mxu3 %vm267_vm0, %v643_v45 }
  0x75   : > { %1445 = vmatmul.msk.bf16.gmra.mxu2 %vm267_vm0, %v535_v50 }
  0x76   : > { %1485 = vmatmul.msk.bf16.gmra.mxu0 %vm267_vm0, %v753_v53 }
  0x77   : > { %1502 = vmatmul.msk.bf16.vlgmr.msra.gmra.mxu1 %vm267_vm0, %v859_v52 }
  0x78   : > { %1465 = vmatmul.msk.bf16.gmra.mxu3 %vm267_vm0, %v644_v54 }
  0x85   : > { %1522 = vmatmul.msk.bf16.vlgmr.msra.gmra.mxu2 %vm267_vm0, %v1792_v34 }
  0x86   : > { %1562 = vmatmul.msk.bf16.vlgmr.msra.gmra.mxu0 %vm267_vm0, %v533_v32 }
  0x87   : > { %1503 = vmatmul.msk.bf16.gmra.mxu1 %vm267_vm0, %v860_v55 }
  0x88   : > { %1542 = vmatmul.msk.bf16.vlgmr.msra.gmra.mxu3 %vm267_vm0, %v1893_v16  ;;  %v319_v16 = vld [vmem:[#allocation3 + $0x8] sm:$0xff] }
  0x95   : > { %1523 = vmatmul.msk.bf16.gmra.mxu2 %vm267_vm0, %v1853_v58 }
  0x96   : > { %1563 = vmatmul.msk.bf16.gmra.mxu0 %vm267_vm0, %v534_v42 }
  0x97   : > { %1504 = vmatmul.msk.bf16.gmra.mxu1 %vm267_vm0, %v861_v56 }
  0x98   : > { %1543 = vmatmul.msk.bf16.gmra.mxu3 %vm267_vm0, %v425_v33 }
  0xa0   : > { %v384_v34 = vpop.f32.mrf.mxu1 }
  0xa1   : > { %v401_v60 = vadd.f32 %v384_v34, %v320_v57 }
  0xa3   : > { %409 = vst.msk [vmem:[#allocation3 + $0x10] sm:$0xff] %vm267_vm0, %v401_v60 }
  0xa5   : > { %1524 = vmatmul.msk.bf16.gmra.mxu2 %vm267_vm0, %v1876_v6 }
  0xa6   : > { %1564 = vmatmul.msk.bf16.gmra.mxu0 %vm267_vm0, %v535_v50 }
  0xa7   : > { %1505 = vmatmul.msk.bf16.gmra.mxu1 %vm267_vm0, %v862_v61 }
  0xa8   : > { %1544 = vmatmul.msk.bf16.gmra.mxu3 %vm267_vm0, %v426_v43  ;;  %v386_v58 = vpop.f32.mrf.mxu1 }
  0xa9   : > { %v402_v63 = vadd.f32 %v386_v58, %v321_v62 }
  0xaa   : > { %v429_v32 = vld [vmem:[#allocation3 + $0x10] sm:$0xff] }
  0xab   : > { %410 = vst.msk [vmem:[#allocation3 + $0x18] sm:$0xff] %vm267_vm0, %v402_v63 }
  0xb2   : > { %v430_v40 = vld [vmem:[#allocation3 + $0x18] sm:$0xff] }
  0xb3   : > { %v379_v8 = vpop.f32.mrf.mxu0 }
  0xb4   : > { %v488_v10 = vpop.f32.mrf.mxu1  ;;  %v399_v6 = vadd.f32 %v379_v8, %v318_v3 }
  0xb5   : > { %1525 = vmatmul.msk.bf16.gmra.mxu2 %vm267_vm0, %v972_v2 }
  0xb6   : > { %407 = vst.msk [vmem:[#allocation3] sm:$0xff] %vm267_vm0, %v399_v6  ;;  %1565 = vmatmul.msk.bf16.gmra.mxu0 %vm267_vm0, %v1190_v7 }
  0xb8   : > { %v389_v13 = vpop.f32.mrf.mxu2  ;;  %1545 = vmatmul.msk.bf16.gmra.mxu3 %vm267_vm0, %v1081_v11 }
  0xb9   : > { %v403_v14 = vadd.f32 %v389_v13, %v322_v12 }
  0xbb   : > { %411 = vst.msk [vmem:[#allocation3 + $0x20] sm:$0xff] %vm267_vm0, %v403_v14  ;;  %v394_v17 = vpop.f32.mrf.mxu3  ;;  %v381_v18 = vpop.f32.mrf.mxu0 }
  0xbc   : > { %v405_v19 = vadd.f32 %v394_v17, %v324_v15  ;;  %v400_v20 = vadd.f32 %v381_v18, %v319_v16  ;;  %v490_v21 = vpop.f32.mrf.mxu1 }
  0xbd   : > { %v427_v22 = vld [vmem:[#allocation3] sm:$0xff] }
  0xbe   : > { %413 = vst.msk [vmem:[#allocation3 + $0x30] sm:$0xff] %vm267_vm0, %v405_v19  ;;  %v508_v24 = vadd.f32 %v488_v10, %v427_v22 }
  0xbf   : > { %408 = vst.msk [vmem:[#allocation3 + $0x8] sm:$0xff] %vm267_vm0, %v400_v20 }
  0xc0   : > { %v391_v25 = vpop.f32.mrf.mxu2  ;;  %516 = vst.msk [vmem:[#allocation3] sm:$0xff] %vm267_vm0, %v508_v24 }
  0xc1   : > { %v404_v26 = vadd.f32 %v391_v25, %v323_v23 }
  0xc2   : > { %v431_v50 = vld [vmem:[#allocation3 + $0x20] sm:$0xff] }
  0xc3   : > { %412 = vst.msk [vmem:[#allocation3 + $0x28] sm:$0xff] %vm267_vm0, %v404_v26  ;;  %v396_v28 = vpop.f32.mrf.mxu3  ;;  %v815_v29 = vpop.f32.mrf.mxu0 }
  0xc4   : > { %v406_v30 = vadd.f32 %v396_v28, %v325_v27  ;;  %v493_v33 = vpop.f32.mrf.mxu1 }
  0xc5   : > { %v510_v35 = vadd.f32 %v493_v33, %v429_v32  ;;  %v433_v10 = vld [vmem:[#allocation3 + $0x30] sm:$0xff] }
  0xc6   : > { %414 = vst.msk [vmem:[#allocation3 + $0x38] sm:$0xff] %vm267_vm0, %v406_v30  ;;  %v428_v36 = vld [vmem:[#allocation3 + $0x8] sm:$0xff] }
  0xc7   : > { %v536_v4 = vld [vmem:[#allocation3] sm:$0xff]  ;;  %v509_v9 = vadd.f32 %v490_v21, %v428_v36  ;;  %518 = vst.msk [vmem:[#allocation3 + $0x10] sm:$0xff] %vm267_vm0, %v510_v35 }
  0xc8   : > { %v597_v31 = vpop.f32.mrf.mxu2 }
  0xc9   : > { %v617_v37 = vadd.f32 %v597_v31, %v536_v4  ;;  %517 = vst.msk [vmem:[#allocation3 + $0x8] sm:$0xff] %vm267_vm0, %v509_v9 }
  0xca   : > { %v432_v61 = vld [vmem:[#allocation3 + $0x28] sm:$0xff] }
  0xcb   : > { %625 = vst.msk [vmem:[#allocation3] sm:$0xff] %vm267_vm0, %v617_v37  ;;  %v706_v38 = vpop.f32.mrf.mxu3  ;;  %v817_v39 = vpop.f32.mrf.mxu0 }
  0xcc   : > { %v495_v41 = vpop.f32.mrf.mxu1 }
  0xcd   : > { %v511_v42 = vadd.f32 %v495_v41, %v430_v40  ;;  %v434_v21 = vld [vmem:[#allocation3 + $0x38] sm:$0xff] }
  0xce   : > { %v538_v53 = vld [vmem:[#allocation3 + $0x10] sm:$0xff] }
  0xcf   : > { %519 = vst.msk [vmem:[#allocation3 + $0x18] sm:$0xff] %vm267_vm0, %v511_v42 }
  0xd0   : > { %v537_v43 = vld [vmem:[#allocation3 + $0x8] sm:$0xff]  ;;  %v599_v44 = vpop.f32.mrf.mxu2 }
  0xd1   : > { %v618_v45 = vadd.f32 %v599_v44, %v537_v43 }
  0xd2   : > { %v645_v46 = vld [vmem:[#allocation3] sm:$0xff] }
  0xd3   : > { %v726_v47 = vadd.f32 %v706_v38, %v645_v46  ;;  %626 = vst.msk [vmem:[#allocation3 + $0x8] sm:$0xff] %vm267_vm0, %v618_v45  ;;  %v708_v48 = vpop.f32.mrf.mxu3  ;;  %v820_v49 = vpop.f32.mrf.mxu0 }
  0xd4   : > { %v498_v51 = vpop.f32.mrf.mxu1 }
  0xd5   : > { %734 = vst.msk [vmem:[#allocation3] sm:$0xff] %vm267_vm0, %v726_v47  ;;  %v512_v52 = vadd.f32 %v498_v51, %v431_v50 }
  0xd6   : > { %v539_v0 = vld [vmem:[#allocation3 + $0x18] sm:$0xff] }
  0xd7   : > { %520 = vst.msk [vmem:[#allocation3 + $0x20] sm:$0xff] %vm267_vm0, %v512_v52 }
  0xd8   : > { %v602_v54 = vpop.f32.mrf.mxu2 }
  0xd9   : > { %v619_v55 = vadd.f32 %v602_v54, %v538_v53 }
  0xda   : > { %v646_v56 = vld [vmem:[#allocation3 + $0x8] sm:$0xff] }
  0xdb   : > { %v727_v57 = vadd.f32 %v708_v48, %v646_v56  ;;  %627 = vst.msk [vmem:[#allocation3 + $0x10] sm:$0xff] %vm267_vm0, %v619_v55  ;;  %v711_v59 = vpop.f32.mrf.mxu3  ;;  %v822_v34 = vpop.f32.mrf.mxu0 }
  0xdc   : > { %v754_v60 = vld [vmem:[#allocation3] sm:$0xff]  ;;  %v500_v62 = vpop.f32.mrf.mxu1 }
  0xdd   : > { %735 = vst.msk [vmem:[#allocation3 + $0x8] sm:$0xff] %vm267_vm0, %v727_v57  ;;  %v835_v58 = vadd.f32 %v815_v29, %v754_v60  ;;  %v513_v63 = vadd.f32 %v500_v62, %v432_v61 }
  0xde   : > { %v540_v14 = vld [vmem:[#allocation3 + $0x20] sm:$0xff] }
  0xdf   : > { %843 = vst.msk [vmem:[#allocation3] sm:$0xff] %vm267_vm0, %v835_v58 }
  0xe0   : > { %v604_v1 = vpop.f32.mrf.mxu2  ;;  %521 = vst.msk [vmem:[#allocation3 + $0x28] sm:$0xff] %vm267_vm0, %v513_v63 }
  0xe1   : > { %v620_v2 = vadd.f32 %v604_v1, %v539_v0 }
  0xe2   : > { %v647_v3 = vld [vmem:[#allocation3 + $0x10] sm:$0xff] }
  0xe3   : > { %v728_v5 = vadd.f32 %v711_v59, %v647_v3  ;;  %628 = vst.msk [vmem:[#allocation3 + $0x18] sm:$0xff] %vm267_vm0, %v620_v2  ;;  %v713_v7 = vpop.f32.mrf.mxu3  ;;  %v825_v13 = vpop.f32.mrf.mxu0 }
  0xe4   : > { %v755_v8 = vld [vmem:[#allocation3 + $0x8] sm:$0xff]  ;;  %v503_v6 = vpop.f32.mrf.mxu1 }
  0xe5   : > { %736 = vst.msk [vmem:[#allocation3 + $0x10] sm:$0xff] %vm267_vm0, %v728_v5  ;;  %v836_v11 = vadd.f32 %v817_v39, %v755_v8  ;;  %v514_v12 = vadd.f32 %v503_v6, %v433_v10 }
  0xe6   : > { %v863_v35 = vld [vmem:[#allocation3] sm:$0xff] }
  0xe7   : > { %844 = vst.msk [vmem:[#allocation3 + $0x8] sm:$0xff] %vm267_vm0, %v836_v11  ;;  %v541_v25 = vld [vmem:[#allocation3 + $0x28] sm:$0xff] }
  0xe8   : > { %v607_v15 = vpop.f32.mrf.mxu2  ;;  %522 = vst.msk [vmem:[#allocation3 + $0x30] sm:$0xff] %vm267_vm0, %v514_v12 }
  0xe9   : > { %v621_v16 = vadd.f32 %v607_v15, %v540_v14 }
  0xea   : > { %v648_v17 = vld [vmem:[#allocation3 + $0x18] sm:$0xff] }
  0xeb   : > { %v729_v18 = vadd.f32 %v713_v7, %v648_v17  ;;  %629 = vst.msk [vmem:[#allocation3 + $0x20] sm:$0xff] %vm267_vm0, %v621_v16  ;;  %v716_v19 = vpop.f32.mrf.mxu3  ;;  %v827_v26 = vpop.f32.mrf.mxu0 }
  0xec   : > { %v756_v20 = vld [vmem:[#allocation3 + $0x10] sm:$0xff]  ;;  %v505_v22 = vpop.f32.mrf.mxu1 }
  0xed   : > { %737 = vst.msk [vmem:[#allocation3 + $0x18] sm:$0xff] %vm267_vm0, %v729_v18  ;;  %v837_v23 = vadd.f32 %v820_v49, %v756_v20  ;;  %v515_v24 = vadd.f32 %v505_v22, %v434_v21 }
  0xee   : > { %v864_v44 = vld [vmem:[#allocation3 + $0x8] sm:$0xff] }
  0xef   : > { %845 = vst.msk [vmem:[#allocation3 + $0x10] sm:$0xff] %vm267_vm0, %v837_v23  ;;  %v542_v31 = vld [vmem:[#allocation3 + $0x30] sm:$0xff] }
  0xf0   : > { %v609_v27 = vpop.f32.mrf.mxu2  ;;  %523 = vst.msk [vmem:[#allocation3 + $0x38] sm:$0xff] %vm267_vm0, %v515_v24 }
  0xf1   : > { %v622_v28 = vadd.f32 %v609_v27, %v541_v25 }
  0xf2   : > { %v649_v29 = vld [vmem:[#allocation3 + $0x20] sm:$0xff] }
  0xf3   : > { %v730_v30 = vadd.f32 %v716_v19, %v649_v29  ;;  %630 = vst.msk [vmem:[#allocation3 + $0x28] sm:$0xff] %vm267_vm0, %v622_v28  ;;  %v718_v32 = vpop.f32.mrf.mxu3  ;;  %v830_v39 = vpop.f32.mrf.mxu0 }
  0xf4   : > { %v757_v33 = vld [vmem:[#allocation3 + $0x18] sm:$0xff]  ;;  %v924_v36 = vpop.f32.mrf.mxu1 }
  0xf5   : > { %738 = vst.msk [vmem:[#allocation3 + $0x20] sm:$0xff] %vm267_vm0, %v730_v30  ;;  %v838_v4 = vadd.f32 %v822_v34, %v757_v33  ;;  %v944_v9 = vadd.f32 %v924_v36, %v863_v35 }
  0xf6   : > { %v865_v56 = vld [vmem:[#allocation3 + $0x10] sm:$0xff] }
  0xf7   : > { %846 = vst.msk [vmem:[#allocation3 + $0x18] sm:$0xff] %vm267_vm0, %v838_v4  ;;  %v543_v48 = vld [vmem:[#allocation3 + $0x38] sm:$0xff] }
  0xf8   : > { %v612_v37 = vpop.f32.mrf.mxu2  ;;  %952 = vst.msk [vmem:[#allocation3] sm:$0xff] %vm267_vm0, %v944_v9 }
  0xf9   : > { %v623_v38 = vadd.f32 %v612_v37, %v542_v31 }
  0xfa   : > { %v650_v40 = vld [vmem:[#allocation3 + $0x28] sm:$0xff] }
  0xfb   : > { %v731_v41 = vadd.f32 %v718_v32, %v650_v40  ;;  %631 = vst.msk [vmem:[#allocation3 + $0x30] sm:$0xff] %vm267_vm0, %v623_v38  ;;  %v721_v42 = vpop.f32.mrf.mxu3  ;;  %v832_v54 = vpop.f32.mrf.mxu0 }
  0xfc   : > { %v758_v43 = vld [vmem:[#allocation3 + $0x20] sm:$0xff]  ;;  %v926_v45 = vpop.f32.mrf.mxu1 }
  0xfd   : > { %739 = vst.msk [vmem:[#allocation3 + $0x28] sm:$0xff] %vm267_vm0, %v731_v41  ;;  %v839_v46 = vadd.f32 %v825_v13, %v758_v43  ;;  %v945_v47 = vadd.f32 %v926_v45, %v864_v44 }
  0xfe   : > { %v866_v2 = vld [vmem:[#allocation3 + $0x18] sm:$0xff] }
  0xff   : > { %847 = vst.msk [vmem:[#allocation3 + $0x20] sm:$0xff] %vm267_vm0, %v839_v46  ;;  %v973_v60 = vld [vmem:[#allocation3] sm:$0xff] }
 0x100   : > { %v614_v49 = vpop.f32.mrf.mxu2  ;;  %953 = vst.msk [vmem:[#allocation3 + $0x8] sm:$0xff] %vm267_vm0, %v945_v47 }
 0x101   : > { %v624_v50 = vadd.f32 %v614_v49, %v543_v48 }
 0x102   : > { %v651_v51 = vld [vmem:[#allocation3 + $0x30] sm:$0xff] }
 0x103   : > { %v732_v52 = vadd.f32 %v721_v42, %v651_v51  ;;  %632 = vst.msk [vmem:[#allocation3 + $0x38] sm:$0xff] %vm267_vm0, %v624_v50  ;;  %v723_v53 = vpop.f32.mrf.mxu3  ;;  %v1252_v7 = vpop.f32.mrf.mxu0 }
 0x104   : > { %v759_v55 = vld [vmem:[#allocation3 + $0x28] sm:$0xff]  ;;  %v929_v57 = vpop.f32.mrf.mxu1 }
 0x105   : > { %740 = vst.msk [vmem:[#allocation3 + $0x30] sm:$0xff] %vm267_vm0, %v732_v52  ;;  %v840_v59 = vadd.f32 %v827_v26, %v759_v55  ;;  %v946_v34 = vadd.f32 %v929_v57, %v865_v56 }
 0x106   : > { %v867_v16 = vld [vmem:[#allocation3 + $0x20] sm:$0xff] }
 0x107   : > { %848 = vst.msk [vmem:[#allocation3 + $0x28] sm:$0xff] %vm267_vm0, %v840_v59  ;;  %v974_v10 = vld [vmem:[#allocation3 + $0x8] sm:$0xff] }
 0x108   : > { %v1034_v61 = vpop.f32.mrf.mxu2  ;;  %954 = vst.msk [vmem:[#allocation3 + $0x10] sm:$0xff] %vm267_vm0, %v946_v34 }
 0x109   : > { %v1054_v62 = vadd.f32 %v1034_v61, %v973_v60 }
 0x10a   : > { %v652_v58 = vld [vmem:[#allocation3 + $0x38] sm:$0xff] }
 0x10b   : > { %v733_v63 = vadd.f32 %v723_v53, %v652_v58  ;;  %1062 = vst.msk [vmem:[#allocation3] sm:$0xff] %vm267_vm0, %v1054_v62  ;;  %v1143_v0 = vpop.f32.mrf.mxu3  ;;  %v1254_v21 = vpop.f32.mrf.mxu0 }
 0x10c   : > { %v760_v1 = vld [vmem:[#allocation3 + $0x30] sm:$0xff]  ;;  %v931_v3 = vpop.f32.mrf.mxu1 }
 0x10d   : > { %741 = vst.msk [vmem:[#allocation3 + $0x38] sm:$0xff] %vm267_vm0, %v733_v63  ;;  %v841_v5 = vadd.f32 %v830_v39, %v760_v1  ;;  %v947_v8 = vadd.f32 %v931_v3, %v866_v2 }
 0x10e   : > { %v868_v28 = vld [vmem:[#allocation3 + $0x28] sm:$0xff] }
 0x10f   : > { %849 = vst.msk [vmem:[#allocation3 + $0x30] sm:$0xff] %vm267_vm0, %v841_v5  ;;  %v975_v20 = vld [vmem:[#allocation3 + $0x10] sm:$0xff] }
 0x110   : > { %v1036_v6 = vpop.f32.mrf.mxu2  ;;  %955 = vst.msk [vmem:[#allocation3 + $0x18] sm:$0xff] %vm267_vm0, %v947_v8 }
 0x111   : > { %v1055_v11 = vadd.f32 %v1036_v6, %v974_v10 }
 0x112   : > { %v1082_v12 = vld [vmem:[#allocation3] sm:$0xff] }
 0x113   : > { %v1163_v13 = vadd.f32 %v1143_v0, %v1082_v12  ;;  %1063 = vst.msk [vmem:[#allocation3 + $0x8] sm:$0xff] %vm267_vm0, %v1055_v11  ;;  %v1145_v14 = vpop.f32.mrf.mxu3  ;;  %v1257_v4 = vpop.f32.mrf.mxu0 }
 0x114   : > { %v761_v15 = vld [vmem:[#allocation3 + $0x38] sm:$0xff]  ;;  %v934_v17 = vpop.f32.mrf.mxu1 }
 0x115   : > { %1171 = vst.msk [vmem:[#allocation3] sm:$0xff] %vm267_vm0, %v1163_v13  ;;  %v842_v18 = vadd.f32 %v832_v54, %v761_v15  ;;  %v948_v19 = vadd.f32 %v934_v17, %v867_v16 }
 0x116   : > { %v869_v39 = vld [vmem:[#allocation3 + $0x30] sm:$0xff] }
 0x117   : > { %850 = vst.msk [vmem:[#allocation3 + $0x38] sm:$0xff] %vm267_vm0, %v842_v18  ;;  %v976_v33 = vld [vmem:[#allocation3 + $0x18] sm:$0xff] }
 0x118   : > { %v1039_v22 = vpop.f32.mrf.mxu2  ;;  %956 = vst.msk [vmem:[#allocation3 + $0x20] sm:$0xff] %vm267_vm0, %v948_v19 }
 0x119   : > { %v1056_v23 = vadd.f32 %v1039_v22, %v975_v20 }
 0x11a   : > { %v1083_v24 = vld [vmem:[#allocation3 + $0x8] sm:$0xff] }
 0x11b   : > { %v1164_v25 = vadd.f32 %v1145_v14, %v1083_v24  ;;  %1064 = vst.msk [vmem:[#allocation3 + $0x10] sm:$0xff] %vm267_vm0, %v1056_v23  ;;  %v1148_v26 = vpop.f32.mrf.mxu3  ;;  %v1259_v49 = vpop.f32.mrf.mxu0 }
 0x11c   : > { %v1191_v27 = vld [vmem:[#allocation3] sm:$0xff]  ;;  %v936_v29 = vpop.f32.mrf.mxu1 }
 0x11d   : > { %1172 = vst.msk [vmem:[#allocation3 + $0x8] sm:$0xff] %vm267_vm0, %v1164_v25  ;;  %v1272_v30 = vadd.f32 %v1252_v7, %v1191_v27  ;;  %v949_v32 = vadd.f32 %v936_v29, %v868_v28 }
 0x11e   : > { %v870_v52 = vld [vmem:[#allocation3 + $0x38] sm:$0xff] }
 0x11f   : > { %1280 = vst.msk [vmem:[#allocation3] sm:$0xff] %vm267_vm0, %v1272_v30  ;;  %v977_v44 = vld [vmem:[#allocation3 + $0x20] sm:$0xff] }
 0x120   : > { %v1041_v35 = vpop.f32.mrf.mxu2  ;;  %957 = vst.msk [vmem:[#allocation3 + $0x28] sm:$0xff] %vm267_vm0, %v949_v32 }
 0x121   : > { %v1057_v36 = vadd.f32 %v1041_v35, %v976_v33 }
 0x122   : > { %v1084_v9 = vld [vmem:[#allocation3 + $0x10] sm:$0xff] }
 0x123   : > { %v1165_v31 = vadd.f32 %v1148_v26, %v1084_v9  ;;  %1065 = vst.msk [vmem:[#allocation3 + $0x18] sm:$0xff] %vm267_vm0, %v1057_v36  ;;  %v1150_v37 = vpop.f32.mrf.mxu3  ;;  %v1262_v63 = vpop.f32.mrf.mxu0 }
 0x124   : > { %v1192_v38 = vld [vmem:[#allocation3 + $0x8] sm:$0xff]  ;;  %v939_v40 = vpop.f32.mrf.mxu1 }
 0x125   : > { %1173 = vst.msk [vmem:[#allocation3 + $0x10] sm:$0xff] %vm267_vm0, %v1165_v31  ;;  %v1273_v41 = vadd.f32 %v1254_v21, %v1192_v38  ;;  %v950_v42 = vadd.f32 %v939_v40, %v869_v39 }
 0x126   : > { %v1288_v43 = vld [vmem:[#allocation3] sm:$0xff] }
 0x127   : > { %1296 = vst.msk [vmem:[%s2027_s8] sm:$0xff] %vm267_vm0, %v1288_v43  ;;  %v978_v56 = vld [vmem:[#allocation3 + $0x28] sm:$0xff] }
 0x128   : > { %1281 = vst.msk [vmem:[#allocation3 + $0x8] sm:$0xff] %vm267_vm0, %v1273_v41  ;;  %v1044_v45 = vpop.f32.mrf.mxu2 }
 0x129   : > { %v1058_v46 = vadd.f32 %v1044_v45, %v977_v44  ;;  %958 = vst.msk [vmem:[#allocation3 + $0x30] sm:$0xff] %vm267_vm0, %v950_v42 }
 0x12a   : > { %v1085_v47 = vld [vmem:[#allocation3 + $0x18] sm:$0xff] }
 0x12b   : > { %v1166_v48 = vadd.f32 %v1150_v37, %v1085_v47  ;;  %1066 = vst.msk [vmem:[#allocation3 + $0x20] sm:$0xff] %vm267_vm0, %v1058_v46  ;;  %v1153_v51 = vpop.f32.mrf.mxu3  ;;  %v1264_v13 = vpop.f32.mrf.mxu0 }
 0x12c   : > { %v1193_v50 = vld [vmem:[#allocation3 + $0x10] sm:$0xff]  ;;  %v941_v53 = vpop.f32.mrf.mxu1 }
 0x12d   : > { %1174 = vst.msk [vmem:[#allocation3 + $0x18] sm:$0xff] %vm267_vm0, %v1166_v48  ;;  %v1274_v54 = vadd.f32 %v1257_v4, %v1193_v50  ;;  %v951_v55 = vadd.f32 %v941_v53, %v870_v52 }
 0x12f   : > { %v1289_v57 = vld [vmem:[#allocation3 + $0x8] sm:$0xff]  ;;  %1282 = vst.msk [vmem:[#allocation3 + $0x10] sm:$0xff] %vm267_vm0, %v1274_v54 }
 0x130   : > { %1297 = vst.msk [vmem:[%s2027_s8 + $0x8] sm:$0xff] %vm267_vm0, %v1289_v57  ;;  %v1046_v59 = vpop.f32.mrf.mxu2  ;;  %v979_v2 = vld [vmem:[#allocation3 + $0x30] sm:$0xff] }
 0x131   : > { %v1059_v34 = vadd.f32 %v1046_v59, %v978_v56  ;;  %959 = vst.msk [vmem:[#allocation3 + $0x38] sm:$0xff] %vm267_vm0, %v951_v55 }
 0x132   : > { %v1086_v60 = vld [vmem:[#allocation3 + $0x20] sm:$0xff] }
 0x133   : > { %v1167_v61 = vadd.f32 %v1153_v51, %v1086_v60  ;;  %1067 = vst.msk [vmem:[#allocation3 + $0x28] sm:$0xff] %vm267_vm0, %v1059_v34  ;;  %v1155_v1 = vpop.f32.mrf.mxu3  ;;  %v1267_v24 = vpop.f32.mrf.mxu0 }
 0x134   : > { %v1194_v62 = vld [vmem:[#allocation3 + $0x18] sm:$0xff] }
 0x135   : > { %1175 = vst.msk [vmem:[#allocation3 + $0x20] sm:$0xff] %vm267_vm0, %v1167_v61  ;;  %v1275_v58 = vadd.f32 %v1259_v49, %v1194_v62 }
 0x136   : > { %v1290_v0 = vld [vmem:[#allocation3 + $0x10] sm:$0xff] }
 0x137   : > { %1298 = vst.msk [vmem:[%s2027_s8 + $0x10] sm:$0xff] %vm267_vm0, %v1290_v0 }
 0x138   : > { %1283 = vst.msk [vmem:[#allocation3 + $0x18] sm:$0xff] %vm267_vm0, %v1275_v58  ;;  %v1049_v3 = vpop.f32.mrf.mxu2  ;;  %v980_v11 = vld [vmem:[#allocation3 + $0x38] sm:$0xff] }
 0x139   : > { %v1060_v5 = vadd.f32 %v1049_v3, %v979_v2 }
 0x13a   : > { %v1087_v7 = vld [vmem:[#allocation3 + $0x28] sm:$0xff] }
 0x13b   : > { %v1168_v8 = vadd.f32 %v1155_v1, %v1087_v7  ;;  %1068 = vst.msk [vmem:[#allocation3 + $0x30] sm:$0xff] %vm267_vm0, %v1060_v5  ;;  %v1158_v14 = vpop.f32.mrf.mxu3  ;;  %v1269_v30 = vpop.f32.mrf.mxu0 }
 0x13c   : > { %v1195_v10 = vld [vmem:[#allocation3 + $0x20] sm:$0xff] }
 0x13d   : > { %1176 = vst.msk [vmem:[#allocation3 + $0x28] sm:$0xff] %vm267_vm0, %v1168_v8  ;;  %v1276_v6 = vadd.f32 %v1262_v63, %v1195_v10 }
 0x13f   : > { %v1291_v12 = vld [vmem:[#allocation3 + $0x18] sm:$0xff]  ;;  %1284 = vst.msk [vmem:[#allocation3 + $0x20] sm:$0xff] %vm267_vm0, %v1276_v6 }
 0x140   : > { %1299 = vst.msk [vmem:[%s2027_s8 + $0x18] sm:$0xff] %vm267_vm0, %v1291_v12  ;;  %v1051_v15 = vpop.f32.mrf.mxu2 }
 0x141   : > { %v1061_v16 = vadd.f32 %v1051_v15, %v980_v11 }
 0x142   : > { %v1088_v17 = vld [vmem:[#allocation3 + $0x30] sm:$0xff] }
 0x143   : > { %v1169_v18 = vadd.f32 %v1158_v14, %v1088_v17  ;;  %1069 = vst.msk [vmem:[#allocation3 + $0x38] sm:$0xff] %vm267_vm0, %v1061_v16  ;;  %v1160_v23 = vpop.f32.mrf.mxu3 }
 0x144   : > { %v1196_v19 = vld [vmem:[#allocation3 + $0x28] sm:$0xff] }
 0x145   : > { %1177 = vst.msk [vmem:[#allocation3 + $0x30] sm:$0xff] %vm267_vm0, %v1169_v18  ;;  %v1277_v20 = vadd.f32 %v1264_v13, %v1196_v19 }
 0x146   : > { %v1292_v21 = vld [vmem:[#allocation3 + $0x20] sm:$0xff] }
 0x147   : > { %1300 = vst.msk [vmem:[%s2027_s8 + $0x20] sm:$0xff] %vm267_vm0, %v1292_v21 }
 0x148   : > { %1285 = vst.msk [vmem:[#allocation3 + $0x28] sm:$0xff] %vm267_vm0, %v1277_v20 }
 0x14a   : > { %v1089_v22 = vld [vmem:[#allocation3 + $0x38] sm:$0xff] }
 0x14b   : > { %v1170_v25 = vadd.f32 %v1160_v23, %v1089_v22 }
 0x14c   : > { %v1197_v26 = vld [vmem:[#allocation3 + $0x30] sm:$0xff] }
 0x14d   : > { %1178 = vst.msk [vmem:[#allocation3 + $0x38] sm:$0xff] %vm267_vm0, %v1170_v25  ;;  %v1278_v27 = vadd.f32 %v1267_v24, %v1197_v26 }
 0x14f   : > { %v1293_v28 = vld [vmem:[#allocation3 + $0x28] sm:$0xff]  ;;  %1286 = vst.msk [vmem:[#allocation3 + $0x30] sm:$0xff] %vm267_vm0, %v1278_v27 }
 0x150   : > { %1301 = vst.msk [vmem:[%s2027_s8 + $0x28] sm:$0xff] %vm267_vm0, %v1293_v28 }
 0x154   : > { %v1198_v29 = vld [vmem:[#allocation3 + $0x38] sm:$0xff] }
 0x155   : > { %v1279_v32 = vadd.f32 %v1269_v30, %v1198_v29 }
 0x156   : > { %v1294_v33 = vld [vmem:[#allocation3 + $0x30] sm:$0xff] }
 0x157   : > { %1302 = vst.msk [vmem:[%s2027_s8 + $0x30] sm:$0xff] %vm267_vm0, %v1294_v33 }
 0x158   : > { %1287 = vst.msk [vmem:[#allocation3 + $0x38] sm:$0xff] %vm267_vm0, %v1279_v32 }
 0x15f   : > { %v1295_v35 = vld [vmem:[#allocation3 + $0x38] sm:$0xff] }
 0x160   : > { %1303 = vst.msk [vmem:[%s2027_s8 + $0x38] sm:$0xff] %vm267_vm0, %v1295_v35 }
 0x161 PF: > { %s14_s15 = sadd.s32 1, %s1635_s15  }
 0x162   : > { %p11_p4 = scmp.ge.s32.totalorder %s14_s15, 4  }
 0x164   :  { %13 = sbr.rel (!%p11_p4) target bundleno = 1 (0x1), region = 74 }

</bundles_post_ra>
